<compile_context>
chip_gen: v7x
topology: tpu7x:2x2x1
jax: 0.10.0
libtpu: 0.0.40
codegen_flags: <defaults>
</compile_context>

<pallas_src>
import functools

import jax
import jax.numpy as jnp
import numpy as np
from jax.experimental import pallas as pl
from jax.experimental.pallas import tpu as pltpu

EPS = 1e-5     # nn.BatchNorm2d default
LANES = 128    # TPU vreg lane width


def _round_up(x, m):
    return (x + m - 1) // m * m


# --------------------------------------------------------------------------- #
# Stage 1: relu(bn1(x)) -> fused [conv1 | shortcut] matmul + bn2 partial stats #
# --------------------------------------------------------------------------- #
def stage1_kernel(x_ref, scale1_ref, shift1_ref, w_ref,
                  conv1_ref, sc_ref, stats_ref, pad_ref):
    """Per-image tile.

    x_ref     : (1, H, W, Cin)   f32  unpadded input tile
    scale1/shift1 : (1, Cin)     f32  precomputed bn1 scale/shift
    w_ref     : (9*Cp, 2*Cp)     bf16 im2col-packed conv1 weights with the 1x1
                                       shortcut in output columns [Cp:2Cp] (center tap)
    conv1_ref : (1, H, W, Cout)  f32  conv1 output tile
    sc_ref    : (1, H, W, Cout)  f32  shortcut output tile
    stats_ref : (1, 8, Cp)       f32  row0 = sum(conv1), row1 = sum(conv1^2) over tile
    pad_ref   : (1, H+2, W+2, Cp) bf16 scratch: zero-padded lane-dense activation
    """
    _, H, W, Cin = x_ref.shape
    Cout = conv1_ref.shape[-1]
    Cp = w_ref.shape[1] // 2
    HW = H * W

    # bn1 (precomputed batch scale/shift) + relu
    x = x_ref[...].reshape(HW, Cin)
    h = jnp.maximum(x * scale1_ref[...] + shift1_ref[...], 0.0)

    # Lane-dense channel padding happens only inside VMEM.
    if Cp > Cin:
        h = jnp.concatenate([h, jnp.zeros((HW, Cp - Cin), jnp.float32)], axis=1)
    h4 = h.astype(jnp.bfloat16).reshape(1, H, W, Cp)

    # Sublane-dense padded activation: full-width row stores only.
    zrow = jnp.zeros((1, 1, W + 2, Cp), jnp.bfloat16)
    zcol = jnp.zeros((1, H, 1, Cp), jnp.bfloat16)
    pad_ref[:, 0:1, :, :] = zrow
    pad_ref[:, H + 1:H + 2, :, :] = zrow
    pad_ref[:, 1:H + 1, :, :] = jnp.concatenate([zcol, h4, zcol], axis=2)

    # im2col taps concatenated along the 128-aligned lane axis -> one wide-K MXU dot
    taps = [pad_ref[:, dy:dy + H, dx:dx + W, :] for dy in range(3) for dx in range(3)]
    patches = jnp.concatenate(taps, axis=3).reshape(HW, 9 * Cp)

    res = jnp.dot(patches, w_ref[...], preferred_element_type=jnp.float32)  # (HW, 2Cp)
    conv1 = res[:, :Cp]                                                     # cols [Cout:] are 0

    conv1_ref[...] = conv1[:, :Cout].reshape(1, H, W, Cout)
    sc_ref[...] = res[:, Cp:Cp + Cout].reshape(1, H, W, Cout)

    # bn2 partial statistics on data already resident in VMEM (one tile traversal).
    s1 = jnp.sum(conv1, axis=0, keepdims=True)                 # (1, Cp)
    s2 = jnp.sum(conv1 * conv1, axis=0, keepdims=True)         # (1, Cp)
    stats_ref[...] = jnp.concatenate(
        [s1, s2, jnp.zeros((6, Cp), jnp.float32)], axis=0).reshape(1, 8, Cp)


# --------------------------------------------------------------------------- #
# Stage 2: relu(bn2(conv1)) -> conv2 matmul + residual add                     #
# --------------------------------------------------------------------------- #
def stage2_kernel(c1_ref, sc_ref, scale2_ref, shift2_ref, w_ref, o_ref, pad_ref):
    """Per-image tile.

    c1_ref    : (1, H, W, Cout) f32   conv1 output tile
    sc_ref    : (1, H, W, Cout) f32   shortcut tile
    scale2/shift2 : (1, Cout)   f32   bn2 scale/shift from the reduced batch stats
    w_ref     : (9*Cp, Cp)      bf16  im2col-packed conv2 weights
    o_ref     : (1, H, W, Cout) f32   block output tile
    pad_ref   : (1, H+2, W+2, Cp) bf16 scratch
    """
    _, H, W, Cout = c1_ref.shape
    Cp = w_ref.shape[1]
    HW = H * W

    c1 = c1_ref[...].reshape(HW, Cout)
    h = jnp.maximum(c1 * scale2_ref[...] + shift2_ref[...], 0.0)
    if Cp > Cout:
        h = jnp.concatenate([h, jnp.zeros((HW, Cp - Cout), jnp.float32)], axis=1)
    h4 = h.astype(jnp.bfloat16).reshape(1, H, W, Cp)

    zrow = jnp.zeros((1, 1, W + 2, Cp), jnp.bfloat16)
    zcol = jnp.zeros((1, H, 1, Cp), jnp.bfloat16)
    pad_ref[:, 0:1, :, :] = zrow
    pad_ref[:, H + 1:H + 2, :, :] = zrow
    pad_ref[:, 1:H + 1, :, :] = jnp.concatenate([zcol, h4, zcol], axis=2)

    taps = [pad_ref[:, dy:dy + H, dx:dx + W, :] for dy in range(3) for dx in range(3)]
    patches = jnp.concatenate(taps, axis=3).reshape(HW, 9 * Cp)
    conv2 = jnp.dot(patches, w_ref[...], preferred_element_type=jnp.float32)  # (HW, Cp)

    # Residual add consumed immediately -> no long-lived fp32 accumulator.
    out = conv2[:, :Cout] + sc_ref[...].reshape(HW, Cout)
    o_ref[...] = out.reshape(1, H, W, Cout).astype(o_ref.dtype)


# --------------------------------------------------------------------------- #
# Weight packing (host side)                                                   #
# --------------------------------------------------------------------------- #
def pack_weights(w1_oihw, w2_oihw, wsc_oihw, cp):
    """im2col-pack the 3x3 convs to (9*cp, ...) and fuse the 1x1 shortcut into w1."""
    cout, cin = w1_oihw.shape[0], w1_oihw.shape[1]

    def pack3x3(w_oihw, cols):
        o, i = w_oihw.shape[0], w_oihw.shape[1]
        w = jnp.transpose(w_oihw, (2, 3, 1, 0)).astype(jnp.float32)   # (kh, kw, I, O)
        wz = jnp.zeros((3, 3, cp, cols), jnp.float32).at[:, :, :i, :o].set(w)
        return wz.reshape(9 * cp, cols)

    # Fused weight: cols [0:cp] = conv1, cols [cp:2cp] = 1x1 shortcut (center tap k=4).
    w1cat = pack3x3(w1_oihw, 2 * cp)
    wsc = jnp.transpose(wsc_oihw[:, :, 0, 0], (1, 0)).astype(jnp.float32)   # (cin, cout)
    w1cat = w1cat.at[4 * cp:4 * cp + cin, cp:cp + cout].set(wsc)

    w2 = pack3x3(w2_oihw, cp)
    return {"w1cat": w1cat.astype(jnp.bfloat16), "w2": w2.astype(jnp.bfloat16)}


# --------------------------------------------------------------------------- #
# Wrapper: NHWC end-to-end, unpadded channels in HBM                           #
# --------------------------------------------------------------------------- #
@functools.partial(jax.jit, static_argnames=("cout",))
def preact_block_nhwc(x_nhwc, g1, b1, g2, b2, packed, *, cout):
    """x_nhwc: (N, H, W, Cin) float32. Returns (N, H, W, cout) float32."""
    N, H, W, Cin = x_nhwc.shape
    Cp = packed["w2"].shape[1]
    nhw = N * H * W
    cparams = pltpu.CompilerParams(
        dimension_semantics=("parallel",),
        vmem_limit_bytes=32 * 1024 * 1024,
    )

    # --- bn1 batch statistics: cheap XLA reduction over x (two-pass, accurate) ---
    mean1 = jnp.mean(x_nhwc, axis=(0, 1, 2))
    var1 = jnp.mean(jnp.square(x_nhwc - mean1), axis=(0, 1, 2))      # biased
    inv1 = jax.lax.rsqrt(var1 + EPS)
    scale1 = (g1 * inv1).reshape(1, Cin).astype(jnp.float32)
    shift1 = (b1 - mean1 * g1 * inv1).reshape(1, Cin).astype(jnp.float32)

    # --- stage 1: relu(bn1) -> fused conv1 + shortcut, per-tile bn2 partial stats ---
    conv1, sc, stats = pl.pallas_call(
        stage1_kernel,
        out_shape=(
            jax.ShapeDtypeStruct((N, H, W, cout), jnp.float32),
            jax.ShapeDtypeStruct((N, H, W, cout), jnp.float32),
            jax.ShapeDtypeStruct((N, 8, Cp), jnp.float32),
        ),
        grid=(N,),
        in_specs=[
            pl.BlockSpec((1, H, W, Cin), lambda n: (n, 0, 0, 0)),
            pl.BlockSpec((1, Cin), lambda n: (0, 0)),
            pl.BlockSpec((1, Cin), lambda n: (0, 0)),
            pl.BlockSpec((9 * Cp, 2 * Cp), lambda n: (0, 0)),
        ],
        out_specs=(
            pl.BlockSpec((1, H, W, cout), lambda n: (n, 0, 0, 0)),
            pl.BlockSpec((1, H, W, cout), lambda n: (n, 0, 0, 0)),
            pl.BlockSpec((1, 8, Cp), lambda n: (n, 0, 0)),
        ),
        scratch_shapes=[pltpu.VMEM((1, H + 2, W + 2, Cp), jnp.bfloat16)],
        compiler_params=cparams,
    )(x_nhwc, scale1, shift1, packed["w1cat"])

    # --- tiny cross-tile reduction of the bn2 statistics ---
    s1 = jnp.sum(stats[:, 0, :cout], axis=0)
    s2 = jnp.sum(stats[:, 1, :cout], axis=0)
    mean2 = s1 / nhw
    # TODO(synk): one-pass variance (E[x^2]-mean^2) can cancel if |mean| >> std; use a
    #             second stats pass if tolerance is tightened.
    var2 = jnp.maximum(s2 / nhw - mean2 * mean2, 0.0)
    inv2 = jax.lax.rsqrt(var2 + EPS)
    scale2 = (g2 * inv2).reshape(1, cout).astype(jnp.float32)
    shift2 = (b2 - mean2 * g2 * inv2).reshape(1, cout).astype(jnp.float32)

    # --- stage 2: relu(bn2) -> conv2, residual add ---
    out = pl.pallas_call(
        stage2_kernel,
        out_shape=jax.ShapeDtypeStruct((N, H, W, cout), jnp.float32),
        grid=(N,),
        in_specs=[
            pl.BlockSpec((1, H, W, cout), lambda n: (n, 0, 0, 0)),
            pl.BlockSpec((1, H, W, cout), lambda n: (n, 0, 0, 0)),
            pl.BlockSpec((1, cout), lambda n: (0, 0)),
            pl.BlockSpec((1, cout), lambda n: (0, 0)),
            pl.BlockSpec((9 * Cp, Cp), lambda n: (0, 0)),
        ],
        out_specs=pl.BlockSpec((1, H, W, cout), lambda n: (n, 0, 0, 0)),
        scratch_shapes=[pltpu.VMEM((1, H + 2, W + 2, Cp), jnp.bfloat16)],
        compiler_params=cparams,
    )(conv1, sc, scale2, shift2, packed["w2"])

    return out


# --------------------------------------------------------------------------- #
# Pure-JAX fp32 reference mirroring the PyTorch forward (NCHW)                 #
# --------------------------------------------------------------------------- #
def reference_nchw(x, g1, b1, w1_oihw, g2, b2, w2_oihw, wsc_oihw):
    hp = jax.lax.Precision.HIGHEST

    def bn(t, g, b):
        m = t.mean(axis=(0, 2, 3), keepdims=True)
        v = ((t - m) ** 2).mean(axis=(0, 2, 3), keepdims=True)
        return (t - m) * jax.lax.rsqrt(v + EPS) * g.reshape(1, -1, 1, 1) + b.reshape(1, -1, 1, 1)

    h = jax.nn.relu(bn(x, g1, b1))
    sc = jax.lax.conv_general_dilated(h, wsc_oihw, (1, 1), "VALID", precision=hp)
    o = jax.lax.conv_general_dilated(h, w1_oihw, (1, 1), ((1, 1), (1, 1)), precision=hp)
    o = jax.nn.relu(bn(o, g2, b2))
    o = jax.lax.conv_general_dilated(o, w2_oihw, (1, 1), ((1, 1), (1, 1)), precision=hp)
    return o + sc


if __name__ == "__main__":
    N, Cin, H, W, Cout = 2, 4, 16, 16, 8   # in_planes=4, planes=8, stride=1 -> 1x1 shortcut

    key = jax.random.PRNGKey(0)
    ks = jax.random.split(key, 8)
    x_nchw = jax.random.normal(ks[0], (N, Cin, H, W), jnp.float32)
    g1 = 1.0 + 0.1 * jax.random.normal(ks[1], (Cin,), jnp.float32)
    b1 = 0.1 * jax.random.normal(ks[2], (Cin,), jnp.float32)
    w1_oihw = 0.1 * jax.random.normal(ks[3], (Cout, Cin, 3, 3), jnp.float32)
    g2 = 1.0 + 0.1 * jax.random.normal(ks[4], (Cout,), jnp.float32)
    b2 = 0.1 * jax.random.normal(ks[5], (Cout,), jnp.float32)
    w2_oihw = 0.1 * jax.random.normal(ks[6], (Cout, Cout, 3, 3), jnp.float32)
    wsc_oihw = 0.1 * jax.random.normal(ks[7], (Cout, Cin, 1, 1), jnp.float32)

    Cp = max(_round_up(Cin, LANES), _round_up(Cout, LANES))
    packed = pack_weights(w1_oihw, w2_oihw, wsc_oihw, Cp)

    # Kernel pipeline is NHWC end-to-end; the single transpose here is test setup only.
    x_nhwc = jnp.transpose(x_nchw, (0, 2, 3, 1))
    out_nhwc = preact_block_nhwc(x_nhwc, g1, b1, g2, b2, packed, cout=Cout)
    out_nhwc = jax.block_until_ready(out_nhwc)
    out = jnp.transpose(out_nhwc, (0, 3, 1, 2))

    ref = reference_nchw(x_nchw, g1, b1, w1_oihw, g2, b2, w2_oihw, wsc_oihw)
    assert out.shape == (N, Cout, H, W), out.shape
    err = float(np.max(np.abs(np.asarray(out) - np.asarray(ref))))
    # bf16 MXU inputs with fp32 accumulation: tolerance widened vs. pure-fp32 reference.
    assert np.allclose(np.asarray(out), np.asarray(ref), atol=2e-2, rtol=2e-2), err

    print("KERNEL_OK")
</pallas_src>

<mosaic_0001>
module attributes {stable_mosaic.version = 11 : i64} {
  func.func @stage1_kernel(%arg0: i32, %arg1: memref<1x16x16x4xf32, #tpu.memory_space<vmem>>, %arg2: memref<1x4xf32, #tpu.memory_space<vmem>>, %arg3: memref<1x4xf32, #tpu.memory_space<vmem>>, %arg4: memref<1152x256xbf16, #tpu.memory_space<vmem>>, %arg5: memref<1x16x16x8xf32, #tpu.memory_space<vmem>>, %arg6: memref<1x16x16x8xf32, #tpu.memory_space<vmem>>, %arg7: memref<1x8x128xf32, #tpu.memory_space<vmem>>, %arg8: memref<1x18x18x128xbf16, #tpu.memory_space<vmem>>) attributes {dimension_semantics = [#tpu.dimension_semantics<parallel>], iteration_bounds = array<i64: 2>, scalar_prefetch = 0 : i64, scratch_operands = 1 : i64, tpu.core_type = #tpu.core_type<tc>, window_params = [{transform_indices = @transform_0, window_bounds = array<i64: 1, 16, 16, 4>}, {pipeline_mode = #tpu.pipeline_mode<synchronous>, transform_indices = @transform_1, window_bounds = array<i64: 1, 4>}, {pipeline_mode = #tpu.pipeline_mode<synchronous>, transform_indices = @transform_2, window_bounds = array<i64: 1, 4>}, {pipeline_mode = #tpu.pipeline_mode<synchronous>, transform_indices = @transform_3, window_bounds = array<i64: 1152, 256>}, {transform_indices = @transform_4, window_bounds = array<i64: 1, 16, 16, 8>}, {transform_indices = @transform_5, window_bounds = array<i64: 1, 16, 16, 8>}, {transform_indices = @transform_6, window_bounds = array<i64: 1, 8, 128>}]} {
    %c0 = arith.constant 0 : index
    %c0_0 = arith.constant 0 : index
    %c0_1 = arith.constant 0 : index
    %c0_2 = arith.constant 0 : index
    %0 = vector.load %arg1[%c0, %c0_0, %c0_1, %c0_2] : memref<1x16x16x4xf32, #tpu.memory_space<vmem>>, vector<1x16x16x4xf32>
    %1 = vector.shape_cast %0 : vector<1x16x16x4xf32> to vector<256x4xf32>
    %c0_3 = arith.constant 0 : index
    %c0_4 = arith.constant 0 : index
    %2 = vector.load %arg2[%c0_3, %c0_4] : memref<1x4xf32, #tpu.memory_space<vmem>>, vector<1x4xf32>
    %3 = vector.broadcast %2 : vector<1x4xf32> to vector<256x4xf32>
    %4 = arith.mulf %1, %3 : vector<256x4xf32>
    %c0_5 = arith.constant 0 : index
    %c0_6 = arith.constant 0 : index
    %5 = vector.load %arg3[%c0_5, %c0_6] : memref<1x4xf32, #tpu.memory_space<vmem>>, vector<1x4xf32>
    %6 = vector.broadcast %5 : vector<1x4xf32> to vector<256x4xf32>
    %7 = arith.addf %4, %6 : vector<256x4xf32>
    %cst = arith.constant 0.000000e+00 : f32
    %8 = vector.broadcast %cst : f32 to vector<256x4xf32>
    %9 = arith.maximumf %7, %8 : vector<256x4xf32>
    %cst_7 = arith.constant 0.000000e+00 : f32
    %10 = vector.broadcast %cst_7 : f32 to vector<256x124xf32>
    %11 = tpu.concatenate %9, %10 in 1 : vector<256x4xf32>, vector<256x124xf32> -> vector<256x128xf32>
    %12 = arith.truncf %11 : vector<256x128xf32> to vector<256x128xbf16>
    %13 = vector.shape_cast %12 : vector<256x128xbf16> to vector<1x16x16x128xbf16>
    %cst_8 = arith.constant 0.000000e+00 : bf16
    %14 = vector.broadcast %cst_8 : bf16 to vector<1x1x18x128xbf16>
    %cst_9 = arith.constant 0.000000e+00 : bf16
    %15 = vector.broadcast %cst_9 : bf16 to vector<1x16x1x128xbf16>
    %c0_10 = arith.constant 0 : index
    %c0_11 = arith.constant 0 : index
    %c0_12 = arith.constant 0 : index
    %c0_13 = arith.constant 0 : index
    %16 = vector.load %arg8[%c0_10, %c0_11, %c0_12, %c0_13] : memref<1x18x18x128xbf16, #tpu.memory_space<vmem>>, vector<1x1x18x128xbf16>
    tpu.vector_store %arg8[%c0_10, %c0_11, %c0_12, %c0_13], %14 {strides = array<i32>} : memref<1x18x18x128xbf16, #tpu.memory_space<vmem>>, vector<1x1x18x128xbf16>,
    %c0_14 = arith.constant 0 : index
    %c17 = arith.constant 17 : index
    %c0_15 = arith.constant 0 : index
    %c0_16 = arith.constant 0 : index
    %17 = vector.load %arg8[%c0_14, %c17, %c0_15, %c0_16] : memref<1x18x18x128xbf16, #tpu.memory_space<vmem>>, vector<1x1x18x128xbf16>
    tpu.vector_store %arg8[%c0_14, %c17, %c0_15, %c0_16], %14 {strides = array<i32>} : memref<1x18x18x128xbf16, #tpu.memory_space<vmem>>, vector<1x1x18x128xbf16>,
    %18 = tpu.concatenate %15, %13, %15 in 2 : vector<1x16x1x128xbf16>, vector<1x16x16x128xbf16>, vector<1x16x1x128xbf16> -> vector<1x16x18x128xbf16>
    %c0_17 = arith.constant 0 : index
    %c1 = arith.constant 1 : index
    %c0_18 = arith.constant 0 : index
    %c0_19 = arith.constant 0 : index
    %19 = vector.load %arg8[%c0_17, %c1, %c0_18, %c0_19] : memref<1x18x18x128xbf16, #tpu.memory_space<vmem>>, vector<1x16x18x128xbf16>
    tpu.vector_store %arg8[%c0_17, %c1, %c0_18, %c0_19], %18 {strides = array<i32>} : memref<1x18x18x128xbf16, #tpu.memory_space<vmem>>, vector<1x16x18x128xbf16>,
    %c0_20 = arith.constant 0 : index
    %c0_21 = arith.constant 0 : index
    %c0_22 = arith.constant 0 : index
    %c0_23 = arith.constant 0 : index
    %20 = vector.load %arg8[%c0_20, %c0_21, %c0_22, %c0_23] : memref<1x18x18x128xbf16, #tpu.memory_space<vmem>>, vector<1x16x16x128xbf16>
    %c0_24 = arith.constant 0 : index
    %c0_25 = arith.constant 0 : index
    %c1_26 = arith.constant 1 : index
    %c0_27 = arith.constant 0 : index
    %21 = vector.load %arg8[%c0_24, %c0_25, %c1_26, %c0_27] : memref<1x18x18x128xbf16, #tpu.memory_space<vmem>>, vector<1x16x16x128xbf16>
    %c0_28 = arith.constant 0 : index
    %c0_29 = arith.constant 0 : index
    %c2 = arith.constant 2 : index
    %c0_30 = arith.constant 0 : index
    %22 = vector.load %arg8[%c0_28, %c0_29, %c2, %c0_30] : memref<1x18x18x128xbf16, #tpu.memory_space<vmem>>, vector<1x16x16x128xbf16>
    %c0_31 = arith.constant 0 : index
    %c1_32 = arith.constant 1 : index
    %c0_33 = arith.constant 0 : index
    %c0_34 = arith.constant 0 : index
    %23 = vector.load %arg8[%c0_31, %c1_32, %c0_33, %c0_34] : memref<1x18x18x128xbf16, #tpu.memory_space<vmem>>, vector<1x16x16x128xbf16>
    %c0_35 = arith.constant 0 : index
    %c1_36 = arith.constant 1 : index
    %c1_37 = arith.constant 1 : index
    %c0_38 = arith.constant 0 : index
    %24 = vector.load %arg8[%c0_35, %c1_36, %c1_37, %c0_38] : memref<1x18x18x128xbf16, #tpu.memory_space<vmem>>, vector<1x16x16x128xbf16>
    %c0_39 = arith.constant 0 : index
    %c1_40 = arith.constant 1 : index
    %c2_41 = arith.constant 2 : index
    %c0_42 = arith.constant 0 : index
    %25 = vector.load %arg8[%c0_39, %c1_40, %c2_41, %c0_42] : memref<1x18x18x128xbf16, #tpu.memory_space<vmem>>, vector<1x16x16x128xbf16>
    %c0_43 = arith.constant 0 : index
    %c2_44 = arith.constant 2 : index
    %c0_45 = arith.constant 0 : index
    %c0_46 = arith.constant 0 : index
    %26 = vector.load %arg8[%c0_43, %c2_44, %c0_45, %c0_46] : memref<1x18x18x128xbf16, #tpu.memory_space<vmem>>, vector<1x16x16x128xbf16>
    %c0_47 = arith.constant 0 : index
    %c2_48 = arith.constant 2 : index
    %c1_49 = arith.constant 1 : index
    %c0_50 = arith.constant 0 : index
    %27 = vector.load %arg8[%c0_47, %c2_48, %c1_49, %c0_50] : memref<1x18x18x128xbf16, #tpu.memory_space<vmem>>, vector<1x16x16x128xbf16>
    %c0_51 = arith.constant 0 : index
    %c2_52 = arith.constant 2 : index
    %c2_53 = arith.constant 2 : index
    %c0_54 = arith.constant 0 : index
    %28 = vector.load %arg8[%c0_51, %c2_52, %c2_53, %c0_54] : memref<1x18x18x128xbf16, #tpu.memory_space<vmem>>, vector<1x16x16x128xbf16>
    %29 = tpu.concatenate %20, %21, %22, %23, %24, %25, %26, %27, %28 in 3 : vector<1x16x16x128xbf16>, vector<1x16x16x128xbf16>, vector<1x16x16x128xbf16>, vector<1x16x16x128xbf16>, vector<1x16x16x128xbf16>, vector<1x16x16x128xbf16>, vector<1x16x16x128xbf16>, vector<1x16x16x128xbf16>, vector<1x16x16x128xbf16> -> vector<1x16x16x1152xbf16>
    %30 = vector.shape_cast %29 : vector<1x16x16x1152xbf16> to vector<256x1152xbf16>
    %c0_55 = arith.constant 0 : index
    %c0_56 = arith.constant 0 : index
    %31 = vector.load %arg4[%c0_55, %c0_56] : memref<1152x256xbf16, #tpu.memory_space<vmem>>, vector<1152x256xbf16>
    %cst_57 = arith.constant dense<0.000000e+00> : vector<256x256xf32>
    %32 = tpu.matmul %30, %31, %cst_57 {dimension_numbers = #tpu.dot_dimension_numbers<[1], [0], [0], [1], [0, 0, 1, 1], [], []>} : vector<256x1152xbf16>, vector<1152x256xbf16>, vector<256x256xf32> -> vector<256x256xf32>
    %33 = vector.extract_strided_slice %32 {offsets = [0, 0], sizes = [256, 128], strides = [1, 1]} : vector<256x256xf32> to vector<256x128xf32>
    %34 = vector.extract_strided_slice %33 {offsets = [0, 0], sizes = [256, 8], strides = [1, 1]} : vector<256x128xf32> to vector<256x8xf32>
    %35 = vector.shape_cast %34 : vector<256x8xf32> to vector<1x16x16x8xf32>
    %c0_58 = arith.constant 0 : index
    %c0_59 = arith.constant 0 : index
    %c0_60 = arith.constant 0 : index
    %c0_61 = arith.constant 0 : index
    %36 = vector.load %arg5[%c0_58, %c0_59, %c0_60, %c0_61] : memref<1x16x16x8xf32, #tpu.memory_space<vmem>>, vector<1x16x16x8xf32>
    tpu.vector_store %arg5[%c0_58, %c0_59, %c0_60, %c0_61], %35 {strides = array<i32>} : memref<1x16x16x8xf32, #tpu.memory_space<vmem>>, vector<1x16x16x8xf32>,
    %37 = vector.extract_strided_slice %32 {offsets = [0, 128], sizes = [256, 8], strides = [1, 1]} : vector<256x256xf32> to vector<256x8xf32>
    %38 = vector.shape_cast %37 : vector<256x8xf32> to vector<1x16x16x8xf32>
    %c0_62 = arith.constant 0 : index
    %c0_63 = arith.constant 0 : index
    %c0_64 = arith.constant 0 : index
    %c0_65 = arith.constant 0 : index
    %39 = vector.load %arg6[%c0_62, %c0_63, %c0_64, %c0_65] : memref<1x16x16x8xf32, #tpu.memory_space<vmem>>, vector<1x16x16x8xf32>
    tpu.vector_store %arg6[%c0_62, %c0_63, %c0_64, %c0_65], %38 {strides = array<i32>} : memref<1x16x16x8xf32, #tpu.memory_space<vmem>>, vector<1x16x16x8xf32>,
    %cst_66 = arith.constant dense<0.000000e+00> : vector<128xf32>
    %40 = vector.multi_reduction <add>, %33, %cst_66 [0] : vector<256x128xf32> to vector<128xf32>
    %41 = vector.shape_cast %40 : vector<128xf32> to vector<1x128xf32>
    %42 = arith.mulf %33, %33 : vector<256x128xf32>
    %cst_67 = arith.constant dense<0.000000e+00> : vector<128xf32>
    %43 = vector.multi_reduction <add>, %42, %cst_67 [0] : vector<256x128xf32> to vector<128xf32>
    %44 = vector.shape_cast %43 : vector<128xf32> to vector<1x128xf32>
    %cst_68 = arith.constant 0.000000e+00 : f32
    %45 = vector.broadcast %cst_68 : f32 to vector<6x128xf32>
    %46 = tpu.concatenate %41, %44, %45 in 0 : vector<1x128xf32>, vector<1x128xf32>, vector<6x128xf32> -> vector<8x128xf32>
    %47 = vector.shape_cast %46 : vector<8x128xf32> to vector<1x8x128xf32>
    %c0_69 = arith.constant 0 : index
    %c0_70 = arith.constant 0 : index
    %c0_71 = arith.constant 0 : index
    %48 = vector.load %arg7[%c0_69, %c0_70, %c0_71] : memref<1x8x128xf32, #tpu.memory_space<vmem>>, vector<1x8x128xf32>
    tpu.vector_store %arg7[%c0_69, %c0_70, %c0_71], %47 {strides = array<i32>} : memref<1x8x128xf32, #tpu.memory_space<vmem>>, vector<1x8x128xf32>,
    return
  }
  func.func @transform_0(%arg0: i32) -> (i32, i32, i32, i32) {
    %c0_i32 = arith.constant 0 : i32
    %c0_i32_0 = arith.constant 0 : i32
    %c0_i32_1 = arith.constant 0 : i32
    %c0_i32_2 = arith.constant 0 : i32
    return %arg0, %c0_i32, %c0_i32_0, %c0_i32_1 : i32, i32, i32, i32
  }
  func.func @transform_1(%arg0: i32) -> (i32, i32) {
    %c0_i32 = arith.constant 0 : i32
    %c0_i32_0 = arith.constant 0 : i32
    %c0_i32_1 = arith.constant 0 : i32
    return %c0_i32, %c0_i32_0 : i32, i32
  }
  func.func @transform_2(%arg0: i32) -> (i32, i32) {
    %c0_i32 = arith.constant 0 : i32
    %c0_i32_0 = arith.constant 0 : i32
    %c0_i32_1 = arith.constant 0 : i32
    return %c0_i32, %c0_i32_0 : i32, i32
  }
  func.func @transform_3(%arg0: i32) -> (i32, i32) {
    %c0_i32 = arith.constant 0 : i32
    %c0_i32_0 = arith.constant 0 : i32
    %c0_i32_1 = arith.constant 0 : i32
    return %c0_i32, %c0_i32_0 : i32, i32
  }
  func.func @transform_4(%arg0: i32) -> (i32, i32, i32, i32) {
    %c0_i32 = arith.constant 0 : i32
    %c0_i32_0 = arith.constant 0 : i32
    %c0_i32_1 = arith.constant 0 : i32
    %c0_i32_2 = arith.constant 0 : i32
    return %arg0, %c0_i32, %c0_i32_0, %c0_i32_1 : i32, i32, i32, i32
  }
  func.func @transform_5(%arg0: i32) -> (i32, i32, i32, i32) {
    %c0_i32 = arith.constant 0 : i32
    %c0_i32_0 = arith.constant 0 : i32
    %c0_i32_1 = arith.constant 0 : i32
    %c0_i32_2 = arith.constant 0 : i32
    return %arg0, %c0_i32, %c0_i32_0, %c0_i32_1 : i32, i32, i32, i32
  }
  func.func @transform_6(%arg0: i32) -> (i32, i32, i32) {
    %c0_i32 = arith.constant 0 : i32
    %c0_i32_0 = arith.constant 0 : i32
    %c0_i32_1 = arith.constant 0 : i32
    return %arg0, %c0_i32, %c0_i32_0 : i32, i32, i32
  }
}

module attributes {stable_mosaic.version = 11 : i64} {
  func.func @stage2_kernel(%arg0: i32, %arg1: memref<1x16x16x8xf32, #tpu.memory_space<vmem>>, %arg2: memref<1x16x16x8xf32, #tpu.memory_space<vmem>>, %arg3: memref<1x8xf32, #tpu.memory_space<vmem>>, %arg4: memref<1x8xf32, #tpu.memory_space<vmem>>, %arg5: memref<1152x128xbf16, #tpu.memory_space<vmem>>, %arg6: memref<1x16x16x8xf32, #tpu.memory_space<vmem>>, %arg7: memref<1x18x18x128xbf16, #tpu.memory_space<vmem>>) attributes {dimension_semantics = [#tpu.dimension_semantics<parallel>], iteration_bounds = array<i64: 2>, scalar_prefetch = 0 : i64, scratch_operands = 1 : i64, tpu.core_type = #tpu.core_type<tc>, window_params = [{transform_indices = @transform_0, window_bounds = array<i64: 1, 16, 16, 8>}, {transform_indices = @transform_1, window_bounds = array<i64: 1, 16, 16, 8>}, {pipeline_mode = #tpu.pipeline_mode<synchronous>, transform_indices = @transform_2, window_bounds = array<i64: 1, 8>}, {pipeline_mode = #tpu.pipeline_mode<synchronous>, transform_indices = @transform_3, window_bounds = array<i64: 1, 8>}, {pipeline_mode = #tpu.pipeline_mode<synchronous>, transform_indices = @transform_4, window_bounds = array<i64: 1152, 128>}, {transform_indices = @transform_5, window_bounds = array<i64: 1, 16, 16, 8>}]} {
    %c0 = arith.constant 0 : index
    %c0_0 = arith.constant 0 : index
    %c0_1 = arith.constant 0 : index
    %c0_2 = arith.constant 0 : index
    %0 = vector.load %arg1[%c0, %c0_0, %c0_1, %c0_2] : memref<1x16x16x8xf32, #tpu.memory_space<vmem>>, vector<1x16x16x8xf32>
    %1 = vector.shape_cast %0 : vector<1x16x16x8xf32> to vector<256x8xf32>
    %c0_3 = arith.constant 0 : index
    %c0_4 = arith.constant 0 : index
    %2 = vector.load %arg3[%c0_3, %c0_4] : memref<1x8xf32, #tpu.memory_space<vmem>>, vector<1x8xf32>
    %3 = vector.broadcast %2 : vector<1x8xf32> to vector<256x8xf32>
    %4 = arith.mulf %1, %3 : vector<256x8xf32>
    %c0_5 = arith.constant 0 : index
    %c0_6 = arith.constant 0 : index
    %5 = vector.load %arg4[%c0_5, %c0_6] : memref<1x8xf32, #tpu.memory_space<vmem>>, vector<1x8xf32>
    %6 = vector.broadcast %5 : vector<1x8xf32> to vector<256x8xf32>
    %7 = arith.addf %4, %6 : vector<256x8xf32>
    %cst = arith.constant 0.000000e+00 : f32
    %8 = vector.broadcast %cst : f32 to vector<256x8xf32>
    %9 = arith.maximumf %7, %8 : vector<256x8xf32>
    %cst_7 = arith.constant 0.000000e+00 : f32
    %10 = vector.broadcast %cst_7 : f32 to vector<256x120xf32>
    %11 = tpu.concatenate %9, %10 in 1 : vector<256x8xf32>, vector<256x120xf32> -> vector<256x128xf32>
    %12 = arith.truncf %11 : vector<256x128xf32> to vector<256x128xbf16>
    %13 = vector.shape_cast %12 : vector<256x128xbf16> to vector<1x16x16x128xbf16>
    %cst_8 = arith.constant 0.000000e+00 : bf16
    %14 = vector.broadcast %cst_8 : bf16 to vector<1x1x18x128xbf16>
    %cst_9 = arith.constant 0.000000e+00 : bf16
    %15 = vector.broadcast %cst_9 : bf16 to vector<1x16x1x128xbf16>
    %c0_10 = arith.constant 0 : index
    %c0_11 = arith.constant 0 : index
    %c0_12 = arith.constant 0 : index
    %c0_13 = arith.constant 0 : index
    %16 = vector.load %arg7[%c0_10, %c0_11, %c0_12, %c0_13] : memref<1x18x18x128xbf16, #tpu.memory_space<vmem>>, vector<1x1x18x128xbf16>
    tpu.vector_store %arg7[%c0_10, %c0_11, %c0_12, %c0_13], %14 {strides = array<i32>} : memref<1x18x18x128xbf16, #tpu.memory_space<vmem>>, vector<1x1x18x128xbf16>,
    %c0_14 = arith.constant 0 : index
    %c17 = arith.constant 17 : index
    %c0_15 = arith.constant 0 : index
    %c0_16 = arith.constant 0 : index
    %17 = vector.load %arg7[%c0_14, %c17, %c0_15, %c0_16] : memref<1x18x18x128xbf16, #tpu.memory_space<vmem>>, vector<1x1x18x128xbf16>
    tpu.vector_store %arg7[%c0_14, %c17, %c0_15, %c0_16], %14 {strides = array<i32>} : memref<1x18x18x128xbf16, #tpu.memory_space<vmem>>, vector<1x1x18x128xbf16>,
    %18 = tpu.concatenate %15, %13, %15 in 2 : vector<1x16x1x128xbf16>, vector<1x16x16x128xbf16>, vector<1x16x1x128xbf16> -> vector<1x16x18x128xbf16>
    %c0_17 = arith.constant 0 : index
    %c1 = arith.constant 1 : index
    %c0_18 = arith.constant 0 : index
    %c0_19 = arith.constant 0 : index
    %19 = vector.load %arg7[%c0_17, %c1, %c0_18, %c0_19] : memref<1x18x18x128xbf16, #tpu.memory_space<vmem>>, vector<1x16x18x128xbf16>
    tpu.vector_store %arg7[%c0_17, %c1, %c0_18, %c0_19], %18 {strides = array<i32>} : memref<1x18x18x128xbf16, #tpu.memory_space<vmem>>, vector<1x16x18x128xbf16>,
    %c0_20 = arith.constant 0 : index
    %c0_21 = arith.constant 0 : index
    %c0_22 = arith.constant 0 : index
    %c0_23 = arith.constant 0 : index
    %20 = vector.load %arg7[%c0_20, %c0_21, %c0_22, %c0_23] : memref<1x18x18x128xbf16, #tpu.memory_space<vmem>>, vector<1x16x16x128xbf16>
    %c0_24 = arith.constant 0 : index
    %c0_25 = arith.constant 0 : index
    %c1_26 = arith.constant 1 : index
    %c0_27 = arith.constant 0 : index
    %21 = vector.load %arg7[%c0_24, %c0_25, %c1_26, %c0_27] : memref<1x18x18x128xbf16, #tpu.memory_space<vmem>>, vector<1x16x16x128xbf16>
    %c0_28 = arith.constant 0 : index
    %c0_29 = arith.constant 0 : index
    %c2 = arith.constant 2 : index
    %c0_30 = arith.constant 0 : index
    %22 = vector.load %arg7[%c0_28, %c0_29, %c2, %c0_30] : memref<1x18x18x128xbf16, #tpu.memory_space<vmem>>, vector<1x16x16x128xbf16>
    %c0_31 = arith.constant 0 : index
    %c1_32 = arith.constant 1 : index
    %c0_33 = arith.constant 0 : index
    %c0_34 = arith.constant 0 : index
    %23 = vector.load %arg7[%c0_31, %c1_32, %c0_33, %c0_34] : memref<1x18x18x128xbf16, #tpu.memory_space<vmem>>, vector<1x16x16x128xbf16>
    %c0_35 = arith.constant 0 : index
    %c1_36 = arith.constant 1 : index
    %c1_37 = arith.constant 1 : index
    %c0_38 = arith.constant 0 : index
    %24 = vector.load %arg7[%c0_35, %c1_36, %c1_37, %c0_38] : memref<1x18x18x128xbf16, #tpu.memory_space<vmem>>, vector<1x16x16x128xbf16>
    %c0_39 = arith.constant 0 : index
    %c1_40 = arith.constant 1 : index
    %c2_41 = arith.constant 2 : index
    %c0_42 = arith.constant 0 : index
    %25 = vector.load %arg7[%c0_39, %c1_40, %c2_41, %c0_42] : memref<1x18x18x128xbf16, #tpu.memory_space<vmem>>, vector<1x16x16x128xbf16>
    %c0_43 = arith.constant 0 : index
    %c2_44 = arith.constant 2 : index
    %c0_45 = arith.constant 0 : index
    %c0_46 = arith.constant 0 : index
    %26 = vector.load %arg7[%c0_43, %c2_44, %c0_45, %c0_46] : memref<1x18x18x128xbf16, #tpu.memory_space<vmem>>, vector<1x16x16x128xbf16>
    %c0_47 = arith.constant 0 : index
    %c2_48 = arith.constant 2 : index
    %c1_49 = arith.constant 1 : index
    %c0_50 = arith.constant 0 : index
    %27 = vector.load %arg7[%c0_47, %c2_48, %c1_49, %c0_50] : memref<1x18x18x128xbf16, #tpu.memory_space<vmem>>, vector<1x16x16x128xbf16>
    %c0_51 = arith.constant 0 : index
    %c2_52 = arith.constant 2 : index
    %c2_53 = arith.constant 2 : index
    %c0_54 = arith.constant 0 : index
    %28 = vector.load %arg7[%c0_51, %c2_52, %c2_53, %c0_54] : memref<1x18x18x128xbf16, #tpu.memory_space<vmem>>, vector<1x16x16x128xbf16>
    %29 = tpu.concatenate %20, %21, %22, %23, %24, %25, %26, %27, %28 in 3 : vector<1x16x16x128xbf16>, vector<1x16x16x128xbf16>, vector<1x16x16x128xbf16>, vector<1x16x16x128xbf16>, vector<1x16x16x128xbf16>, vector<1x16x16x128xbf16>, vector<1x16x16x128xbf16>, vector<1x16x16x128xbf16>, vector<1x16x16x128xbf16> -> vector<1x16x16x1152xbf16>
    %30 = vector.shape_cast %29 : vector<1x16x16x1152xbf16> to vector<256x1152xbf16>
    %c0_55 = arith.constant 0 : index
    %c0_56 = arith.constant 0 : index
    %31 = vector.load %arg5[%c0_55, %c0_56] : memref<1152x128xbf16, #tpu.memory_space<vmem>>, vector<1152x128xbf16>
    %cst_57 = arith.constant dense<0.000000e+00> : vector<256x128xf32>
    %32 = tpu.matmul %30, %31, %cst_57 {dimension_numbers = #tpu.dot_dimension_numbers<[1], [0], [0], [1], [0, 0, 1, 1], [], []>} : vector<256x1152xbf16>, vector<1152x128xbf16>, vector<256x128xf32> -> vector<256x128xf32>
    %33 = vector.extract_strided_slice %32 {offsets = [0, 0], sizes = [256, 8], strides = [1, 1]} : vector<256x128xf32> to vector<256x8xf32>
    %c0_58 = arith.constant 0 : index
    %c0_59 = arith.constant 0 : index
    %c0_60 = arith.constant 0 : index
    %c0_61 = arith.constant 0 : index
    %34 = vector.load %arg2[%c0_58, %c0_59, %c0_60, %c0_61] : memref<1x16x16x8xf32, #tpu.memory_space<vmem>>, vector<1x16x16x8xf32>
    %35 = vector.shape_cast %34 : vector<1x16x16x8xf32> to vector<256x8xf32>
    %36 = arith.addf %33, %35 : vector<256x8xf32>
    %37 = vector.shape_cast %36 : vector<256x8xf32> to vector<1x16x16x8xf32>
    %c0_62 = arith.constant 0 : index
    %c0_63 = arith.constant 0 : index
    %c0_64 = arith.constant 0 : index
    %c0_65 = arith.constant 0 : index
    %38 = vector.load %arg6[%c0_62, %c0_63, %c0_64, %c0_65] : memref<1x16x16x8xf32, #tpu.memory_space<vmem>>, vector<1x16x16x8xf32>
    tpu.vector_store %arg6[%c0_62, %c0_63, %c0_64, %c0_65], %37 {strides = array<i32>} : memref<1x16x16x8xf32, #tpu.memory_space<vmem>>, vector<1x16x16x8xf32>,
    return
  }
  func.func @transform_0(%arg0: i32) -> (i32, i32, i32, i32) {
    %c0_i32 = arith.constant 0 : i32
    %c0_i32_0 = arith.constant 0 : i32
    %c0_i32_1 = arith.constant 0 : i32
    %c0_i32_2 = arith.constant 0 : i32
    return %arg0, %c0_i32, %c0_i32_0, %c0_i32_1 : i32, i32, i32, i32
  }
  func.func @transform_1(%arg0: i32) -> (i32, i32, i32, i32) {
    %c0_i32 = arith.constant 0 : i32
    %c0_i32_0 = arith.constant 0 : i32
    %c0_i32_1 = arith.constant 0 : i32
    %c0_i32_2 = arith.constant 0 : i32
    return %arg0, %c0_i32, %c0_i32_0, %c0_i32_1 : i32, i32, i32, i32
  }
  func.func @transform_2(%arg0: i32) -> (i32, i32) {
    %c0_i32 = arith.constant 0 : i32
    %c0_i32_0 = arith.constant 0 : i32
    %c0_i32_1 = arith.constant 0 : i32
    return %c0_i32, %c0_i32_0 : i32, i32
  }
  func.func @transform_3(%arg0: i32) -> (i32, i32) {
    %c0_i32 = arith.constant 0 : i32
    %c0_i32_0 = arith.constant 0 : i32
    %c0_i32_1 = arith.constant 0 : i32
    return %c0_i32, %c0_i32_0 : i32, i32
  }
  func.func @transform_4(%arg0: i32) -> (i32, i32) {
    %c0_i32 = arith.constant 0 : i32
    %c0_i32_0 = arith.constant 0 : i32
    %c0_i32_1 = arith.constant 0 : i32
    return %c0_i32, %c0_i32_0 : i32, i32
  }
  func.func @transform_5(%arg0: i32) -> (i32, i32, i32, i32) {
    %c0_i32 = arith.constant 0 : i32
    %c0_i32_0 = arith.constant 0 : i32
    %c0_i32_1 = arith.constant 0 : i32
    %c0_i32_2 = arith.constant 0 : i32
    return %arg0, %c0_i32, %c0_i32_0, %c0_i32_1 : i32, i32, i32, i32
  }
}

</mosaic_0001>

<bundles_post_ra>
// kernel: preact_block_nhwc.2
= control target key start
LH: loop header
LB: loop body
LE: loop exit
PB: predicated region body
PF: predicated region fallthrough
CT: control target
= control target key end

     0   :  { %12 = vsyncpa [#allocation4], 0  ;;  %s5794_s21 = smov 0   ;;  %s6881_s0 = inlined_call_operand.vmem [shape: f32[2,16,16,4], index: 0, kind: input, shape index: {}]   ;;  %s6882_s1 = inlined_call_operand.vmem [shape: f32[1,4], index: 1, kind: input, shape index: {}]   ;;  %s6883_s2 = inlined_call_operand.vmem [shape: f32[1,4], index: 2, kind: input, shape index: {}]   ;;  %s6884_s3 = inlined_call_operand.hbm [shape: bf16[1152,256], index: 3, kind: input, shape index: {}]   ;;  %s6885_s4 = inlined_call_operand.vmem [shape: f32[2,16,16,8], index: 4, kind: output, shape index: {0}]   ;;  %s6886_s5 = inlined_call_operand.vmem [shape: f32[2,16,16,8], index: 5, kind: output, shape index: {1}]   ;;  %s6887_s6 = inlined_call_operand.vmem [shape: f32[2,8,128], index: 6, kind: output, shape index: {2}]  }
   0x1 LB: > { %s5800_s22 = sadd.s32 4294967295, %s5753_s21   ;;  %p4618_p0 = scmp.ge.s32.totalorder %s5753_s21, 1  ;;  %s5753_s21 = sphi %s5794_s21, %s18_s21  }
   0x2   : > { %p190_p1 = scmp.lt.s32.totalorder %s5753_s21, 3  ;;  %s5755_s23 = smov [#allocation3]  }
   0x3   : > { %s208_s24 = sshll.u32 %s5755_s23, 4  ;;  %p6888_p3 = scmp.eq.s32.totalorder %s5800_s22, 0  ;;  %s209_s24 = int_to_ptr.vmem [resolvable:$true] %s208_s24 }
   0x4   : > { %p5804_p2 = pnand %p4618_p0, %p190_p1  ;;  %s5715_s29 = scalar_lea.hbm %s6884_s3, 18432 }
   0x5   : > { %p5716_p6 = scmp.ne.s32.totalorder %s6884_s3, %s5715_s29  ;;  %p5722_p10 = scmp.lt.u32.totalorder %s5715_s29, %s6884_s3 }
   0x6   : > { %s6890_s25 = scalar_select %p5804_p2, 1, 0 }
   0x7   : > { %p5265_p4 = pneg %p5804_p2 }
   0x9   : > { %p5813_p5 = pnand %p6888_p3, %p5265_p4 }
   0xb   : > { %p5717_p7 = pneg %p5813_p5 }
   0xd   : > { %p5718_p8 = pnand %p5717_p7, %p5716_p6 }
   0xf   : > { %p5719_p9 = pneg %p5718_p8 }
  0x11   : > { %p5724_p11 = pnand %p5722_p10, %p5719_p9 }
  0x13   : > { %5727 = shalt.err (!%p5724_p11)
}
  0x14   : > { %s5728_s10 = scalar_lea.vmem %s209_s24, 18432  ;;  %p5736_p1 = scmp.lt.s32.totalorder %s209_s24, %s209_s24 }
  0x15   : > { %p5729_p12 = scmp.ne.s32.totalorder %s209_s24, %s5728_s10  ;;  %p5737_p4 = scmp.lt.s32.totalorder %s5728_s10, %s5728_s10 }
  0x17   : > { %p5731_p13 = pnand %p5729_p12, %p5717_p7  ;;  %p5738_p3 = por %p5737_p4, %p5736_p1 }
  0x19   : > { %p5732_p0 = pneg %p5731_p13 }
  0x1b   : > { %p5739_p2 = pnand %p5738_p3, %p5732_p0 }
  0x1d   : > { %5742 = shalt.err (!%p5739_p2)
}
  0x1e   : > { %s5756_s11 = smov 128   ;;  %s5757_s12 = smov 8  }
  0x1f   : > { %5268 = dma.hbm_to_vmem [thread:$0]  (!%p5813_p5), %s6884_s3, 18432, %s209_s24, [#allocation4], %s5756_s11, %s5756_s11, %s5757_s12  }
  0x20   : > { %p6892_p6 = scmp.ne.s32.totalorder %s6890_s25, 0 }
  0x21   : > { %p6893_p8 = scmp.eq.s32.totalorder (!%p6892_p6), %s5800_s22, 0 }
  0x22   : > { %232 = sbr.rel (%p6892_p6) target bundleno = 677 (0x2a5), region = 36 }
  0x29   : > { %5748 = dma.done.wait (%p6893_p8), [#allocation4], 18432   ;;  %p6894_p7 = pmov %p6893_p8 }
  0x2a   : > { %v5758_v0 = vmov 0   ;;  %v5283_v1 = vld [vmem:[#allocation3 + $0x4] ss:$8 sps:$4 sm:$0xff]   ;;  %v5287_v3 = vld [vmem:[#allocation3] ss:$8 sps:$4 sm:$0xff]   ;;  %p271_p2 = scmp.lt.s32.totalorder %s5800_s22, 1 }
  0x2b   : > { %5750 = vsyncadd (%p6894_p7), [#allocation4], 4294948864  ;;  %482 = vst [vmem:[#allocation2] sm:$0xf] %v5758_v0  ;;  %v5285_v2 = vld [vmem:[#allocation3 + $0x204] ss:$8 sps:$4 sm:$0xff]   ;;  %3344 = vmatprep.subr.bf16.mxu1 %v5283_v1 }
  0x2c   : > { %483 = vst [vmem:[#allocation2 + $0x4] sm:$0xf] %v5758_v0  ;;  %484 = vst [vmem:[#allocation2 + $0x8] sm:$0x1] %v5758_v0  ;;  %v5288_v4 = vld [vmem:[#allocation3 + $0x200] ss:$8 sps:$4 sm:$0xff]   ;;  %3730 = vmatprep.subr.bf16.mxu0 %v5285_v2  ;;  %3345 = vmatpush1.bf16.msra.mxu1 %v5287_v3 }
  0x2d   : > { %486 = vst [vmem:[#allocation2 + $0xcc] sm:$0xf] %v5758_v0  ;;  %487 = vst [vmem:[#allocation2 + $0xd0] sm:$0xf] %v5758_v0  ;;  %v5289_v5 = vld [vmem:[#allocation3 + $0x14] ss:$8 sps:$4 sm:$0xff]   ;;  %3731 = vmatpush1.bf16.msra.mxu0 %v5288_v4 }
  0x2e   : > { %488 = vst [vmem:[#allocation2 + $0xd4] sm:$0x1] %v5758_v0  ;;  %v5291_v6 = vld [vmem:[#allocation3 + $0x214] ss:$8 sps:$4 sm:$0xff]   ;;  %v5293_v7 = vld [vmem:[#allocation3 + $0x10] ss:$8 sps:$4 sm:$0xff]   ;;  %3346 = vmatprep.subr.bf16.mxu1 %v5289_v5 }
  0x2f   : > { %v5294_v8 = vld [vmem:[#allocation3 + $0x210] ss:$8 sps:$4 sm:$0xff]   ;;  %3732 = vmatprep.subr.bf16.mxu0 %v5291_v6  ;;  %v5295_v9 = vld [vmem:[#allocation3 + $0x24] ss:$8 sps:$4 sm:$0xff]   ;;  %v5299_v11 = vld [vmem:[#allocation3 + $0x20] ss:$8 sps:$4 sm:$0xff]  }
  0x30   : > { %v5297_v10 = vld [vmem:[#allocation3 + $0x224] ss:$8 sps:$4 sm:$0xff]   ;;  %v5300_v12 = vld [vmem:[#allocation3 + $0x220] ss:$8 sps:$4 sm:$0xff]   ;;  %3347 = vmatpush1.bf16.msra.mxu1 %v5293_v7  ;;  %v5301_v13 = vld [vmem:[#allocation3 + $0x34] ss:$8 sps:$4 sm:$0xff]  }
  0x31   : > { %3733 = vmatpush1.bf16.msra.mxu0 %v5294_v8  ;;  %3348 = vmatprep.subr.bf16.mxu1 %v5295_v9  ;;  %v5303_v14 = vld [vmem:[#allocation3 + $0x234] ss:$8 sps:$4 sm:$0xff]   ;;  %v5305_v15 = vld [vmem:[#allocation3 + $0x30] ss:$8 sps:$4 sm:$0xff]   ;;  %v5307_v17 = vld [vmem:[#allocation3 + $0x44] ss:$8 sps:$4 sm:$0xff]  }
  0x32   : > { %3734 = vmatprep.subr.bf16.mxu0 %v5297_v10  ;;  %v5306_v16 = vld [vmem:[#allocation3 + $0x230] ss:$8 sps:$4 sm:$0xff]   ;;  %v5309_v18 = vld [vmem:[#allocation3 + $0x244] ss:$8 sps:$4 sm:$0xff]   ;;  %v5311_v19 = vld [vmem:[#allocation3 + $0x40] ss:$8 sps:$4 sm:$0xff]  }
  0x33   : > { %v5312_v20 = vld [vmem:[#allocation3 + $0x240] ss:$8 sps:$4 sm:$0xff]   ;;  %v5313_v21 = vld [vmem:[#allocation3 + $0x54] ss:$8 sps:$4 sm:$0xff]   ;;  %v5317_v23 = vld [vmem:[#allocation3 + $0x50] ss:$8 sps:$4 sm:$0xff]  }
  0x34   : > { %3349 = vmatpush1.bf16.msra.mxu1 %v5299_v11  ;;  %v5315_v22 = vld [vmem:[#allocation3 + $0x254] ss:$8 sps:$4 sm:$0xff]   ;;  %v5318_v24 = vld [vmem:[#allocation3 + $0x250] ss:$8 sps:$4 sm:$0xff]   ;;  %v5319_v25 = vld [vmem:[#allocation3 + $0x64] ss:$8 sps:$4 sm:$0xff]  }
  0x35   : > { %3735 = vmatpush1.bf16.msra.mxu0 %v5300_v12  ;;  %3350 = vmatprep.subr.bf16.mxu1 %v5301_v13  ;;  %v5321_v26 = vld [vmem:[#allocation3 + $0x264] ss:$8 sps:$4 sm:$0xff]   ;;  %v5323_v27 = vld [vmem:[#allocation3 + $0x60] ss:$8 sps:$4 sm:$0xff]   ;;  %v5325_v29 = vld [vmem:[#allocation3 + $0x74] ss:$8 sps:$4 sm:$0xff]  }
  0x36   : > { %3736 = vmatprep.subr.bf16.mxu0 %v5303_v14  ;;  %v5324_v28 = vld [vmem:[#allocation3 + $0x260] ss:$8 sps:$4 sm:$0xff]   ;;  %v5327_v30 = vld [vmem:[#allocation3 + $0x274] ss:$8 sps:$4 sm:$0xff]   ;;  %v5329_v31 = vld [vmem:[#allocation3 + $0x70] ss:$8 sps:$4 sm:$0xff]  }
  0x37   : > { %v5330_v32 = vld [vmem:[#allocation3 + $0x270] ss:$8 sps:$4 sm:$0xff]   ;;  %v5331_v33 = vld [vmem:[#allocation3 + $0x84] ss:$8 sps:$4 sm:$0xff]   ;;  %v5335_v35 = vld [vmem:[#allocation3 + $0x80] ss:$8 sps:$4 sm:$0xff]  }
  0x38   : > { %3351 = vmatpush1.bf16.msra.mxu1 %v5305_v15  ;;  %v5333_v34 = vld [vmem:[#allocation3 + $0x284] ss:$8 sps:$4 sm:$0xff]   ;;  %v5336_v36 = vld [vmem:[#allocation3 + $0x280] ss:$8 sps:$4 sm:$0xff]   ;;  %v5337_v37 = vld [vmem:[#allocation3 + $0x94] ss:$8 sps:$4 sm:$0xff]  }
  0x39   : > { %3737 = vmatpush1.bf16.msra.mxu0 %v5306_v16  ;;  %3352 = vmatprep.subr.bf16.mxu1 %v5307_v17  ;;  %v5339_v38 = vld [vmem:[#allocation3 + $0x294] ss:$8 sps:$4 sm:$0xff]   ;;  %s6898_s22 = smov (!%p271_p2, %s5800_s22), 1  ;;  %v5341_v39 = vld [vmem:[#allocation3 + $0x90] ss:$8 sps:$4 sm:$0xff]   ;;  %vm433_vm1 = vcmask 31744  }
  0x3a   : > { %3738 = vmatprep.subr.bf16.mxu0 %v5309_v18  ;;  %v5342_v40 = vld [vmem:[#allocation3 + $0x290] ss:$8 sps:$4 sm:$0xff]   ;;  %v5343_v41 = vld [vmem:[#allocation3 + $0xa4] ss:$8 sps:$4 sm:$0xff]   ;;  %s5850_s15 = sshll.u32 %s6898_s22, 8  ;;  %vm633_vm2 = vcmask 1040384  }
  0x3b   : > { %v5345_v42 = vld [vmem:[#allocation3 + $0x2a4] ss:$8 sps:$4 sm:$0xff]   ;;  %v5347_v43 = vld [vmem:[#allocation3 + $0xa0] ss:$8 sps:$4 sm:$0xff]   ;;  %v5349_v45 = vld [vmem:[#allocation3 + $0xb4] ss:$8 sps:$4 sm:$0xff]   ;;  %s5856_s18 = scalar_lea.vmem %s6881_s0, %s5850_s15  ;;  %s6714_s11 = scalar_lea.vmem %s6885_s4, %s5850_s15 }
  0x3c   : > { %3353 = vmatpush1.bf16.msra.mxu1 %v5311_v19  ;;  %v5348_v44 = vld [vmem:[#allocation3 + $0x2a0] ss:$8 sps:$4 sm:$0xff]   ;;  %v5351_v46 = vld [vmem:[#allocation3 + $0x2b4] ss:$8 sps:$4 sm:$0xff]   ;;  %v5353_v47 = vld [vmem:[#allocation3 + $0xb0] ss:$8 sps:$4 sm:$0xff]   ;;  %s6720_s14 = scalar_lea.vmem %s6886_s5, %s5850_s15 }
  0x3d   : > { %3739 = vmatpush1.bf16.msra.mxu0 %v5312_v20  ;;  %3354 = vmatprep.subr.bf16.mxu1 %v5313_v21  ;;  %v5354_v48 = vld [vmem:[#allocation3 + $0x2b0] ss:$8 sps:$4 sm:$0xff]   ;;  %v893_v49 = vld [vmem:[#allocation2] sm:$0xf]  ;;  %v5355_v50 = vld [vmem:[#allocation3 + $0xc4] ss:$8 sps:$4 sm:$0xff]  }
  0x3e   : > { %3740 = vmatprep.subr.bf16.mxu0 %v5315_v22  ;;  %v5357_v51 = vld [vmem:[#allocation3 + $0x2c4] ss:$8 sps:$4 sm:$0xff]   ;;  %v5380_v55 = vld [vmem:[#allocation2 + $0x8] ss:$0 sps:$4 sm:$0x11]   ;;  %v293_v12 = vld [vmem:[%s5856_s18 + $0x10] sm:$0xff] }
  0x3f   : > { %v894_v52 = vld [vmem:[#allocation2 + $0x4] sm:$0xf]  ;;  %v292_v56 = vld [vmem:[%s5856_s18 + $0x8] sm:$0xff]  ;;  %v5865_v57 = vld [vmem:[%s6882_s1] ss:$0 sm:$0xff]  ;;  %v1239_v63 = vshll.u32 %v5380_v55, 16 }
  0x40   : > { %3355 = vmatpush1.bf16.msra.mxu1 %v5317_v23  ;;  %v291_v53 = vld [vmem:[%s5856_s18] sm:$0xff]  ;;  %v5859_v54 = vcombine.low %v893_v49, %v894_v52  ;;  %v331_v59 = vmul.f32 %v5865_v57, %v292_v56  ;;  %vm1230_vm0 = vsmask.f32 7424  ;;  %v5361_v5 = vld [vmem:[#allocation3 + $0xd4] ss:$8 sps:$4 sm:$0xff]   ;;  %v294_v13 = vld [vmem:[%s5856_s18 + $0x18] sm:$0xff]  ;;  %v332_v17 = vmul.f32 %v5865_v57, %v293_v12 }
  0x41   : > { %3741 = vmatpush1.bf16.msra.mxu0 %v5318_v24  ;;  %3356 = vmatprep.subr.bf16.mxu1 %v5319_v25  ;;  %v330_v58 = vmul.f32 %v5865_v57, %v291_v53  ;;  %v5872_v60 = vld [vmem:[%s6883_s2] ss:$0 sm:$0xff]  ;;  %v1241_v7 = vrot.slane %v1239_v63, 1  ;;  %v5363_v8 = vld [vmem:[#allocation3 + $0x2d4] ss:$8 sps:$4 sm:$0xff]   ;;  %v333_v18 = vmul.f32 %v5865_v57, %v294_v13  ;;  %vm1487_vm5 = vcmask 1046528  }
  0x42   : > { %3742 = vmatprep.subr.bf16.mxu0 %v5321_v26  ;;  %v1232_v61 = vshrl.u32 %v5859_v54, 16  ;;  %v1234_v62 = vshll.u32 %v5859_v54, 16  ;;  %v5359_v1 = vld [vmem:[#allocation3 + $0xc0] ss:$8 sps:$4 sm:$0xff]   ;;  %v370_v3 = vadd.f32 %v5872_v60, %v331_v59  ;;  %vm634_vm3 = vsmask.f32 256 }
  0x43   : > { %v369_v2 = vadd.f32 %v5872_v60, %v330_v58  ;;  %v5360_v4 = vld [vmem:[#allocation3 + $0x2c0] ss:$8 sps:$4 sm:$0xff]   ;;  %v5365_v14 = vld [vmem:[#allocation3 + $0xd0] ss:$8 sps:$4 sm:$0xff]   ;;  %v5367_v22 = vld [vmem:[#allocation3 + $0xe4] ss:$8 sps:$4 sm:$0xff]   ;;  %v371_v24 = vadd.f32 %v5872_v60, %v332_v17  ;;  %v372_v25 = vadd.f32 %v5872_v60, %v333_v18 }
  0x44   : > { %3357 = vmatpush1.bf16.msra.mxu1 %v5323_v27  ;;  %v1236_v6 = vrot.slane %v1234_v62, 1  ;;  %v402_v10 = vmax.f32 %v370_v3, 0.0  ;;  %v5366_v19 = vld [vmem:[#allocation3 + $0x2d0] ss:$8 sps:$4 sm:$0xff]   ;;  %v5369_v23 = vld [vmem:[#allocation3 + $0x2e4] ss:$8 sps:$4 sm:$0xff]   ;;  %vm5889_vm4 = vmand %vm633_vm2, %vm634_vm3 }
  0x45   : > { %3743 = vmatpush1.bf16.msra.mxu0 %v5324_v28  ;;  %3358 = vmatprep.subr.bf16.mxu1 %v5325_v29  ;;  %v401_v9 = vmax.f32 %v369_v2, 0.0  ;;  %v295_v29 = vld [vmem:[%s5856_s18 + $0x20] sm:$0xff]  ;;  %v298_v58 = vld [vmem:[%s5856_s18 + $0x38] sm:$0xff]  ;;  %v5398_v18 = vld [vmem:[#allocation3 + $0x110] ss:$8 sps:$4 sm:$0xff]   ;;  %vm4309_vm6 = vcmask 64512  }
  0x46   : > { %3744 = vmatprep.subr.bf16.mxu0 %v5327_v30  ;;  %v1237_v11 = vor.u32 %v1236_v6, %v1232_v61  ;;  %v435_v16 = vsel %vm433_vm1, %v402_v10, 0.0  ;;  %v5371_v30 = vld [vmem:[#allocation3 + $0xe0] ss:$8 sps:$4 sm:$0xff]   ;;  %v5386_v62 = vld [vmem:[#allocation3 + $0x104] ss:$8 sps:$4 sm:$0xff]   ;;  %s4629_s15 = sshll.u32 %s6898_s22, 3 }
  0x47   : > { %v434_v15 = vsel %vm433_vm1, %v401_v9, 0.0  ;;  %v5389_v63 = vld [vmem:[#allocation3 + $0x304] ss:$8 sps:$4 sm:$0xff]   ;;  %vm4482_vm7 = vcmask 1041408  }
  0x48   : > { %3359 = vmatpush1.bf16.msra.mxu1 %v5329_v31  ;;  %v1242_v20 = vsel %vm1230_vm0, %v1237_v11, %v1241_v7  ;;  %v466_v21 = vpack.c.bf16 %v435_v16, %v434_v15  ;;  %v403_v31 = vmax.f32 %v371_v24, 0.0  ;;  %v5400_v11 = vld [vmem:[#allocation3 + $0x114] ss:$8 sps:$4 sm:$0xff]  }
  0x49   : > { %3745 = vmatpush1.bf16.msra.mxu0 %v5330_v32  ;;  %3360 = vmatprep.subr.bf16.mxu1 %v5331_v33  ;;  %v404_v32 = vmax.f32 %v372_v25, 0.0  ;;  %v296_v33 = vld [vmem:[%s5856_s18 + $0x28] sm:$0xff] }
  0x4a   : > { %3746 = vmatprep.subr.bf16.mxu0 %v5333_v34  ;;  %3376 = vmatprep.mubr.bf16.mxu1 %v1242_v20  ;;  %v490_v26 = vshrl.u32 %v466_v21, 16  ;;  %v493_v27 = vshll.u32 %v466_v21, 16  ;;  %v334_v34 = vmul.f32 %v5865_v57, %v295_v29 }
  0x4c   : > { %3361 = vmatpush1.bf16.msra.mxu1 %v5335_v35  ;;  %v5372_v35 = vld [vmem:[#allocation3 + $0x2e0] ss:$8 sps:$4 sm:$0xff]  }
  0x4d   : > { %3747 = vmatpush1.bf16.msra.mxu0 %v5336_v36  ;;  %3362 = vmatprep.subr.bf16.mxu1 %v5337_v37  ;;  %v5373_v36 = vld [vmem:[#allocation3 + $0xf4] ss:$8 sps:$4 sm:$0xff]   ;;  %v492_v37 = vrot.slane %v490_v26, 7 }
  0x4e   : > { %3748 = vmatprep.subr.bf16.mxu0 %v5339_v38  ;;  %v335_v38 = vmul.f32 %v5865_v57, %v296_v33 }
  0x50   : > { %3363 = vmatpush1.bf16.msra.mxu1 %v5341_v39  ;;  %v5375_v39 = vld [vmem:[#allocation3 + $0x2f4] ss:$8 sps:$4 sm:$0xff]  }
  0x51   : > { %3749 = vmatpush1.bf16.msra.mxu0 %v5342_v40  ;;  %3364 = vmatprep.subr.bf16.mxu1 %v5343_v41  ;;  %v436_v40 = vsel %vm433_vm1, %v403_v31, 0.0  ;;  %v437_v41 = vsel %vm433_vm1, %v404_v32, 0.0 }
  0x52   : > { %3750 = vmatprep.subr.bf16.mxu0 %v5345_v42  ;;  %v373_v42 = vadd.f32 %v5872_v60, %v334_v34 }
  0x54   : > { %3365 = vmatpush1.bf16.msra.mxu1 %v5347_v43  ;;  %v495_v43 = vor.u32 %v493_v27, %v492_v37 }
  0x55   : > { %3751 = vmatpush1.bf16.msra.mxu0 %v5348_v44  ;;  %3366 = vmatprep.subr.bf16.mxu1 %v5349_v45  ;;  %v652_v44 = vsel %vm5889_vm4, %v492_v37, 0  ;;  %v467_v45 = vpack.c.bf16 %v437_v41, %v436_v40 }
  0x56   : > { %3752 = vmatprep.subr.bf16.mxu0 %v5351_v46  ;;  %v374_v46 = vadd.f32 %v5872_v60, %v335_v38  ;;  %v4634_v49 = vcombine.low %v652_v44, %v652_v44  ;;  %v636_v52 = vsel %vm5889_vm4, 0, %v495_v43 }
  0x57   : > { %v497_v53 = vshrl.u32 %v467_v45, 16  ;;  %v500_v55 = vshll.u32 %v467_v45, 16  ;;  %v4632_v59 = vcombine.low %v636_v52, %v636_v52  ;;  %v4633_v61 = vcombine.high %v636_v52, %v636_v52 }
  0x58   : > { %3367 = vmatpush1.bf16.msra.mxu1 %v5353_v47  ;;  %v5377_v47 = vld [vmem:[#allocation3 + $0xf0] ss:$8 sps:$4 sm:$0xff]   ;;  %v406_v56 = vmax.f32 %v374_v46, 0.0  ;;  %847 = vst [vmem:[#allocation2 + $0x14] sm:$0x1] %v4634_v49 }
  0x59   : > { %3753 = vmatpush1.bf16.msra.mxu0 %v5354_v48  ;;  %3368 = vmatprep.subr.bf16.mxu1 %v5355_v50  ;;  %v5378_v48 = vld [vmem:[#allocation3 + $0x2f0] ss:$8 sps:$4 sm:$0xff]   ;;  %v405_v50 = vmax.f32 %v373_v42, 0.0  ;;  %v499_v3 = vrot.slane %v497_v53, 7  ;;  %845 = vst [vmem:[#allocation2 + $0xc] sm:$0xf] %v4632_v59 }
  0x5a   : > { %3754 = vmatprep.subr.bf16.mxu0 %v5357_v51  ;;  %v297_v51 = vld [vmem:[%s5856_s18 + $0x30] sm:$0xff]  ;;  %846 = vst [vmem:[#allocation2 + $0x10] sm:$0xf] %v4633_v61 }
  0x5b   : > { %v336_v2 = vmul.f32 %v5865_v57, %v297_v51  ;;  %v502_v9 = vor.u32 %v500_v55, %v499_v3  ;;  %v653_v10 = vsel %vm5889_vm4, %v499_v3, 0  ;;  %v5428_v42 = vld [vmem:[#allocation3 + $0x134] ss:$8 sps:$4 sm:$0xff]   ;;  %v5426_v61 = vld [vmem:[#allocation3 + $0x130] ss:$8 sps:$4 sm:$0xff]  }
  0x5c   : > { %3369 = vmatpush1.bf16.msra.mxu1 %v5359_v1  ;;  %v438_v1 = vsel %vm433_vm1, %v405_v50, 0.0  ;;  %v4637_v13 = vcombine.low %v653_v10, %v653_v10  ;;  %v301_v53 = vld [vmem:[%s5856_s18 + $0x50] sm:$0xff] }
  0x5d   : > { %3755 = vmatpush1.bf16.msra.mxu0 %v5360_v4  ;;  %3370 = vmatprep.subr.bf16.mxu1 %v5361_v5  ;;  %v439_v4 = vsel %vm433_vm1, %v406_v56, 0.0  ;;  %v337_v5 = vmul.f32 %v5865_v57, %v298_v58  ;;  %v375_v7 = vadd.f32 %v5872_v60, %v336_v2  ;;  %v637_v17 = vsel %vm5889_vm4, 0, %v502_v9  ;;  %v5387_v2 = vld [vmem:[#allocation3 + $0x300] ss:$8 sps:$4 sm:$0xff]  }
  0x5e   : > { %3756 = vmatprep.subr.bf16.mxu0 %v5363_v8  ;;  %v468_v6 = vpack.c.bf16 %v439_v4, %v438_v1  ;;  %v5384_v8 = vld [vmem:[#allocation3 + $0x100] ss:$8 sps:$4 sm:$0xff]   ;;  %v4635_v20 = vcombine.low %v637_v17, %v637_v17  ;;  %v4636_v21 = vcombine.high %v637_v17, %v637_v17  ;;  %850 = vst [vmem:[#allocation2 + $0x20] sm:$0x1] %v4637_v13 }
  0x5f   : > { %v376_v12 = vadd.f32 %v5872_v60, %v337_v5  ;;  %v407_v16 = vmax.f32 %v375_v7, 0.0  ;;  %v5382_v25 = vld [vmem:[#allocation2 + $0x14] ss:$0 sps:$4 sm:$0x11]  }
  0x60   : > { %3371 = vmatpush1.bf16.msra.mxu1 %v5365_v14  ;;  %v504_v14 = vshrl.u32 %v468_v6, 16  ;;  %v507_v15 = vshll.u32 %v468_v6, 16  ;;  %v5394_v27 = vld [vmem:[#allocation2 + $0x14] ss:$0 sps:$4 sm:$0x11]   ;;  %v1953_v38 = vrot.slane %v5382_v25, 1 }
  0x61   : > { %3757 = vmatpush1.bf16.msra.mxu0 %v5366_v19  ;;  %3372 = vmatprep.subr.bf16.mxu1 %v5367_v22  ;;  %v408_v19 = vmax.f32 %v376_v12, 0.0  ;;  %v440_v24 = vsel %vm433_vm1, %v407_v16, 0.0  ;;  %848 = vst [vmem:[#allocation2 + $0x18] sm:$0xf] %v4635_v20  ;;  %849 = vst [vmem:[#allocation2 + $0x1c] sm:$0xf] %v4636_v21  ;;  %v340_v12 = vmul.f32 %v5865_v57, %v301_v53 }
  0x62   : > { %3758 = vmatprep.subr.bf16.mxu0 %v5369_v23  ;;  %v506_v22 = vrot.slane %v504_v14, 7  ;;  %v5414_v23 = vld [vmem:[#allocation3 + $0x124] ss:$8 sps:$4 sm:$0xff]   ;;  %v957_v31 = vld [vmem:[#allocation2 + $0xc] sm:$0xf]  ;;  %v1251_v44 = vshll.u32 %v5394_v27, 16 }
  0x63   : > { %v441_v26 = vsel %vm433_vm1, %v408_v19, 0.0  ;;  %v958_v32 = vld [vmem:[#allocation2 + $0x10] sm:$0xf]  ;;  %v1005_v33 = vld [vmem:[#allocation2 + $0xc] sm:$0xe] }
  0x64   : > { %3373 = vmatpush1.bf16.msra.mxu1 %v5371_v30  ;;  %v509_v29 = vor.u32 %v507_v15, %v506_v22  ;;  %v654_v30 = vsel %vm5889_vm4, %v506_v22, 0  ;;  %v4760_v37 = vcombine.low %v1005_v33, %v958_v32  ;;  %v895_v40 = vld [vmem:[#allocation2 + $0xc] sm:$0xf]  ;;  %v896_v41 = vld [vmem:[#allocation2 + $0x10] sm:$0xf]  ;;  %v1253_v58 = vrot.slane %v1251_v44, 1 }
  0x65   : > { %3759 = vmatpush1.bf16.msra.mxu0 %v5372_v35  ;;  %3374 = vmatprep.subr.bf16.mxu1 %v5373_v36  ;;  %v4640_v34 = vcombine.low %v654_v30, %v654_v30  ;;  %v5412_v35 = vld [vmem:[#allocation3 + $0x120] ss:$8 sps:$4 sm:$0xff]   ;;  %v5924_v36 = vcombine.low %v957_v31, %v958_v32  ;;  %v5926_v43 = vcombine.low %v895_v40, %v896_v41  ;;  %v5392_v6 = vld [vmem:[#allocation3 + $0x314] ss:$8 sps:$4 sm:$0xff]   ;;  %v5442_v19 = vld [vmem:[#allocation3 + $0x144] ss:$8 sps:$4 sm:$0xff]  }
  0x66   : > { %3760 = vmatprep.subr.bf16.mxu0 %v5375_v39  ;;  %v1704_v39 = vshll.u32 %v5382_v25, 16  ;;  %v638_v45 = vsel %vm5889_vm4, 0, %v509_v29  ;;  %v1952_v49 = vrot.slane %v4760_v37, 1  ;;  %v5396_v3 = vld [vmem:[#allocation2 + $0x20] ss:$0 sps:$4 sm:$0x11]  }
  0x67   : > { %853 = vst [vmem:[#allocation2 + $0x2c] sm:$0x1] %v4640_v34  ;;  %v1697_v50 = vshrl.u32 %v5924_v36, 16  ;;  %v1699_v51 = vshll.u32 %v5924_v36, 16  ;;  %v1244_v55 = vshrl.u32 %v5926_v43, 16  ;;  %v1246_v56 = vshll.u32 %v5926_v43, 16 }
  0x68   : > { %3375 = vmatpush1.bf16.msra.mxu1 %v5377_v47  ;;  %v299_v47 = vld [vmem:[%s5856_s18 + $0x40] sm:$0xff]  ;;  %v1706_v52 = vrot.slane %v1704_v39, 1  ;;  %v4638_v59 = vcombine.low %v638_v45, %v638_v45  ;;  %v4639_v4 = vcombine.high %v638_v45, %v638_v45  ;;  %v960_v9 = vld [vmem:[#allocation2 + $0x1c] sm:$0xf]  ;;  %v1006_v14 = vld [vmem:[#allocation2 + $0x18] sm:$0xe] }
  0x69   : > { %3761 = vmatpush1.bf16.msra.mxu0 %v5378_v48  ;;  %3537 = vmatprep.subr.bf16.mxu1 %v5386_v62  ;;  %v300_v48 = vld [vmem:[%s5856_s18 + $0x48] sm:$0xff]  ;;  %v302_v62 = vld [vmem:[%s5856_s18 + $0x58] sm:$0xff]  ;;  %v1701_v1 = vrot.slane %v1699_v51, 1  ;;  %v338_v5 = vmul.f32 %v5865_v57, %v299_v47  ;;  %v1248_v7 = vrot.slane %v1246_v56, 1  ;;  %v1956_v16 = vrot.slane %v5396_v3, 1 }
  0x6a   : > { %3923 = vmatprep.subr.bf16.mxu0 %v5389_v63  ;;  %v1954_v63 = vsel %vm1487_vm5, %v1952_v49, %v1953_v38  ;;  %851 = vst [vmem:[#allocation2 + $0x24] sm:$0xf] %v4638_v59  ;;  %v1716_v17 = vshll.u32 %v5396_v3, 16  ;;  %852 = vst [vmem:[#allocation2 + $0x28] sm:$0xf] %v4639_v4  ;;  %v4761_v21 = vcombine.low %v1006_v14, %v960_v9 }
  0x6b   : > { %3377 = vmatmul.mubr.bf16.vlgmr.msra.gmra.mrb[0].mxu1 %v5859_v54  ;;  %v5922_v54 = vpack.c.bf16 %v441_v26, %v440_v24  ;;  %3762 = vmatprep.mubr.bf16.mxu0 %v1954_v63  ;;  %v1702_v13 = vor.u32 %v1701_v1, %v1697_v50  ;;  %v1249_v20 = vor.u32 %v1248_v7, %v1244_v55  ;;  %v898_v22 = vld [vmem:[#allocation2 + $0x1c] sm:$0xf]  ;;  %v5440_v25 = vld [vmem:[#allocation3 + $0x140] ss:$8 sps:$4 sm:$0xff]   ;;  %v5390_v29 = vld [vmem:[#allocation3 + $0x310] ss:$8 sps:$4 sm:$0xff]  }
  0x6c   : > { %3538 = vmatpush1.bf16.msra.mxu1 %v5384_v8  ;;  %v959_v8 = vld [vmem:[#allocation2 + $0x18] sm:$0xf]  ;;  %v341_v26 = vmul.f32 %v5865_v57, %v302_v62  ;;  %v1718_v32 = vrot.slane %v1716_v17, 1  ;;  %v1955_v34 = vrot.slane %v4761_v21, 1  ;;  %v5957_v41 = vadd.f32 %v5872_v60, %v338_v5  ;;  %v5403_v44 = vld [vmem:[#allocation3 + $0x324] ss:$8 sps:$4 sm:$0xff]  }
  0x6d   : > { %3539 = vmatprep.subr.bf16.mxu1 %v5400_v11  ;;  %v511_v46 = vshrl.u32 %v5922_v54, 16  ;;  %v339_v11 = vmul.f32 %v5865_v57, %v300_v48  ;;  %v5945_v15 = vcombine.low %v959_v8, %v960_v9  ;;  %v514_v24 = vshll.u32 %v5922_v54, 16  ;;  %v5401_v63 = vld [vmem:[#allocation3 + $0x320] ss:$8 sps:$4 sm:$0xff]   ;;  %v5406_v5 = vld [vmem:[#allocation3 + $0x334] ss:$8 sps:$4 sm:$0xff]  }
  0x6e   : > { %v1707_v27 = vsel %vm1230_vm0, %v1702_v13, %v1706_v52  ;;  %v1254_v33 = vsel %vm1230_vm0, %v1249_v20, %v1253_v58  ;;  %v5410_v38 = vld [vmem:[#allocation2 + $0x2c] ss:$0 sps:$4 sm:$0x11]   ;;  %v379_v59 = vadd.f32 %v5872_v60, %v340_v12  ;;  %v5454_v21 = vld [vmem:[#allocation3 + $0x150] ss:$8 sps:$4 sm:$0xff]  }
  0x6f   : > { %v5941_v10 = vrot.slane %v511_v46, 7  ;;  %v1709_v30 = vshrl.u32 %v5945_v15, 16  ;;  %v1711_v31 = vshll.u32 %v5945_v15, 16  ;;  %3763 = vmatmul.mubr.bf16.vlgmr.msra.gmra.mrb[0].mxu0 %v1707_v27  ;;  %3386 = vmatprep.mubr.bf16.mxu1 %v1254_v33  ;;  %v5422_v39 = vld [vmem:[#allocation2 + $0x2c] ss:$0 sps:$4 sm:$0x11]   ;;  %v5964_v53 = vadd.f32 %v5872_v60, %v339_v11 }
  0x70   : > { %3540 = vmatpush1.bf16.msra.mxu1 %v5398_v18  ;;  %v897_v18 = vld [vmem:[#allocation2 + $0x18] sm:$0xf]  ;;  %3924 = vmatpush1.bf16.msra.mxu0 %v5387_v2  ;;  %v1959_v51 = vrot.slane %v5410_v38, 1  ;;  %v1728_v52 = vshll.u32 %v5410_v38, 16  ;;  %v5456_v11 = vld [vmem:[#allocation3 + $0x154] ss:$8 sps:$4 sm:$0xff]  }
  0x71   : > { %3541 = vmatprep.subr.bf16.mxu1 %v5414_v23  ;;  %v5408_v23 = vld [vmem:[#allocation2 + $0x20] ss:$0 sps:$4 sm:$0x11]   ;;  %v1713_v54 = vrot.slane %v1711_v31, 1  ;;  %v516_v40 = vor.u32 %v514_v24, %v5941_v10  ;;  %3925 = vmatprep.subr.bf16.mxu0 %v5392_v6  ;;  %v961_v49 = vld [vmem:[#allocation2 + $0x24] sm:$0xf] }
  0x72   : > { %v1263_v37 = vshll.u32 %v5408_v23, 16  ;;  %v1007_v50 = vld [vmem:[#allocation2 + $0x24] sm:$0xe]  ;;  %v962_v56 = vld [vmem:[#allocation2 + $0x28] sm:$0xf]  ;;  %v1730_v3 = vrot.slane %v1728_v52, 1 }
  0x73   : > { %3387 = vmatmul.mubr.bf16.gmra.mrb[4].mxu1 %v5926_v43  ;;  %v1714_v48 = vor.u32 %v1713_v54, %v1709_v30  ;;  %v899_v58 = vld [vmem:[#allocation2 + $0x24] sm:$0xf]  ;;  %v1275_v43 = vshll.u32 %v5422_v39, 16  ;;  %v5969_v1 = vcombine.low %v961_v49, %v962_v56  ;;  %v4762_v2 = vcombine.low %v1007_v50, %v962_v56  ;;  %v900_v4 = vld [vmem:[#allocation2 + $0x28] sm:$0xf] }
  0x74   : > { %3542 = vmatpush1.bf16.msra.mxu1 %v5412_v35  ;;  %v5953_v35 = vcombine.low %v897_v18, %v898_v22  ;;  %v1265_v47 = vrot.slane %v1263_v37, 1  ;;  %3926 = vmatpush1.bf16.msra.mxu0 %v5390_v29  ;;  %v5971_v7 = vcombine.low %v899_v58, %v900_v4  ;;  %v639_v9 = vsel %vm5889_vm4, 0, %v516_v40  ;;  %v5404_v22 = vld [vmem:[#allocation3 + $0x330] ss:$8 sps:$4 sm:$0xff]   ;;  %v303_v27 = vld [vmem:[%s5856_s18 + $0x60] sm:$0xff] }
  0x75   : > { %3543 = vmatprep.subr.bf16.mxu1 %v5428_v42  ;;  %v1957_v42 = vsel %vm1487_vm5, %v1955_v34, %v1956_v16  ;;  %v1719_v62 = vsel %vm1230_vm0, %v1714_v48, %v1718_v32  ;;  %3927 = vmatprep.subr.bf16.mxu0 %v5403_v44  ;;  %v1277_v8 = vrot.slane %v1275_v43, 1  ;;  %v1958_v12 = vrot.slane %v4762_v2, 1  ;;  %v304_v33 = vld [vmem:[%s5856_s18 + $0x68] sm:$0xff]  ;;  %v5468_v39 = vld [vmem:[#allocation3 + $0x160] ss:$8 sps:$4 sm:$0xff]  }
  0x76   : > { %v1256_v45 = vshrl.u32 %v5953_v35, 16  ;;  %v1258_v46 = vshll.u32 %v5953_v35, 16  ;;  %3772 = vmatprep.mubr.bf16.mxu0 %v1957_v42  ;;  %v1721_v13 = vshrl.u32 %v5969_v1, 16  ;;  %v1723_v14 = vshll.u32 %v5969_v1, 16  ;;  %v5470_v40 = vld [vmem:[#allocation3 + $0x164] ss:$8 sps:$4 sm:$0xff]  }
  0x77   : > { %v655_v16 = vsel %vm5889_vm4, %v5941_v10, 0  ;;  %3773 = vmatmul.mubr.bf16.gmra.mrb[4].mxu0 %v1719_v62  ;;  %v1268_v18 = vshrl.u32 %v5971_v7, 16  ;;  %v4641_v20 = vcombine.low %v639_v9, %v639_v9  ;;  %v1960_v23 = vsel %vm1487_vm5, %v1958_v12, %v1959_v51  ;;  %v5420_v50 = vld [vmem:[#allocation3 + $0x354] ss:$8 sps:$4 sm:$0xff]   ;;  %v5418_v56 = vld [vmem:[#allocation3 + $0x350] ss:$8 sps:$4 sm:$0xff]  }
  0x78   : > { %3544 = vmatpush1.bf16.msra.mxu1 %v5426_v61  ;;  %v1260_v55 = vrot.slane %v1258_v46, 1  ;;  %v380_v61 = vadd.f32 %v5872_v60, %v341_v26  ;;  %3928 = vmatpush1.bf16.msra.mxu0 %v5401_v63  ;;  %v1725_v24 = vrot.slane %v1723_v14, 1  ;;  %v4642_v10 = vcombine.high %v639_v9, %v639_v9  ;;  %v5415_v46 = vld [vmem:[#allocation3 + $0x340] ss:$8 sps:$4 sm:$0xff]   ;;  %v5431_v63 = vld [vmem:[#allocation3 + $0x364] ss:$8 sps:$4 sm:$0xff]  }
  0x79   : > { %3545 = vmatprep.subr.bf16.mxu1 %v5442_v19  ;;  %v1270_v19 = vshll.u32 %v5971_v7, 16  ;;  %v4643_v26 = vcombine.low %v655_v16, %v655_v16  ;;  %3929 = vmatprep.subr.bf16.mxu0 %v5406_v5  ;;  %854 = vst [vmem:[#allocation2 + $0x30] sm:$0xf] %v4641_v20  ;;  %v409_v30 = vmax.f32 %v5957_v41, 0.0  ;;  %v410_v31 = vmax.f32 %v5964_v53, 0.0 }
  0x7a   : > { %v1261_v6 = vor.u32 %v1260_v55, %v1256_v45  ;;  %3782 = vmatprep.mubr.bf16.mxu0 %v1960_v23  ;;  %v411_v32 = vmax.f32 %v379_v59, 0.0  ;;  %v1726_v34 = vor.u32 %v1725_v24, %v1721_v13  ;;  %855 = vst [vmem:[#allocation2 + $0x34] sm:$0xf] %v4642_v10  ;;  %v412_v37 = vmax.f32 %v380_v61, 0.0  ;;  %v305_v55 = vld [vmem:[%s5856_s18 + $0x70] sm:$0xff]  ;;  %v306_v61 = vld [vmem:[%s5856_s18 + $0x78] sm:$0xff] }
  0x7b   : > { %v1272_v29 = vrot.slane %v1270_v19, 1  ;;  %856 = vst [vmem:[#allocation2 + $0x38] sm:$0x1] %v4643_v26  ;;  %v342_v38 = vmul.f32 %v5865_v57, %v303_v27  ;;  %v343_v54 = vmul.f32 %v5865_v57, %v304_v33  ;;  %v442_v44 = vsel %vm433_vm1, %v409_v30, 0.0  ;;  %v5482_v14 = vld [vmem:[#allocation3 + $0x170] ss:$8 sps:$4 sm:$0xff]  }
  0x7c   : > { %3546 = vmatpush1.bf16.msra.mxu1 %v5440_v25  ;;  %v1266_v17 = vsel %vm1230_vm0, %v1261_v6, %v1265_v47  ;;  %v5417_v25 = vld [vmem:[#allocation3 + $0x344] ss:$8 sps:$4 sm:$0xff]   ;;  %v443_v41 = vsel %vm433_vm1, %v410_v31, 0.0  ;;  %v444_v45 = vsel %vm433_vm1, %v411_v32, 0.0  ;;  %3930 = vmatpush1.bf16.msra.mxu0 %v5404_v22  ;;  %v445_v48 = vsel %vm433_vm1, %v412_v37, 0.0 }
  0x7d   : > { %3547 = vmatprep.subr.bf16.mxu1 %v5456_v11  ;;  %3396 = vmatprep.mubr.bf16.mxu1 %v1266_v17  ;;  %v1273_v42 = vor.u32 %v1272_v29, %v1268_v18  ;;  %v470_v47 = vpack.c.bf16 %v443_v41, %v442_v44  ;;  %v381_v49 = vadd.f32 %v5872_v60, %v342_v38  ;;  %v5429_v19 = vld [vmem:[#allocation3 + $0x360] ss:$8 sps:$4 sm:$0xff]   ;;  %v5434_v22 = vld [vmem:[#allocation3 + $0x374] ss:$8 sps:$4 sm:$0xff]   ;;  %v5655_v28 = vld [vmem:[#allocation2 + $0x1c] sm:$0xf] }
  0x7e   : > { %3397 = vmatmul.mubr.bf16.gmra.mrb[8].mxu1 %v5953_v35  ;;  %v1731_v35 = vsel %vm1230_vm0, %v1726_v34, %v1730_v3  ;;  %3931 = vmatprep.subr.bf16.mxu0 %v5417_v25  ;;  %v5998_v52 = vpack.c.bf16 %v445_v48, %v444_v45  ;;  %v382_v53 = vadd.f32 %v5872_v60, %v343_v54  ;;  %v5484_v31 = vld [vmem:[#allocation3 + $0x174] ss:$8 sps:$4 sm:$0xff]  }
  0x7f   : > { %v1278_v51 = vsel %vm1230_vm0, %v1273_v42, %v1277_v8  ;;  %v518_v58 = vshrl.u32 %v470_v47, 16  ;;  %v521_v43 = vshll.u32 %v470_v47, 16  ;;  %v413_v59 = vmax.f32 %v381_v49, 0.0  ;;  %3783 = vmatmul.mubr.bf16.gmra.mrb[8].mxu0 %v1731_v35  ;;  %v5432_v42 = vld [vmem:[#allocation3 + $0x370] ss:$8 sps:$4 sm:$0xff]  }
  0x80   : > { %3548 = vmatpush1.bf16.msra.mxu1 %v5454_v21  ;;  %3406 = vmatprep.mubr.bf16.mxu1 %v1278_v51  ;;  %v344_v62 = vmul.f32 %v5865_v57, %v305_v55  ;;  %v525_v2 = vshrl.u32 %v5998_v52, 16  ;;  %v528_v3 = vshll.u32 %v5998_v52, 16  ;;  %v414_v4 = vmax.f32 %v382_v53, 0.0  ;;  %v963_v6 = vld [vmem:[#allocation2 + $0x30] sm:$0xf] }
  0x81   : > { %3549 = vmatprep.subr.bf16.mxu1 %v5470_v40  ;;  %v345_v5 = vmul.f32 %v5865_v57, %v306_v61  ;;  %3932 = vmatpush1.bf16.msra.mxu0 %v5415_v46  ;;  %v1008_v8 = vld [vmem:[#allocation2 + $0x30] sm:$0xe]  ;;  %v964_v11 = vld [vmem:[#allocation2 + $0x34] sm:$0xf]  ;;  %v520_v21 = vrot.slane %v518_v58, 7  ;;  %v446_v25 = vsel %vm433_vm1, %v413_v59, 0.0 }
  0x82   : > { %v901_v9 = vld [vmem:[#allocation2 + $0x30] sm:$0xf]  ;;  %3933 = vmatprep.subr.bf16.mxu0 %v5420_v50  ;;  %v902_v12 = vld [vmem:[#allocation2 + $0x34] sm:$0xf]  ;;  %v6008_v13 = vadd.f32 %v5872_v60, %v344_v62  ;;  %v6010_v16 = vcombine.low %v963_v6, %v964_v11  ;;  %v4763_v18 = vcombine.low %v1008_v8, %v964_v11  ;;  %v527_v24 = vrot.slane %v525_v2, 7 }
  0x83   : > { %v5424_v17 = vld [vmem:[#allocation2 + $0x38] ss:$0 sps:$4 sm:$0x11]   ;;  %v6013_v20 = vcombine.low %v901_v9, %v902_v12  ;;  %v447_v10 = vsel %vm433_vm1, %v414_v4, 0.0  ;;  %v6018_v26 = vadd.f32 %v5872_v60, %v345_v5  ;;  %v523_v60 = vor.u32 %v521_v43, %v520_v21  ;;  %v5445_v47 = vld [vmem:[#allocation3 + $0x384] ss:$8 sps:$4 sm:$0xff]  }
  0x84   : > { %3550 = vmatpush1.bf16.msra.mxu1 %v5468_v39  ;;  %v5436_v23 = vld [vmem:[#allocation2 + $0x38] ss:$0 sps:$4 sm:$0x11]   ;;  %v1961_v27 = vrot.slane %v4763_v18, 1  ;;  %v1962_v29 = vrot.slane %v5424_v17, 1  ;;  %v1733_v30 = vshrl.u32 %v6010_v16, 16  ;;  %v530_v48 = vor.u32 %v528_v3, %v527_v24 }
  0x85   : > { %3934 = vmatpush1.bf16.msra.mxu0 %v5418_v56  ;;  %v1740_v32 = vshll.u32 %v5424_v17, 16  ;;  %v1280_v33 = vshrl.u32 %v6013_v20, 16  ;;  %v1282_v34 = vshll.u32 %v6013_v20, 16  ;;  %v1287_v37 = vshll.u32 %v5436_v23, 16  ;;  %3551 = vmatprep.subr.bf16.mxu1 %v5484_v31  ;;  %v1022_v50 = vld [vmem:[#allocation2 + $0x18] sm:$0xf] }
  0x86   : > { %3407 = vmatmul.mubr.bf16.gmra.mrb[12].mxu1 %v5971_v7  ;;  %v1735_v7 = vshll.u32 %v6010_v16, 16  ;;  %3935 = vmatprep.subr.bf16.mxu0 %v5431_v63  ;;  %v1963_v38 = vsel %vm1487_vm5, %v1961_v27, %v1962_v29  ;;  %v656_v39 = vsel %vm5889_vm4, %v520_v21, 0  ;;  %v640_v46 = vsel %vm5889_vm4, 0, %v523_v60  ;;  %v1023_v56 = vld [vmem:[#allocation2 + $0x1c] sm:$0xf] }
  0x87   : > { %3792 = vmatprep.mubr.bf16.mxu0 %v1963_v38  ;;  %v1742_v40 = vrot.slane %v1740_v32, 1  ;;  %v1284_v44 = vrot.slane %v1282_v34, 1  ;;  %v1289_v41 = vrot.slane %v1287_v37, 1  ;;  %v4646_v45 = vcombine.low %v656_v39, %v656_v39  ;;  %v5494_v62 = vld [vmem:[#allocation2 + $0x20] ss:$0 sps:$4 sm:$0x11]  }
  0x88   : > { %v1737_v54 = vrot.slane %v1735_v7, 1  ;;  %3552 = vmatpush1.bf16.msra.mxu1 %v5482_v14  ;;  %v657_v49 = vsel %vm5889_vm4, %v527_v24, 0  ;;  %v4644_v52 = vcombine.low %v640_v46, %v640_v46  ;;  %v4645_v53 = vcombine.high %v640_v46, %v640_v46  ;;  %v5495_v5 = vld [vmem:[#allocation3 + $0x180] ss:$8 sps:$4 sm:$0xff]   ;;  %v5497_v6 = vld [vmem:[#allocation3 + $0x184] ss:$8 sps:$4 sm:$0xff]  }
  0x89   : > { %3936 = vmatpush1.bf16.msra.mxu0 %v5429_v19  ;;  %v1285_v51 = vor.u32 %v1284_v44, %v1280_v33  ;;  %859 = vst [vmem:[#allocation2 + $0x44] sm:$0x1] %v4646_v45  ;;  %v4649_v55 = vcombine.low %v657_v49, %v657_v49  ;;  %v641_v43 = vsel %vm5889_vm4, 0, %v530_v48  ;;  %v472_v59 = vpack.c.bf16 %v447_v10, %v446_v25  ;;  %v5443_v8 = vld [vmem:[#allocation3 + $0x380] ss:$8 sps:$4 sm:$0xff]  }
  0x8a   : > { %v1738_v35 = vor.u32 %v1737_v54, %v1733_v30  ;;  %3937 = vmatprep.subr.bf16.mxu0 %v5434_v22  ;;  %v415_v61 = vmax.f32 %v6008_v13, 0.0  ;;  %857 = vst [vmem:[#allocation2 + $0x3c] sm:$0xf] %v4644_v52  ;;  %858 = vst [vmem:[#allocation2 + $0x40] sm:$0xf] %v4645_v53  ;;  %v4647_v2 = vcombine.low %v641_v43, %v641_v43  ;;  %v416_v4 = vmax.f32 %v6018_v26, 0.0 }
  0x8b   : > { %v1290_v63 = vsel %vm1230_vm0, %v1285_v51, %v1289_v41  ;;  %v4648_v3 = vcombine.high %v641_v43, %v641_v43  ;;  %862 = vst [vmem:[#allocation2 + $0x50] sm:$0x1] %v4649_v55  ;;  %v532_v9 = vshrl.u32 %v472_v59, 16  ;;  %v535_v11 = vshll.u32 %v472_v59, 16  ;;  %v5448_v14 = vld [vmem:[#allocation3 + $0x394] ss:$8 sps:$4 sm:$0xff]   ;;  %3553 = vmatprep.subr.bf16.mxu1 %v5497_v6 }
  0x8c   : > { %v1743_v58 = vsel %vm1230_vm0, %v1738_v35, %v1742_v40  ;;  %3416 = vmatprep.mubr.bf16.mxu1 %v1290_v63  ;;  %v448_v12 = vsel %vm433_vm1, %v415_v61, 0.0  ;;  %v6038_v13 = vcombine.low %v1022_v50, %v1023_v56  ;;  %860 = vst [vmem:[#allocation2 + $0x48] sm:$0xf] %v4647_v2  ;;  %v449_v17 = vsel %vm433_vm1, %v416_v4, 0.0  ;;  %v5446_v19 = vld [vmem:[#allocation3 + $0x390] ss:$8 sps:$4 sm:$0xff]   ;;  %3554 = vmatpush1.bf16.msra.mxu1 %v5495_v5 }
  0x8d   : > { %3793 = vmatmul.mubr.bf16.gmra.mrb[12].mxu0 %v1743_v58  ;;  %861 = vst [vmem:[#allocation2 + $0x4c] sm:$0xf] %v4648_v3  ;;  %v2168_v18 = vshll.u32 %v5494_v62, 16  ;;  %v534_v21 = vrot.slane %v532_v9, 7  ;;  %v6042_v22 = vpack.c.bf16 %v449_v17, %v448_v12  ;;  %v5459_v23 = vld [vmem:[#allocation3 + $0x3a4] ss:$8 sps:$4 sm:$0xff]  }
  0x8e   : > { %3938 = vmatpush1.bf16.msra.mxu0 %v5432_v42  ;;  %3417 = vmatmul.mubr.bf16.gmra.mrb[16].mxu1 %v6013_v20  ;;  %v2161_v24 = vshrl.u32 %v6038_v13, 16  ;;  %v2163_v25 = vshll.u32 %v6038_v13, 16  ;;  %v307_v20 = vld [vmem:[%s5856_s18 + $0x80] sm:$0xff]  ;;  %v5462_v44 = vld [vmem:[#allocation3 + $0x3b4] ss:$8 sps:$4 sm:$0xff]  }
  0x8f   : > { %3939 = vmatprep.subr.bf16.mxu0 %v5445_v47  ;;  %v6046_v10 = vrot.slane %v2168_v18, 1  ;;  %v537_v27 = vor.u32 %v535_v11, %v534_v21  ;;  %v658_v29 = vsel %vm5889_vm4, %v534_v21, 0  ;;  %v539_v31 = vshrl.u32 %v6042_v22, 16  ;;  %v5457_v37 = vld [vmem:[#allocation3 + $0x3a0] ss:$8 sps:$4 sm:$0xff]   ;;  %v308_v59 = vld [vmem:[%s5856_s18 + $0x88] sm:$0xff] }
  0x90   : > { %v5438_v26 = vld [vmem:[#allocation2 + $0x44] ss:$0 sps:$4 sm:$0x11]   ;;  %v4652_v7 = vcombine.low %v658_v29, %v658_v29  ;;  %v346_v48 = vmul.f32 %v5865_v57, %v307_v20  ;;  %v309_v12 = vld [vmem:[%s5856_s18 + $0x90] sm:$0xff] }
  0x91   : > { %v5450_v30 = vld [vmem:[#allocation2 + $0x44] ss:$0 sps:$4 sm:$0x11]   ;;  %v965_v32 = vld [vmem:[#allocation2 + $0x3c] sm:$0xf]  ;;  %v1965_v60 = vrot.slane %v5438_v26, 1 }
  0x92   : > { %3940 = vmatpush1.bf16.msra.mxu0 %v5443_v8  ;;  %v966_v33 = vld [vmem:[#allocation2 + $0x40] sm:$0xf]  ;;  %v1009_v34 = vld [vmem:[#allocation2 + $0x3c] sm:$0xe]  ;;  %v1752_v39 = vshll.u32 %v5438_v26, 16  ;;  %v1299_v45 = vshll.u32 %v5450_v30, 16 }
  0x93   : > { %3941 = vmatprep.subr.bf16.mxu0 %v5448_v14  ;;  %v6052_v38 = vcombine.low %v965_v32, %v966_v33  ;;  %v4764_v54 = vcombine.low %v1009_v34, %v966_v33  ;;  %v903_v40 = vld [vmem:[#allocation2 + $0x3c] sm:$0xf]  ;;  %v904_v42 = vld [vmem:[#allocation2 + $0x40] sm:$0xf]  ;;  %865 = vst [vmem:[#allocation2 + $0x5c] sm:$0x1] %v4652_v7 }
  0x94   : > { %v6054_v41 = vcombine.low %v903_v40, %v904_v42  ;;  %v967_v35 = vld [vmem:[#allocation2 + $0x48] sm:$0xf]  ;;  %v968_v46 = vld [vmem:[#allocation2 + $0x4c] sm:$0xf]  ;;  %v642_v47 = vsel %vm5889_vm4, 0, %v537_v27  ;;  %v1754_v52 = vrot.slane %v1752_v39, 1 }
  0x95   : > { %v1964_v49 = vrot.slane %v4764_v54, 1  ;;  %v1745_v50 = vshrl.u32 %v6052_v38, 16  ;;  %v1747_v51 = vshll.u32 %v6052_v38, 16  ;;  %v1301_v56 = vrot.slane %v1299_v45, 1  ;;  %v1010_v58 = vld [vmem:[#allocation2 + $0x48] sm:$0xe] }
  0x96   : > { %3942 = vmatpush1.bf16.msra.mxu0 %v5446_v19  ;;  %v1292_v53 = vshrl.u32 %v6054_v41, 16  ;;  %v1294_v55 = vshll.u32 %v6054_v41, 16  ;;  %v6063_v43 = vcombine.low %v967_v35, %v968_v46  ;;  %v5452_v62 = vld [vmem:[#allocation2 + $0x50] ss:$0 sps:$4 sm:$0x11]   ;;  %v4765_v63 = vcombine.low %v1010_v58, %v968_v46 }
  0x97   : > { %3943 = vmatprep.subr.bf16.mxu0 %v5459_v23  ;;  %v1966_v61 = vsel %vm1487_vm5, %v1964_v49, %v1965_v60  ;;  %v1749_v57 = vrot.slane %v1747_v51, 1  ;;  %v905_v2 = vld [vmem:[#allocation2 + $0x48] sm:$0xf]  ;;  %v4650_v3 = vcombine.low %v642_v47, %v642_v47  ;;  %v906_v9 = vld [vmem:[#allocation2 + $0x4c] sm:$0xf]  ;;  %v4651_v11 = vcombine.high %v642_v47, %v642_v47  ;;  %v310_v23 = vld [vmem:[%s5856_s18 + $0x98] sm:$0xff] }
  0x98   : > { %3802 = vmatprep.mubr.bf16.mxu0 %v1966_v61  ;;  %v1296_v4 = vrot.slane %v1294_v55, 1  ;;  %v1757_v5 = vshrl.u32 %v6063_v43, 16  ;;  %v1759_v6 = vshll.u32 %v6063_v43, 16  ;;  %v5460_v8 = vld [vmem:[#allocation3 + $0x3b0] ss:$8 sps:$4 sm:$0xff]   ;;  %v1967_v17 = vrot.slane %v4765_v63, 1 }
  0x99   : > { %v1750_v14 = vor.u32 %v1749_v57, %v1745_v50  ;;  %v1968_v18 = vrot.slane %v5452_v62, 1  ;;  %v1764_v19 = vshll.u32 %v5452_v62, 16  ;;  %863 = vst [vmem:[#allocation2 + $0x54] sm:$0xf] %v4650_v3  ;;  %v5473_v21 = vld [vmem:[#allocation3 + $0x3c4] ss:$8 sps:$4 sm:$0xff]   ;;  %v6071_v27 = vcombine.low %v905_v2, %v906_v9 }
  0x9a   : > { %3944 = vmatpush1.bf16.msra.mxu0 %v5457_v37  ;;  %v1297_v20 = vor.u32 %v1296_v4, %v1292_v53  ;;  %v1761_v26 = vrot.slane %v1759_v6, 1  ;;  %v5464_v29 = vld [vmem:[#allocation2 + $0x50] ss:$0 sps:$4 sm:$0x11]   ;;  %864 = vst [vmem:[#allocation2 + $0x58] sm:$0xf] %v4651_v11 }
  0x9b   : > { %3945 = vmatprep.subr.bf16.mxu0 %v5462_v44  ;;  %v6076_v30 = vld [vmem:[%s6882_s1] ss:$0 sm:$0xff]  ;;  %v1755_v32 = vsel %vm1230_vm0, %v1750_v14, %v1754_v52  ;;  %v1969_v33 = vsel %vm1487_vm5, %v1967_v17, %v1968_v18  ;;  %v1766_v34 = vrot.slane %v1764_v19, 1  ;;  %v6081_v37 = vld [vmem:[#allocation2 + $0x5c] ss:$0 sps:$4 sm:$0x11]  }
  0x9c   : > { %v347_v7 = vmul.f32 %v6076_v30, %v308_v59  ;;  %v6086_v54 = vld [vmem:[%s6883_s2] ss:$0 sm:$0xff]  ;;  %v1024_v39 = vld [vmem:[#allocation2 + $0x24] sm:$0xf]  ;;  %3803 = vmatmul.mubr.bf16.gmra.mrb[16].mxu0 %v1755_v32  ;;  %v1302_v40 = vsel %vm1230_vm0, %v1297_v20, %v1301_v56  ;;  %v1304_v42 = vshrl.u32 %v6071_v27, 16  ;;  %v1306_v44 = vshll.u32 %v6071_v27, 16 }
  0x9d   : > { %v385_v60 = vadd.f32 %v6086_v54, %v346_v48  ;;  %v5471_v45 = vld [vmem:[#allocation3 + $0x3c0] ss:$8 sps:$4 sm:$0xff]   ;;  %v6092_v35 = vld [vmem:[#allocation2 + $0x5c] ss:$0 sps:$4 sm:$0x11]   ;;  %v348_v46 = vmul.f32 %v6076_v30, %v309_v12  ;;  %3426 = vmatprep.mubr.bf16.mxu1 %v1302_v40  ;;  %3812 = vmatprep.mubr.bf16.mxu0 %v1969_v33  ;;  %v1762_v47 = vor.u32 %v1761_v26, %v1757_v5  ;;  %v1311_v49 = vshll.u32 %v5464_v29, 16 }
  0x9e   : > { %v1776_v50 = vshll.u32 %v6081_v37, 16  ;;  %v541_v48 = vrot.slane %v539_v31, 7  ;;  %v1025_v51 = vld [vmem:[#allocation2 + $0x28] sm:$0xf]  ;;  %3427 = vmatmul.mubr.bf16.gmra.mrb[20].mxu1 %v6054_v41  ;;  %3946 = vmatpush1.bf16.msra.mxu0 %v5460_v8  ;;  %v1308_v52 = vrot.slane %v1306_v44, 1  ;;  %v542_v55 = vshll.u32 %v6042_v22, 16 }
  0x9f   : > { %v5476_v53 = vld [vmem:[#allocation3 + $0x3d4] ss:$8 sps:$4 sm:$0xff]   ;;  %v386_v56 = vadd.f32 %v6086_v54, %v347_v7  ;;  %v5505_v58 = vld [vmem:[#allocation3 + $0x190] ss:$8 sps:$4 sm:$0xff]   ;;  %v349_v59 = vmul.f32 %v6076_v30, %v310_v23  ;;  %v1313_v61 = vrot.slane %v1311_v49, 1  ;;  %v1971_v57 = vrot.slane %v6081_v37, 1  ;;  %3947 = vmatprep.subr.bf16.mxu0 %v5473_v21 }
  0xa0   : > { %v1323_v62 = vshll.u32 %v6092_v35, 16  ;;  %v659_v31 = vsel %vm5889_vm4, %v541_v48, 0  ;;  %v5507_v41 = vld [vmem:[#allocation3 + $0x194] ss:$8 sps:$4 sm:$0xff]   ;;  %v1309_v63 = vor.u32 %v1308_v52, %v1304_v42  ;;  %v544_v22 = vor.u32 %v542_v55, %v541_v48  ;;  %v5474_v23 = vld [vmem:[#allocation3 + $0x3d0] ss:$8 sps:$4 sm:$0xff]  }
  0xa1   : > { %v969_v2 = vld [vmem:[#allocation2 + $0x54] sm:$0xf]  ;;  %v4655_v5 = vcombine.low %v659_v31, %v659_v31  ;;  %v6106_v6 = vcombine.low %v1024_v39, %v1025_v51  ;;  %v1767_v8 = vsel %vm1230_vm0, %v1762_v47, %v1766_v34  ;;  %v970_v9 = vld [vmem:[#allocation2 + $0x58] sm:$0xf]  ;;  %v1778_v11 = vrot.slane %v1776_v50, 1  ;;  %3555 = vmatprep.subr.bf16.mxu1 %v5507_v41 }
  0xa2   : > { %v1011_v3 = vld [vmem:[#allocation2 + $0x54] sm:$0xe]  ;;  %v908_v12 = vld [vmem:[#allocation2 + $0x58] sm:$0xf]  ;;  %v417_v14 = vmax.f32 %v385_v60, 0.0  ;;  %v6110_v17 = vadd.f32 %v6086_v54, %v348_v46  ;;  %v1314_v18 = vsel %vm1230_vm0, %v1309_v63, %v1313_v61  ;;  %v6113_v19 = vcombine.low %v969_v2, %v970_v9  ;;  %3948 = vmatpush1.bf16.msra.mxu0 %v5471_v45  ;;  %3556 = vmatpush1.bf16.msra.mxu1 %v5505_v58 }
  0xa3   : > { %v907_v4 = vld [vmem:[#allocation2 + $0x54] sm:$0xf]  ;;  %v4766_v21 = vcombine.low %v1011_v3, %v970_v9  ;;  %868 = vst [vmem:[#allocation2 + $0x68] sm:$0x1] %v4655_v5  ;;  %3436 = vmatprep.mubr.bf16.mxu1 %v1314_v18  ;;  %3949 = vmatprep.subr.bf16.mxu0 %v5476_v53  ;;  %v643_v26 = vsel %vm5889_vm4, 0, %v544_v22  ;;  %v418_v7 = vmax.f32 %v386_v56, 0.0  ;;  %v6121_v33 = vadd.f32 %v6086_v54, %v349_v59 }
  0xa4   : > { %v6115_v20 = vcombine.low %v907_v4, %v908_v12  ;;  %v5487_v29 = vld [vmem:[#allocation3 + $0x3e4] ss:$8 sps:$4 sm:$0xff]   ;;  %v450_v32 = vsel %vm433_vm1, %v417_v14, 0.0  ;;  %3813 = vmatmul.mubr.bf16.gmra.mrb[20].mxu0 %v1767_v8  ;;  %v1769_v37 = vshrl.u32 %v6113_v19, 16  ;;  %v1771_v60 = vshll.u32 %v6113_v19, 16 }
  0xa5   : > { %v1970_v34 = vrot.slane %v4766_v21, 1  ;;  %v5485_v40 = vld [vmem:[#allocation3 + $0x3e0] ss:$8 sps:$4 sm:$0xff]   ;;  %v4653_v45 = vcombine.low %v643_v26, %v643_v26  ;;  %v4654_v35 = vcombine.high %v643_v26, %v643_v26  ;;  %v5490_v46 = vld [vmem:[#allocation3 + $0x3f4] ss:$8 sps:$4 sm:$0xff]   ;;  %v451_v47 = vsel %vm433_vm1, %v418_v7, 0.0 }
  0xa6   : > { %v1316_v39 = vshrl.u32 %v6115_v20, 16  ;;  %v5512_v42 = vld [vmem:[#allocation3 + $0x1a0] ss:$8 sps:$4 sm:$0xff]   ;;  %v1318_v44 = vshll.u32 %v6115_v20, 16  ;;  %v5514_v49 = vld [vmem:[#allocation3 + $0x1a4] ss:$8 sps:$4 sm:$0xff]   ;;  %3437 = vmatmul.mubr.bf16.gmra.mrb[24].mxu1 %v6071_v27  ;;  %3950 = vmatpush1.bf16.msra.mxu0 %v5474_v23  ;;  %v474_v52 = vpack.c.bf16 %v451_v47, %v450_v32 }
  0xa7   : > { %v1972_v50 = vsel %vm1487_vm5, %v1970_v34, %v1971_v57  ;;  %v1773_v48 = vrot.slane %v1771_v60, 1  ;;  %v2165_v51 = vrot.slane %v2163_v25, 1  ;;  %v5504_v53 = vld [vmem:[#allocation2 + $0x2c] ss:$0 sps:$4 sm:$0x11]   ;;  %v1325_v56 = vrot.slane %v1323_v62, 1  ;;  %3951 = vmatprep.subr.bf16.mxu0 %v5487_v29  ;;  %3557 = vmatprep.subr.bf16.mxu1 %v5514_v49 }
  0xa8   : > { %3822 = vmatprep.mubr.bf16.mxu0 %v1972_v50  ;;  %v1320_v55 = vrot.slane %v1318_v44, 1  ;;  %866 = vst [vmem:[#allocation2 + $0x60] sm:$0xf] %v4653_v45  ;;  %867 = vst [vmem:[#allocation2 + $0x64] sm:$0xf] %v4654_v35  ;;  %v2173_v58 = vshrl.u32 %v6106_v6, 16  ;;  %3558 = vmatpush1.bf16.msra.mxu1 %v5512_v42 }
  0xa9   : > { %v2175_v59 = vshll.u32 %v6106_v6, 16  ;;  %v1026_v61 = vld [vmem:[#allocation2 + $0x30] sm:$0xf]  ;;  %v1774_v57 = vor.u32 %v1773_v48, %v1769_v37  ;;  %v546_v31 = vshrl.u32 %v474_v52, 16  ;;  %v549_v41 = vshll.u32 %v474_v52, 16  ;;  %v311_v21 = vld [vmem:[%s5856_s18 + $0xa0] sm:$0xff] }
  0xaa   : > { %v5488_v27 = vld [vmem:[#allocation3 + $0x3f0] ss:$8 sps:$4 sm:$0xff]   ;;  %v419_v63 = vmax.f32 %v6110_v17, 0.0  ;;  %v1027_v25 = vld [vmem:[#allocation2 + $0x34] sm:$0xf]  ;;  %v1321_v2 = vor.u32 %v1320_v55, %v1316_v39  ;;  %v420_v4 = vmax.f32 %v6121_v33, 0.0  ;;  %3952 = vmatpush1.bf16.msra.mxu0 %v5485_v40  ;;  %v6141_v8 = vor.u32 %v2165_v51, %v2161_v24 }
  0xab   : > { %v6135_v62 = vld [vmem:[#allocation2 + $0x68] ss:$0 sps:$4 sm:$0x11]   ;;  %v5500_v3 = vld [vmem:[#allocation3 + $0x404] ss:$8 sps:$4 sm:$0xff]   ;;  %v1779_v22 = vsel %vm1230_vm0, %v1774_v57, %v1778_v11  ;;  %v548_v9 = vrot.slane %v546_v31, 7  ;;  %3953 = vmatprep.subr.bf16.mxu0 %v5490_v46  ;;  %v6146_v18 = vcombine.low %v1026_v61, %v1027_v25  ;;  %v350_v44 = vmul.f32 %v6076_v30, %v311_v21 }
  0xac   : > { %v5492_v5 = vld [vmem:[#allocation2 + $0x68] ss:$0 sps:$4 sm:$0x11]   ;;  %v1326_v12 = vsel %vm1230_vm0, %v1321_v2, %v1325_v56  ;;  %v6144_v14 = vrot.slane %v2175_v59, 1  ;;  %v2180_v17 = vshll.u32 %v5504_v53, 16  ;;  %3823 = vmatmul.mubr.bf16.gmra.mrb[24].mxu0 %v1779_v22  ;;  %v1974_v11 = vrot.slane %v6135_v62, 1 }
  0xad   : > { %v312_v23 = vld [vmem:[%s5856_s18 + $0xa8] sm:$0xff]  ;;  %3446 = vmatprep.mubr.bf16.mxu1 %v1326_v12  ;;  %v1788_v26 = vshll.u32 %v6135_v62, 16  ;;  %v551_v29 = vor.u32 %v549_v41, %v548_v9  ;;  %v660_v24 = vsel %vm5889_vm4, %v548_v9, 0  ;;  %v1335_v7 = vshll.u32 %v5492_v5, 16  ;;  %v1028_v31 = vld [vmem:[#allocation2 + $0x3c] sm:$0xf] }
  0xae   : > { %v4658_v32 = vcombine.low %v660_v24, %v660_v24  ;;  %v452_v33 = vsel %vm433_vm1, %v419_v63, 0.0  ;;  %v453_v34 = vsel %vm433_vm1, %v420_v4, 0.0  ;;  %v5522_v37 = vld [vmem:[#allocation3 + $0x1b0] ss:$8 sps:$4 sm:$0xff]   ;;  %3447 = vmatmul.mubr.bf16.gmra.mrb[28].mxu1 %v6115_v20  ;;  %3954 = vmatpush1.bf16.msra.mxu0 %v5488_v27  ;;  %v351_v45 = vmul.f32 %v6076_v30, %v312_v23  ;;  %v5524_v56 = vld [vmem:[#allocation3 + $0x1b4] ss:$8 sps:$4 sm:$0xff]  }
  0xaf   : > { %v971_v60 = vld [vmem:[#allocation2 + $0x60] sm:$0xf]  ;;  %v972_v39 = vld [vmem:[#allocation2 + $0x64] sm:$0xf]  ;;  %v475_v42 = vpack.c.bf16 %v453_v34, %v452_v33  ;;  %4116 = vmatprep.subr.bf16.mxu0 %v5500_v3  ;;  %v644_v50 = vsel %vm5889_vm4, 0, %v551_v29  ;;  %v6163_v48 = vrot.slane %v2180_v17, 1  ;;  %3559 = vmatprep.subr.bf16.mxu1 %v5524_v56  ;;  %v389_v5 = vadd.f32 %v6086_v54, %v350_v44 }
  0xb0   : > { %v1012_v40 = vld [vmem:[#allocation2 + $0x60] sm:$0xe]  ;;  %v6159_v35 = vcombine.low %v971_v60, %v972_v39  ;;  %v910_v49 = vld [vmem:[#allocation2 + $0x64] sm:$0xf]  ;;  %871 = vst [vmem:[#allocation2 + $0x74] sm:$0x1] %v4658_v32  ;;  %v4656_v20 = vcombine.low %v644_v50, %v644_v50  ;;  %v4657_v52 = vcombine.high %v644_v50, %v644_v50  ;;  %3560 = vmatpush1.bf16.msra.mxu1 %v5522_v37 }
  0xb1   : > { %v4767_v46 = vcombine.low %v1012_v40, %v972_v39  ;;  %v909_v47 = vld [vmem:[#allocation2 + $0x60] sm:$0xf]  ;;  %v553_v53 = vshrl.u32 %v475_v42, 16  ;;  %v5511_v55 = vld [vmem:[#allocation2 + $0x38] ss:$0 sps:$4 sm:$0x11]   ;;  %v390_v21 = vadd.f32 %v6086_v54, %v351_v45  ;;  %v2171_v37 = vsel %vm1230_vm0, %v6141_v8, %v6046_v10 }
  0xb2   : > { %v6165_v51 = vcombine.low %v909_v47, %v910_v49  ;;  %v1781_v61 = vshrl.u32 %v6159_v35, 16  ;;  %v1783_v57 = vshll.u32 %v6159_v35, 16  ;;  %v556_v27 = vshll.u32 %v475_v42, 16  ;;  %869 = vst [vmem:[#allocation2 + $0x6c] sm:$0xf] %v4656_v20  ;;  %v313_v23 = vld [vmem:[%s5856_s18 + $0xb0] sm:$0xff] }
  0xb3   : > { %v1973_v59 = vrot.slane %v4767_v46, 1  ;;  %v1790_v41 = vrot.slane %v1788_v26, 1  ;;  %870 = vst [vmem:[#allocation2 + $0x70] sm:$0xf] %v4657_v52  ;;  %v555_v2 = vrot.slane %v553_v53, 7  ;;  %v1337_v22 = vrot.slane %v1335_v7, 1 }
  0xb4   : > { %v1328_v63 = vshrl.u32 %v6165_v51, 16  ;;  %v1330_v25 = vshll.u32 %v6165_v51, 16  ;;  %v1029_v62 = vld [vmem:[#allocation2 + $0x40] sm:$0xf]  ;;  %v1785_v4 = vrot.slane %v1783_v57, 1  ;;  %v314_v26 = vld [vmem:[%s5856_s18 + $0xb8] sm:$0xff]  ;;  %v352_v46 = vmul.f32 %v6076_v30, %v313_v23 }
  0xb5   : > { %v1975_v3 = vsel %vm1487_vm5, %v1973_v59, %v1974_v11  ;;  %v558_v12 = vor.u32 %v556_v27, %v555_v2  ;;  %v661_v17 = vsel %vm5889_vm4, %v555_v2, 0  ;;  %v2187_v32 = vshll.u32 %v6146_v18, 16  ;;  %v5529_v33 = vld [vmem:[#allocation3 + $0x1c0] ss:$8 sps:$4 sm:$0xff]   ;;  %v5531_v7 = vld [vmem:[#allocation3 + $0x1c4] ss:$8 sps:$4 sm:$0xff]  }
  0xb6   : > { %3832 = vmatprep.mubr.bf16.mxu0 %v1975_v3  ;;  %v1332_v9 = vrot.slane %v1330_v25, 1  ;;  %v1786_v29 = vor.u32 %v1785_v4, %v1781_v61  ;;  %v4661_v24 = vcombine.low %v661_v17, %v661_v17  ;;  %v2192_v11 = vshll.u32 %v5511_v55, 16  ;;  %3561 = vmatprep.subr.bf16.mxu1 %v5531_v7  ;;  %v1030_v25 = vld [vmem:[#allocation2 + $0x48] sm:$0xf]  ;;  %v315_v2 = vld [vmem:[%s5856_s18 + $0xc0] sm:$0xff] }
  0xb7   : > { %v5502_v60 = vld [vmem:[#allocation2 + $0x74] ss:$0 sps:$4 sm:$0x11]   ;;  %v645_v39 = vsel %vm5889_vm4, 0, %v558_v12  ;;  %v6184_v40 = vcombine.low %v1028_v31, %v1029_v62  ;;  %v421_v50 = vmax.f32 %v389_v5, 0.0  ;;  %v422_v10 = vmax.f32 %v390_v21, 0.0  ;;  %3562 = vmatpush1.bf16.msra.mxu1 %v5529_v33 }
  0xb8   : > { %v1333_v34 = vor.u32 %v1332_v9, %v1328_v63  ;;  %v1791_v42 = vsel %vm1230_vm0, %v1786_v29, %v1790_v41  ;;  %v4659_v44 = vcombine.low %v645_v39, %v645_v39  ;;  %v4660_v45 = vcombine.high %v645_v39, %v645_v39  ;;  %874 = vst [vmem:[#allocation2 + $0x80] sm:$0x1] %v4661_v24  ;;  %v5498_v31 = vld [vmem:[#allocation3 + $0x400] ss:$8 sps:$4 sm:$0xff]   ;;  %v5517_v4 = vld [vmem:[#allocation3 + $0x414] ss:$8 sps:$4 sm:$0xff]  }
  0xb9   : > { %3833 = vmatmul.mubr.bf16.gmra.mrb[28].mxu0 %v1791_v42  ;;  %v1347_v49 = vshll.u32 %v5502_v60, 16  ;;  %v911_v8 = vld [vmem:[#allocation2 + $0x6c] sm:$0xf]  ;;  %v2178_v52 = vor.u32 %v6144_v14, %v2173_v58  ;;  %v2185_v53 = vshrl.u32 %v6146_v18, 16  ;;  %v2189_v55 = vrot.slane %v2187_v32, 1 }
  0xba   : > { %v1338_v47 = vsel %vm1230_vm0, %v1333_v34, %v1337_v22  ;;  %3955 = vmatprep.mubr.bf16.mxu0 %v2171_v37  ;;  %v912_v20 = vld [vmem:[#allocation2 + $0x70] sm:$0xf]  ;;  %872 = vst [vmem:[#allocation2 + $0x78] sm:$0xf] %v4659_v44  ;;  %873 = vst [vmem:[#allocation2 + $0x7c] sm:$0xf] %v4660_v45  ;;  %v353_v56 = vmul.f32 %v6076_v30, %v314_v26  ;;  %v391_v63 = vadd.f32 %v6086_v54, %v352_v46 }
  0xbb   : > { %3456 = vmatprep.mubr.bf16.mxu1 %v1338_v47  ;;  %v4689_v59 = vcombine.low %v911_v8, %v912_v20  ;;  %v6195_v61 = vrot.slane %v2192_v11, 1  ;;  %v454_v57 = vsel %vm433_vm1, %v421_v50, 0.0  ;;  %v455_v27 = vsel %vm433_vm1, %v422_v10, 0.0  ;;  %v1031_v5 = vld [vmem:[#allocation2 + $0x4c] sm:$0xf] }
  0xbc   : > { %3457 = vmatmul.mubr.bf16.gmra.mrb[32].mxu1 %v6165_v51  ;;  %v476_v58 = vpack.c.bf16 %v455_v27, %v454_v57  ;;  %v2197_v14 = vshrl.u32 %v6184_v40, 16  ;;  %v2199_v41 = vshll.u32 %v6184_v40, 16  ;;  %v1349_v3 = vrot.slane %v1347_v49, 1  ;;  %v316_v17 = vld [vmem:[%s5856_s18 + $0xc8] sm:$0xff] }
  0xbd   : > { %v1340_v62 = vshrl.u32 %v4689_v59, 16  ;;  %v1342_v51 = vshll.u32 %v4689_v59, 16  ;;  %v392_v22 = vadd.f32 %v6086_v54, %v353_v56  ;;  %v5539_v21 = vld [vmem:[#allocation3 + $0x1d0] ss:$8 sps:$4 sm:$0xff]   ;;  %v2183_v26 = vsel %vm1230_vm0, %v2178_v52, %v6163_v48  ;;  %v5541_v60 = vld [vmem:[#allocation3 + $0x1d4] ss:$8 sps:$4 sm:$0xff]  }
  0xbe   : > { %v560_v9 = vshrl.u32 %v476_v58, 16  ;;  %v563_v12 = vshll.u32 %v476_v58, 16  ;;  %v2190_v24 = vor.u32 %v2189_v55, %v2185_v53  ;;  %v6207_v32 = vld [vmem:[#allocation2 + $0x44] ss:$0 sps:$4 sm:$0x11]   ;;  %v354_v11 = vmul.f32 %v6076_v30, %v315_v2  ;;  %3563 = vmatprep.subr.bf16.mxu1 %v5541_v60  ;;  %v318_v60 = vld [vmem:[%s5856_s18 + $0xd8] sm:$0xff] }
  0xbf   : > { %v1344_v23 = vrot.slane %v1342_v51, 1  ;;  %v5509_v29 = vld [vmem:[#allocation2 + $0x80] ss:$0 sps:$4 sm:$0x11]   ;;  %v2201_v7 = vrot.slane %v2199_v41, 1  ;;  %v423_v34 = vmax.f32 %v391_v63, 0.0  ;;  %v6211_v46 = vcombine.low %v1030_v25, %v1031_v5  ;;  %3564 = vmatpush1.bf16.msra.mxu1 %v5539_v21 }
  0xc0   : > { %v562_v33 = vrot.slane %v560_v9, 7  ;;  %v424_v37 = vmax.f32 %v392_v22, 0.0  ;;  %v1359_v45 = vshll.u32 %v5509_v29, 16  ;;  %v355_v48 = vmul.f32 %v6076_v30, %v316_v17  ;;  %v5515_v49 = vld [vmem:[#allocation3 + $0x410] ss:$8 sps:$4 sm:$0xff]  }
  0xc1   : > { %3956 = vmatmul.mubr.bf16.vlgmr.msra.gmra.mrb[0].mxu0 %v6038_v13  ;;  %v1345_v39 = vor.u32 %v1344_v23, %v1340_v62  ;;  %v913_v42 = vld [vmem:[#allocation2 + $0x78] sm:$0xf]  ;;  %v914_v44 = vld [vmem:[#allocation2 + $0x7c] sm:$0xf]  ;;  %v456_v8 = vsel %vm433_vm1, %v423_v34, 0.0  ;;  %v393_v56 = vadd.f32 %v6086_v54, %v354_v11  ;;  %v317_v63 = vld [vmem:[%s5856_s18 + $0xd0] sm:$0xff]  ;;  %v2195_v17 = vsel %vm1230_vm0, %v2190_v24, %v6195_v61 }
  0xc2   : > { %4117 = vmatpush1.bf16.msra.mxu0 %v5498_v31  ;;  %3965 = vmatprep.mubr.bf16.mxu0 %v2183_v26  ;;  %v6214_v47 = vcombine.low %v913_v42, %v914_v44  ;;  %v565_v50 = vor.u32 %v563_v12, %v562_v33  ;;  %v662_v10 = vsel %vm5889_vm4, %v562_v33, 0  ;;  %v457_v52 = vsel %vm433_vm1, %v424_v37, 0.0  ;;  %v6221_v53 = vld [vmem:[#allocation2 + $0x50] ss:$0 sps:$4 sm:$0x11]  }
  0xc3   : > { %v1350_v13 = vsel %vm1230_vm0, %v1345_v39, %v1349_v3  ;;  %4118 = vmatprep.subr.bf16.mxu0 %v5517_v4  ;;  %v4664_v20 = vcombine.low %v662_v10, %v662_v10  ;;  %v5534_v55 = vld [vmem:[#allocation3 + $0x424] ss:$8 sps:$4 sm:$0xff]   ;;  %v477_v58 = vpack.c.bf16 %v457_v52, %v456_v8  ;;  %v5532_v41 = vld [vmem:[#allocation3 + $0x420] ss:$8 sps:$4 sm:$0xff]   ;;  %v1361_v25 = vrot.slane %v1359_v45, 1 }
  0xc4   : > { %3466 = vmatprep.mubr.bf16.mxu1 %v1350_v13  ;;  %v1352_v57 = vshrl.u32 %v6214_v47, 16  ;;  %v1354_v27 = vshll.u32 %v6214_v47, 16  ;;  %v646_v31 = vsel %vm5889_vm4, 0, %v565_v50  ;;  %v2204_v51 = vshll.u32 %v6207_v32, 16  ;;  %v5546_v3 = vld [vmem:[#allocation3 + $0x1e0] ss:$8 sps:$4 sm:$0xff]  }
  0xc5   : > { %3467 = vmatmul.mubr.bf16.gmra.mrb[36].mxu1 %v4689_v59  ;;  %v4662_v2 = vcombine.low %v646_v31, %v646_v31  ;;  %v4663_v62 = vcombine.high %v646_v31, %v646_v31  ;;  %877 = vst [vmem:[#allocation2 + $0x8c] sm:$0x1] %v4664_v20  ;;  %v567_v22 = vshrl.u32 %v477_v58, 16  ;;  %v570_v5 = vshll.u32 %v477_v58, 16  ;;  %v5548_v12 = vld [vmem:[#allocation3 + $0x1e4] ss:$8 sps:$4 sm:$0xff]  }
  0xc6   : > { %v1356_v4 = vrot.slane %v1354_v27, 1  ;;  %4119 = vmatpush1.bf16.msra.mxu0 %v5515_v49  ;;  %v394_v9 = vadd.f32 %v6086_v54, %v355_v48  ;;  %v2211_v59 = vshll.u32 %v6211_v46, 16  ;;  %v425_v21 = vmax.f32 %v393_v56, 0.0  ;;  %v1032_v23 = vld [vmem:[#allocation2 + $0x54] sm:$0xf]  ;;  %3565 = vmatprep.subr.bf16.mxu1 %v5548_v12 }
  0xc7   : > { %875 = vst [vmem:[#allocation2 + $0x84] sm:$0xf] %v4662_v2  ;;  %876 = vst [vmem:[#allocation2 + $0x88] sm:$0xf] %v4663_v62  ;;  %4120 = vmatprep.subr.bf16.mxu0 %v5534_v55  ;;  %v2202_v29 = vor.u32 %v2201_v7, %v2197_v14  ;;  %v569_v32 = vrot.slane %v567_v22, 7  ;;  %v2206_v61 = vrot.slane %v2204_v51, 1  ;;  %v356_v39 = vmul.f32 %v6076_v30, %v317_v63 }
  0xc8   : > { %v1357_v26 = vor.u32 %v1356_v4, %v1352_v57  ;;  %v426_v11 = vmax.f32 %v394_v9, 0.0  ;;  %v1033_v33 = vld [vmem:[#allocation2 + $0x58] sm:$0xf]  ;;  %v5551_v34 = vld [vmem:[#allocation3 + $0x434] ss:$8 sps:$4 sm:$0xff]   ;;  %v2216_v24 = vshll.u32 %v6221_v53, 16  ;;  %3566 = vmatpush1.bf16.msra.mxu1 %v5546_v3  ;;  %v357_v52 = vmul.f32 %v6076_v30, %v318_v60 }
  0xc9   : > { %3966 = vmatmul.mubr.bf16.gmra.mrb[4].mxu0 %v6106_v6  ;;  %v458_v37 = vsel %vm433_vm1, %v425_v21, 0.0  ;;  %v572_v14 = vor.u32 %v570_v5, %v569_v32  ;;  %v663_v7 = vsel %vm5889_vm4, %v569_v32, 0  ;;  %v5549_v6 = vld [vmem:[#allocation3 + $0x430] ss:$8 sps:$4 sm:$0xff]   ;;  %v2209_v48 = vshrl.u32 %v6211_v46, 16  ;;  %v319_v21 = vld [vmem:[%s5856_s18 + $0xe0] sm:$0xff] }
  0xca   : > { %v1362_v42 = vsel %vm1230_vm0, %v1357_v26, %v1361_v25  ;;  %3975 = vmatprep.mubr.bf16.mxu0 %v2195_v17  ;;  %4121 = vmatpush1.bf16.msra.mxu0 %v5532_v41  ;;  %v459_v44 = vsel %vm433_vm1, %v426_v11, 0.0  ;;  %v4667_v45 = vcombine.low %v663_v7, %v663_v7  ;;  %v2213_v49 = vrot.slane %v2211_v59, 1  ;;  %v6252_v20 = vld [vmem:[#allocation2 + $0x5c] ss:$0 sps:$4 sm:$0x11]  }
  0xcb   : > { %3476 = vmatprep.mubr.bf16.mxu1 %v1362_v42  ;;  %v478_v50 = vpack.c.bf16 %v459_v44, %v458_v37  ;;  %4122 = vmatprep.subr.bf16.mxu0 %v5551_v34  ;;  %v647_v8 = vsel %vm5889_vm4, 0, %v572_v14  ;;  %v6250_v13 = vcombine.low %v1032_v23, %v1033_v33  ;;  %v395_v53 = vadd.f32 %v6086_v54, %v356_v39  ;;  %v5556_v31 = vld [vmem:[#allocation3 + $0x1f0] ss:$8 sps:$4 sm:$0xff]   ;;  %v5558_v58 = vld [vmem:[#allocation3 + $0x1f4] ss:$8 sps:$4 sm:$0xff]  }
  0xcc   : > { %v6246_v10 = vld [vmem:[#allocation2 + $0x8c] ss:$0 sps:$4 sm:$0x11]   ;;  %v4665_v55 = vcombine.low %v647_v8, %v647_v8  ;;  %v4666_v56 = vcombine.high %v647_v8, %v647_v8  ;;  %880 = vst [vmem:[#allocation2 + $0x98] sm:$0x1] %v4667_v45  ;;  %v2207_v25 = vsel %vm1230_vm0, %v2202_v29, %v2206_v61  ;;  %v2218_v2 = vrot.slane %v2216_v24, 1  ;;  %3567 = vmatprep.subr.bf16.mxu1 %v5558_v58 }
  0xcd   : > { %3477 = vmatmul.mubr.bf16.gmra.mrb[40].mxu1 %v6214_v47  ;;  %v574_v57 = vshrl.u32 %v478_v50, 16  ;;  %v577_v27 = vshll.u32 %v478_v50, 16  ;;  %v396_v62 = vadd.f32 %v6086_v54, %v357_v52  ;;  %v1371_v47 = vshll.u32 %v6246_v10, 16  ;;  %v1034_v22 = vld [vmem:[#allocation2 + $0x60] sm:$0xf]  ;;  %v320_v42 = vld [vmem:[%s5856_s18 + $0xe8] sm:$0xff] }
  0xce   : > { %v915_v41 = vld [vmem:[#allocation2 + $0x84] sm:$0xf]  ;;  %v6257_v63 = vld [vmem:[#allocation2 + $0x88] sm:$0xf]  ;;  %4123 = vmatpush1.bf16.msra.mxu0 %v5549_v6  ;;  %878 = vst [vmem:[#allocation2 + $0x90] sm:$0xf] %v4665_v55  ;;  %v2214_v9 = vor.u32 %v2213_v49, %v2209_v48  ;;  %3568 = vmatpush1.bf16.msra.mxu1 %v5556_v31  ;;  %v358_v45 = vmul.f32 %v6076_v30, %v319_v21 }
  0xcf   : > { %v4691_v51 = vcombine.low %v915_v41, %v6257_v63  ;;  %879 = vst [vmem:[#allocation2 + $0x94] sm:$0xf] %v4666_v56  ;;  %v576_v3 = vrot.slane %v574_v57, 7  ;;  %v427_v4 = vmax.f32 %v395_v53, 0.0  ;;  %v1035_v5 = vld [vmem:[#allocation2 + $0x64] sm:$0xf]  ;;  %v359_v57 = vmul.f32 %v6076_v30, %v320_v42 }
  0xd0   : > { %v2221_v12 = vshrl.u32 %v6250_v13, 16  ;;  %v2223_v17 = vshll.u32 %v6250_v13, 16  ;;  %v428_v59 = vmax.f32 %v396_v62, 0.0  ;;  %v5645_v11 = vld [vmem:[#allocation3 + $0x204] ss:$8 sps:$4 sm:$0xff]   ;;  %v2228_v34 = vshll.u32 %v6252_v20, 16 }
  0xd1   : > { %3976 = vmatmul.mubr.bf16.gmra.mrb[8].mxu0 %v6146_v18  ;;  %v1364_v23 = vshrl.u32 %v4691_v51, 16  ;;  %v1366_v26 = vshll.u32 %v4691_v51, 16  ;;  %v579_v29 = vor.u32 %v577_v27, %v576_v3  ;;  %v664_v32 = vsel %vm5889_vm4, %v576_v3, 0  ;;  %4973 = vmatprep.subr.bf16.mxu1 %v5645_v11  ;;  %v5545_v56 = vld [vmem:[#allocation2 + $0x68] ss:$0 sps:$4 sm:$0x11]  }
  0xd2   : > { %3985 = vmatprep.mubr.bf16.mxu0 %v2207_v25  ;;  %v4670_v33 = vcombine.low %v664_v32, %v664_v32  ;;  %v460_v61 = vsel %vm433_vm1, %v427_v4, 0.0  ;;  %v461_v24 = vsel %vm433_vm1, %v428_v59, 0.0  ;;  %v1373_v60 = vrot.slane %v1371_v47, 1  ;;  %v5562_v62 = vld [vmem:[#allocation3 + $0x440] ss:$8 sps:$4 sm:$0xff]  }
  0xd3   : > { %v1368_v37 = vrot.slane %v1366_v26, 1  ;;  %v648_v18 = vsel %vm5889_vm4, 0, %v579_v29  ;;  %v479_v39 = vpack.c.bf16 %v461_v24, %v460_v61  ;;  %v6275_v14 = vld [vmem:[#allocation2 + $0x98] ss:$0 sps:$4 sm:$0x11]   ;;  %v6277_v6 = vcombine.low %v1034_v22, %v1035_v5 }
  0xd4   : > { %v4668_v7 = vcombine.low %v648_v18, %v648_v18  ;;  %v4669_v44 = vcombine.high %v648_v18, %v648_v18  ;;  %883 = vst [vmem:[#allocation2 + $0xa4] sm:$0x1] %v4670_v33  ;;  %v2225_v49 = vrot.slane %v2223_v17, 1  ;;  %v1383_v53 = vshll.u32 %v6275_v14, 16  ;;  %v5564_v47 = vld [vmem:[#allocation3 + $0x444] ss:$8 sps:$4 sm:$0xff]  }
  0xd5   : > { %v1369_v48 = vor.u32 %v1368_v37, %v1364_v23  ;;  %v581_v50 = vshrl.u32 %v479_v39, 16  ;;  %v584_v8 = vshll.u32 %v479_v39, 16  ;;  %v917_v20 = vld [vmem:[#allocation2 + $0x90] sm:$0xf]  ;;  %v2230_v55 = vrot.slane %v2228_v34, 1  ;;  %4124 = vmatprep.subr.bf16.mxu0 %v5564_v47 }
  0xd6   : > { %v6280_v52 = vld [vmem:[#allocation2 + $0x94] sm:$0xf]  ;;  %881 = vst [vmem:[#allocation2 + $0x9c] sm:$0xf] %v4668_v7  ;;  %882 = vst [vmem:[#allocation2 + $0xa0] sm:$0xf] %v4669_v44  ;;  %v397_v27 = vadd.f32 %v6086_v54, %v358_v45  ;;  %v2219_v41 = vsel %vm1230_vm0, %v2214_v9, %v2218_v2  ;;  %v398_v22 = vadd.f32 %v6086_v54, %v359_v57  ;;  %4125 = vmatpush1.bf16.msra.mxu0 %v5562_v62 }
  0xd7   : > { %v1374_v31 = vsel %vm1230_vm0, %v1369_v48, %v1373_v60  ;;  %v4692_v58 = vcombine.low %v917_v20, %v6280_v52  ;;  %v583_v25 = vrot.slane %v581_v50, 7  ;;  %v2233_v3 = vshrl.u32 %v6277_v6, 16  ;;  %v1036_v30 = vld [vmem:[#allocation2 + $0x6c] sm:$0xf]  ;;  %v6295_v32 = vld [vmem:[#allocation2 + $0x70] sm:$0xf] }
  0xd8   : > { %3486 = vmatprep.mubr.bf16.mxu1 %v1374_v31  ;;  %v2235_v4 = vshll.u32 %v6277_v6, 16  ;;  %v429_v5 = vmax.f32 %v397_v27, 0.0  ;;  %v1385_v9 = vrot.slane %v1383_v53, 1  ;;  %v430_v26 = vmax.f32 %v398_v22, 0.0  ;;  %v1038_v31 = vld [vmem:[#allocation2 + $0x78] sm:$0xf] }
  0xd9   : > { %3487 = vmatmul.mubr.bf16.gmra.mrb[44].mxu1 %v4691_v51  ;;  %3986 = vmatmul.mubr.bf16.gmra.mrb[12].mxu0 %v6184_v40  ;;  %v1376_v17 = vshrl.u32 %v4692_v58, 16  ;;  %v1378_v59 = vshll.u32 %v4692_v58, 16  ;;  %v586_v21 = vor.u32 %v584_v8, %v583_v25  ;;  %v665_v2 = vsel %vm5889_vm4, %v583_v25, 0  ;;  %v6313_v53 = vld [vmem:[#allocation2 + $0x74] ss:$0 sps:$4 sm:$0x11]  }
  0xda   : > { %3995 = vmatprep.mubr.bf16.mxu0 %v2219_v41  ;;  %v4673_v23 = vcombine.low %v665_v2, %v665_v2  ;;  %v462_v29 = vsel %vm433_vm1, %v429_v5, 0.0  ;;  %v2226_v40 = vor.u32 %v2225_v49, %v2221_v12  ;;  %v2237_v33 = vrot.slane %v2235_v4, 1  ;;  %v6317_v41 = vld [vmem:[#allocation2 + $0x7c] sm:$0xf]  ;;  %v5571_v47 = vld [vmem:[#allocation3 + $0x450] ss:$8 sps:$4 sm:$0xff]  }
  0xdb   : > { %v1380_v54 = vrot.slane %v1378_v59, 1  ;;  %v6297_v11 = vld [vmem:[#allocation2 + $0xa4] ss:$0 sps:$4 sm:$0x11]   ;;  %v649_v51 = vsel %vm5889_vm4, 0, %v586_v21  ;;  %v2240_v34 = vshll.u32 %v5545_v56, 16  ;;  %v6307_v42 = vcombine.low %v1036_v30, %v6295_v32 }
  0xdc   : > { %886 = vst [vmem:[#allocation2 + $0xb0] sm:$0x1] %v4673_v23  ;;  %v463_v61 = vsel %vm433_vm1, %v430_v26, 0.0  ;;  %v4671_v18 = vcombine.low %v649_v51, %v649_v51  ;;  %v4672_v39 = vcombine.high %v649_v51, %v649_v51  ;;  %v1395_v7 = vshll.u32 %v6297_v11, 16 }
  0xdd   : > { %v1381_v24 = vor.u32 %v1380_v54, %v1376_v17  ;;  %v919_v37 = vld [vmem:[#allocation2 + $0x9c] sm:$0xf]  ;;  %v6304_v60 = vld [vmem:[#allocation2 + $0xa0] sm:$0xf]  ;;  %v480_v44 = vpack.c.bf16 %v463_v61, %v462_v29  ;;  %v2231_v48 = vsel %vm1230_vm0, %v2226_v40, %v2230_v55  ;;  %v2238_v56 = vor.u32 %v2237_v33, %v2233_v3 }
  0xde   : > { %v4693_v12 = vcombine.low %v919_v37, %v6304_v60  ;;  %884 = vst [vmem:[#allocation2 + $0xa8] sm:$0xf] %v4671_v18  ;;  %885 = vst [vmem:[#allocation2 + $0xac] sm:$0xf] %v4672_v39  ;;  %v2242_v57 = vrot.slane %v2240_v34, 1  ;;  %v2247_v27 = vshll.u32 %v6307_v42, 16  ;;  %v6332_v29 = vcombine.low %v1038_v31, %v6317_v41 }
  0xdf   : > { %v1386_v45 = vsel %vm1230_vm0, %v1381_v24, %v1385_v9  ;;  %v588_v8 = vshrl.u32 %v480_v44, 16  ;;  %v591_v20 = vshll.u32 %v480_v44, 16  ;;  %v1397_v25 = vrot.slane %v1395_v7, 1  ;;  %v6337_v24 = vld [vmem:[#allocation2 + $0x80] ss:$0 sps:$4 sm:$0x11]  }
  0xe0   : > { %3496 = vmatprep.mubr.bf16.mxu1 %v1386_v45  ;;  %v1388_v49 = vshrl.u32 %v4693_v12, 16  ;;  %v1390_v50 = vshll.u32 %v4693_v12, 16  ;;  %v2243_v3 = vsel %vm1230_vm0, %v2238_v56, %v2242_v57  ;;  %v2245_v17 = vshrl.u32 %v6307_v42, 16  ;;  %v1040_v18 = vld [vmem:[#allocation2 + $0x84] sm:$0xf] }
  0xe1   : > { %3497 = vmatmul.mubr.bf16.gmra.mrb[48].mxu1 %v4692_v58  ;;  %3996 = vmatmul.mubr.bf16.gmra.mrb[16].mxu0 %v6211_v46  ;;  %v590_v62 = vrot.slane %v588_v8, 7  ;;  %v5573_v46 = vld [vmem:[#allocation3 + $0x454] ss:$8 sps:$4 sm:$0xff]   ;;  %v2249_v59 = vrot.slane %v2247_v27, 1  ;;  %v2252_v26 = vshll.u32 %v6313_v53, 16  ;;  %v2259_v45 = vshll.u32 %v6332_v29, 16 }
  0xe2   : > { %v1392_v55 = vrot.slane %v1390_v50, 1  ;;  %4005 = vmatprep.mubr.bf16.mxu0 %v2231_v48  ;;  %4126 = vmatprep.subr.bf16.mxu0 %v5573_v46  ;;  %v6340_v48 = vld [vmem:[#allocation2 + $0x88] sm:$0xf]  ;;  %v5582_v50 = vld [vmem:[#allocation3 + $0x464] ss:$8 sps:$4 sm:$0xff]   ;;  %v2257_v8 = vshrl.u32 %v6332_v29, 16 }
  0xe3   : > { %v6319_v4 = vld [vmem:[#allocation2 + $0xb0] ss:$0 sps:$4 sm:$0x11]   ;;  %v593_v5 = vor.u32 %v591_v20, %v590_v62  ;;  %v666_v58 = vsel %vm5889_vm4, %v590_v62, 0  ;;  %4127 = vmatpush1.bf16.msra.mxu0 %v5571_v47  ;;  %v2250_v37 = vor.u32 %v2249_v59, %v2245_v17  ;;  %v2254_v44 = vrot.slane %v2252_v26, 1 }
  0xe4   : > { %v1393_v22 = vor.u32 %v1392_v55, %v1388_v49  ;;  %v4676_v30 = vcombine.low %v666_v58, %v666_v58  ;;  %v1407_v40 = vshll.u32 %v6319_v4, 16  ;;  %v5580_v49 = vld [vmem:[#allocation3 + $0x460] ss:$8 sps:$4 sm:$0xff]   ;;  %v6346_v20 = vcombine.low %v1040_v18, %v6340_v48  ;;  %4128 = vmatprep.subr.bf16.mxu0 %v5582_v50  ;;  %v321_v58 = vld [vmem:[%s5856_s18 + $0xf0] sm:$0xff] }
  0xe5   : > { %v921_v2 = vld [vmem:[#allocation2 + $0xa8] sm:$0xf]  ;;  %v6326_v9 = vld [vmem:[#allocation2 + $0xac] sm:$0xf]  ;;  %v650_v23 = vsel %vm5889_vm4, 0, %v593_v5  ;;  %v2255_v57 = vsel %vm1230_vm0, %v2250_v37, %v2254_v44  ;;  %v2261_v27 = vrot.slane %v2259_v45, 1 }
  0xe6   : > { %v1398_v21 = vsel %vm1230_vm0, %v1393_v22, %v1397_v25  ;;  %v4694_v54 = vcombine.low %v921_v2, %v6326_v9  ;;  %v4674_v51 = vcombine.low %v650_v23, %v650_v23  ;;  %v4675_v33 = vcombine.high %v650_v23, %v650_v23  ;;  %889 = vst [vmem:[#allocation2 + $0xbc] sm:$0x1] %v4676_v30  ;;  %v6356_v22 = vld [vmem:[#allocation2 + $0x8c] ss:$0 sps:$4 sm:$0x11]  }
  0xe7   : > { %3506 = vmatprep.mubr.bf16.mxu1 %v1398_v21  ;;  %v1409_v7 = vrot.slane %v1407_v40, 1  ;;  %v2264_v31 = vshll.u32 %v6337_v24, 16  ;;  %4129 = vmatpush1.bf16.msra.mxu0 %v5580_v49  ;;  %v2271_v5 = vshll.u32 %v6346_v20, 16  ;;  %v2262_v30 = vor.u32 %v2261_v27, %v2257_v8  ;;  %v1042_v59 = vld [vmem:[#allocation2 + $0x90] sm:$0xf]  ;;  %v322_v21 = vld [vmem:[%s5856_s18 + $0xf8] sm:$0xff]  ;;  %s289_s18 = scalar_lea.vmem %s6887_s6, %s4629_s15 }
  0xe8   : > { %v1400_v34 = vshrl.u32 %v4694_v54, 16  ;;  %v1402_v61 = vshll.u32 %v4694_v54, 16  ;;  %887 = vst [vmem:[#allocation2 + $0xb4] sm:$0xf] %v4674_v51  ;;  %888 = vst [vmem:[#allocation2 + $0xb8] sm:$0xf] %v4675_v33 }
  0xe9   : > { %3507 = vmatmul.mubr.bf16.gmra.mrb[52].mxu1 %v4693_v12  ;;  %4006 = vmatmul.mubr.bf16.gmra.mrb[20].mxu0 %v6250_v13  ;;  %v2266_v17 = vrot.slane %v2264_v31, 1  ;;  %v6361_v2 = vld [vmem:[#allocation2 + $0x94] sm:$0xf]  ;;  %v5589_v23 = vld [vmem:[#allocation3 + $0x470] ss:$8 sps:$4 sm:$0xff]   ;;  %v2276_v37 = vshll.u32 %v6356_v22, 16 }
  0xea   : > { %4015 = vmatprep.mubr.bf16.mxu0 %v2243_v3  ;;  %v1404_v39 = vrot.slane %v1402_v61, 1  ;;  %v941_v40 = vld [vmem:[#allocation2] sm:$0xe]  ;;  %v5646_v51 = vld [vmem:[%s6882_s1] ss:$0 sm:$0xff]  ;;  %v2273_v61 = vrot.slane %v2271_v5, 1  ;;  %v6370_v44 = vcombine.low %v1042_v59, %v6361_v2 }
  0xeb   : > { %v360_v33 = vmul.f32 %v5646_v51, %v321_v58  ;;  %v361_v18 = vmul.f32 %v5646_v51, %v322_v21  ;;  %v5647_v45 = vld [vmem:[%s6883_s2] ss:$0 sm:$0xff]  ;;  %v2278_v31 = vrot.slane %v2276_v37, 1  ;;  %v5649_v5 = vld [vmem:[#allocation2 + $0x8] ss:$0 sps:$4 sm:$0x11]  }
  0xec   : > { %v1405_v12 = vor.u32 %v1404_v39, %v1400_v34  ;;  %v2269_v34 = vshrl.u32 %v6346_v20, 16  ;;  %v1489_v58 = vrot.slane %v5649_v5, 1  ;;  %v942_v21 = vld [vmem:[#allocation2 + $0xc] sm:$0xe]  ;;  %v943_v5 = vld [vmem:[#allocation2 + $0x18] sm:$0xe] }
  0xed   : > { %v6342_v13 = vld [vmem:[#allocation2 + $0xbc] ss:$0 sps:$4 sm:$0x11]   ;;  %v399_v49 = vadd.f32 %v5647_v45, %v360_v33  ;;  %v400_v8 = vadd.f32 %v5647_v45, %v361_v18 }
  0xee   : > { %v1410_v56 = vsel %vm1230_vm0, %v1405_v12, %v1409_v7  ;;  %v1419_v47 = vshll.u32 %v6342_v13, 16  ;;  %v2267_v7 = vsel %vm1230_vm0, %v2262_v30, %v2266_v17  ;;  %v5648_v12 = vld [vmem:[#allocation2 + $0x4] sm:$0xf]  ;;  %v2274_v27 = vor.u32 %v2273_v61, %v2269_v34  ;;  %v1044_v17 = vld [vmem:[#allocation2 + $0x9c] sm:$0xf] }
  0xef   : > { %3516 = vmatprep.mubr.bf16.mxu1 %v1410_v56  ;;  %v923_v55 = vld [vmem:[#allocation2 + $0xb4] sm:$0xf]  ;;  %v6351_v25 = vld [vmem:[#allocation2 + $0xb8] sm:$0xf]  ;;  %v4712_v50 = vcombine.low %v941_v40, %v5648_v12  ;;  %v5650_v34 = vld [vmem:[#allocation2 + $0x10] sm:$0xf] }
  0xf0   : > { %v4695_v62 = vcombine.low %v923_v55, %v6351_v25  ;;  %v6377_v55 = vld [vmem:[#allocation2 + $0x98] ss:$0 sps:$4 sm:$0x11]   ;;  %v4713_v61 = vcombine.low %v942_v21, %v5650_v34  ;;  %v6396_v12 = vld [vmem:[#allocation2 + $0xac] sm:$0xf] }
  0xf1   : > { %3517 = vmatmul.mubr.bf16.gmra.mrb[56].mxu1 %v4694_v54  ;;  %4016 = vmatmul.mubr.bf16.gmra.mrb[24].mxu0 %v6277_v6  ;;  %v5591_v6 = vld [vmem:[#allocation3 + $0x474] ss:$8 sps:$4 sm:$0xff]   ;;  %v1421_v54 = vrot.slane %v1419_v47, 1  ;;  %v432_v47 = vmax.f32 %v400_v8, 0.0  ;;  %v1488_v30 = vrot.slane %v4712_v50, 1 }
  0xf2   : > { %4025 = vmatprep.mubr.bf16.mxu0 %v2255_v57  ;;  %v1412_v46 = vshrl.u32 %v4695_v62, 16  ;;  %v1414_v3 = vshll.u32 %v4695_v62, 16  ;;  %4130 = vmatprep.subr.bf16.mxu0 %v5591_v6  ;;  %v431_v57 = vmax.f32 %v399_v49, 0.0  ;;  %v2279_v6 = vsel %vm1230_vm0, %v2274_v27, %v2278_v31  ;;  %v1046_v49 = vld [vmem:[#allocation2 + $0xa8] sm:$0xf] }
  0xf3   : > { %4131 = vmatpush1.bf16.msra.mxu0 %v5589_v23  ;;  %v465_v59 = vsel %vm433_vm1, %v432_v47, 0.0  ;;  %v1490_v33 = vsel %vm1487_vm5, %v1488_v30, %v1489_v58  ;;  %v5653_v47 = vld [vmem:[#allocation3 + $0x214] ss:$8 sps:$4 sm:$0xff]   ;;  %v953_v34 = vld [vmem:[#allocation2 + $0x90] sm:$0xe] }
  0xf4   : > { %v1416_v26 = vrot.slane %v1414_v3, 1  ;;  %v464_v3 = vsel %vm433_vm1, %v431_v57, 0.0  ;;  %v5652_v57 = vld [vmem:[#allocation2 + $0x14] ss:$0 sps:$4 sm:$0x11]  }
  0xf5   : > { %v481_v23 = vpack.c.bf16 %v465_v59, %v464_v3  ;;  %v1492_v27 = vrot.slane %v5652_v57, 1  ;;  %v944_v57 = vld [vmem:[#allocation2 + $0x24] sm:$0xe] }
  0xf6   : > { %v1417_v39 = vor.u32 %v1416_v26, %v1412_v46  ;;  %v2283_v46 = vshll.u32 %v6370_v44, 16  ;;  %v2281_v26 = vshrl.u32 %v6370_v44, 16 }
  0xf7   : > { %v595_v51 = vshrl.u32 %v481_v23, 16 }
  0xf8   : > { %v1422_v56 = vsel %vm1230_vm0, %v1417_v39, %v1421_v54  ;;  %v2285_v54 = vrot.slane %v2283_v46, 1  ;;  %v6393_v39 = vld [vmem:[#allocation2 + $0xa4] ss:$0 sps:$4 sm:$0x11]   ;;  %v6404_v46 = vcombine.low %v1046_v49, %v6396_v12 }
  0xf9   : > { %4026 = vmatmul.mubr.bf16.gmra.mrb[28].mxu0 %v6307_v42  ;;  %3526 = vmatprep.mubr.bf16.mxu1 %v1422_v56  ;;  %v6382_v42 = vld [vmem:[#allocation2 + $0xa0] sm:$0xf]  ;;  %v597_v37 = vrot.slane %v595_v51, 7  ;;  %v6411_v51 = vld [vmem:[#allocation2 + $0xb0] ss:$0 sps:$4 sm:$0x11]  }
  0xfa   : > { %4035 = vmatprep.mubr.bf16.mxu0 %v2267_v7  ;;  %3527 = vmatmul.mubr.bf16.gmra.mrb[60].mxu1 %v4695_v62  ;;  %v2288_v62 = vshll.u32 %v6377_v55, 16  ;;  %v6389_v40 = vcombine.low %v1044_v17, %v6382_v42  ;;  %v2286_v7 = vor.u32 %v2285_v54, %v2281_v26  ;;  %v5651_v56 = vld [vmem:[#allocation3 + $0x200] ss:$8 sps:$4 sm:$0xff]   ;;  %v952_v17 = vld [vmem:[#allocation2 + $0x84] sm:$0xe] }
  0xfb   : > { %3569 = vmatprep.mubr.bf16.mxu1 %v5924_v36  ;;  %v598_v36 = vshll.u32 %v481_v23, 16  ;;  %v667_v8 = vsel %vm5889_vm4, %v597_v37, 0  ;;  %v2300_v23 = vshll.u32 %v6393_v39, 16  ;;  %v5654_v26 = vld [vmem:[#allocation3 + $0x210] ss:$8 sps:$4 sm:$0xff]  }
  0xfc   : > { %v2290_v18 = vrot.slane %v2288_v62, 1  ;;  %v2295_v45 = vshll.u32 %v6389_v40, 16  ;;  %v4679_v31 = vcombine.low %v667_v8, %v667_v8  ;;  %v4714_v62 = vcombine.low %v943_v5, %v5655_v28  ;;  %v5656_v54 = vld [vmem:[#allocation3 + $0x224] ss:$8 sps:$4 sm:$0xff]  }
  0xfd   : > { %v600_v50 = vor.u32 %v598_v36, %v597_v37  ;;  %v4723_v36 = vcombine.low %v952_v17, %v6257_v63  ;;  %v1048_v37 = vld [vmem:[#allocation2 + $0xb4] sm:$0xf]  ;;  %v5657_v8 = vld [vmem:[#allocation2 + $0x20] ss:$0 sps:$4 sm:$0x11]  }
  0xfe   : > { %892 = vst [vmem:[#allocation2 + $0xc8] sm:$0x1] %v4679_v31  ;;  %v2291_v59 = vsel %vm1230_vm0, %v2286_v7, %v2290_v18  ;;  %v2297_v21 = vrot.slane %v2295_v45, 1  ;;  %v6416_v18 = vld [vmem:[#allocation2 + $0xb8] sm:$0xf]  ;;  %v2302_v45 = vrot.slane %v2300_v23, 1 }
  0xff   : > { %v651_v58 = vsel %vm5889_vm4, 0, %v600_v50  ;;  %v1521_v49 = vrot.slane %v4723_v36, 1  ;;  %v1494_v50 = vrot.slane %v4714_v62, 1  ;;  %v5658_v63 = vld [vmem:[#allocation3 + $0x220] ss:$8 sps:$4 sm:$0xff]   ;;  %v2305_v31 = vshrl.u32 %v6404_v46, 16 }
 0x100   : > { %v4677_v3 = vcombine.low %v651_v58, %v651_v58  ;;  %v4678_v30 = vcombine.high %v651_v58, %v651_v58  ;;  %v6427_v58 = vcombine.low %v1048_v37, %v6416_v18  ;;  %v5660_v17 = vld [vmem:[#allocation2 + $0x28] sm:$0xf]  ;;  %v6436_v28 = vld [vmem:[#allocation2 + $0xbc] ss:$0 sps:$4 sm:$0x11]  }
 0x101   : > { %4036 = vmatmul.mubr.bf16.gmra.mrb[32].mxu0 %v6332_v29  ;;  %v1491_v29 = vrot.slane %v4713_v61, 1  ;;  %v2307_v61 = vshll.u32 %v6404_v46, 16 }
 0x102   : > { %4045 = vmatprep.mubr.bf16.mxu0 %v2279_v6  ;;  %3570 = vmatmul.mubr.bf16.vlgmr.msra.gmra.mrb[0].mxu1 %v1490_v33  ;;  %890 = vst [vmem:[#allocation2 + $0xc0] sm:$0xf] %v4677_v3  ;;  %891 = vst [vmem:[#allocation2 + $0xc4] sm:$0xf] %v4678_v30  ;;  %v1522_v33 = vrot.slane %v6246_v10, 1  ;;  %v4724_v10 = vcombine.low %v953_v34, %v6280_v52  ;;  %v2319_v36 = vshll.u32 %v6427_v58, 16 }
 0x103   : > { %4989 = vmatpush1.bf16.msra.mxu1 %v5651_v56  ;;  %3579 = vmatprep.mubr.bf16.mxu1 %v5945_v15  ;;  %v2293_v15 = vshrl.u32 %v6389_v40, 16  ;;  %v1493_v6 = vsel %vm1487_vm5, %v1491_v29, %v1492_v27  ;;  %v1495_v56 = vrot.slane %v5657_v8, 1  ;;  %v1525_v29 = vrot.slane %v6275_v14, 1  ;;  %v5659_v27 = vld [vmem:[#allocation3 + $0x234] ss:$8 sps:$4 sm:$0xff]  }
 0x104   : > { %4974 = vmatprep.subr.bf16.mxu1 %v5653_v47  ;;  %v2312_v47 = vshll.u32 %v6411_v51, 16  ;;  %v6424_v5 = vsel %vm1487_vm5, %v1521_v49, %v1522_v33  ;;  %v1524_v3 = vrot.slane %v4724_v10, 1  ;;  %v956_v33 = vld [vmem:[#allocation2 + $0xb4] sm:$0xe]  ;;  %v945_v34 = vld [vmem:[#allocation2 + $0x30] sm:$0xe] }
 0x105   : > { %v2298_v7 = vor.u32 %v2297_v21, %v2293_v15  ;;  %v1496_v14 = vsel %vm1487_vm5, %v1494_v50, %v1495_v56  ;;  %v5661_v15 = vld [vmem:[#allocation3 + $0x230] ss:$8 sps:$4 sm:$0xff]   ;;  %v2317_v56 = vshrl.u32 %v6427_v58, 16  ;;  %v5665_v10 = vld [vmem:[#allocation3 + $0x254] ss:$8 sps:$4 sm:$0xff]  }
 0x106   : > { %v6433_v21 = vsel %vm1487_vm5, %v1524_v3, %v1525_v29  ;;  %v2438_v3 = vrot.slane %v6313_v53, 1 }
 0x107   : > { %4990 = vmatpush1.bf16.msra.mxu1 %v5654_v26  ;;  %v2303_v52 = vsel %vm1230_vm0, %v2298_v7, %v2302_v45  ;;  %v5662_v26 = vld [vmem:[#allocation3 + $0x244] ss:$8 sps:$4 sm:$0xff]   ;;  %v1077_v7 = vld [vmem:[#allocation2 + $0x6c] sm:$0xe] }
 0x108   : > { %4975 = vmatprep.subr.bf16.mxu1 %v5656_v54  ;;  %v2314_v54 = vrot.slane %v2312_v47, 1 }
 0x109   : > { %4046 = vmatmul.mubr.bf16.gmra.mrb[36].mxu0 %v6346_v20  ;;  %v954_v20 = vld [vmem:[#allocation2 + $0x9c] sm:$0xe]  ;;  %v1050_v50 = vld [vmem:[#allocation2 + $0xc0] sm:$0xf]  ;;  %v6446_v8 = vld [vmem:[#allocation2 + $0xc4] sm:$0xf] }
 0x10a   : > { %4055 = vmatprep.mubr.bf16.mxu0 %v2291_v59  ;;  %3580 = vmatmul.mubr.bf16.gmra.mrb[4].mxu1 %v1493_v6  ;;  %v4725_v30 = vcombine.low %v954_v20, %v6304_v60  ;;  %v4715_v59 = vcombine.low %v944_v57, %v5660_v17  ;;  %v955_v6 = vld [vmem:[#allocation2 + $0xa8] sm:$0xe]  ;;  %v1528_v60 = vrot.slane %v6297_v11, 1  ;;  %v5663_v11 = vld [vmem:[#allocation2 + $0x2c] ss:$0 sps:$4 sm:$0x11]  }
 0x10b   : > { %3589 = vmatprep.mubr.bf16.mxu1 %v5969_v1  ;;  %4991 = vmatpush1.bf16.msra.mxu1 %v5658_v63  ;;  %v2309_v1 = vrot.slane %v2307_v61, 1  ;;  %v4726_v37 = vcombine.low %v955_v6, %v6326_v9  ;;  %v1498_v49 = vrot.slane %v5663_v11, 1  ;;  %v5664_v20 = vld [vmem:[#allocation3 + $0x240] ss:$8 sps:$4 sm:$0xff]   ;;  %v2324_v63 = vshll.u32 %v6436_v28, 16 }
 0x10c   : > { %4976 = vmatprep.subr.bf16.mxu1 %v5659_v27  ;;  %v1527_v23 = vrot.slane %v4725_v30, 1  ;;  %v1497_v45 = vrot.slane %v4715_v59, 1  ;;  %v1534_v57 = vrot.slane %v6342_v13, 1  ;;  %v4815_v27 = vcombine.low %v1077_v7, %v6295_v32  ;;  %v1078_v30 = vld [vmem:[#allocation2 + $0x78] sm:$0xe] }
 0x10d   : > { %v2310_v62 = vor.u32 %v2309_v1, %v2305_v31  ;;  %v1530_v9 = vrot.slane %v4726_v37, 1  ;;  %v6455_v31 = vcombine.low %v1050_v50, %v6446_v8  ;;  %v5667_v17 = vld [vmem:[#allocation3 + $0x250] ss:$8 sps:$4 sm:$0xff]   ;;  %v5668_v32 = vld [vmem:[#allocation3 + $0x264] ss:$8 sps:$4 sm:$0xff]   ;;  %v4816_v6 = vcombine.low %v1078_v30, %v6317_v41 }
 0x10e   : > { %v6441_v61 = vsel %vm1487_vm5, %v1527_v23, %v1528_v60  ;;  %v2437_v59 = vrot.slane %v4815_v27, 1  ;;  %v6466_v23 = vld [vmem:[#allocation2 + $0xd0] sm:$0xf]  ;;  %v5670_v37 = vld [vmem:[#allocation3 + $0x260] ss:$8 sps:$4 sm:$0xff]  }
 0x10f   : > { %4992 = vmatpush1.bf16.msra.mxu1 %v5661_v15  ;;  %v2315_v29 = vsel %vm1230_vm0, %v2310_v62, %v2314_v54  ;;  %v1052_v15 = vld [vmem:[#allocation2 + $0xcc] sm:$0xf]  ;;  %v2326_v62 = vrot.slane %v2324_v63, 1  ;;  %v2331_v54 = vshll.u32 %v6455_v31, 16  ;;  %v946_v7 = vld [vmem:[#allocation2 + $0x3c] sm:$0xe] }
 0x110   : > { %4977 = vmatprep.subr.bf16.mxu1 %v5662_v26  ;;  %v6469_v53 = vsel %vm1487_vm5, %v2437_v59, %v2438_v3  ;;  %v2441_v26 = vrot.slane %v6337_v24, 1  ;;  %v1080_v41 = vld [vmem:[#allocation2 + $0x90] sm:$0xe]  ;;  %v6478_v24 = vcombine.low %v1052_v15, %v6466_v23  ;;  %v5672_v63 = vld [vmem:[#allocation2 + $0x40] sm:$0xf] }
 0x111   : > { %4056 = vmatmul.mubr.bf16.gmra.mrb[40].mxu0 %v6370_v44  ;;  %v1531_v44 = vrot.slane %v6319_v4, 1  ;;  %v4727_v4 = vcombine.low %v956_v33, %v6351_v25  ;;  %v5666_v25 = vld [vmem:[#allocation2 + $0x34] sm:$0xf]  ;;  %v5669_v33 = vld [vmem:[#allocation2 + $0x38] ss:$0 sps:$4 sm:$0x11]  }
 0x112   : > { %4065 = vmatprep.mubr.bf16.mxu0 %v2303_v52  ;;  %3590 = vmatmul.mubr.bf16.gmra.mrb[8].mxu1 %v1496_v14  ;;  %v1499_v52 = vsel %vm1487_vm5, %v1497_v45, %v1498_v49  ;;  %v4716_v14 = vcombine.low %v945_v34, %v5666_v25  ;;  %v1501_v34 = vrot.slane %v5669_v33, 1  ;;  %v5671_v45 = vld [vmem:[#allocation3 + $0x274] ss:$8 sps:$4 sm:$0xff]   ;;  %v5676_v59 = vld [vmem:[#allocation3 + $0x280] ss:$8 sps:$4 sm:$0xff]  }
 0x113   : > { %3599 = vmatprep.mubr.bf16.mxu1 %v6010_v16  ;;  %4993 = vmatpush1.bf16.msra.mxu1 %v5664_v20  ;;  %v2321_v16 = vrot.slane %v2319_v36, 1  ;;  %v6458_v47 = vsel %vm1487_vm5, %v1530_v9, %v1531_v44  ;;  %v1533_v1 = vrot.slane %v4727_v4, 1  ;;  %v2440_v44 = vrot.slane %v4816_v6, 1  ;;  %v5673_v9 = vld [vmem:[#allocation3 + $0x270] ss:$8 sps:$4 sm:$0xff]  }
 0x114   : > { %4978 = vmatprep.subr.bf16.mxu1 %v5665_v10  ;;  %v1500_v36 = vrot.slane %v4716_v14, 1  ;;  %v2333_v20 = vrot.slane %v2331_v54, 1  ;;  %v4717_v10 = vcombine.low %v946_v7, %v5672_v63  ;;  %v4818_v4 = vcombine.low %v1080_v41, %v6361_v2  ;;  %v6490_v27 = vld [vmem:[#allocation2 + $0xd4] ss:$0 sps:$4 sm:$0x11]  }
 0x115   : > { %v6464_v13 = vsel %vm1487_vm5, %v1533_v1, %v1534_v57  ;;  %v2322_v60 = vor.u32 %v2321_v16, %v2317_v56  ;;  %v6481_v11 = vsel %vm1487_vm5, %v2440_v44, %v2441_v26  ;;  %v1081_v16 = vld [vmem:[#allocation2 + $0x9c] sm:$0xe]  ;;  %v2343_v1 = vshll.u32 %v6478_v24, 16  ;;  %v1082_v14 = vld [vmem:[#allocation2 + $0xa8] sm:$0xe] }
 0x116   : > { %v1502_v56 = vsel %vm1487_vm5, %v1500_v36, %v1501_v34  ;;  %v5674_v57 = vld [vmem:[#allocation3 + $0x284] ss:$8 sps:$4 sm:$0xff]   ;;  %v2446_v3 = vrot.slane %v4818_v4, 1  ;;  %v4819_v25 = vcombine.low %v1081_v16, %v6382_v42  ;;  %v2450_v2 = vrot.slane %v6393_v39, 1  ;;  %v947_v15 = vld [vmem:[#allocation2 + $0x48] sm:$0xe] }
 0x117   : > { %4994 = vmatpush1.bf16.msra.mxu1 %v5667_v17  ;;  %v2327_v49 = vsel %vm1230_vm0, %v2322_v60, %v2326_v62  ;;  %v5677_v6 = vld [vmem:[#allocation3 + $0x294] ss:$8 sps:$4 sm:$0xff]   ;;  %v2348_v60 = vshll.u32 %v6490_v27, 16  ;;  %v4820_v42 = vcombine.low %v1082_v14, %v6396_v12  ;;  %v2453_v39 = vrot.slane %v6411_v51, 1  ;;  %v5679_v7 = vld [vmem:[#allocation3 + $0x290] ss:$8 sps:$4 sm:$0xff]  }
 0x118   : > { %4979 = vmatprep.subr.bf16.mxu1 %v5668_v32  ;;  %v2449_v26 = vrot.slane %v4819_v25, 1  ;;  %v1083_v62 = vld [vmem:[#allocation2 + $0xb4] sm:$0xe]  ;;  %v2341_v54 = vshrl.u32 %v6478_v24, 16  ;;  %v2345_v36 = vrot.slane %v2343_v1, 1 }
 0x119   : > { %4066 = vmatmul.mubr.bf16.gmra.mrb[44].mxu0 %v6389_v40  ;;  %v6473_v40 = vld [vmem:[#allocation2 + $0xc8] ss:$0 sps:$4 sm:$0x11]   ;;  %v5680_v12 = vld [vmem:[#allocation3 + $0x2a4] ss:$8 sps:$4 sm:$0xff]   ;;  %v4821_v51 = vcombine.low %v1083_v62, %v6416_v18 }
 0x11a   : > { %4075 = vmatprep.mubr.bf16.mxu0 %v2315_v29  ;;  %3600 = vmatmul.mubr.bf16.gmra.mrb[12].mxu1 %v1499_v52  ;;  %v2336_v50 = vshll.u32 %v6473_v40, 16  ;;  %v2447_v29 = vrot.slane %v6377_v55, 1  ;;  %v1503_v55 = vrot.slane %v4717_v10, 1  ;;  %v6505_v33 = vsel %vm1487_vm5, %v2449_v26, %v2450_v2  ;;  %v5681_v63 = vld [vmem:[#allocation2 + $0x50] ss:$0 sps:$4 sm:$0x11]  }
 0x11b   : > { %3609 = vmatprep.mubr.bf16.mxu1 %v6052_v38  ;;  %4995 = vmatpush1.bf16.msra.mxu1 %v5670_v37  ;;  %v2329_v38 = vshrl.u32 %v6455_v31, 16  ;;  %v5678_v37 = vld [vmem:[#allocation2 + $0x4c] sm:$0xf]  ;;  %v1507_v10 = vrot.slane %v5681_v63, 1  ;;  %v5684_v1 = vld [vmem:[#allocation2 + $0x58] sm:$0xf] }
 0x11c   : > { %4980 = vmatprep.subr.bf16.mxu1 %v5671_v45  ;;  %v2338_v52 = vrot.slane %v2336_v50, 1  ;;  %v6497_v32 = vsel %vm1487_vm5, %v2446_v3, %v2447_v29  ;;  %v4718_v44 = vcombine.low %v947_v15, %v5678_v37  ;;  %v2452_v45 = vrot.slane %v4820_v42, 1  ;;  %v5683_v4 = vld [vmem:[#allocation3 + $0x2b4] ss:$8 sps:$4 sm:$0xff]   ;;  %v1084_v29 = vld [vmem:[#allocation2 + $0xc0] sm:$0xe] }
 0x11d   : > { %v2334_v30 = vor.u32 %v2333_v20, %v2329_v38  ;;  %v2346_v38 = vor.u32 %v2345_v36, %v2341_v54  ;;  %v2350_v20 = vrot.slane %v2348_v60, 1  ;;  %v2455_v50 = vrot.slane %v4821_v51, 1  ;;  %v5685_v3 = vld [vmem:[#allocation3 + $0x2b0] ss:$8 sps:$4 sm:$0xff]   ;;  %v5686_v25 = vld [vmem:[#allocation3 + $0x2c4] ss:$8 sps:$4 sm:$0xff]  }
 0x11e   : > { %v6511_v41 = vsel %vm1487_vm5, %v2452_v45, %v2453_v39  ;;  %v5688_v15 = vld [vmem:[#allocation3 + $0x2c0] ss:$8 sps:$4 sm:$0xff]   ;;  %v5690_v26 = vld [vmem:[#allocation2 + $0x1c] sm:$0xf]  ;;  %v5691_v62 = vld [vmem:[#allocation2 + $0x64] sm:$0xf] }
 0x11f   : > { %4996 = vmatpush1.bf16.msra.mxu1 %v5673_v9  ;;  %v948_v9 = vld [vmem:[#allocation2 + $0x54] sm:$0xe]  ;;  %v2351_v16 = vsel %vm1230_vm0, %v2346_v38, %v2350_v20  ;;  %v5692_v54 = vld [vmem:[#allocation3 + $0x2d0] ss:$8 sps:$4 sm:$0xff]   ;;  %v5693_v37 = vld [vmem:[#allocation3 + $0x2e4] ss:$8 sps:$4 sm:$0xff]  }
 0x120   : > { %4981 = vmatprep.subr.bf16.mxu1 %v5674_v57  ;;  %v6541_v20 = vld [vmem:[#allocation2 + $0x7c] sm:$0xf] }
 0x121   : > { %4076 = vmatmul.mubr.bf16.gmra.mrb[48].mxu0 %v6404_v46  ;;  %v5675_v46 = vld [vmem:[#allocation2 + $0x44] ss:$0 sps:$4 sm:$0x11]  }
 0x122   : > { %4085 = vmatprep.mubr.bf16.mxu0 %v2327_v49  ;;  %3610 = vmatmul.mubr.bf16.gmra.mrb[16].mxu1 %v1502_v56  ;;  %v1504_v17 = vrot.slane %v5675_v46, 1  ;;  %v2456_v49 = vrot.slane %v6436_v28, 1  ;;  %v1506_v56 = vrot.slane %v4718_v44, 1  ;;  %v4822_v28 = vcombine.low %v1084_v29, %v6446_v8  ;;  %v1070_v8 = vld [vmem:[#allocation2 + $0x18] sm:$0xe] }
 0x123   : > { %3619 = vmatprep.mubr.bf16.mxu1 %v6063_v43  ;;  %4997 = vmatpush1.bf16.msra.mxu1 %v5676_v59  ;;  %v2339_v43 = vsel %vm1230_vm0, %v2334_v30, %v2338_v52  ;;  %v2459_v52 = vrot.slane %v6473_v40, 1  ;;  %v6527_v59 = vld [vmem:[#allocation2 + $0x70] sm:$0xf]  ;;  %v949_v40 = vld [vmem:[#allocation2 + $0x60] sm:$0xe]  ;;  %v4808_v60 = vcombine.low %v1070_v8, %v5690_v26 }
 0x124   : > { %4982 = vmatprep.subr.bf16.mxu1 %v5677_v6  ;;  %v1505_v34 = vsel %vm1487_vm5, %v1503_v55, %v1504_v17  ;;  %v6516_v18 = vsel %vm1487_vm5, %v2455_v50, %v2456_v49  ;;  %v1508_v57 = vsel %vm1487_vm5, %v1506_v56, %v1507_v10  ;;  %v2458_v30 = vrot.slane %v4822_v28, 1  ;;  %v5687_v55 = vld [vmem:[#allocation2 + $0x5c] ss:$0 sps:$4 sm:$0x11]   ;;  %v973_v17 = vld [vmem:[#allocation2 + $0x6c] sm:$0xf] }
 0x125   : > { %v1510_v46 = vrot.slane %v5687_v55, 1  ;;  %v1085_v6 = vld [vmem:[#allocation2 + $0xcc] sm:$0xe]  ;;  %v6531_v39 = vcombine.low %v973_v17, %v6527_v59  ;;  %v2416_v44 = vrot.slane %v4808_v60, 1  ;;  %v5698_v10 = vld [vmem:[#allocation2 + $0x28] sm:$0xf] }
 0x126   : > { %v6524_v2 = vsel %vm1487_vm5, %v2458_v30, %v2459_v52  ;;  %v4823_v42 = vcombine.low %v1085_v6, %v6466_v23  ;;  %v5694_v23 = vld [vmem:[#allocation2 + $0x20] ss:$0 sps:$4 sm:$0x11]   ;;  %v5695_v49 = vld [vmem:[#allocation2 + $0x68] ss:$0 sps:$4 sm:$0x11]  }
 0x127   : > { %4998 = vmatpush1.bf16.msra.mxu1 %v5679_v7  ;;  %v2417_v7 = vrot.slane %v5694_v23, 1  ;;  %v1513_v38 = vrot.slane %v5695_v49, 1  ;;  %v950_v50 = vld [vmem:[#allocation2 + $0x6c] sm:$0xe]  ;;  %v5699_v29 = vld [vmem:[#allocation2 + $0x70] sm:$0xf] }
 0x128   : > { %4983 = vmatprep.subr.bf16.mxu1 %v5680_v12  ;;  %v2461_v36 = vrot.slane %v4823_v42, 1  ;;  %v1071_v12 = vld [vmem:[#allocation2 + $0x24] sm:$0xe]  ;;  %v5697_v56 = vld [vmem:[#allocation3 + $0x2f4] ss:$8 sps:$4 sm:$0xff]   ;;  %v4721_v28 = vcombine.low %v950_v50, %v5699_v29 }
 0x129   : > { %4086 = vmatmul.mubr.bf16.gmra.mrb[52].mxu0 %v6427_v58  ;;  %v5682_v58 = vld [vmem:[#allocation3 + $0x2a0] ss:$8 sps:$4 sm:$0xff]   ;;  %v2418_v63 = vsel %vm1487_vm5, %v2416_v44, %v2417_v7  ;;  %v5702_v52 = vld [vmem:[#allocation2 + $0x74] ss:$0 sps:$4 sm:$0x11]  }
 0x12a   : > { %4095 = vmatprep.mubr.bf16.mxu0 %v2339_v43  ;;  %3620 = vmatmul.mubr.bf16.gmra.mrb[20].mxu1 %v1505_v34  ;;  %v4720_v43 = vcombine.low %v949_v40, %v5691_v62  ;;  %v2462_v34 = vrot.slane %v6490_v27, 1  ;;  %v5696_v27 = vld [vmem:[#allocation3 + $0x2e0] ss:$8 sps:$4 sm:$0xff]   ;;  %v1515_v30 = vrot.slane %v4721_v28, 1  ;;  %v977_v8 = vld [vmem:[#allocation2 + $0x84] sm:$0xf] }
 0x12b   : > { %3629 = vmatprep.mubr.bf16.mxu1 %v6113_v19  ;;  %4999 = vmatpush1.bf16.msra.mxu1 %v5682_v58  ;;  %v4719_v19 = vcombine.low %v948_v9, %v5684_v1  ;;  %v4809_v58 = vcombine.low %v1071_v12, %v5698_v10  ;;  %v5701_v1 = vld [vmem:[#allocation2 + $0x2c] ss:$0 sps:$4 sm:$0x11]   ;;  %v951_v55 = vld [vmem:[#allocation2 + $0x78] sm:$0xe] }
 0x12c   : > { %4984 = vmatprep.subr.bf16.mxu1 %v5683_v4  ;;  %v6538_v45 = vsel %vm1487_vm5, %v2461_v36, %v2462_v34  ;;  %v1512_v51 = vrot.slane %v4720_v43, 1  ;;  %v5703_v17 = vld [vmem:[#allocation2 + $0x34] sm:$0xf]  ;;  %v5704_v6 = vld [vmem:[#allocation2 + $0x7c] sm:$0xf] }
 0x12d   : > { %v1509_v14 = vrot.slane %v4719_v19, 1  ;;  %v2420_v19 = vrot.slane %v5701_v1, 1  ;;  %v4722_v26 = vcombine.low %v951_v55, %v5704_v6  ;;  %v5705_v42 = vld [vmem:[#allocation2 + $0x38] ss:$0 sps:$4 sm:$0x11]  }
 0x12e   : > { %v1514_v9 = vsel %vm1487_vm5, %v1512_v51, %v1513_v38  ;;  %v1073_v62 = vld [vmem:[#allocation2 + $0x3c] sm:$0xe]  ;;  %v979_v34 = vld [vmem:[#allocation2 + $0x90] sm:$0xf]  ;;  %v5707_v23 = vld [vmem:[#allocation2 + $0x40] sm:$0xf] }
 0x12f   : > { %5000 = vmatpush1.bf16.msra.mxu1 %v5685_v3  ;;  %v1072_v3 = vld [vmem:[#allocation2 + $0x30] sm:$0xe]  ;;  %v1518_v43 = vrot.slane %v4722_v26, 1  ;;  %v4811_v7 = vcombine.low %v1073_v62, %v5707_v23  ;;  %v5708_v38 = vld [vmem:[#allocation2 + $0x44] ss:$0 sps:$4 sm:$0x11]  }
 0x130   : > { %4985 = vmatprep.subr.bf16.mxu1 %v5686_v25  ;;  %v1516_v25 = vrot.slane %v5702_v52, 1  ;;  %v981_v50 = vld [vmem:[#allocation2 + $0x9c] sm:$0xf]  ;;  %v5709_v10 = vld [vmem:[#allocation2 + $0x4c] sm:$0xf] }
 0x131   : > { %4096 = vmatmul.mubr.bf16.gmra.mrb[56].mxu0 %v6455_v31  ;;  %v5689_v31 = vld [vmem:[#allocation3 + $0x2d4] ss:$8 sps:$4 sm:$0xff]   ;;  %v2425_v49 = vrot.slane %v4811_v7, 1  ;;  %v5710_v28 = vld [vmem:[#allocation2 + $0x50] ss:$0 sps:$4 sm:$0x11]  }
 0x132   : > { %4105 = vmatprep.mubr.bf16.mxu0 %v2351_v16  ;;  %3630 = vmatmul.mubr.bf16.gmra.mrb[24].mxu1 %v1508_v57  ;;  %v5700_v16 = vld [vmem:[#allocation3 + $0x2f0] ss:$8 sps:$4 sm:$0xff]   ;;  %v2419_v57 = vrot.slane %v4809_v58, 1  ;;  %v1517_v40 = vsel %vm1487_vm5, %v1515_v30, %v1516_v25  ;;  %v5711_v30 = vld [vmem:[#allocation2 + $0x58] sm:$0xf] }
 0x133   : > { %3639 = vmatprep.mubr.bf16.mxu1 %v6159_v35  ;;  %5001 = vmatpush1.bf16.msra.mxu1 %v5688_v15  ;;  %v1511_v35 = vsel %vm1487_vm5, %v1509_v14, %v1510_v46  ;;  %v6550_v14 = vld [vmem:[#allocation2 + $0x88] sm:$0xf]  ;;  %v4810_v15 = vcombine.low %v1072_v3, %v5703_v17  ;;  %v5712_v55 = vld [vmem:[#allocation2 + $0x5c] ss:$0 sps:$4 sm:$0x11]  }
 0x134   : > { %4986 = vmatprep.subr.bf16.mxu1 %v5689_v31  ;;  %v2421_v46 = vsel %vm1487_vm5, %v2419_v57, %v2420_v19  ;;  %v6555_v31 = vcombine.low %v977_v8, %v6550_v14  ;;  %v1075_v57 = vld [vmem:[#allocation2 + $0x54] sm:$0xe]  ;;  %v983_v1 = vld [vmem:[#allocation2 + $0xa8] sm:$0xf]  ;;  %v6577_v19 = vld [vmem:[#allocation2 + $0xac] sm:$0xf] }
 0x135   : > { %v2422_v60 = vrot.slane %v4810_v15, 1  ;;  %v4813_v52 = vcombine.low %v1075_v57, %v5711_v30  ;;  %v6581_v25 = vcombine.low %v983_v1, %v6577_v19  ;;  %v985_v17 = vld [vmem:[#allocation2 + $0xb4] sm:$0xf]  ;;  %v6586_v15 = vld [vmem:[#allocation2 + $0xb8] sm:$0xf] }
 0x136   : > { %v5713_v6 = vld [vmem:[#allocation2 + $0x64] sm:$0xf]  ;;  %v5627_v23 = vld [vmem:[#allocation2 + $0x74] ss:$0 sps:$4 sm:$0x11]  }
 0x137   : > { %5002 = vmatpush1.bf16.msra.mxu1 %v5692_v54  ;;  %v5706_v54 = vld [vmem:[#allocation2 + $0x80] ss:$0 sps:$4 sm:$0x11]   ;;  %v2431_v8 = vrot.slane %v4813_v52, 1 }
 0x138   : > { %4987 = vmatprep.subr.bf16.mxu1 %v5693_v37  ;;  %v1519_v36 = vrot.slane %v5706_v54, 1  ;;  %v6559_v37 = vld [vmem:[#allocation2 + $0x94] sm:$0xf]  ;;  %v1013_v54 = vld [vmem:[#allocation2 + $0x6c] sm:$0xe] }
 0x139   : > { %4106 = vmatmul.mubr.bf16.gmra.mrb[60].mxu0 %v6478_v24  ;;  %v975_v24 = vld [vmem:[#allocation2 + $0x78] sm:$0xf]  ;;  %v6564_v51 = vcombine.low %v979_v34, %v6559_v37  ;;  %v5631_v52 = vld [vmem:[#allocation2 + $0x8c] ss:$0 sps:$4 sm:$0x11]  }
 0x13a   : > { %4148 = vmatprep.mubr.bf16.mxu0 %v5758_v0  ;;  %3640 = vmatmul.mubr.bf16.gmra.mrb[28].mxu1 %v1511_v35  ;;  %v6546_v4 = vcombine.low %v975_v24, %v6541_v20  ;;  %v2423_v35 = vrot.slane %v5705_v42, 1  ;;  %v1520_v12 = vsel %vm1487_vm5, %v1518_v43, %v1519_v36  ;;  %v1074_v24 = vld [vmem:[#allocation2 + $0x48] sm:$0xe]  ;;  %v6595_v43 = vld [vmem:[#allocation2 + $0xc4] sm:$0xf] }
 0x13b   : > { %3649 = vmatprep.mubr.bf16.mxu1 %v6531_v39  ;;  %5003 = vmatpush1.bf16.msra.mxu1 %v5696_v27  ;;  %v2426_v27 = vrot.slane %v5708_v38, 1  ;;  %v4812_v58 = vcombine.low %v1074_v24, %v5709_v10  ;;  %v1793_v38 = vshrl.u32 %v6531_v39, 16  ;;  %v1800_v24 = vshll.u32 %v5627_v23, 16 }
 0x13c   : > { %4988 = vmatprep.subr.bf16.mxu1 %v5697_v56  ;;  %v2424_v44 = vsel %vm1487_vm5, %v2422_v60, %v2423_v35  ;;  %v6568_v56 = vld [vmem:[#allocation2 + $0xa0] sm:$0xf]  ;;  %v6590_v60 = vcombine.low %v985_v17, %v6586_v15  ;;  %v5714_v35 = vld [vmem:[#allocation2 + $0x68] ss:$0 sps:$4 sm:$0x11]   ;;  %v1807_v10 = vshll.u32 %v6546_v4, 16 }
 0x13d   : > { %v2428_v29 = vrot.slane %v4812_v58, 1  ;;  %v2435_v62 = vrot.slane %v5714_v35, 1  ;;  %v1805_v57 = vshrl.u32 %v6546_v4, 16  ;;  %v1983_v17 = vrot.slane %v5631_v52, 1 }
 0x13e   : > { %v1809_v1 = vrot.slane %v1807_v10, 1 }
 0x13f   : > { %5004 = vmatpush1.bf16.msra.mxu1 %v5700_v16  ;;  %v2429_v16 = vrot.slane %v5710_v28, 1 }
 0x141   : > { %4149 = vmatmul.mubr.bf16.vlgmr.msra.gmra.mrb[0].mxu0 %v2418_v63  ;;  %v2427_v63 = vsel %vm1487_vm5, %v2425_v49, %v2426_v27  ;;  %v2430_v3 = vsel %vm1487_vm5, %v2428_v29, %v2429_v16  ;;  %v1014_v49 = vld [vmem:[#allocation2 + $0x78] sm:$0xe]  ;;  %v1802_v29 = vrot.slane %v1800_v24, 1  ;;  %v1015_v16 = vld [vmem:[#allocation2 + $0x84] sm:$0xe] }
 0x142   : > { %4158 = vmatprep.mubr.bf16.mxu0 %v5758_v0  ;;  %3650 = vmatmul.mubr.bf16.gmra.mrb[32].mxu1 %v1514_v9  ;;  %v6572_v9 = vcombine.low %v981_v50, %v6568_v56  ;;  %v4769_v50 = vcombine.low %v1014_v49, %v6541_v20  ;;  %v4770_v30 = vcombine.low %v1015_v16, %v6550_v14  ;;  %v1855_v16 = vshll.u32 %v6581_v25, 16 }
 0x143   : > { %3659 = vmatprep.mubr.bf16.mxu1 %v6546_v4 }
 0x144   : > { %v1843_v24 = vshll.u32 %v6572_v9, 16 }
 0x149   : > { %4159 = vmatmul.mubr.bf16.gmra.mrb[4].mxu0 %v2421_v46  ;;  %v2432_v46 = vrot.slane %v5712_v55, 1  ;;  %v2444_v55 = vrot.slane %v6356_v22, 1 }
 0x14a   : > { %4168 = vmatprep.mubr.bf16.mxu0 %v5758_v0  ;;  %3660 = vmatmul.mubr.bf16.gmra.mrb[36].mxu1 %v1517_v40 }
 0x14b   : > { %3669 = vmatprep.mubr.bf16.mxu1 %v6555_v31  ;;  %v2433_v40 = vsel %vm1487_vm5, %v2431_v8, %v2432_v46  ;;  %v1810_v46 = vor.u32 %v1809_v1, %v1805_v57 }
 0x151   : > { %4169 = vmatmul.mubr.bf16.gmra.mrb[8].mxu0 %v2424_v44  ;;  %v4768_v44 = vcombine.low %v1013_v54, %v6527_v59 }
 0x152   : > { %4178 = vmatprep.mubr.bf16.mxu0 %v5758_v0  ;;  %3670 = vmatmul.mubr.bf16.gmra.mrb[40].mxu1 %v1520_v12  ;;  %v1977_v12 = vrot.slane %v5627_v23, 1 }
 0x153   : > { %3679 = vmatprep.mubr.bf16.mxu1 %v6564_v51  ;;  %v1976_v7 = vrot.slane %v4768_v44, 1 }
 0x155   : > { %v1978_v59 = vsel %vm1487_vm5, %v1976_v7, %v1977_v12  ;;  %v1829_v7 = vshrl.u32 %v6564_v51, 16 }
 0x159   : > { %4179 = vmatmul.mubr.bf16.gmra.mrb[12].mxu0 %v2427_v63  ;;  %v5629_v63 = vld [vmem:[#allocation2 + $0x80] ss:$0 sps:$4 sm:$0x11]  }
 0x15a   : > { %4188 = vmatprep.mubr.bf16.mxu0 %v5758_v0  ;;  %3680 = vmatmul.mubr.bf16.gmra.mrb[44].mxu1 %v6424_v5  ;;  %v1076_v5 = vld [vmem:[#allocation2 + $0x60] sm:$0xe]  ;;  %v1980_v28 = vrot.slane %v5629_v63, 1 }
 0x15b   : > { %3689 = vmatprep.mubr.bf16.mxu1 %v6572_v9  ;;  %v4814_v26 = vcombine.low %v1076_v5, %v5713_v6  ;;  %v1982_v5 = vrot.slane %v4770_v30, 1  ;;  %v1817_v6 = vshrl.u32 %v6555_v31, 16  ;;  %v1857_v30 = vrot.slane %v1855_v16, 1 }
 0x15d   : > { %v2434_v42 = vrot.slane %v4814_v26, 1  ;;  %v1984_v22 = vsel %vm1487_vm5, %v1982_v5, %v1983_v17 }
 0x15f   : > { %v2436_v36 = vsel %vm1487_vm5, %v2434_v42, %v2435_v62  ;;  %v1824_v42 = vshll.u32 %v5631_v52, 16  ;;  %v5633_v62 = vld [vmem:[#allocation2 + $0x98] ss:$0 sps:$4 sm:$0x11]  }
 0x160   : > { %v1986_v23 = vrot.slane %v5633_v62, 1  ;;  %v1836_v12 = vshll.u32 %v5633_v62, 16 }
 0x161   : > { %4189 = vmatmul.mubr.bf16.gmra.mrb[16].mxu0 %v2430_v3  ;;  %v1812_v3 = vshll.u32 %v5629_v63, 16 }
 0x162   : > { %4198 = vmatprep.mubr.bf16.mxu0 %v5758_v0  ;;  %3690 = vmatmul.mubr.bf16.gmra.mrb[48].mxu1 %v6433_v21  ;;  %v987_v21 = vld [vmem:[#allocation2 + $0xc0] sm:$0xf] }
 0x163   : > { %3699 = vmatprep.mubr.bf16.mxu1 %v6581_v25  ;;  %v6599_v34 = vcombine.low %v987_v21, %v6595_v43  ;;  %v1814_v4 = vrot.slane %v1812_v3, 1  ;;  %v1831_v21 = vshll.u32 %v6564_v51, 16  ;;  %v1018_v51 = vld [vmem:[#allocation2 + $0xa8] sm:$0xe] }
 0x169   : > { %4199 = vmatmul.mubr.bf16.gmra.mrb[20].mxu0 %v2433_v40  ;;  %v1016_v40 = vld [vmem:[#allocation2 + $0x90] sm:$0xe] }
 0x16a   : > { %4208 = vmatprep.mubr.bf16.mxu0 %v5758_v0  ;;  %3700 = vmatmul.mubr.bf16.gmra.mrb[52].mxu1 %v6441_v61  ;;  %v1795_v61 = vshll.u32 %v6531_v39, 16  ;;  %v1979_v39 = vrot.slane %v4769_v50, 1  ;;  %v4771_v35 = vcombine.low %v1016_v40, %v6559_v37  ;;  %v1833_v37 = vrot.slane %v1831_v21, 1 }
 0x16b   : > { %3709 = vmatprep.mubr.bf16.mxu1 %v6590_v60  ;;  %v1877_v21 = vshrl.u32 %v6599_v34, 16 }
 0x16c   : > { %v1797_v27 = vrot.slane %v1795_v61, 1  ;;  %v1985_v44 = vrot.slane %v4771_v35, 1  ;;  %v1017_v61 = vld [vmem:[#allocation2 + $0x9c] sm:$0xe]  ;;  %v1834_v50 = vor.u32 %v1833_v37, %v1829_v7 }
 0x16d   : > { %v4772_v49 = vcombine.low %v1017_v61, %v6568_v56  ;;  %v1841_v56 = vshrl.u32 %v6572_v9, 16  ;;  %v1019_v9 = vld [vmem:[#allocation2 + $0xb4] sm:$0xe] }
 0x16e   : > { %v1798_v58 = vor.u32 %v1797_v27, %v1793_v38  ;;  %v1987_v38 = vsel %vm1487_vm5, %v1985_v44, %v1986_v23  ;;  %v5635_v27 = vld [vmem:[#allocation2 + $0xa4] ss:$0 sps:$4 sm:$0x11]  }
 0x16f   : > { %v1988_v63 = vrot.slane %v4772_v49, 1 }
 0x171   : > { %4209 = vmatmul.mubr.bf16.gmra.mrb[24].mxu0 %v2436_v36  ;;  %v1826_v36 = vrot.slane %v1824_v42, 1 }
 0x172   : > { %4218 = vmatprep.mubr.bf16.mxu0 %v5758_v0  ;;  %3710 = vmatmul.mubr.bf16.gmra.mrb[56].mxu1 %v6458_v47  ;;  %v1079_v47 = vld [vmem:[#allocation2 + $0x84] sm:$0xe] }
 0x173   : > { %3719 = vmatprep.mubr.bf16.mxu1 %v6599_v34  ;;  %v4817_v20 = vcombine.low %v1079_v47, %v6340_v48  ;;  %v1819_v48 = vshll.u32 %v6555_v31, 16  ;;  %v1989_v47 = vrot.slane %v5635_v27, 1 }
 0x175   : > { %v2443_v8 = vrot.slane %v4817_v20, 1  ;;  %v1821_v26 = vrot.slane %v1819_v48, 1 }
 0x177   : > { %v2445_v14 = vsel %vm1487_vm5, %v2443_v8, %v2444_v55  ;;  %v1822_v54 = vor.u32 %v1821_v26, %v1817_v6  ;;  %v5639_v8 = vld [vmem:[#allocation2 + $0xbc] ss:$0 sps:$4 sm:$0x11]   ;;  %v1867_v55 = vshll.u32 %v6590_v60, 16  ;;  %v1879_v26 = vshll.u32 %v6599_v34, 16 }
 0x178   : > { %v1995_v5 = vrot.slane %v5639_v8, 1  ;;  %v5641_v6 = vld [vmem:[#allocation2 + $0xc8] ss:$0 sps:$4 sm:$0x11]  }
 0x179   : > { %4219 = vmatmul.mubr.bf16.gmra.mrb[28].mxu0 %v6469_v53  ;;  %v1803_v53 = vsel %vm1230_vm0, %v1798_v58, %v1802_v29  ;;  %v1827_v31 = vsel %vm1230_vm0, %v1822_v54, %v1826_v36  ;;  %v1845_v58 = vrot.slane %v1843_v24, 1  ;;  %v4773_v29 = vcombine.low %v1018_v51, %v6577_v19 }
 0x17a   : > { %4228 = vmatprep.mubr.bf16.mxu0 %v5758_v0  ;;  %3720 = vmatmul.mubr.bf16.gmra.mrb[60].mxu1 %v6464_v13  ;;  %v1981_v13 = vsel %vm1487_vm5, %v1979_v39, %v1980_v28  ;;  %v1990_v39 = vsel %vm1487_vm5, %v1988_v63, %v1989_v47  ;;  %v5637_v28 = vld [vmem:[#allocation2 + $0xb0] ss:$0 sps:$4 sm:$0x11]   ;;  %v1853_v19 = vshrl.u32 %v6581_v25, 16  ;;  %v1020_v25 = vld [vmem:[#allocation2 + $0xc0] sm:$0xe] }
 0x17b   : > { %3842 = vmatprep.mubr.bf16.mxu1 %v1978_v59  ;;  %v1838_v59 = vrot.slane %v1836_v12, 1  ;;  %v1846_v20 = vor.u32 %v1845_v58, %v1841_v56  ;;  %v1991_v57 = vrot.slane %v4773_v29, 1  ;;  %v1992_v1 = vrot.slane %v5637_v28, 1 }
 0x17c   : > { %v1858_v48 = vor.u32 %v1857_v30, %v1853_v19  ;;  %v1869_v40 = vrot.slane %v1867_v55, 1  ;;  %v1998_v62 = vrot.slane %v5641_v6, 1  ;;  %v1884_v54 = vshll.u32 %v5641_v6, 16 }
 0x17d   : > { %v1839_v10 = vsel %vm1230_vm0, %v1834_v50, %v1838_v59  ;;  %v1993_v52 = vsel %vm1487_vm5, %v1991_v57, %v1992_v1 }
 0x17e   : > { %v1886_v44 = vrot.slane %v1884_v54, 1 }
 0x181   : > { %4229 = vmatmul.mubr.bf16.gmra.mrb[32].mxu0 %v6481_v11  ;;  %v1815_v11 = vsel %vm1230_vm0, %v1810_v46, %v1814_v4 }
 0x182   : > { %4238 = vmatprep.mubr.bf16.mxu0 %v5758_v0  ;;  %3843 = vmatmul.mubr.bf16.vlgmr.msra.gmra.mrb[32].mxu1 %v1803_v53 }
 0x183   : > { %3852 = vmatprep.mubr.bf16.mxu1 %v1981_v13  ;;  %v4774_v13 = vcombine.low %v1019_v9, %v6586_v15  ;;  %v1865_v15 = vshrl.u32 %v6590_v60, 16 }
 0x185   : > { %v1994_v4 = vrot.slane %v4774_v13, 1  ;;  %v1870_v42 = vor.u32 %v1869_v40, %v1865_v15 }
 0x189   : > { %4239 = vmatmul.mubr.bf16.gmra.mrb[36].mxu0 %v2445_v14  ;;  %v4775_v14 = vcombine.low %v1020_v25, %v6595_v43  ;;  %v1881_v43 = vrot.slane %v1879_v26, 1 }
 0x18a   : > { %4248 = vmatprep.mubr.bf16.mxu0 %v5758_v0  ;;  %3853 = vmatmul.mubr.bf16.gmra.mrb[36].mxu1 %v1815_v11  ;;  %v1996_v11 = vsel %vm1487_vm5, %v1994_v4, %v1995_v5 }
 0x18b   : > { %3862 = vmatprep.mubr.bf16.mxu1 %v1984_v22  ;;  %v1997_v22 = vrot.slane %v4775_v14, 1  ;;  %v1882_v36 = vor.u32 %v1881_v43, %v1877_v21 }
 0x18d   : > { %v1887_v23 = vsel %vm1230_vm0, %v1882_v36, %v1886_v44 }
 0x191   : > { %4249 = vmatmul.mubr.bf16.gmra.mrb[40].mxu0 %v6497_v32  ;;  %v1848_v32 = vshll.u32 %v5635_v27, 16 }
 0x192   : > { %4258 = vmatprep.mubr.bf16.mxu0 %v5758_v0  ;;  %3863 = vmatmul.mubr.bf16.gmra.mrb[40].mxu1 %v1827_v31 }
 0x193   : > { %3872 = vmatprep.mubr.bf16.mxu1 %v1987_v38  ;;  %v1850_v53 = vrot.slane %v1848_v32, 1 }
 0x195   : > { %v1851_v3 = vsel %vm1230_vm0, %v1846_v20, %v1850_v53 }
 0x199   : > { %4259 = vmatmul.mubr.bf16.gmra.mrb[44].mxu0 %v6505_v33  ;;  %v1860_v33 = vshll.u32 %v5637_v28, 16 }
 0x19a   : > { %4268 = vmatprep.mubr.bf16.mxu0 %v5758_v0  ;;  %3873 = vmatmul.mubr.bf16.gmra.mrb[44].mxu1 %v1839_v10 }
 0x19b   : > { %3882 = vmatprep.mubr.bf16.mxu1 %v1990_v39  ;;  %v1862_v46 = vrot.slane %v1860_v33, 1 }
 0x19d   : > { %v1863_v17 = vsel %vm1230_vm0, %v1858_v48, %v1862_v46 }
 0x1a1   : > { %4269 = vmatmul.mubr.bf16.gmra.mrb[48].mxu0 %v6511_v41  ;;  %v1872_v41 = vshll.u32 %v5639_v8, 16 }
 0x1a2   : > { %4278 = vmatprep.mubr.bf16.mxu0 %v5758_v0  ;;  %3883 = vmatmul.mubr.bf16.gmra.mrb[48].mxu1 %v1851_v3 }
 0x1a3   : > { %3892 = vmatprep.mubr.bf16.mxu1 %v1993_v52  ;;  %v1874_v35 = vrot.slane %v1872_v41, 1 }
 0x1a5   : > { %v1875_v60 = vsel %vm1230_vm0, %v1870_v42, %v1874_v35 }
 0x1a9   : > { %4279 = vmatmul.mubr.bf16.gmra.mrb[52].mxu0 %v6516_v18  ;;  %v1999_v18 = vsel %vm1487_vm5, %v1997_v22, %v1998_v62 }
 0x1aa   : > { %4288 = vmatprep.mubr.bf16.mxu0 %v5758_v0  ;;  %3893 = vmatmul.mubr.bf16.gmra.mrb[52].mxu1 %v1863_v17 }
 0x1ab   : > { %3902 = vmatprep.mubr.bf16.mxu1 %v1996_v11 }
 0x1b1   : > { %4289 = vmatmul.mubr.bf16.gmra.mrb[56].mxu0 %v6524_v2 }
 0x1b2   : > { %4298 = vmatprep.mubr.bf16.mxu0 %v5758_v0  ;;  %3903 = vmatmul.mubr.bf16.gmra.mrb[56].mxu1 %v1875_v60 }
 0x1b3   : > { %3912 = vmatprep.mubr.bf16.mxu1 %v1999_v18 }
 0x1b9   : > { %4299 = vmatmul.mubr.bf16.gmra.mrb[60].mxu0 %v6538_v45 }
 0x1ba   : > { %3913 = vmatmul.mubr.bf16.gmra.mrb[60].mxu1 %v1887_v23 }
 0x1d5   : > { %v3571_v61 = vpop.f32.mrb[0].mxu1 }
 0x1d6   : > { %v3573_v31 = vpop.f32.mrb[1].mxu1 }
 0x1d7   : > { %v3575_v34 = vpop.f32.mrb[2].mxu1 }
 0x1d8   : > { %v3577_v7 = vpop.f32.mrb[3].mxu1 }
 0x1dd   : > { %v3581_v37 = vpop.f32.mrb[4].mxu1 }
 0x1de   : > { %v3583_v12 = vpop.f32.mrb[5].mxu1 }
 0x1df   : > { %v3585_v2 = vpop.f32.mrb[6].mxu1 }
 0x1e0   : > { %v3587_v49 = vpop.f32.mrb[7].mxu1 }
 0x1e5   : > { %v3591_v38 = vpop.f32.mrb[8].mxu1 }
 0x1e6   : > { %v6664_v27 = vpop.f32.mrb[9].mxu1 }
 0x1e7   : > { %v6666_v0 = vpop.f32.mrb[10].mxu1 }
 0x1e8   : > { %v6668_v24 = vpop.f32.mrb[11].mxu1 }
 0x1ed   : > { %v6670_v50 = vpop.f32.mrb[12].mxu1 }
 0x1ee   : > { %v6672_v59 = vpop.f32.mrb[13].mxu1 }
 0x1ef   : > { %v6674_v45 = vpop.f32.mrb[14].mxu1 }
 0x1f0   : > { %v6676_v63 = vpop.f32.mrb[15].mxu1 }
 0x1f5   : > { %v6678_v47 = vpop.f32.mrb[16].mxu1 }
 0x1f6   : > { %v6680_v51 = vpop.f32.mrb[17].mxu1 }
 0x1f7   : > { %v6682_v10 = vpop.f32.mrb[18].mxu1 }
 0x1f8   : > { %v6684_v56 = vpop.f32.mrb[19].mxu1 }
 0x1fd   : > { %v6686_v58 = vpop.f32.mrb[20].mxu1 }
 0x1fe   : > { %v6688_v32 = vpop.f32.mrb[21].mxu1 }
 0x1ff   : > { %v6690_v29 = vpop.f32.mrb[22].mxu1 }
 0x200   : > { %v6692_v39 = vpop.f32.mrb[23].mxu1 }
 0x205   : > { %v6694_v28 = vpop.f32.mrb[24].mxu1 }
 0x206   : > { %v6696_v16 = vpop.f32.mrb[25].mxu1 }
 0x207   : > { %v6698_v20 = vpop.f32.mrb[26].mxu1 }
 0x208   : > { %v6700_v53 = vpop.f32.mrb[27].mxu1 }
 0x20d   : > { %v6702_v57 = vpop.f32.mrb[28].mxu1 }
 0x20e   : > { %v6704_v1 = vpop.f32.mrb[29].mxu1 }
 0x20f   : > { %v6706_v9 = vpop.f32.mrb[30].mxu1 }
 0x210   : > { %v6708_v3 = vpop.f32.mrb[31].mxu1 }
 0x214   : > { %v4150_v19 = vpop.f32.mrb[0].mxu0 }
 0x215   : > { %v5005_v30 = vadd.f32 %v4150_v19, %v3571_v61  ;;  %v4152_v33 = vpop.f32.mrb[1].mxu0 }
 0x216   : > { %v5006_v13 = vadd.f32 %v4152_v33, %v3573_v31  ;;  %v4154_v52 = vpop.f32.mrb[2].mxu0 }
 0x217   : > { %4310 = vst.msk [vmem:[%s6714_s11] sm:$0xff] %vm4309_vm6, %v5005_v30  ;;  %v5007_v8 = vadd.f32 %v4154_v52, %v3575_v34  ;;  %v4156_v55 = vpop.f32.mrb[3].mxu0  ;;  %v4411_v46 = vmul.f32 %v5005_v30, %v5005_v30 }
 0x218   : > { %4342 = vst.msk [vmem:[%s6720_s14] sm:$0xff] %vm4309_vm6, %v5006_v13  ;;  %v5008_v48 = vadd.f32 %v4156_v55, %v3577_v7 }
 0x219   : > { %4311 = vst.msk [vmem:[%s6714_s11 + $0x8] sm:$0xff] %vm4309_vm6, %v5007_v8  ;;  %v4374_v4 = vadd.f32 %v5007_v8, %v5005_v30  ;;  %v4412_v5 = vmul.f32 %v5007_v8, %v5007_v8 }
 0x21a   : > { %4343 = vst.msk [vmem:[%s6720_s14 + $0x8] sm:$0xff] %vm4309_vm6, %v5008_v48 }
 0x21b   : > { %v4443_v25 = vadd.f32 %v4412_v5, %v4411_v46 }
 0x21c   : > { %v4160_v17 = vpop.f32.mrb[4].mxu0 }
 0x21d   : > { %v5009_v15 = vadd.f32 %v4160_v17, %v3581_v37  ;;  %v4162_v40 = vpop.f32.mrb[5].mxu0 }
 0x21e   : > { %v5010_v41 = vadd.f32 %v4162_v40, %v3583_v12  ;;  %v4164_v14 = vpop.f32.mrb[6].mxu0 }
 0x21f   : > { %4312 = vst.msk [vmem:[%s6714_s11 + $0x10] sm:$0xff] %vm4309_vm6, %v5009_v15  ;;  %v4375_v11 = vadd.f32 %v5009_v15, %v4374_v4  ;;  %v4413_v6 = vmul.f32 %v5009_v15, %v5009_v15  ;;  %v5011_v26 = vadd.f32 %v4164_v14, %v3585_v2  ;;  %v4166_v42 = vpop.f32.mrb[7].mxu0 }
 0x220   : > { %4344 = vst.msk [vmem:[%s6720_s14 + $0x10] sm:$0xff] %vm4309_vm6, %v5010_v41  ;;  %v5012_v35 = vadd.f32 %v4166_v42, %v3587_v49 }
 0x221   : > { %v4444_v22 = vadd.f32 %v4443_v25, %v4413_v6  ;;  %4313 = vst.msk [vmem:[%s6714_s11 + $0x18] sm:$0xff] %vm4309_vm6, %v5011_v26  ;;  %v4376_v62 = vadd.f32 %v5011_v26, %v4375_v11  ;;  %v4414_v60 = vmul.f32 %v5011_v26, %v5011_v26 }
 0x222   : > { %4345 = vst.msk [vmem:[%s6720_s14 + $0x18] sm:$0xff] %vm4309_vm6, %v5012_v35 }
 0x223   : > { %v4445_v21 = vadd.f32 %v4444_v22, %v4414_v60 }
 0x224   : > { %v4170_v43 = vpop.f32.mrb[8].mxu0 }
 0x225   : > { %v5013_v54 = vadd.f32 %v4170_v43, %v3591_v38  ;;  %v4172_v18 = vpop.f32.mrb[9].mxu0 }
 0x226   : > { %v5014_v36 = vadd.f32 %v4172_v18, %v6664_v27  ;;  %v4174_v44 = vpop.f32.mrb[10].mxu0 }
 0x227   : > { %4314 = vst.msk [vmem:[%s6714_s11 + $0x20] sm:$0xff] %vm4309_vm6, %v5013_v54  ;;  %v4377_v23 = vadd.f32 %v5013_v54, %v4376_v62  ;;  %v4415_v61 = vmul.f32 %v5013_v54, %v5013_v54  ;;  %v5015_v31 = vadd.f32 %v4174_v44, %v6666_v0  ;;  %v4176_v34 = vpop.f32.mrb[11].mxu0 }
 0x228   : > { %4346 = vst.msk [vmem:[%s6720_s14 + $0x20] sm:$0xff] %vm4309_vm6, %v5014_v36  ;;  %v5016_v7 = vadd.f32 %v4176_v34, %v6668_v24 }
 0x229   : > { %v4446_v37 = vadd.f32 %v4445_v21, %v4415_v61  ;;  %4315 = vst.msk [vmem:[%s6714_s11 + $0x28] sm:$0xff] %vm4309_vm6, %v5015_v31  ;;  %v4378_v12 = vadd.f32 %v5015_v31, %v4377_v23  ;;  %v4416_v2 = vmul.f32 %v5015_v31, %v5015_v31 }
 0x22a   : > { %4347 = vst.msk [vmem:[%s6720_s14 + $0x28] sm:$0xff] %vm4309_vm6, %v5016_v7 }
 0x22b   : > { %v4447_v49 = vadd.f32 %v4446_v37, %v4416_v2 }
 0x22c   : > { %v4180_v38 = vpop.f32.mrb[12].mxu0 }
 0x22d   : > { %v5017_v27 = vadd.f32 %v4180_v38, %v6670_v50  ;;  %v4182_v0 = vpop.f32.mrb[13].mxu0 }
 0x22e   : > { %v5018_v19 = vadd.f32 %v4182_v0, %v6672_v59  ;;  %v4184_v30 = vpop.f32.mrb[14].mxu0 }
 0x22f   : > { %4316 = vst.msk [vmem:[%s6714_s11 + $0x30] sm:$0xff] %vm4309_vm6, %v5017_v27  ;;  %v4379_v24 = vadd.f32 %v5017_v27, %v4378_v12  ;;  %v4417_v33 = vmul.f32 %v5017_v27, %v5017_v27  ;;  %v5019_v13 = vadd.f32 %v4184_v30, %v6674_v45  ;;  %v4186_v52 = vpop.f32.mrb[15].mxu0 }
 0x230   : > { %4348 = vst.msk [vmem:[%s6720_s14 + $0x30] sm:$0xff] %vm4309_vm6, %v5018_v19  ;;  %v5020_v8 = vadd.f32 %v4186_v52, %v6676_v63 }
 0x231   : > { %v4448_v55 = vadd.f32 %v4447_v49, %v4417_v33  ;;  %4317 = vst.msk [vmem:[%s6714_s11 + $0x38] sm:$0xff] %vm4309_vm6, %v5019_v13  ;;  %v4380_v50 = vadd.f32 %v5019_v13, %v4379_v24  ;;  %v4418_v48 = vmul.f32 %v5019_v13, %v5019_v13 }
 0x232   : > { %4349 = vst.msk [vmem:[%s6720_s14 + $0x38] sm:$0xff] %vm4309_vm6, %v5020_v8 }
 0x233   : > { %v4449_v59 = vadd.f32 %v4448_v55, %v4418_v48 }
 0x234   : > { %v4190_v46 = vpop.f32.mrb[16].mxu0 }
 0x235   : > { %v5021_v4 = vadd.f32 %v4190_v46, %v6678_v47  ;;  %v4192_v45 = vpop.f32.mrb[17].mxu0 }
 0x236   : > { %v5022_v5 = vadd.f32 %v4192_v45, %v6680_v51  ;;  %v4194_v25 = vpop.f32.mrb[18].mxu0 }
 0x237   : > { %4318 = vst.msk [vmem:[%s6714_s11 + $0x40] sm:$0xff] %vm4309_vm6, %v5021_v4  ;;  %v4381_v63 = vadd.f32 %v5021_v4, %v4380_v50  ;;  %v4419_v17 = vmul.f32 %v5021_v4, %v5021_v4  ;;  %v5023_v15 = vadd.f32 %v4194_v25, %v6682_v10  ;;  %v4196_v40 = vpop.f32.mrb[19].mxu0 }
 0x238   : > { %4350 = vst.msk [vmem:[%s6720_s14 + $0x40] sm:$0xff] %vm4309_vm6, %v5022_v5  ;;  %v5024_v41 = vadd.f32 %v4196_v40, %v6684_v56 }
 0x239   : > { %v4450_v14 = vadd.f32 %v4449_v59, %v4419_v17  ;;  %4319 = vst.msk [vmem:[%s6714_s11 + $0x48] sm:$0xff] %vm4309_vm6, %v5023_v15  ;;  %v4382_v47 = vadd.f32 %v5023_v15, %v4381_v63  ;;  %v4420_v11 = vmul.f32 %v5023_v15, %v5023_v15 }
 0x23a   : > { %4351 = vst.msk [vmem:[%s6720_s14 + $0x48] sm:$0xff] %vm4309_vm6, %v5024_v41 }
 0x23b   : > { %v4451_v51 = vadd.f32 %v4450_v14, %v4420_v11 }
 0x23c   : > { %v4200_v6 = vpop.f32.mrb[20].mxu0 }
 0x23d   : > { %v5025_v26 = vadd.f32 %v4200_v6, %v6686_v58  ;;  %v4202_v10 = vpop.f32.mrb[21].mxu0 }
 0x23e   : > { %v5026_v42 = vadd.f32 %v4202_v10, %v6688_v32  ;;  %v4204_v35 = vpop.f32.mrb[22].mxu0 }
 0x23f   : > { %4320 = vst.msk [vmem:[%s6714_s11 + $0x50] sm:$0xff] %vm4309_vm6, %v5025_v26  ;;  %v4383_v56 = vadd.f32 %v5025_v26, %v4382_v47  ;;  %v4421_v22 = vmul.f32 %v5025_v26, %v5025_v26  ;;  %v5027_v62 = vadd.f32 %v4204_v35, %v6690_v29  ;;  %v4206_v60 = vpop.f32.mrb[23].mxu0 }
 0x240   : > { %4352 = vst.msk [vmem:[%s6720_s14 + $0x50] sm:$0xff] %vm4309_vm6, %v5026_v42  ;;  %v5028_v21 = vadd.f32 %v4206_v60, %v6692_v39 }
 0x241   : > { %v4452_v43 = vadd.f32 %v4451_v51, %v4421_v22  ;;  %4321 = vst.msk [vmem:[%s6714_s11 + $0x58] sm:$0xff] %vm4309_vm6, %v5027_v62  ;;  %v4384_v58 = vadd.f32 %v5027_v62, %v4383_v56  ;;  %v4422_v54 = vmul.f32 %v5027_v62, %v5027_v62 }
 0x242   : > { %4353 = vst.msk [vmem:[%s6720_s14 + $0x58] sm:$0xff] %vm4309_vm6, %v5028_v21 }
 0x243   : > { %v4453_v32 = vadd.f32 %v4452_v43, %v4422_v54 }
 0x244   : > { %v4210_v18 = vpop.f32.mrb[24].mxu0 }
 0x245   : > { %v5029_v36 = vadd.f32 %v4210_v18, %v6694_v28  ;;  %v4212_v29 = vpop.f32.mrb[25].mxu0 }
 0x246   : > { %v5030_v44 = vadd.f32 %v4212_v29, %v6696_v16  ;;  %v4214_v23 = vpop.f32.mrb[26].mxu0 }
 0x247   : > { %4322 = vst.msk [vmem:[%s6714_s11 + $0x60] sm:$0xff] %vm4309_vm6, %v5029_v36  ;;  %v4385_v39 = vadd.f32 %v5029_v36, %v4384_v58  ;;  %v4423_v61 = vmul.f32 %v5029_v36, %v5029_v36  ;;  %v5031_v31 = vadd.f32 %v4214_v23, %v6698_v20  ;;  %v4216_v34 = vpop.f32.mrb[27].mxu0 }
 0x248   : > { %4354 = vst.msk [vmem:[%s6720_s14 + $0x60] sm:$0xff] %vm4309_vm6, %v5030_v44  ;;  %v5032_v7 = vadd.f32 %v4216_v34, %v6700_v53 }
 0x249   : > { %v4454_v37 = vadd.f32 %v4453_v32, %v4423_v61  ;;  %4323 = vst.msk [vmem:[%s6714_s11 + $0x68] sm:$0xff] %vm4309_vm6, %v5031_v31  ;;  %v4386_v28 = vadd.f32 %v5031_v31, %v4385_v39  ;;  %v4424_v12 = vmul.f32 %v5031_v31, %v5031_v31 }
 0x24a   : > { %4355 = vst.msk [vmem:[%s6720_s14 + $0x68] sm:$0xff] %vm4309_vm6, %v5032_v7 }
 0x24b   : > { %v4455_v16 = vadd.f32 %v4454_v37, %v4424_v12 }
 0x24c   : > { %v4220_v2 = vpop.f32.mrb[28].mxu0 }
 0x24d   : > { %v5033_v49 = vadd.f32 %v4220_v2, %v6702_v57  ;;  %v4222_v20 = vpop.f32.mrb[29].mxu0 }
 0x24e   : > { %v5034_v38 = vadd.f32 %v4222_v20, %v6704_v1  ;;  %v4224_v27 = vpop.f32.mrb[30].mxu0 }
 0x24f   : > { %4324 = vst.msk [vmem:[%s6714_s11 + $0x70] sm:$0xff] %vm4309_vm6, %v5033_v49  ;;  %v4387_v53 = vadd.f32 %v5033_v49, %v4386_v28  ;;  %v4425_v0 = vmul.f32 %v5033_v49, %v5033_v49  ;;  %v5035_v19 = vadd.f32 %v4224_v27, %v6706_v9  ;;  %v4226_v30 = vpop.f32.mrb[31].mxu0 }
 0x250   : > { %4356 = vst.msk [vmem:[%s6720_s14 + $0x70] sm:$0xff] %vm4309_vm6, %v5034_v38  ;;  %v5036_v24 = vadd.f32 %v4226_v30, %v6708_v3 }
 0x251   : > { %v4456_v33 = vadd.f32 %v4455_v16, %v4425_v0  ;;  %4325 = vst.msk [vmem:[%s6714_s11 + $0x78] sm:$0xff] %vm4309_vm6, %v5035_v19  ;;  %v4388_v57 = vadd.f32 %v5035_v19, %v4387_v53  ;;  %v4426_v13 = vmul.f32 %v5035_v19, %v5035_v19 }
 0x252   : > { %4357 = vst.msk [vmem:[%s6720_s14 + $0x78] sm:$0xff] %vm4309_vm6, %v5036_v24 }
 0x253   : > { %v4457_v1 = vadd.f32 %v4456_v33, %v4426_v13 }
 0x254   : > { %v4230_v52 = vpop.f32.mrb[32].mxu0 }
 0x255   : > { %v4232_v8 = vpop.f32.mrb[33].mxu0  ;;  %v3844_v55 = vpop.f32.mrb[32].mxu1 }
 0x256   : > { %v4234_v9 = vpop.f32.mrb[34].mxu0  ;;  %v5037_v50 = vadd.f32 %v4230_v52, %v3844_v55  ;;  %v3846_v48 = vpop.f32.mrb[33].mxu1 }
 0x257   : > { %v4236_v59 = vpop.f32.mrb[35].mxu0  ;;  %v5038_v3 = vadd.f32 %v4232_v8, %v3846_v48  ;;  %v3848_v46 = vpop.f32.mrb[34].mxu1 }
 0x258   : > { %4326 = vst.msk [vmem:[%s6714_s11 + $0x80] sm:$0xff] %vm4309_vm6, %v5037_v50  ;;  %v4389_v4 = vadd.f32 %v5037_v50, %v4388_v57  ;;  %v4427_v45 = vmul.f32 %v5037_v50, %v5037_v50  ;;  %v5039_v5 = vadd.f32 %v4234_v9, %v3848_v46  ;;  %v3850_v25 = vpop.f32.mrb[35].mxu1 }
 0x259   : > { %4358 = vst.msk [vmem:[%s6720_s14 + $0x80] sm:$0xff] %vm4309_vm6, %v5038_v3  ;;  %v5040_v63 = vadd.f32 %v4236_v59, %v3850_v25 }
 0x25a   : > { %v4458_v17 = vadd.f32 %v4457_v1, %v4427_v45  ;;  %4327 = vst.msk [vmem:[%s6714_s11 + $0x88] sm:$0xff] %vm4309_vm6, %v5039_v5  ;;  %v4390_v15 = vadd.f32 %v5039_v5, %v4389_v4  ;;  %v4428_v40 = vmul.f32 %v5039_v5, %v5039_v5 }
 0x25b   : > { %4359 = vst.msk [vmem:[%s6720_s14 + $0x88] sm:$0xff] %vm4309_vm6, %v5040_v63 }
 0x25c   : > { %v4240_v41 = vpop.f32.mrb[36].mxu0  ;;  %v4459_v14 = vadd.f32 %v4458_v17, %v4428_v40 }
 0x25d   : > { %v4242_v47 = vpop.f32.mrb[37].mxu0  ;;  %v3854_v11 = vpop.f32.mrb[36].mxu1 }
 0x25e   : > { %v4244_v51 = vpop.f32.mrb[38].mxu0  ;;  %v5041_v6 = vadd.f32 %v4240_v41, %v3854_v11  ;;  %v3856_v26 = vpop.f32.mrb[37].mxu1 }
 0x25f   : > { %v4246_v10 = vpop.f32.mrb[39].mxu0  ;;  %v5042_v42 = vadd.f32 %v4242_v47, %v3856_v26  ;;  %v3858_v35 = vpop.f32.mrb[38].mxu1 }
 0x260   : > { %4328 = vst.msk [vmem:[%s6714_s11 + $0x90] sm:$0xff] %vm4309_vm6, %v5041_v6  ;;  %v4391_v56 = vadd.f32 %v5041_v6, %v4390_v15  ;;  %v4429_v22 = vmul.f32 %v5041_v6, %v5041_v6  ;;  %v5043_v62 = vadd.f32 %v4244_v51, %v3858_v35  ;;  %v3860_v60 = vpop.f32.mrb[39].mxu1 }
 0x261   : > { %4360 = vst.msk [vmem:[%s6720_s14 + $0x90] sm:$0xff] %vm4309_vm6, %v5042_v42  ;;  %v5044_v21 = vadd.f32 %v4246_v10, %v3860_v60 }
 0x262   : > { %v4460_v43 = vadd.f32 %v4459_v14, %v4429_v22  ;;  %4329 = vst.msk [vmem:[%s6714_s11 + $0x98] sm:$0xff] %vm4309_vm6, %v5043_v62  ;;  %v4392_v58 = vadd.f32 %v5043_v62, %v4391_v56  ;;  %v4430_v54 = vmul.f32 %v5043_v62, %v5043_v62 }
 0x263   : > { %4361 = vst.msk [vmem:[%s6720_s14 + $0x98] sm:$0xff] %vm4309_vm6, %v5044_v21 }
 0x264   : > { %v4250_v32 = vpop.f32.mrb[40].mxu0  ;;  %v4461_v18 = vadd.f32 %v4460_v43, %v4430_v54 }
 0x265   : > { %v4252_v36 = vpop.f32.mrb[41].mxu0  ;;  %v3864_v29 = vpop.f32.mrb[40].mxu1 }
 0x266   : > { %v4254_v44 = vpop.f32.mrb[42].mxu0  ;;  %v5045_v23 = vadd.f32 %v4250_v32, %v3864_v29  ;;  %v3866_v39 = vpop.f32.mrb[41].mxu1 }
 0x267   : > { %v4256_v61 = vpop.f32.mrb[43].mxu0  ;;  %v5046_v31 = vadd.f32 %v4252_v36, %v3866_v39  ;;  %v3868_v34 = vpop.f32.mrb[42].mxu1 }
 0x268   : > { %4330 = vst.msk [vmem:[%s6714_s11 + $0xa0] sm:$0xff] %vm4309_vm6, %v5045_v23  ;;  %v4393_v7 = vadd.f32 %v5045_v23, %v4392_v58  ;;  %v4431_v37 = vmul.f32 %v5045_v23, %v5045_v23  ;;  %v5047_v28 = vadd.f32 %v4254_v44, %v3868_v34  ;;  %v3870_v12 = vpop.f32.mrb[43].mxu1 }
 0x269   : > { %4362 = vst.msk [vmem:[%s6720_s14 + $0xa0] sm:$0xff] %vm4309_vm6, %v5046_v31  ;;  %v5048_v16 = vadd.f32 %v4256_v61, %v3870_v12 }
 0x26a   : > { %v4462_v2 = vadd.f32 %v4461_v18, %v4431_v37  ;;  %4331 = vst.msk [vmem:[%s6714_s11 + $0xa8] sm:$0xff] %vm4309_vm6, %v5047_v28  ;;  %v4394_v49 = vadd.f32 %v5047_v28, %v4393_v7  ;;  %v4432_v20 = vmul.f32 %v5047_v28, %v5047_v28 }
 0x26b   : > { %4363 = vst.msk [vmem:[%s6720_s14 + $0xa8] sm:$0xff] %vm4309_vm6, %v5048_v16 }
 0x26c   : > { %v4260_v38 = vpop.f32.mrb[44].mxu0  ;;  %v4463_v27 = vadd.f32 %v4462_v2, %v4432_v20 }
 0x26d   : > { %v4262_v53 = vpop.f32.mrb[45].mxu0  ;;  %v3874_v0 = vpop.f32.mrb[44].mxu1 }
 0x26e   : > { %v4264_v19 = vpop.f32.mrb[46].mxu0  ;;  %v5049_v30 = vadd.f32 %v4260_v38, %v3874_v0  ;;  %v3876_v24 = vpop.f32.mrb[45].mxu1 }
 0x26f   : > { %v4266_v33 = vpop.f32.mrb[47].mxu0  ;;  %v5050_v57 = vadd.f32 %v4262_v53, %v3876_v24  ;;  %v3878_v13 = vpop.f32.mrb[46].mxu1 }
 0x270   : > { %4332 = vst.msk [vmem:[%s6714_s11 + $0xb0] sm:$0xff] %vm4309_vm6, %v5049_v30  ;;  %v4395_v1 = vadd.f32 %v5049_v30, %v4394_v49  ;;  %v4433_v52 = vmul.f32 %v5049_v30, %v5049_v30  ;;  %v5051_v8 = vadd.f32 %v4264_v19, %v3878_v13  ;;  %v3880_v55 = vpop.f32.mrb[47].mxu1 }
 0x271   : > { %4364 = vst.msk [vmem:[%s6720_s14 + $0xb0] sm:$0xff] %vm4309_vm6, %v5050_v57  ;;  %v5052_v9 = vadd.f32 %v4266_v33, %v3880_v55 }
 0x272   : > { %v4464_v50 = vadd.f32 %v4463_v27, %v4433_v52  ;;  %4333 = vst.msk [vmem:[%s6714_s11 + $0xb8] sm:$0xff] %vm4309_vm6, %v5051_v8  ;;  %v4396_v48 = vadd.f32 %v5051_v8, %v4395_v1  ;;  %v4434_v59 = vmul.f32 %v5051_v8, %v5051_v8 }
 0x273   : > { %4365 = vst.msk [vmem:[%s6720_s14 + $0xb8] sm:$0xff] %vm4309_vm6, %v5052_v9 }
 0x274   : > { %v4270_v3 = vpop.f32.mrb[48].mxu0  ;;  %v4465_v46 = vadd.f32 %v4464_v50, %v4434_v59 }
 0x275   : > { %v4272_v4 = vpop.f32.mrb[49].mxu0  ;;  %v3884_v45 = vpop.f32.mrb[48].mxu1 }
 0x276   : > { %v4274_v5 = vpop.f32.mrb[50].mxu0  ;;  %v5053_v25 = vadd.f32 %v4270_v3, %v3884_v45  ;;  %v3886_v63 = vpop.f32.mrb[49].mxu1 }
 0x277   : > { %v4276_v17 = vpop.f32.mrb[51].mxu0  ;;  %v5054_v15 = vadd.f32 %v4272_v4, %v3886_v63  ;;  %v3888_v40 = vpop.f32.mrb[50].mxu1 }
 0x278   : > { %4334 = vst.msk [vmem:[%s6714_s11 + $0xc0] sm:$0xff] %vm4309_vm6, %v5053_v25  ;;  %v4397_v41 = vadd.f32 %v5053_v25, %v4396_v48  ;;  %v4435_v14 = vmul.f32 %v5053_v25, %v5053_v25  ;;  %v5055_v47 = vadd.f32 %v4274_v5, %v3888_v40  ;;  %v3890_v11 = vpop.f32.mrb[51].mxu1 }
 0x279   : > { %4366 = vst.msk [vmem:[%s6720_s14 + $0xc0] sm:$0xff] %vm4309_vm6, %v5054_v15  ;;  %v5056_v51 = vadd.f32 %v4276_v17, %v3890_v11 }
 0x27a   : > { %v4466_v6 = vadd.f32 %v4465_v46, %v4435_v14  ;;  %4335 = vst.msk [vmem:[%s6714_s11 + $0xc8] sm:$0xff] %vm4309_vm6, %v5055_v47  ;;  %v4398_v26 = vadd.f32 %v5055_v47, %v4397_v41  ;;  %v4436_v10 = vmul.f32 %v5055_v47, %v5055_v47 }
 0x27b   : > { %4367 = vst.msk [vmem:[%s6720_s14 + $0xc8] sm:$0xff] %vm4309_vm6, %v5056_v51 }
 0x27c   : > { %v4280_v42 = vpop.f32.mrb[52].mxu0  ;;  %v4467_v35 = vadd.f32 %v4466_v6, %v4436_v10 }
 0x27d   : > { %v4282_v56 = vpop.f32.mrb[53].mxu0  ;;  %v3894_v22 = vpop.f32.mrb[52].mxu1 }
 0x27e   : > { %v4284_v62 = vpop.f32.mrb[54].mxu0  ;;  %v5057_v60 = vadd.f32 %v4280_v42, %v3894_v22  ;;  %v3896_v21 = vpop.f32.mrb[53].mxu1 }
 0x27f   : > { %v4286_v43 = vpop.f32.mrb[55].mxu0  ;;  %v5058_v58 = vadd.f32 %v4282_v56, %v3896_v21  ;;  %v3898_v54 = vpop.f32.mrb[54].mxu1 }
 0x280   : > { %4336 = vst.msk [vmem:[%s6714_s11 + $0xd0] sm:$0xff] %vm4309_vm6, %v5057_v60  ;;  %v4399_v32 = vadd.f32 %v5057_v60, %v4398_v26  ;;  %v4437_v18 = vmul.f32 %v5057_v60, %v5057_v60  ;;  %v5059_v36 = vadd.f32 %v4284_v62, %v3898_v54  ;;  %v3900_v29 = vpop.f32.mrb[55].mxu1 }
 0x281   : > { %4368 = vst.msk [vmem:[%s6720_s14 + $0xd0] sm:$0xff] %vm4309_vm6, %v5058_v58  ;;  %v5060_v44 = vadd.f32 %v4286_v43, %v3900_v29 }
 0x282   : > { %v4468_v23 = vadd.f32 %v4467_v35, %v4437_v18  ;;  %4337 = vst.msk [vmem:[%s6714_s11 + $0xd8] sm:$0xff] %vm4309_vm6, %v5059_v36  ;;  %v4400_v39 = vadd.f32 %v5059_v36, %v4399_v32  ;;  %v4438_v61 = vmul.f32 %v5059_v36, %v5059_v36 }
 0x283   : > { %4369 = vst.msk [vmem:[%s6720_s14 + $0xd8] sm:$0xff] %vm4309_vm6, %v5060_v44 }
 0x284   : > { %v4290_v31 = vpop.f32.mrb[56].mxu0  ;;  %v4469_v34 = vadd.f32 %v4468_v23, %v4438_v61 }
 0x285   : > { %v4292_v7 = vpop.f32.mrb[57].mxu0  ;;  %v3904_v37 = vpop.f32.mrb[56].mxu1 }
 0x286   : > { %v4294_v28 = vpop.f32.mrb[58].mxu0  ;;  %v5061_v12 = vadd.f32 %v4290_v31, %v3904_v37  ;;  %v3906_v16 = vpop.f32.mrb[57].mxu1 }
 0x287   : > { %v4296_v2 = vpop.f32.mrb[59].mxu0  ;;  %v5062_v49 = vadd.f32 %v4292_v7, %v3906_v16  ;;  %v3908_v20 = vpop.f32.mrb[58].mxu1 }
 0x288   : > { %4338 = vst.msk [vmem:[%s6714_s11 + $0xe0] sm:$0xff] %vm4309_vm6, %v5061_v12  ;;  %v4401_v38 = vadd.f32 %v5061_v12, %v4400_v39  ;;  %v4439_v27 = vmul.f32 %v5061_v12, %v5061_v12  ;;  %v5063_v53 = vadd.f32 %v4294_v28, %v3908_v20  ;;  %v3910_v0 = vpop.f32.mrb[59].mxu1 }
 0x289   : > { %4370 = vst.msk [vmem:[%s6720_s14 + $0xe0] sm:$0xff] %vm4309_vm6, %v5062_v49  ;;  %v5064_v19 = vadd.f32 %v4296_v2, %v3910_v0 }
 0x28a   : > { %v4470_v30 = vadd.f32 %v4469_v34, %v4439_v27  ;;  %4339 = vst.msk [vmem:[%s6714_s11 + $0xe8] sm:$0xff] %vm4309_vm6, %v5063_v53  ;;  %v4402_v24 = vadd.f32 %v5063_v53, %v4401_v38  ;;  %v4440_v33 = vmul.f32 %v5063_v53, %v5063_v53 }
 0x28b   : > { %4371 = vst.msk [vmem:[%s6720_s14 + $0xe8] sm:$0xff] %vm4309_vm6, %v5064_v19 }
 0x28c   : > { %v4300_v57 = vpop.f32.mrb[60].mxu0  ;;  %v4471_v13 = vadd.f32 %v4470_v30, %v4440_v33 }
 0x28d   : > { %v4302_v1 = vpop.f32.mrb[61].mxu0  ;;  %v3914_v52 = vpop.f32.mrb[60].mxu1 }
 0x28e   : > { %v4304_v8 = vpop.f32.mrb[62].mxu0  ;;  %v5065_v55 = vadd.f32 %v4300_v57, %v3914_v52  ;;  %v3916_v9 = vpop.f32.mrb[61].mxu1 }
 0x28f   : > { %v4306_v50 = vpop.f32.mrb[63].mxu0  ;;  %v5066_v48 = vadd.f32 %v4302_v1, %v3916_v9  ;;  %v3918_v59 = vpop.f32.mrb[62].mxu1 }
 0x290   : > { %4340 = vst.msk [vmem:[%s6714_s11 + $0xf0] sm:$0xff] %vm4309_vm6, %v5065_v55  ;;  %v4403_v3 = vadd.f32 %v5065_v55, %v4402_v24  ;;  %v4441_v46 = vmul.f32 %v5065_v55, %v5065_v55  ;;  %v5067_v4 = vadd.f32 %v4304_v8, %v3918_v59  ;;  %v3920_v45 = vpop.f32.mrb[63].mxu1 }
 0x291   : > { %4372 = vst.msk [vmem:[%s6720_s14 + $0xf0] sm:$0xff] %vm4309_vm6, %v5066_v48  ;;  %v5068_v5 = vadd.f32 %v4306_v50, %v3920_v45 }
 0x292   : > { %v4472_v25 = vadd.f32 %v4471_v13, %v4441_v46  ;;  %4341 = vst.msk [vmem:[%s6714_s11 + $0xf8] sm:$0xff] %vm4309_vm6, %v5067_v4  ;;  %v4404_v63 = vadd.f32 %v5067_v4, %v4403_v3  ;;  %v4442_v17 = vmul.f32 %v5067_v4, %v5067_v4 }
 0x293   : > { %4373 = vst.msk [vmem:[%s6720_s14 + $0xf8] sm:$0xff] %vm4309_vm6, %v5068_v5 }
 0x294   : > { %v4405_v15 = vrot.slane %v4404_v63, 4  ;;  %v4473_v40 = vadd.f32 %v4472_v25, %v4442_v17 }
 0x296   : > { %v4406_v41 = vadd.f32 %v4405_v15, %v4404_v63  ;;  %v4474_v14 = vrot.slane %v4473_v40, 4 }
 0x298   : > { %v4407_v47 = vrot.slane %v4406_v41, 2  ;;  %v4475_v11 = vadd.f32 %v4474_v14, %v4473_v40 }
 0x29a   : > { %v4408_v51 = vadd.f32 %v4407_v47, %v4406_v41  ;;  %v4476_v6 = vrot.slane %v4475_v11, 2 }
 0x29c   : > { %v4409_v26 = vrot.slane %v4408_v51, 1  ;;  %v4477_v10 = vadd.f32 %v4476_v6, %v4475_v11 }
 0x29e   : > { %v4478_v42 = vrot.slane %v4477_v10, 1  ;;  %v4410_v35 = vadd.f32 %v4409_v26, %v4408_v51 }
 0x2a0   : > { %v4479_v56 = vadd.f32 %v4478_v42, %v4477_v10 }
 0x2a2   : > { %v4481_v22 = vsel %vm633_vm2, %v4410_v35, %v4479_v56 }
 0x2a3   : > { %v4483_v62 = vsel %vm4482_vm7, %v4481_v22, 0.0 }
 0x2a4   : > { %4484 = vst [vmem:[%s289_s18] sm:$0xff] %v4483_v62 }
 0x2a5 PF: > { %s18_s21 = sadd.s32 1, %s5753_s21  }
 0x2a6   : > { %p15_p3 = scmp.ge.s32.totalorder %s18_s21, 4  }
 0x2a8   :  { %17 = sbr.rel (!%p15_p3) target bundleno = 1 (0x1), region = 98 }
 0x2af   :  { %4536 = vsyncpa [#allocation4], 1 }
 0x2b0   :  { %4538 = vsyncpa [#allocation4 + $0x1], 1 }

// kernel: preact_block_nhwc.3
= control target key start
LH: loop header
LB: loop body
LE: loop exit
PB: predicated region body
PF: predicated region fallthrough
CT: control target
= control target key end

     0   :  { %s5071_s18 = smov 0   ;;  %s6558_s0 = inlined_call_operand.vmem [shape: f32[2,16,16,8], index: 0, kind: input, shape index: {}]   ;;  %s6559_s1 = inlined_call_operand.vmem [shape: f32[2,16,16,8], index: 1, kind: input, shape index: {}]   ;;  %s6560_s2 = inlined_call_operand.vmem [shape: f32[1,8], index: 2, kind: input, shape index: {}]   ;;  %s6561_s3 = inlined_call_operand.vmem [shape: f32[1,8], index: 3, kind: input, shape index: {}]   ;;  %s6562_s4 = inlined_call_operand.vmem [shape: bf16[1152,128], index: 4, kind: input, shape index: {}]   ;;  %s6563_s5 = inlined_call_operand.vmem [shape: f32[2,16,16,8], index: 5, kind: output, shape index: {}]  }
   0x1 LB: > { %s3979_s19 = sadd.s32 4294967295, %s5038_s18   ;;  %p3983_p0 = scmp.ge.s32.totalorder %s5038_s18, 1  ;;  %s5038_s18 = sphi %s5071_s18, %s15_s18  }
   0x2   : > { %p197_p1 = scmp.lt.s32.totalorder %s5038_s18, 3 }
   0x4   : > { %p198_p2 = pnand %p3983_p0, %p197_p1 }
   0x5   : > { %v4806_v0 = vld [vmem:[%s6562_s4 + $0x40] sm:$0xff] (!%p198_p2)   ;;  %v5040_v2 = vmov (!%p198_p2), 0   ;;  %v4808_v3 = vld [vmem:[%s6562_s4 + $0x48] sm:$0xff] (!%p198_p2)   ;;  %p230_p3 = scmp.lt.s32.totalorder (!%p198_p2), %s3979_s19, 1  ;;  %v4810_v5 = vld [vmem:[%s6562_s4 + $0x50] sm:$0xff] (!%p198_p2)   ;;  %vm388_vm1 = vcmask (!%p198_p2), 64512  }
   0x6   : > { %201 = sbr.rel (%p198_p2) target bundleno = 568 (0x238), region = 40  ;;  %v4807_v1 = vld [vmem:[%s6562_s4] sm:$0xff] (!%p198_p2)   ;;  %437 = vst [vmem:[#allocation2] sm:$0xf] (!%p198_p2), %v5040_v2  ;;  %438 = vst [vmem:[#allocation2 + $0x4] sm:$0xf] (!%p198_p2), %v5040_v2  ;;  %4261 = vmatprep.subr.bf16.mxu0 (!%p198_p2), %v4806_v0  ;;  %4781 = vmatprep.subr.bf16.mxu1 (!%p198_p2), %v4806_v0 }
   0x7   : > { %439 = vst [vmem:[#allocation2 + $0x8] sm:$0x1] (!%p198_p2), %v5040_v2  ;;  %441 = vst [vmem:[#allocation2 + $0xcc] sm:$0xf] (!%p198_p2), %v5040_v2  ;;  %4262 = vmatpush3.bf16.msra.mxu0 (!%p198_p2), %v4807_v1  ;;  %v4809_v4 = vld [vmem:[%s6562_s4 + $0x8] sm:$0xff] (!%p198_p2)   ;;  %4789 = vmatpush3.bf16.msra.mxu1 (!%p198_p2), %v4807_v1  ;;  %v4811_v6 = vld [vmem:[%s6562_s4 + $0x10] sm:$0xff] (!%p198_p2)  }
   0x8   : > { %442 = vst [vmem:[#allocation2 + $0xd0] sm:$0xf] (!%p198_p2), %v5040_v2  ;;  %443 = vst [vmem:[#allocation2 + $0xd4] sm:$0x1] (!%p198_p2), %v5040_v2  ;;  %4263 = vmatprep.subr.bf16.mxu0 (!%p198_p2), %v4808_v3  ;;  %4782 = vmatprep.subr.bf16.mxu1 (!%p198_p2), %v4808_v3  ;;  %v4812_v7 = vld [vmem:[%s6562_s4 + $0x58] sm:$0xff] (!%p198_p2)   ;;  %v4814_v9 = vld [vmem:[%s6562_s4 + $0x60] sm:$0xff] (!%p198_p2)  }
   0x9   : > { %v4813_v8 = vld [vmem:[%s6562_s4 + $0x18] sm:$0xff] (!%p198_p2)   ;;  %v4815_v10 = vld [vmem:[%s6562_s4 + $0x20] sm:$0xff] (!%p198_p2)   ;;  %v4816_v11 = vld [vmem:[%s6562_s4 + $0x68] sm:$0xff] (!%p198_p2)   ;;  %vm1185_vm0 = vsmask.f32 (!%p198_p2), 7424  ;;  %vm588_vm2 = vcmask (!%p198_p2), 1040384  }
   0xa   : > { %v5132_v18 = vld [vmem:[%s6560_s2] ss:$0 sm:$0xff] (!%p198_p2)  ;;  %v4817_v20 = vld [vmem:[%s6562_s4 + $0x28] sm:$0xff] (!%p198_p2)   ;;  %v4818_v26 = vld [vmem:[%s6562_s4 + $0x70] sm:$0xff] (!%p198_p2)   ;;  %vm589_vm3 = vsmask.f32 (!%p198_p2), 256 }
   0xb   : > { %4264 = vmatpush3.bf16.msra.mxu0 (!%p198_p2), %v4809_v4  ;;  %4790 = vmatpush3.bf16.msra.mxu1 (!%p198_p2), %v4809_v4  ;;  %v5137_v19 = vld [vmem:[%s6561_s3] ss:$0 sm:$0xff] (!%p198_p2)  ;;  %v4819_v36 = vld [vmem:[%s6562_s4 + $0x30] sm:$0xff] (!%p198_p2)   ;;  %v4820_v39 = vld [vmem:[%s6562_s4 + $0x78] sm:$0xff] (!%p198_p2)   ;;  %vm1442_vm5 = vcmask (!%p198_p2), 1046528  }
   0xc   : > { %4265 = vmatprep.subr.bf16.mxu0 (!%p198_p2), %v4810_v5  ;;  %4783 = vmatprep.subr.bf16.mxu1 (!%p198_p2), %v4810_v5  ;;  %v4821_v43 = vld [vmem:[%s6562_s4 + $0x38] sm:$0xff] (!%p198_p2)   ;;  %v4828_v49 = vld [vmem:[%s6562_s4 + $0xc0] sm:$0xff] (!%p198_p2)   ;;  %vm5195_vm4 = vmand (!%p198_p2), %vm588_vm2, %vm589_vm3 }
   0xd   : > { %s6567_s19 = smov (!%p230_p3, %s3979_s19), 1  ;;  %v848_v12 = vld [vmem:[#allocation2] sm:$0xf]  ;;  %v5120_v13 = vld [vmem:[#allocation2 + $0x4] sm:$0xf] }
   0xe   : > { %s5103_s11 = sshll.u32 %s6567_s19, 8  ;;  %v5123_v14 = vcombine.low %v848_v12, %v5120_v13  ;;  %v5125_v15 = vld [vmem:[#allocation2 + $0x8] ss:$0 sps:$4 sm:$0x11]   ;;  %v4831_v50 = vld [vmem:[%s6562_s4 + $0x140] sm:$0xff]  }
   0xf   : > { %4266 = vmatpush3.bf16.msra.mxu0 %v4811_v6  ;;  %4791 = vmatpush3.bf16.msra.mxu1 %v4811_v6  ;;  %s5115_s20 = scalar_lea.vmem %s6558_s0, %s5103_s11  ;;  %v1194_v23 = vshll.u32 %v5125_v15, 16  ;;  %v4833_v5 = vld [vmem:[%s6562_s4 + $0x100] sm:$0xff]   ;;  %s6395_s21 = scalar_lea.vmem %s6559_s1, %s5103_s11 }
  0x10   : > { %4267 = vmatprep.subr.bf16.mxu0 %v4812_v7  ;;  %4784 = vmatprep.subr.bf16.mxu1 %v4812_v7  ;;  %v246_v16 = vld [vmem:[%s5115_s20] sm:$0xff]  ;;  %v247_v17 = vld [vmem:[%s5115_s20 + $0x8] sm:$0xff]  ;;  %v1187_v21 = vshrl.u32 %v5123_v14, 16  ;;  %v1189_v22 = vshll.u32 %v5123_v14, 16  ;;  %v268_v24 = vld [vmem:[%s5115_s20 + $0xb0] sm:$0xff]  ;;  %s6413_s24 = scalar_lea.vmem %s6563_s5, %s5103_s11 }
  0x11   : > { %v269_v25 = vld [vmem:[%s5115_s20 + $0xb8] sm:$0xff]  ;;  %v285_v27 = vmul.f32 %v5132_v18, %v246_v16  ;;  %v286_v28 = vmul.f32 %v5132_v18, %v247_v17  ;;  %v307_v29 = vmul.f32 %v5132_v18, %v268_v24  ;;  %v1196_v31 = vrot.slane %v1194_v23, 1  ;;  %v248_v53 = vld [vmem:[%s5115_s20 + $0x10] sm:$0xff]  ;;  %v270_v58 = vld [vmem:[%s5115_s20 + $0xc0] sm:$0xff] }
  0x12   : > { %v1191_v30 = vrot.slane %v1189_v22, 1  ;;  %v308_v32 = vmul.f32 %v5132_v18, %v269_v25  ;;  %v249_v54 = vld [vmem:[%s5115_s20 + $0x18] sm:$0xff]  ;;  %v287_v56 = vmul.f32 %v5132_v18, %v248_v53  ;;  %v271_v59 = vld [vmem:[%s5115_s20 + $0xc8] sm:$0xff]  ;;  %v309_v62 = vmul.f32 %v5132_v18, %v270_v58  ;;  %v250_v25 = vld [vmem:[%s5115_s20 + $0x20] sm:$0xff] }
  0x13   : > { %4268 = vmatpush3.bf16.msra.mxu0 %v4813_v8  ;;  %4792 = vmatpush3.bf16.msra.mxu1 %v4813_v8  ;;  %v324_v33 = vadd.f32 %v5137_v19, %v285_v27  ;;  %v325_v34 = vadd.f32 %v5137_v19, %v286_v28  ;;  %v346_v35 = vadd.f32 %v5137_v19, %v307_v29  ;;  %v272_v27 = vld [vmem:[%s5115_s20 + $0xd0] sm:$0xff]  ;;  %v1444_v53 = vrot.slane %v5125_v15, 1 }
  0x14   : > { %4269 = vmatprep.subr.bf16.mxu0 %v4814_v9  ;;  %4785 = vmatprep.subr.bf16.mxu1 %v4814_v9  ;;  %v1192_v37 = vor.u32 %v1191_v30, %v1187_v21  ;;  %v347_v38 = vadd.f32 %v5137_v19, %v308_v32  ;;  %v288_v57 = vmul.f32 %v5132_v18, %v249_v54 }
  0x15   : > { %v356_v40 = vmax.f32 %v324_v33, 0.0  ;;  %v357_v41 = vmax.f32 %v325_v34, 0.0  ;;  %v378_v42 = vmax.f32 %v346_v35, 0.0  ;;  %v310_v63 = vmul.f32 %v5132_v18, %v271_v59 }
  0x16   : > { %v1197_v44 = vsel %vm1185_vm0, %v1192_v37, %v1196_v31  ;;  %v379_v45 = vmax.f32 %v347_v38, 0.0  ;;  %v326_v2 = vadd.f32 %v5137_v19, %v287_v56  ;;  %v327_v3 = vadd.f32 %v5137_v19, %v288_v57 }
  0x17   : > { %4270 = vmatpush3.bf16.msra.mxu0 %v4815_v10  ;;  %4793 = vmatpush3.bf16.msra.mxu1 %v4815_v10  ;;  %v389_v46 = vsel %vm388_vm1, %v356_v40, 0.0  ;;  %v390_v47 = vsel %vm388_vm1, %v357_v41, 0.0  ;;  %v411_v48 = vsel %vm388_vm1, %v378_v42, 0.0  ;;  %v348_v6 = vadd.f32 %v5137_v19, %v309_v62  ;;  %v274_v62 = vld [vmem:[%s5115_s20 + $0xe0] sm:$0xff] }
  0x18   : > { %4271 = vmatprep.subr.bf16.mxu0 %v4816_v11  ;;  %4786 = vmatprep.subr.bf16.mxu1 %v4816_v11  ;;  %v421_v51 = vpack.c.bf16 %v390_v47, %v389_v46  ;;  %v412_v52 = vsel %vm388_vm1, %v379_v45, 0.0  ;;  %v349_v7 = vadd.f32 %v5137_v19, %v310_v63  ;;  %v358_v10 = vmax.f32 %v326_v2, 0.0 }
  0x19   : > { %3043 = vmatprep.mubr.bf16.mxu0 %v1197_v44  ;;  %v432_v55 = vpack.c.bf16 %v412_v52, %v411_v48  ;;  %v359_v11 = vmax.f32 %v327_v3, 0.0  ;;  %v380_v17 = vmax.f32 %v348_v6, 0.0  ;;  %v289_v40 = vmul.f32 %v5132_v18, %v250_v25  ;;  %v4849_v48 = vld [vmem:[%s6562_s4 + $0x108] sm:$0xff]  }
  0x1a   : > { %v445_v60 = vshrl.u32 %v421_v51, 16  ;;  %v448_v61 = vshll.u32 %v421_v51, 16  ;;  %v391_v24 = vsel %vm388_vm1, %v358_v10, 0.0  ;;  %v311_v46 = vmul.f32 %v5132_v18, %v272_v27 }
  0x1b   : > { %4272 = vmatpush3.bf16.msra.mxu0 %v4817_v20  ;;  %4794 = vmatpush3.bf16.msra.mxu1 %v4817_v20  ;;  %v522_v0 = vshrl.u32 %v432_v55, 16  ;;  %v525_v1 = vshll.u32 %v432_v55, 16  ;;  %v381_v20 = vmax.f32 %v349_v7, 0.0  ;;  %v392_v30 = vsel %vm388_vm1, %v359_v11, 0.0 }
  0x1c   : > { %4273 = vmatprep.subr.bf16.mxu0 %v4818_v26  ;;  %4787 = vmatprep.subr.bf16.mxu1 %v4818_v26  ;;  %v447_v4 = vrot.slane %v445_v60, 7  ;;  %v251_v26 = vld [vmem:[%s5115_s20 + $0x28] sm:$0xff]  ;;  %v413_v31 = vsel %vm388_vm1, %v380_v17, 0.0  ;;  %v422_v35 = vpack.c.bf16 %v392_v30, %v391_v24  ;;  %v328_v45 = vadd.f32 %v5137_v19, %v289_v40  ;;  %v252_v60 = vld [vmem:[%s5115_s20 + $0x30] sm:$0xff] }
  0x1d   : > { %v524_v9 = vrot.slane %v522_v0, 7  ;;  %v290_v44 = vmul.f32 %v5132_v18, %v251_v26  ;;  %v350_v55 = vadd.f32 %v5137_v19, %v311_v46  ;;  %v291_v3 = vmul.f32 %v5132_v18, %v252_v60 }
  0x1e   : > { %v450_v12 = vor.u32 %v448_v61, %v447_v4  ;;  %v607_v16 = vsel %vm5195_vm4, %v447_v4, 0  ;;  %v452_v41 = vshrl.u32 %v422_v35, 16  ;;  %v455_v42 = vshll.u32 %v422_v35, 16  ;;  %v253_v61 = vld [vmem:[%s5115_s20 + $0x38] sm:$0xff] }
  0x1f   : > { %4274 = vmatpush3.bf16.msra.mxu0 %v4819_v36  ;;  %4795 = vmatpush3.bf16.msra.mxu1 %v4819_v36  ;;  %v3994_v21 = vcombine.low %v607_v16, %v607_v16  ;;  %v527_v22 = vor.u32 %v525_v1, %v524_v9  ;;  %v618_v23 = vsel %vm5195_vm4, %v524_v9, 0  ;;  %v4847_v36 = vld [vmem:[%s6562_s4 + $0x148] sm:$0xff]   ;;  %v329_v52 = vadd.f32 %v5137_v19, %v290_v44 }
  0x20   : > { %4275 = vmatprep.subr.bf16.mxu0 %v4820_v39  ;;  %4788 = vmatprep.subr.bf16.mxu1 %v4820_v39  ;;  %v591_v28 = vsel %vm5195_vm4, 0, %v450_v12  ;;  %v4027_v29 = vcombine.low %v618_v23, %v618_v23  ;;  %v414_v39 = vsel %vm388_vm1, %v381_v20, 0.0  ;;  %v360_v54 = vmax.f32 %v328_v45, 0.0 }
  0x21   : > { %v3992_v32 = vcombine.low %v591_v28, %v591_v28  ;;  %v3993_v33 = vcombine.high %v591_v28, %v591_v28  ;;  %802 = vst [vmem:[#allocation2 + $0x14] sm:$0x1] %v3994_v21  ;;  %v602_v34 = vsel %vm5195_vm4, 0, %v527_v22  ;;  %v361_v59 = vmax.f32 %v329_v52, 0.0 }
  0x22   : > { %v4025_v37 = vcombine.low %v602_v34, %v602_v34  ;;  %v4026_v38 = vcombine.high %v602_v34, %v602_v34  ;;  %835 = vst [vmem:[#allocation2 + $0x98] sm:$0x1] %v4027_v29  ;;  %v393_v1 = vsel %vm388_vm1, %v360_v54, 0.0  ;;  %v292_v7 = vmul.f32 %v5132_v18, %v253_v61  ;;  %v4830_v54 = vld [vmem:[%s6562_s4 + $0xc8] sm:$0xff]  }
  0x23   : > { %4276 = vmatpush3.bf16.msra.mxu0 %v4821_v43  ;;  %4796 = vmatpush3.bf16.msra.mxu1 %v4821_v43  ;;  %800 = vst [vmem:[#allocation2 + $0xc] sm:$0xf] %v3992_v32  ;;  %801 = vst [vmem:[#allocation2 + $0x10] sm:$0xf] %v3993_v33  ;;  %v433_v43 = vpack.c.bf16 %v414_v39, %v413_v31  ;;  %v313_v9 = vmul.f32 %v5132_v18, %v274_v62  ;;  %v394_v33 = vsel %vm388_vm1, %v361_v59, 0.0 }
  0x24   : > { %4373 = vmatprep.subr.bf16.mxu1 %v4828_v49  ;;  %4485 = vmatprep.subr.bf16.mxu0 %v4831_v50  ;;  %833 = vst [vmem:[#allocation2 + $0x90] sm:$0xf] %v4025_v37  ;;  %834 = vst [vmem:[#allocation2 + $0x94] sm:$0xf] %v4026_v38  ;;  %v454_v49 = vrot.slane %v452_v41, 7  ;;  %v382_v37 = vmax.f32 %v350_v55, 0.0  ;;  %v330_v41 = vadd.f32 %v5137_v19, %v291_v3 }
  0x25   : > { %v529_v50 = vshrl.u32 %v433_v43, 16  ;;  %v532_v51 = vshll.u32 %v433_v43, 16  ;;  %v275_v38 = vld [vmem:[%s5115_s20 + $0xe8] sm:$0xff] }
  0x26   : > { %3044 = vmatmul.mubr.bf16.vlgmr.msra.gmra.mrb[0].mxu0 %v5123_v14  ;;  %v273_v14 = vld [vmem:[%s5115_s20 + $0xd8] sm:$0xff]  ;;  %v457_v56 = vor.u32 %v455_v42, %v454_v49  ;;  %v608_v57 = vsel %vm5195_vm4, %v454_v49, 0  ;;  %v5256_v42 = vadd.f32 %v5137_v19, %v292_v7  ;;  %v415_v46 = vsel %vm388_vm1, %v382_v37, 0.0 }
  0x27   : > { %4486 = vmatpush3.bf16.msra.mxu0 %v4833_v5  ;;  %v312_v47 = vmul.f32 %v5132_v18, %v273_v14  ;;  %v531_v58 = vrot.slane %v529_v50, 7  ;;  %v3997_v0 = vcombine.low %v608_v57, %v608_v57  ;;  %v362_v57 = vmax.f32 %v330_v41, 0.0 }
  0x28   : > { %4487 = vmatprep.subr.bf16.mxu0 %v4847_v36  ;;  %v5235_v63 = vld [vmem:[#allocation2 + $0x14] ss:$0 sps:$4 sm:$0x11]   ;;  %v592_v5 = vsel %vm5195_vm4, 0, %v457_v56  ;;  %v423_v36 = vpack.c.bf16 %v394_v33, %v393_v1  ;;  %v363_v62 = vmax.f32 %v5256_v42, 0.0 }
  0x29   : > { %v351_v2 = vadd.f32 %v5137_v19, %v312_v47  ;;  %v4827_v4 = vld [vmem:[#allocation2 + $0x98] ss:$0 sps:$4 sm:$0x11]   ;;  %v534_v6 = vor.u32 %v532_v51, %v531_v58  ;;  %v1206_v12 = vshll.u32 %v5235_v63, 16  ;;  %v3995_v16 = vcombine.low %v592_v5, %v592_v5  ;;  %805 = vst [vmem:[#allocation2 + $0x20] sm:$0x1] %v3997_v0 }
  0x2a   : > { %v850_v10 = vld [vmem:[#allocation2 + $0xc] sm:$0xf]  ;;  %v5244_v11 = vld [vmem:[#allocation2 + $0x10] sm:$0xf]  ;;  %v3996_v17 = vcombine.high %v592_v5, %v592_v5  ;;  %v619_v20 = vsel %vm5195_vm4, %v531_v58, 0  ;;  %v1338_v24 = vshll.u32 %v4827_v4, 16  ;;  %v314_v51 = vmul.f32 %v5132_v18, %v275_v38 }
  0x2b   : > { %4488 = vmatpush3.bf16.msra.mxu0 %v4849_v48  ;;  %v4041_v21 = vcombine.low %v850_v10, %v5244_v11  ;;  %v872_v22 = vld [vmem:[#allocation2 + $0x90] sm:$0xf]  ;;  %v873_v23 = vld [vmem:[#allocation2 + $0x94] sm:$0xf]  ;;  %v603_v25 = vsel %vm5195_vm4, 0, %v534_v6  ;;  %v4030_v26 = vcombine.low %v619_v20, %v619_v20  ;;  %v1208_v27 = vrot.slane %v1206_v12, 1 }
  0x2c   : > { %v4052_v28 = vcombine.low %v872_v22, %v873_v23  ;;  %803 = vst [vmem:[#allocation2 + $0x18] sm:$0xf] %v3995_v16  ;;  %804 = vst [vmem:[#allocation2 + $0x1c] sm:$0xf] %v3996_v17  ;;  %v4028_v29 = vcombine.low %v603_v25, %v603_v25  ;;  %v4029_v30 = vcombine.high %v603_v25, %v603_v25  ;;  %v1340_v32 = vrot.slane %v1338_v24, 1  ;;  %v4829_v48 = vld [vmem:[%s6562_s4 + $0x80] sm:$0xff]  }
  0x2d   : > { %v1199_v31 = vshrl.u32 %v4041_v21, 16  ;;  %v1201_v14 = vshll.u32 %v4041_v21, 16  ;;  %838 = vst [vmem:[#allocation2 + $0xa4] sm:$0x1] %v4030_v26  ;;  %v383_v40 = vmax.f32 %v351_v2, 0.0  ;;  %v459_v44 = vshrl.u32 %v423_v36, 16 }
  0x2e   : > { %v1331_v34 = vshrl.u32 %v4052_v28, 16  ;;  %v1333_v35 = vshll.u32 %v4052_v28, 16  ;;  %836 = vst [vmem:[#allocation2 + $0x9c] sm:$0xf] %v4028_v29  ;;  %837 = vst [vmem:[#allocation2 + $0xa0] sm:$0xf] %v4029_v30  ;;  %v5275_v0 = vadd.f32 %v5137_v19, %v313_v9  ;;  %v353_v17 = vadd.f32 %v5137_v19, %v314_v51 }
  0x2f   : > { %v1203_v39 = vrot.slane %v1201_v14, 1  ;;  %v462_v45 = vshll.u32 %v423_v36, 16  ;;  %v416_v50 = vsel %vm388_vm1, %v383_v40, 0.0  ;;  %v461_v55 = vrot.slane %v459_v44, 7  ;;  %v4832_v6 = vld [vmem:[%s6562_s4 + $0x88] sm:$0xff]   ;;  %v4861_v33 = vld [vmem:[%s6562_s4 + $0x110] sm:$0xff]  }
  0x30   : > { %v1335_v43 = vrot.slane %v1333_v35, 1  ;;  %v5262_v49 = vld [vmem:[#allocation2 + $0x20] ss:$0 sps:$4 sm:$0x11]   ;;  %v434_v56 = vpack.c.bf16 %v416_v50, %v415_v46  ;;  %v395_v29 = vsel %vm388_vm1, %v362_v57, 0.0  ;;  %v396_v41 = vsel %vm388_vm1, %v363_v62, 0.0 }
  0x31   : > { %v1204_v47 = vor.u32 %v1203_v39, %v1199_v31  ;;  %v1218_v61 = vshll.u32 %v5262_v49, 16  ;;  %v464_v4 = vor.u32 %v462_v45, %v461_v55  ;;  %v609_v5 = vsel %vm5195_vm4, %v461_v55, 0  ;;  %v4839_v42 = vld [vmem:[%s6562_s4 + $0x90] sm:$0xff]   ;;  %v255_v55 = vld [vmem:[%s5115_s20 + $0x48] sm:$0xff] }
  0x32   : > { %v1336_v52 = vor.u32 %v1335_v43, %v1331_v34  ;;  %v4000_v12 = vcombine.low %v609_v5, %v609_v5  ;;  %v536_v16 = vshrl.u32 %v434_v56, 16  ;;  %v4840_v43 = vld [vmem:[%s6562_s4 + $0xd8] sm:$0xff]   ;;  %v424_v45 = vpack.c.bf16 %v396_v41, %v395_v29  ;;  %v4850_v29 = vld [vmem:[%s6562_s4 + $0xe8] sm:$0xff]  }
  0x33   : > { %v1209_v58 = vsel %vm1185_vm0, %v1204_v47, %v1208_v27  ;;  %v852_v59 = vld [vmem:[#allocation2 + $0x18] sm:$0xf]  ;;  %v5270_v60 = vld [vmem:[#allocation2 + $0x1c] sm:$0xf]  ;;  %v1220_v7 = vrot.slane %v1218_v61, 1  ;;  %v593_v25 = vsel %vm5195_vm4, 0, %v464_v4 }
  0x34   : > { %3051 = vmatprep.mubr.bf16.mxu0 %v1209_v58  ;;  %v1341_v1 = vsel %vm1185_vm0, %v1336_v52, %v1340_v32  ;;  %v5279_v2 = vcombine.low %v852_v59, %v5270_v60  ;;  %v4837_v3 = vld [vmem:[#allocation2 + $0xa4] ss:$0 sps:$4 sm:$0x11]   ;;  %808 = vst [vmem:[#allocation2 + $0x2c] sm:$0x1] %v4000_v12  ;;  %v538_v26 = vrot.slane %v536_v16, 7  ;;  %v3998_v34 = vcombine.low %v593_v25, %v593_v25 }
  0x35   : > { %3139 = vmatprep.mubr.bf16.mxu1 %v1341_v1  ;;  %3052 = vmatmul.mubr.bf16.gmra.mrb[4].mxu0 %v4041_v21  ;;  %v874_v9 = vld [vmem:[#allocation2 + $0x9c] sm:$0xf]  ;;  %v875_v10 = vld [vmem:[#allocation2 + $0xa0] sm:$0xf]  ;;  %v1350_v24 = vshll.u32 %v4837_v3, 16  ;;  %v4859_v21 = vld [vmem:[%s6562_s4 + $0x150] sm:$0xff]   ;;  %v3999_v35 = vcombine.high %v593_v25, %v593_v25 }
  0x36   : > { %3140 = vmatmul.mubr.bf16.vlgmr.msra.gmra.mrb[0].mxu1 %v4052_v28  ;;  %v1211_v20 = vshrl.u32 %v5279_v2, 16  ;;  %v1213_v22 = vshll.u32 %v5279_v2, 16  ;;  %v4053_v23 = vcombine.low %v874_v9, %v875_v10  ;;  %v539_v27 = vshll.u32 %v434_v56, 16  ;;  %v4838_v32 = vld [vmem:[%s6562_s4 + $0xd0] sm:$0xff]   ;;  %4489 = vmatprep.subr.bf16.mxu0 %v4859_v21  ;;  %806 = vst [vmem:[#allocation2 + $0x24] sm:$0xf] %v3998_v34 }
  0x37   : > { %4374 = vmatpush3.bf16.msra.mxu1 %v4829_v48  ;;  %v1352_v14 = vrot.slane %v1350_v24, 1  ;;  %v620_v37 = vsel %vm5195_vm4, %v538_v26, 0  ;;  %4490 = vmatpush3.bf16.msra.mxu0 %v4861_v33  ;;  %807 = vst [vmem:[#allocation2 + $0x28] sm:$0xf] %v3999_v35  ;;  %v384_v46 = vmax.f32 %v5275_v0, 0.0  ;;  %v385_v47 = vmax.f32 %v353_v17, 0.0 }
  0x38   : > { %4375 = vmatprep.subr.bf16.mxu1 %v4830_v54  ;;  %v1215_v28 = vrot.slane %v1213_v22, 1  ;;  %v1343_v30 = vshrl.u32 %v4053_v23, 16  ;;  %v1345_v31 = vshll.u32 %v4053_v23, 16  ;;  %v541_v36 = vor.u32 %v539_v27, %v538_v26  ;;  %v254_v48 = vld [vmem:[%s5115_s20 + $0x40] sm:$0xff]  ;;  %v4841_v0 = vld [vmem:[%s6562_s4 + $0x98] sm:$0xff]  }
  0x39   : > { %v4033_v40 = vcombine.low %v620_v37, %v620_v37  ;;  %v466_v56 = vshrl.u32 %v424_v45, 16  ;;  %v469_v57 = vshll.u32 %v424_v45, 16  ;;  %v417_v58 = vsel %vm388_vm1, %v384_v46, 0.0  ;;  %v5318_v61 = vld [vmem:[#allocation2] sm:$0xe]  ;;  %v257_v16 = vld [vmem:[%s5115_s20 + $0x58] sm:$0xff] }
  0x3a   : > { %v1216_v38 = vor.u32 %v1215_v28, %v1211_v20  ;;  %v1347_v39 = vrot.slane %v1345_v31, 1  ;;  %v604_v44 = vsel %vm5195_vm4, 0, %v541_v36  ;;  %v418_v59 = vsel %vm388_vm1, %v385_v47, 0.0  ;;  %v4846_v9 = vld [vmem:[%s6562_s4 + $0xe0] sm:$0xff]   ;;  %v4873_v17 = vld [vmem:[%s6562_s4 + $0x158] sm:$0xff]  }
  0x3b   : > { %4376 = vmatpush3.bf16.msra.mxu1 %v4832_v6  ;;  %v4031_v52 = vcombine.low %v604_v44, %v604_v44  ;;  %v4032_v54 = vcombine.high %v604_v44, %v604_v44  ;;  %841 = vst [vmem:[#allocation2 + $0xb0] sm:$0x1] %v4033_v40  ;;  %v5325_v1 = vld [vmem:[#allocation2 + $0x2c] ss:$0 sps:$4 sm:$0x11]   ;;  %v435_v3 = vpack.c.bf16 %v418_v59, %v417_v58  ;;  %v468_v5 = vrot.slane %v466_v56, 7 }
  0x3c   : > { %v1221_v50 = vsel %vm1185_vm0, %v1216_v38, %v1220_v7  ;;  %v1348_v51 = vor.u32 %v1347_v39, %v1343_v30  ;;  %4377 = vmatprep.subr.bf16.mxu1 %v4838_v32  ;;  %v293_v4 = vmul.f32 %v5132_v18, %v254_v48  ;;  %v294_v6 = vmul.f32 %v5132_v18, %v255_v55  ;;  %v256_v7 = vld [vmem:[%s5115_s20 + $0x50] sm:$0xff]  ;;  %v4848_v20 = vld [vmem:[%s6562_s4 + $0xa0] sm:$0xff]   ;;  %v4875_v39 = vld [vmem:[%s6562_s4 + $0x118] sm:$0xff]  }
  0x3d   : > { %3059 = vmatprep.mubr.bf16.mxu0 %v1221_v50  ;;  %839 = vst [vmem:[#allocation2 + $0xa8] sm:$0xf] %v4031_v52  ;;  %840 = vst [vmem:[#allocation2 + $0xac] sm:$0xf] %v4032_v54  ;;  %v543_v10 = vshrl.u32 %v435_v3, 16  ;;  %v546_v12 = vshll.u32 %v435_v3, 16  ;;  %v471_v22 = vor.u32 %v469_v57, %v468_v5  ;;  %v4072_v21 = vcombine.low %v5318_v61, %v5120_v13 }
  0x3e   : > { %v1353_v62 = vsel %vm1185_vm0, %v1348_v51, %v1352_v14  ;;  %3060 = vmatmul.mubr.bf16.gmra.mrb[8].mxu0 %v5279_v2  ;;  %v1230_v2 = vshll.u32 %v5325_v1, 16  ;;  %v332_v24 = vadd.f32 %v5137_v19, %v293_v4  ;;  %v854_v25 = vld [vmem:[#allocation2 + $0x24] sm:$0xf]  ;;  %v5346_v26 = vld [vmem:[#allocation2 + $0x28] sm:$0xf]  ;;  %v295_v31 = vmul.f32 %v5132_v18, %v256_v7  ;;  %4491 = vmatprep.subr.bf16.mxu0 %v4873_v17  ;;  %v4856_v59 = vld [vmem:[%s6562_s4 + $0xf0] sm:$0xff]  }
  0x3f   : > { %3147 = vmatprep.mubr.bf16.mxu1 %v1353_v62  ;;  %4378 = vmatpush3.bf16.msra.mxu1 %v4839_v42  ;;  %v545_v30 = vrot.slane %v543_v10, 7  ;;  %v4043_v14 = vcombine.low %v854_v25, %v5346_v26  ;;  %v594_v13 = vsel %vm5195_vm4, 0, %v471_v22  ;;  %v333_v33 = vadd.f32 %v5137_v19, %v294_v6  ;;  %v4851_v48 = vld [vmem:[%s6562_s4 + $0xa8] sm:$0xff]   ;;  %v4857_v6 = vld [vmem:[%s6562_s4 + $0xb0] sm:$0xff]   ;;  %v4858_v7 = vld [vmem:[%s6562_s4 + $0xf8] sm:$0xff]  }
  0x40   : > { %3148 = vmatmul.mubr.bf16.gmra.mrb[4].mxu1 %v4053_v23  ;;  %4379 = vmatprep.subr.bf16.mxu1 %v4840_v43  ;;  %v610_v23 = vsel %vm5195_vm4, %v468_v5, 0  ;;  %v1232_v27 = vrot.slane %v1230_v2, 1  ;;  %v296_v34 = vmul.f32 %v5132_v18, %v257_v16  ;;  %v4001_v35 = vcombine.low %v594_v13, %v594_v13  ;;  %v259_v22 = vld [vmem:[%s5115_s20 + $0x68] sm:$0xff] }
  0x41   : > { %v4003_v28 = vcombine.low %v610_v23, %v610_v23  ;;  %v4002_v36 = vcombine.high %v594_v13, %v594_v13  ;;  %v548_v37 = vor.u32 %v546_v12, %v545_v30  ;;  %v621_v38 = vsel %vm5195_vm4, %v545_v30, 0  ;;  %4492 = vmatpush3.bf16.msra.mxu0 %v4875_v39  ;;  %v258_v12 = vld [vmem:[%s5115_s20 + $0x60] sm:$0xff] }
  0x42   : > { %v4845_v32 = vld [vmem:[#allocation2 + $0xb0] ss:$0 sps:$4 sm:$0x11]   ;;  %v1223_v40 = vshrl.u32 %v4043_v14, 16  ;;  %v1225_v41 = vshll.u32 %v4043_v14, 16  ;;  %v4036_v44 = vcombine.low %v621_v38, %v621_v38  ;;  %v334_v45 = vadd.f32 %v5137_v19, %v295_v31 }
  0x43   : > { %4380 = vmatpush3.bf16.msra.mxu1 %v4841_v0  ;;  %811 = vst [vmem:[#allocation2 + $0x38] sm:$0x1] %v4003_v28  ;;  %v1362_v47 = vshll.u32 %v4845_v32, 16  ;;  %809 = vst [vmem:[#allocation2 + $0x30] sm:$0xf] %v4001_v35  ;;  %v605_v50 = vsel %vm5195_vm4, 0, %v548_v37  ;;  %v297_v35 = vmul.f32 %v5132_v18, %v258_v12 }
  0x44   : > { %4381 = vmatprep.subr.bf16.mxu1 %v4846_v9  ;;  %v876_v42 = vld [vmem:[#allocation2 + $0xa8] sm:$0xf]  ;;  %v877_v43 = vld [vmem:[#allocation2 + $0xac] sm:$0xf]  ;;  %810 = vst [vmem:[#allocation2 + $0x34] sm:$0xf] %v4002_v36  ;;  %v4034_v54 = vcombine.low %v605_v50, %v605_v50  ;;  %v4035_v55 = vcombine.high %v605_v50, %v605_v50  ;;  %v335_v9 = vadd.f32 %v5137_v19, %v296_v34 }
  0x45   : > { %v4054_v46 = vcombine.low %v876_v42, %v877_v43  ;;  %v364_v51 = vmax.f32 %v332_v24, 0.0  ;;  %v1227_v52 = vrot.slane %v1225_v41, 1  ;;  %844 = vst [vmem:[#allocation2 + $0xbc] sm:$0x1] %v4036_v44  ;;  %v365_v56 = vmax.f32 %v333_v33, 0.0  ;;  %v4866_v33 = vld [vmem:[%s6562_s4 + $0x1c0] sm:$0xff]  }
  0x46   : > { %v1364_v0 = vrot.slane %v1362_v47, 1  ;;  %842 = vst [vmem:[#allocation2 + $0xb4] sm:$0xf] %v4034_v54  ;;  %843 = vst [vmem:[#allocation2 + $0xb8] sm:$0xf] %v4035_v55  ;;  %v1443_v4 = vrot.slane %v4072_v21, 1  ;;  %v298_v36 = vmul.f32 %v5132_v18, %v259_v22 }
  0x47   : > { %4382 = vmatpush3.bf16.msra.mxu1 %v4848_v20  ;;  %v1355_v57 = vshrl.u32 %v4054_v46, 16  ;;  %v1357_v58 = vshll.u32 %v4054_v46, 16  ;;  %v397_v61 = vsel %vm388_vm1, %v364_v51, 0.0  ;;  %v1228_v62 = vor.u32 %v1227_v52, %v1223_v40  ;;  %v897_v12 = vld [vmem:[#allocation2 + $0xc] sm:$0xe] }
  0x48   : > { %4383 = vmatprep.subr.bf16.mxu1 %v4850_v29  ;;  %v398_v3 = vsel %vm388_vm1, %v365_v56, 0.0  ;;  %v366_v10 = vmax.f32 %v334_v45, 0.0  ;;  %v5387_v20 = vsel %vm1442_vm5, %v1443_v4, %v1444_v53  ;;  %v367_v25 = vmax.f32 %v335_v9, 0.0  ;;  %v4883_v29 = vld [vmem:[%s6562_s4 + $0x160] sm:$0xff]   ;;  %v912_v56 = vld [vmem:[#allocation2 + $0xc] sm:$0xf] }
  0x49   : > { %v1359_v5 = vrot.slane %v1357_v58, 1  ;;  %v425_v2 = vpack.c.bf16 %v398_v3, %v397_v61  ;;  %v1233_v16 = vsel %vm1185_vm0, %v1228_v62, %v1232_v27  ;;  %4493 = vmatprep.subr.bf16.mxu0 %v4883_v29  ;;  %v336_v4 = vadd.f32 %v5137_v19, %v297_v35 }
  0x4a   : > { %v5382_v17 = vld [vmem:[#allocation2 + $0x38] ss:$0 sps:$4 sm:$0x11]   ;;  %3067 = vmatprep.mubr.bf16.mxu0 %v1233_v16  ;;  %v856_v27 = vld [vmem:[#allocation2 + $0x30] sm:$0xf]  ;;  %v399_v53 = vsel %vm388_vm1, %v366_v10, 0.0 }
  0x4b   : > { %4384 = vmatpush3.bf16.msra.mxu1 %v4851_v48  ;;  %v1360_v23 = vor.u32 %v1359_v5, %v1355_v57  ;;  %v473_v24 = vshrl.u32 %v425_v2, 16  ;;  %v476_v21 = vshll.u32 %v425_v2, 16  ;;  %3068 = vmatmul.mubr.bf16.gmra.mrb[12].mxu0 %v4043_v14  ;;  %v5393_v28 = vld [vmem:[#allocation2 + $0x34] sm:$0xf]  ;;  %v1242_v15 = vshll.u32 %v5382_v17, 16  ;;  %v4860_v14 = vld [vmem:[%s6562_s4 + $0xb8] sm:$0xff]  }
  0x4c   : > { %4385 = vmatprep.subr.bf16.mxu1 %v4856_v59  ;;  %v4044_v31 = vcombine.low %v856_v27, %v5393_v28  ;;  %v4855_v32 = vld [vmem:[#allocation2 + $0xbc] ss:$0 sps:$4 sm:$0x11]   ;;  %v400_v34 = vsel %vm388_vm1, %v367_v25, 0.0  ;;  %v4884_v48 = vld [vmem:[%s6562_s4 + $0x120] sm:$0xff]   ;;  %v337_v5 = vadd.f32 %v5137_v19, %v298_v36  ;;  %v368_v16 = vmax.f32 %v336_v4, 0.0 }
  0x4d   : > { %v1365_v30 = vsel %vm1185_vm0, %v1360_v23, %v1364_v0  ;;  %v475_v13 = vrot.slane %v473_v24, 7  ;;  %v878_v39 = vld [vmem:[#allocation2 + $0xb4] sm:$0xf]  ;;  %v879_v40 = vld [vmem:[#allocation2 + $0xb8] sm:$0xf]  ;;  %v426_v42 = vpack.c.bf16 %v400_v34, %v399_v53  ;;  %v1244_v43 = vrot.slane %v1242_v15, 1  ;;  %4494 = vmatpush3.bf16.msra.mxu0 %v4884_v48 }
  0x4e   : > { %3155 = vmatprep.mubr.bf16.mxu1 %v1365_v30  ;;  %v1235_v37 = vshrl.u32 %v4044_v31, 16  ;;  %v1237_v38 = vshll.u32 %v4044_v31, 16  ;;  %v4055_v44 = vcombine.low %v878_v39, %v879_v40  ;;  %v1374_v45 = vshll.u32 %v4855_v32, 16  ;;  %v5415_v57 = vld [vmem:[#allocation2 + $0x10] sm:$0xf]  ;;  %v4894_v53 = vld [vmem:[%s6562_s4 + $0x168] sm:$0xff]  }
  0x4f   : > { %4386 = vmatpush3.bf16.msra.mxu1 %v4857_v6  ;;  %v478_v41 = vor.u32 %v476_v21, %v475_v13  ;;  %v611_v47 = vsel %vm5195_vm4, %v475_v13, 0  ;;  %v480_v51 = vshrl.u32 %v426_v42, 16  ;;  %v483_v62 = vshll.u32 %v426_v42, 16  ;;  %v260_v23 = vld [vmem:[%s5115_s20 + $0x70] sm:$0xff]  ;;  %v261_v21 = vld [vmem:[%s5115_s20 + $0x78] sm:$0xff]  ;;  %v262_v40 = vld [vmem:[%s5115_s20 + $0x80] sm:$0xff]  ;;  %4495 = vmatprep.subr.bf16.mxu0 %v4894_v53 }
  0x50   : > { %3156 = vmatmul.mubr.bf16.gmra.mrb[8].mxu1 %v4054_v46  ;;  %4387 = vmatprep.subr.bf16.mxu1 %v4858_v7  ;;  %v1239_v50 = vrot.slane %v1237_v38, 1  ;;  %v4006_v46 = vcombine.low %v611_v47, %v611_v47  ;;  %v1367_v52 = vshrl.u32 %v4055_v44, 16  ;;  %v1369_v54 = vshll.u32 %v4055_v44, 16  ;;  %v5439_v32 = vld [vmem:[%s6560_s2] ss:$0 sm:$0xff] }
  0x51   : > { %v595_v18 = vsel %vm5195_vm4, 0, %v478_v41  ;;  %v482_v61 = vrot.slane %v480_v51, 7  ;;  %v1376_v3 = vrot.slane %v1374_v45, 1  ;;  %v369_v22 = vmax.f32 %v337_v5, 0.0  ;;  %v5454_v38 = vld [vmem:[%s6561_s3] ss:$0 sm:$0xff] }
  0x52   : > { %v4004_v55 = vcombine.low %v595_v18, %v595_v18  ;;  %v1240_v58 = vor.u32 %v1239_v50, %v1235_v37  ;;  %v4005_v59 = vcombine.high %v595_v18, %v595_v18  ;;  %814 = vst [vmem:[#allocation2 + $0x44] sm:$0x1] %v4006_v46  ;;  %v1371_v0 = vrot.slane %v1369_v54, 1  ;;  %v5449_v37 = vld [vmem:[#allocation2 + $0x1c] sm:$0xf]  ;;  %v263_v46 = vld [vmem:[%s5115_s20 + $0x88] sm:$0xff] }
  0x53   : > { %4388 = vmatpush3.bf16.msra.mxu1 %v4860_v14  ;;  %v485_v7 = vor.u32 %v483_v62, %v482_v61  ;;  %v612_v2 = vsel %vm5195_vm4, %v482_v61, 0  ;;  %v5424_v24 = vcombine.low %v912_v56, %v5415_v57  ;;  %v401_v15 = vsel %vm388_vm1, %v368_v16, 0.0  ;;  %v5479_v62 = vld [vmem:[#allocation2 + $0x18] sm:$0xe] }
  0x54   : > { %4597 = vmatprep.subr.bf16.mxu1 %v4866_v33  ;;  %812 = vst [vmem:[#allocation2 + $0x3c] sm:$0xf] %v4004_v55  ;;  %v1245_v6 = vsel %vm1185_vm0, %v1240_v58, %v1244_v43  ;;  %813 = vst [vmem:[#allocation2 + $0x40] sm:$0xf] %v4005_v59  ;;  %v1372_v9 = vor.u32 %v1371_v0, %v1367_v52  ;;  %v4009_v10 = vcombine.low %v612_v2, %v612_v2  ;;  %v914_v33 = vld [vmem:[#allocation2 + $0x18] sm:$0xf] }
  0x55   : > { %3075 = vmatprep.mubr.bf16.mxu0 %v1245_v6  ;;  %v596_v19 = vsel %vm5195_vm4, 0, %v485_v7  ;;  %v4073_v30 = vcombine.low %v897_v12, %v5244_v11  ;;  %v299_v13 = vmul.f32 %v5439_v32, %v260_v23  ;;  %v300_v35 = vmul.f32 %v5439_v32, %v261_v21  ;;  %v4897_v11 = vld [vmem:[%s6562_s4 + $0x128] sm:$0xff]   ;;  %v4868_v52 = vld [vmem:[%s6562_s4 + $0x180] sm:$0xff]   ;;  %v4904_v58 = vld [vmem:[%s6562_s4 + $0x170] sm:$0xff]  }
  0x56   : > { %3076 = vmatmul.mubr.bf16.gmra.mrb[16].mxu0 %v4044_v31  ;;  %v1377_v25 = vsel %vm1185_vm0, %v1372_v9, %v1376_v3  ;;  %v4007_v29 = vcombine.low %v596_v19, %v596_v19  ;;  %v4008_v27 = vcombine.high %v596_v19, %v596_v19  ;;  %817 = vst [vmem:[#allocation2 + $0x50] sm:$0x1] %v4009_v10  ;;  %v402_v31 = vsel %vm388_vm1, %v369_v22, 0.0  ;;  %v4905_v3 = vld [vmem:[%s6562_s4 + $0x130] sm:$0xff]   ;;  %v4880_v7 = vld [vmem:[%s6562_s4 + $0x1c8] sm:$0xff]  }
  0x57   : > { %3163 = vmatprep.mubr.bf16.mxu1 %v1377_v25  ;;  %v427_v34 = vpack.c.bf16 %v402_v31, %v401_v15  ;;  %v338_v39 = vadd.f32 %v5454_v38, %v299_v13  ;;  %v339_v45 = vadd.f32 %v5454_v38, %v300_v35  ;;  %4496 = vmatpush3.bf16.msra.mxu0 %v4897_v11  ;;  %v1446_v48 = vrot.slane %v4073_v30, 1  ;;  %v916_v23 = vld [vmem:[#allocation2 + $0x24] sm:$0xf]  ;;  %v5496_v19 = vld [vmem:[#allocation2 + $0x28] sm:$0xf] }
  0x58   : > { %3164 = vmatmul.mubr.bf16.gmra.mrb[12].mxu1 %v4055_v44  ;;  %815 = vst [vmem:[#allocation2 + $0x48] sm:$0xf] %v4007_v29  ;;  %816 = vst [vmem:[#allocation2 + $0x4c] sm:$0xf] %v4008_v27  ;;  %v1447_v50 = vrot.slane %v5235_v63, 1  ;;  %v301_v56 = vmul.f32 %v5439_v32, %v262_v40  ;;  %v5477_v63 = vcombine.low %v914_v33, %v5449_v37  ;;  %4497 = vmatprep.subr.bf16.mxu0 %v4904_v58 }
  0x59   : > { %v5442_v14 = vld [vmem:[#allocation2 + $0x44] ss:$0 sps:$4 sm:$0x11]   ;;  %3204 = vmatprep.mubr.bf16.mxu1 %v5424_v24  ;;  %v487_v43 = vshrl.u32 %v427_v34, 16  ;;  %v490_v44 = vshll.u32 %v427_v34, 16  ;;  %v370_v18 = vmax.f32 %v338_v39, 0.0  ;;  %v302_v9 = vmul.f32 %v5439_v32, %v263_v46 }
  0x5a   : > { %v1254_v42 = vshll.u32 %v5442_v14, 16  ;;  %v371_v55 = vmax.f32 %v339_v45, 0.0  ;;  %v340_v25 = vadd.f32 %v5454_v38, %v301_v56  ;;  %v4074_v11 = vcombine.low %v5479_v62, %v5270_v60  ;;  %v4895_v39 = vld [vmem:[%s6562_s4 + $0x1d0] sm:$0xff]   ;;  %v4914_v62 = vld [vmem:[%s6562_s4 + $0x138] sm:$0xff]  }
  0x5b   : > { %v858_v36 = vld [vmem:[#allocation2 + $0x3c] sm:$0xf]  ;;  %v5458_v41 = vld [vmem:[#allocation2 + $0x40] sm:$0xf]  ;;  %v489_v54 = vrot.slane %v487_v43, 7  ;;  %v403_v0 = vsel %vm388_vm1, %v370_v18, 0.0  ;;  %4498 = vmatpush3.bf16.msra.mxu0 %v4905_v3  ;;  %v341_v53 = vadd.f32 %v5454_v38, %v302_v9  ;;  %v5521_v60 = vcombine.low %v916_v23, %v5496_v19 }
  0x5c   : > { %v5463_v47 = vcombine.low %v858_v36, %v5458_v41  ;;  %v1256_v51 = vrot.slane %v1254_v42, 1  ;;  %v404_v2 = vsel %vm388_vm1, %v371_v55, 0.0  ;;  %v899_v43 = vld [vmem:[#allocation2 + $0x24] sm:$0xe]  ;;  %v264_v55 = vld [vmem:[%s5115_s20 + $0x90] sm:$0xff]  ;;  %v1449_v3 = vrot.slane %v4074_v11, 1 }
  0x5d   : > { %v5485_v4 = vld [vmem:[#allocation2 + $0x50] ss:$0 sps:$4 sm:$0x11]   ;;  %v492_v5 = vor.u32 %v490_v44, %v489_v54  ;;  %v613_v6 = vsel %vm5195_vm4, %v489_v54, 0  ;;  %v428_v21 = vpack.c.bf16 %v404_v2, %v403_v0  ;;  %v372_v44 = vmax.f32 %v340_v25, 0.0 }
  0x5e   : > { %v1247_v59 = vshrl.u32 %v5463_v47, 16  ;;  %v1249_v61 = vshll.u32 %v5463_v47, 16  ;;  %v4012_v22 = vcombine.low %v613_v6, %v613_v6  ;;  %v1266_v27 = vshll.u32 %v5485_v4, 16  ;;  %v4898_v54 = vld [vmem:[%s6562_s4 + $0x190] sm:$0xff]   ;;  %v265_v6 = vld [vmem:[%s5115_s20 + $0x98] sm:$0xff] }
  0x5f   : > { %v860_v12 = vld [vmem:[#allocation2 + $0x48] sm:$0xf]  ;;  %v5494_v16 = vld [vmem:[#allocation2 + $0x4c] sm:$0xf]  ;;  %v597_v15 = vsel %vm5195_vm4, 0, %v492_v5  ;;  %v494_v33 = vshrl.u32 %v428_v21, 16  ;;  %v4075_v9 = vcombine.low %v899_v43, %v5346_v26 }
  0x60   : > { %v1251_v10 = vrot.slane %v1249_v61, 1  ;;  %3205 = vmatmul.mubr.bf16.vlgmr.msra.gmra.mrb[16].mxu1 %v5387_v20  ;;  %v5501_v29 = vcombine.low %v860_v12, %v5494_v16  ;;  %v4010_v31 = vcombine.low %v597_v15, %v597_v15  ;;  %v4011_v13 = vcombine.high %v597_v15, %v597_v15  ;;  %820 = vst [vmem:[#allocation2 + $0x5c] sm:$0x1] %v4012_v22  ;;  %v4882_v20 = vld [vmem:[%s6562_s4 + $0x188] sm:$0xff]   ;;  %v5533_v58 = vld [vmem:[#allocation2 + $0x34] sm:$0xf] }
  0x61   : > { %4598 = vmatpush3.bf16.msra.mxu1 %v4868_v52  ;;  %3212 = vmatprep.mubr.bf16.mxu1 %v5477_v63  ;;  %v497_v36 = vshll.u32 %v428_v21, 16  ;;  %v496_v42 = vrot.slane %v494_v33, 7  ;;  %v373_v45 = vmax.f32 %v341_v53, 0.0  ;;  %v1268_v46 = vrot.slane %v1266_v27, 1  ;;  %v4910_v12 = vld [vmem:[%s6562_s4 + $0x1d8] sm:$0xff]  }
  0x62   : > { %v1252_v30 = vor.u32 %v1251_v10, %v1247_v59  ;;  %v1259_v34 = vshrl.u32 %v5501_v29, 16  ;;  %v1261_v35 = vshll.u32 %v5501_v29, 16  ;;  %4599 = vmatprep.subr.bf16.mxu1 %v4880_v7  ;;  %818 = vst [vmem:[#allocation2 + $0x54] sm:$0xf] %v4010_v31  ;;  %819 = vst [vmem:[#allocation2 + $0x58] sm:$0xf] %v4011_v13  ;;  %v1448_v52 = vsel %vm1442_vm5, %v1446_v48, %v1447_v50 }
  0x63   : > { %v499_v56 = vor.u32 %v497_v36, %v496_v42  ;;  %v614_v48 = vsel %vm5195_vm4, %v496_v42, 0  ;;  %v918_v50 = vld [vmem:[#allocation2 + $0x30] sm:$0xf]  ;;  %v405_v59 = vsel %vm388_vm1, %v372_v44, 0.0  ;;  %v406_v61 = vsel %vm388_vm1, %v373_v45, 0.0  ;;  %v4912_v26 = vld [vmem:[%s6562_s4 + $0x198] sm:$0xff]  }
  0x64   : > { %v1257_v40 = vsel %vm1185_vm0, %v1252_v30, %v1256_v51  ;;  %v1263_v18 = vrot.slane %v1261_v35, 1  ;;  %v4913_v51 = vld [vmem:[%s6562_s4 + $0x178] sm:$0xff]   ;;  %v4015_v5 = vcombine.low %v614_v48, %v614_v48  ;;  %v1450_v7 = vrot.slane %v5262_v49, 1  ;;  %v5561_v30 = vld [vmem:[%s6562_s4 + $0x200] sm:$0xff]  }
  0x65   : > { %3083 = vmatprep.mubr.bf16.mxu0 %v1257_v40  ;;  %4600 = vmatpush3.bf16.msra.mxu1 %v4882_v20  ;;  %v598_v2 = vsel %vm5195_vm4, 0, %v499_v56  ;;  %v303_v10 = vmul.f32 %v5439_v32, %v264_v55  ;;  %v304_v15 = vmul.f32 %v5439_v32, %v265_v6  ;;  %v5567_v33 = vcombine.low %v918_v50, %v5533_v58  ;;  %v4922_v40 = vld [vmem:[%s6562_s4 + $0x1e0] sm:$0xff]   ;;  %v267_v56 = vld [vmem:[%s5115_s20 + $0xa8] sm:$0xff] }
  0x66   : > { %3084 = vmatmul.mubr.bf16.gmra.mrb[20].mxu0 %v5463_v47  ;;  %v1264_v0 = vor.u32 %v1263_v18, %v1259_v34  ;;  %v429_v47 = vpack.c.bf16 %v406_v61, %v405_v59  ;;  %4601 = vmatprep.subr.bf16.mxu1 %v4895_v39  ;;  %v4013_v21 = vcombine.low %v598_v2, %v598_v2  ;;  %v1452_v42 = vrot.slane %v4075_v9, 1  ;;  %v900_v18 = vld [vmem:[#allocation2 + $0x30] sm:$0xe]  ;;  %v4924_v48 = vld [vmem:[%s6562_s4 + $0x1a0] sm:$0xff]  }
  0x67   : > { %4499 = vmatprep.subr.bf16.mxu0 %v4913_v51  ;;  %v5550_v23 = vld [vmem:[#allocation2 + $0x5c] ss:$0 sps:$4 sm:$0x11]   ;;  %v4014_v25 = vcombine.high %v598_v2, %v598_v2  ;;  %823 = vst [vmem:[#allocation2 + $0x68] sm:$0x1] %v4015_v5  ;;  %v342_v53 = vadd.f32 %v5454_v38, %v303_v10  ;;  %v1451_v11 = vsel %vm1442_vm5, %v1449_v3, %v1450_v7  ;;  %v1453_v43 = vrot.slane %v5325_v1, 1 }
  0x68   : > { %4500 = vmatpush3.bf16.msra.mxu0 %v4914_v62  ;;  %v1269_v22 = vsel %vm1185_vm0, %v1264_v0, %v1268_v46  ;;  %3213 = vmatmul.mubr.bf16.gmra.mrb[20].mxu1 %v1448_v52  ;;  %v501_v49 = vshrl.u32 %v429_v47, 16  ;;  %v504_v27 = vshll.u32 %v429_v47, 16  ;;  %v1278_v20 = vshll.u32 %v5550_v23, 16  ;;  %821 = vst [vmem:[#allocation2 + $0x60] sm:$0xf] %v4013_v21  ;;  %v266_v46 = vld [vmem:[%s5115_s20 + $0xa0] sm:$0xff] }
  0x69   : > { %3091 = vmatprep.mubr.bf16.mxu0 %v1269_v22  ;;  %3220 = vmatprep.mubr.bf16.mxu1 %v5521_v60  ;;  %v862_v31 = vld [vmem:[#allocation2 + $0x54] sm:$0xf]  ;;  %v5563_v13 = vld [vmem:[#allocation2 + $0x58] sm:$0xf]  ;;  %822 = vst [vmem:[#allocation2 + $0x64] sm:$0xf] %v4014_v25  ;;  %v343_v36 = vadd.f32 %v5454_v38, %v304_v15  ;;  %v305_v5 = vmul.f32 %v5439_v32, %v266_v46 }
  0x6a   : > { %v503_v34 = vrot.slane %v501_v49, 7  ;;  %4602 = vmatpush3.bf16.msra.mxu1 %v4898_v54  ;;  %v4047_v35 = vcombine.low %v862_v31, %v5563_v13  ;;  %v374_v39 = vmax.f32 %v342_v53, 0.0  ;;  %4733 = vmatprep.subr.bf16.mxu0 %v5561_v30  ;;  %v1280_v50 = vrot.slane %v1278_v20, 1  ;;  %v920_v47 = vld [vmem:[#allocation2 + $0x3c] sm:$0xf] }
  0x6b   : > { %4603 = vmatprep.subr.bf16.mxu1 %v4910_v12  ;;  %v375_v51 = vmax.f32 %v343_v36, 0.0  ;;  %v5594_v6 = vld [vmem:[#allocation2 + $0x40] sm:$0xf]  ;;  %v4076_v7 = vcombine.low %v900_v18, %v5393_v28  ;;  %v306_v9 = vmul.f32 %v5439_v32, %v267_v56  ;;  %v344_v49 = vadd.f32 %v5454_v38, %v305_v5  ;;  %v4955_v56 = vld [vmem:[%s6562_s4 + $0x1f8] sm:$0xff]  }
  0x6c   : > { %v506_v44 = vor.u32 %v504_v27, %v503_v34  ;;  %v615_v45 = vsel %vm5195_vm4, %v503_v34, 0  ;;  %v1271_v52 = vshrl.u32 %v4047_v35, 16  ;;  %v1273_v54 = vshll.u32 %v4047_v35, 16  ;;  %v4935_v27 = vld [vmem:[%s6562_s4 + $0x1a8] sm:$0xff]   ;;  %v4944_v34 = vld [vmem:[%s6562_s4 + $0x1f0] sm:$0xff]  }
  0x6d   : > { %v4018_v55 = vcombine.low %v615_v45, %v615_v45  ;;  %v407_v59 = vsel %vm388_vm1, %v374_v39, 0.0  ;;  %v408_v2 = vsel %vm388_vm1, %v375_v51, 0.0  ;;  %v345_v28 = vadd.f32 %v5454_v38, %v306_v9 }
  0x6e   : > { %3092 = vmatmul.mubr.bf16.gmra.mrb[24].mxu0 %v5501_v29  ;;  %v599_v1 = vsel %vm5195_vm4, 0, %v506_v44  ;;  %4604 = vmatpush3.bf16.msra.mxu1 %v4912_v26  ;;  %v4933_v29 = vld [vmem:[%s6562_s4 + $0x1e8] sm:$0xff]   ;;  %v1275_v61 = vrot.slane %v1273_v54, 1  ;;  %v430_v25 = vpack.c.bf16 %v408_v2, %v407_v59  ;;  %v1454_v53 = vsel %vm1442_vm5, %v1452_v42, %v1453_v43  ;;  %v4946_v42 = vld [vmem:[%s6562_s4 + $0x1b0] sm:$0xff]  }
  0x6f   : > { %v5591_v62 = vld [vmem:[#allocation2 + $0x68] ss:$0 sps:$4 sm:$0x11]   ;;  %v4016_v0 = vcombine.low %v599_v1, %v599_v1  ;;  %v4017_v3 = vcombine.high %v599_v1, %v599_v1  ;;  %826 = vst [vmem:[#allocation2 + $0x74] sm:$0x1] %v4018_v55  ;;  %4605 = vmatprep.subr.bf16.mxu1 %v4922_v40  ;;  %v376_v39 = vmax.f32 %v344_v49, 0.0  ;;  %v5615_v45 = vcombine.low %v920_v47, %v5594_v6 }
  0x70   : > { %3221 = vmatmul.mubr.bf16.gmra.mrb[24].mxu1 %v1451_v11  ;;  %v1276_v10 = vor.u32 %v1275_v61, %v1271_v52  ;;  %v864_v12 = vld [vmem:[#allocation2 + $0x60] sm:$0xf]  ;;  %v5599_v22 = vld [vmem:[#allocation2 + $0x64] sm:$0xf]  ;;  %v1290_v21 = vshll.u32 %v5591_v62, 16  ;;  %v508_v31 = vshrl.u32 %v430_v25, 16 }
  0x71   : > { %3228 = vmatprep.mubr.bf16.mxu1 %v5567_v33  ;;  %824 = vst [vmem:[#allocation2 + $0x6c] sm:$0xf] %v4016_v0  ;;  %825 = vst [vmem:[#allocation2 + $0x70] sm:$0xf] %v4017_v3  ;;  %v4048_v26 = vcombine.low %v864_v12, %v5599_v22  ;;  %v511_v20 = vshll.u32 %v430_v25, 16  ;;  %v377_v40 = vmax.f32 %v345_v28, 0.0 }
  0x72   : > { %4606 = vmatpush3.bf16.msra.mxu1 %v4924_v48  ;;  %v1281_v15 = vsel %vm1185_vm0, %v1276_v10, %v1280_v50  ;;  %v1292_v44 = vrot.slane %v1290_v21, 1  ;;  %v1455_v18 = vrot.slane %v4076_v7, 1  ;;  %v510_v46 = vrot.slane %v508_v31, 7  ;;  %v901_v47 = vld [vmem:[#allocation2 + $0x3c] sm:$0xe] }
  0x73   : > { %4607 = vmatprep.subr.bf16.mxu1 %v4933_v29  ;;  %3099 = vmatprep.mubr.bf16.mxu0 %v1281_v15  ;;  %v1283_v11 = vshrl.u32 %v4048_v26, 16  ;;  %v1285_v36 = vshll.u32 %v4048_v26, 16  ;;  %v410_v51 = vsel %vm388_vm1, %v377_v40, 0.0  ;;  %v1456_v59 = vrot.slane %v5382_v17, 1  ;;  %v922_v10 = vld [vmem:[#allocation2 + $0x48] sm:$0xf] }
  0x74   : > { %v513_v54 = vor.u32 %v511_v20, %v510_v46  ;;  %v616_v55 = vsel %vm5195_vm4, %v510_v46, 0  ;;  %v5638_v12 = vld [vmem:[#allocation2 + $0x4c] sm:$0xf]  ;;  %v4957_v17 = vld [vmem:[%s6562_s4 + $0x1b8] sm:$0xff]   ;;  %v4077_v15 = vcombine.low %v901_v47, %v5458_v41  ;;  %v924_v46 = vld [vmem:[#allocation2 + $0x54] sm:$0xf] }
  0x75   : > { %v1287_v43 = vrot.slane %v1285_v36, 1  ;;  %v4021_v29 = vcombine.low %v616_v55, %v616_v55  ;;  %v5646_v20 = vcombine.low %v922_v10, %v5638_v12  ;;  %v5651_v41 = vld [vmem:[#allocation2 + $0x58] sm:$0xf] }
  0x76   : > { %3100 = vmatmul.mubr.bf16.gmra.mrb[28].mxu0 %v4047_v35  ;;  %v5620_v52 = vld [vmem:[#allocation2 + $0x74] ss:$0 sps:$4 sm:$0x11]   ;;  %4608 = vmatpush3.bf16.msra.mxu1 %v4935_v27  ;;  %v409_v35 = vsel %vm388_vm1, %v376_v39, 0.0  ;;  %v600_v5 = vsel %vm5195_vm4, 0, %v513_v54  ;;  %v1457_v27 = vsel %vm1442_vm5, %v1455_v18, %v1456_v59  ;;  %v1458_v40 = vrot.slane %v4077_v15, 1 }
  0x77   : > { %4609 = vmatprep.subr.bf16.mxu1 %v4944_v34  ;;  %v1288_v48 = vor.u32 %v1287_v43, %v1283_v11  ;;  %v431_v61 = vpack.c.bf16 %v410_v51, %v409_v35  ;;  %v1302_v3 = vshll.u32 %v5620_v52, 16  ;;  %v4019_v2 = vcombine.low %v600_v5, %v600_v5  ;;  %829 = vst [vmem:[#allocation2 + $0x80] sm:$0x1] %v4021_v29  ;;  %v902_v35 = vld [vmem:[#allocation2 + $0x48] sm:$0xe] }
  0x78   : > { %3229 = vmatmul.mubr.bf16.gmra.mrb[28].mxu1 %v1454_v53  ;;  %v866_v50 = vld [vmem:[#allocation2 + $0x6c] sm:$0xf]  ;;  %v5629_v1 = vld [vmem:[#allocation2 + $0x70] sm:$0xf]  ;;  %v4020_v9 = vcombine.high %v600_v5, %v600_v5  ;;  %v5665_v59 = vcombine.low %v924_v46, %v5651_v41  ;;  %v4078_v29 = vcombine.low %v902_v35, %v5494_v16 }
  0x79   : > { %v4049_v0 = vcombine.low %v866_v50, %v5629_v1  ;;  %3236 = vmatprep.mubr.bf16.mxu1 %v5615_v45  ;;  %v1293_v7 = vsel %vm1185_vm0, %v1288_v48, %v1292_v44  ;;  %v515_v49 = vshrl.u32 %v431_v61, 16  ;;  %v518_v28 = vshll.u32 %v431_v61, 16  ;;  %827 = vst [vmem:[#allocation2 + $0x78] sm:$0xf] %v4019_v2  ;;  %v960_v5 = vld [vmem:[#allocation2 + $0xc] sm:$0xe] }
  0x7a   : > { %4610 = vmatpush3.bf16.msra.mxu1 %v4946_v42  ;;  %3107 = vmatprep.mubr.bf16.mxu0 %v1293_v7  ;;  %828 = vst [vmem:[#allocation2 + $0x7c] sm:$0xf] %v4020_v9  ;;  %v1304_v31 = vrot.slane %v1302_v3, 1  ;;  %v1459_v44 = vrot.slane %v5442_v14, 1  ;;  %v1462_v2 = vrot.slane %v5485_v4, 1 }
  0x7b   : > { %v1295_v21 = vshrl.u32 %v4049_v0, 16  ;;  %v1297_v25 = vshll.u32 %v4049_v0, 16  ;;  %4611 = vmatprep.subr.bf16.mxu1 %v4955_v56  ;;  %v517_v34 = vrot.slane %v515_v49, 7 }
  0x7c   : > { %v1460_v50 = vsel %vm1442_vm5, %v1458_v40, %v1459_v44  ;;  %v961_v40 = vld [vmem:[#allocation2 + $0x18] sm:$0xe] }
  0x7d   : > { %v1299_v53 = vrot.slane %v1297_v25, 1  ;;  %v520_v36 = vor.u32 %v518_v28, %v517_v34  ;;  %v617_v39 = vsel %vm5195_vm4, %v517_v34, 0  ;;  %v903_v25 = vld [vmem:[#allocation2 + $0x54] sm:$0xe]  ;;  %v4120_v28 = vcombine.low %v960_v5, %v5415_v57 }
  0x7e   : > { %3108 = vmatmul.mubr.bf16.gmra.mrb[32].mxu0 %v4048_v26  ;;  %4612 = vmatpush3.bf16.msra.mxu1 %v4957_v17  ;;  %v4024_v18 = vcombine.low %v617_v39, %v617_v39  ;;  %v5654_v42 = vld [vmem:[#allocation2 + $0x80] ss:$0 sps:$4 sm:$0x11]   ;;  %v1654_v57 = vshll.u32 %v5424_v24, 16 }
  0x7f   : > { %v1300_v11 = vor.u32 %v1299_v53, %v1295_v21  ;;  %v601_v43 = vsel %vm5195_vm4, 0, %v520_v36  ;;  %v1314_v48 = vshll.u32 %v5654_v42, 16  ;;  %v926_v17 = vld [vmem:[#allocation2 + $0x60] sm:$0xf]  ;;  %v5672_v21 = vld [vmem:[#allocation2 + $0x64] sm:$0xf] }
  0x80   : > { %3237 = vmatmul.mubr.bf16.gmra.mrb[32].mxu1 %v1457_v27  ;;  %v4022_v54 = vcombine.low %v601_v43, %v601_v43  ;;  %v4023_v55 = vcombine.high %v601_v43, %v601_v43  ;;  %832 = vst [vmem:[#allocation2 + $0x8c] sm:$0x1] %v4024_v18  ;;  %v868_v51 = vld [vmem:[#allocation2 + $0x78] sm:$0xf]  ;;  %v5682_v34 = vcombine.low %v926_v17, %v5672_v21  ;;  %v1907_v46 = vrot.slane %v4120_v28, 1 }
  0x81   : > { %v1305_v26 = vsel %vm1185_vm0, %v1300_v11, %v1304_v31  ;;  %3244 = vmatprep.mubr.bf16.mxu1 %v5646_v20  ;;  %v5659_v14 = vld [vmem:[#allocation2 + $0x7c] sm:$0xf]  ;;  %v1316_v7 = vrot.slane %v1314_v48, 1  ;;  %v4917_v53 = vld [vmem:[#allocation2 + $0x14] ss:$0 sps:$4 sm:$0x11]   ;;  %v4079_v11 = vcombine.low %v903_v25, %v5563_v13 }
  0x82   : > { %3115 = vmatprep.mubr.bf16.mxu0 %v1305_v26  ;;  %v4050_v56 = vcombine.low %v868_v51, %v5659_v14  ;;  %830 = vst [vmem:[#allocation2 + $0x84] sm:$0xf] %v4022_v54  ;;  %831 = vst [vmem:[#allocation2 + $0x88] sm:$0xf] %v4023_v55  ;;  %v1908_v26 = vrot.slane %v4917_v53, 1  ;;  %v1465_v54 = vrot.slane %v5550_v23, 1 }
  0x83   : > { %v1464_v43 = vrot.slane %v4079_v11, 1  ;;  %v904_v55 = vld [vmem:[#allocation2 + $0x60] sm:$0xe]  ;;  %v928_v51 = vld [vmem:[#allocation2 + $0x6c] sm:$0xf]  ;;  %v1656_v48 = vrot.slane %v1654_v57, 1 }
  0x84   : > { %v1307_v61 = vshrl.u32 %v4050_v56, 16  ;;  %v1309_v3 = vshll.u32 %v4050_v56, 16  ;;  %v5688_v13 = vld [vmem:[#allocation2 + $0x70] sm:$0xf]  ;;  %v4080_v23 = vcombine.low %v904_v55, %v5599_v22  ;;  %v277_v17 = vld [vmem:[%s5115_s20 + $0xf8] sm:$0xff]  ;;  %v1468_v22 = vrot.slane %v5591_v62, 1 }
  0x85   : > { %v4921_v5 = vld [vmem:[#allocation2 + $0x20] ss:$0 sps:$4 sm:$0x11]   ;;  %v1664_v11 = vshrl.u32 %v5477_v63, 16  ;;  %v4936_v62 = vld [vmem:[%s6562_s4 + $0x208] sm:$0xff]  }
  0x86   : > { %3116 = vmatmul.mubr.bf16.gmra.mrb[36].mxu0 %v4049_v0  ;;  %v1311_v47 = vrot.slane %v1309_v3, 1  ;;  %v1461_v0 = vrot.slane %v4078_v29, 1  ;;  %v4121_v29 = vcombine.low %v961_v40, %v5449_v37  ;;  %v1909_v3 = vsel %vm1442_vm5, %v1907_v46, %v1908_v26  ;;  %v4928_v40 = vld [vmem:[#allocation2 + $0x2c] ss:$0 sps:$4 sm:$0x11]  }
  0x87   : > { %v5669_v9 = vld [vmem:[#allocation2 + $0x8c] ss:$0 sps:$4 sm:$0x11]   ;;  %v1467_v28 = vrot.slane %v4080_v23, 1  ;;  %v1678_v26 = vshll.u32 %v5521_v60, 16 }
  0x88   : > { %3245 = vmatmul.mubr.bf16.gmra.mrb[36].mxu1 %v1460_v50  ;;  %v1312_v10 = vor.u32 %v1311_v47, %v1307_v61  ;;  %v1326_v4 = vshll.u32 %v5669_v9, 16  ;;  %v1463_v31 = vsel %vm1442_vm5, %v1461_v0, %v1462_v2  ;;  %v1659_v50 = vshll.u32 %v4917_v53, 16  ;;  %v962_v2 = vld [vmem:[#allocation2 + $0x24] sm:$0xe]  ;;  %v905_v53 = vld [vmem:[#allocation2 + $0x6c] sm:$0xe] }
  0x89   : > { %3252 = vmatprep.mubr.bf16.mxu1 %v5665_v59  ;;  %v870_v49 = vld [vmem:[#allocation2 + $0x84] sm:$0xf]  ;;  %v5674_v16 = vld [vmem:[#allocation2 + $0x88] sm:$0xf]  ;;  %v1466_v47 = vsel %vm1442_vm5, %v1464_v43, %v1465_v54  ;;  %v1910_v25 = vrot.slane %v4121_v29, 1 }
  0x8a   : > { %v1317_v27 = vsel %vm1185_vm0, %v1312_v10, %v1316_v7  ;;  %v4051_v15 = vcombine.low %v870_v49, %v5674_v16  ;;  %v1328_v18 = vrot.slane %v1326_v4, 1  ;;  %v5697_v7 = vcombine.low %v928_v51, %v5688_v13  ;;  %v276_v10 = vld [vmem:[%s5115_s20 + $0xf0] sm:$0xff]  ;;  %v932_v29 = vld [vmem:[#allocation2 + $0x84] sm:$0xf] }
  0x8b   : > { %3123 = vmatprep.mubr.bf16.mxu0 %v1317_v27  ;;  %v1661_v37 = vrot.slane %v1659_v50, 1  ;;  %v1911_v49 = vrot.slane %v4921_v5, 1  ;;  %v930_v27 = vld [vmem:[#allocation2 + $0x78] sm:$0xf]  ;;  %v4122_v4 = vcombine.low %v962_v2, %v5496_v19  ;;  %v316_v19 = vmul.f32 %v5439_v32, %v277_v17 }
  0x8c   : > { %v1319_v36 = vshrl.u32 %v4051_v15, 16  ;;  %v1321_v39 = vshll.u32 %v4051_v15, 16  ;;  %v1914_v51 = vrot.slane %v4928_v40, 1 }
  0x8d   : > { %v1912_v57 = vsel %vm1442_vm5, %v1910_v25, %v1911_v49  ;;  %v1913_v55 = vrot.slane %v4122_v4, 1  ;;  %v964_v4 = vld [vmem:[#allocation2 + $0x3c] sm:$0xe] }
  0x8e   : > { %3124 = vmatmul.mubr.bf16.gmra.mrb[40].mxu0 %v4050_v56  ;;  %v1323_v44 = vrot.slane %v1321_v39, 1  ;;  %v1652_v56 = vshrl.u32 %v5424_v24, 16  ;;  %v1666_v24 = vshll.u32 %v5477_v63, 16  ;;  %v1671_v39 = vshll.u32 %v4921_v5, 16  ;;  %v906_v5 = vld [vmem:[#allocation2 + $0x78] sm:$0xe] }
  0x8f   : > { %v4081_v63 = vcombine.low %v905_v53, %v5629_v1  ;;  %v1915_v2 = vsel %vm1442_vm5, %v1913_v55, %v1914_v51  ;;  %v4082_v17 = vcombine.low %v906_v5, %v5659_v14  ;;  %v4966_v14 = vld [vmem:[%s6562_s4 + $0x220] sm:$0xff]  }
  0x90   : > { %3253 = vmatmul.mubr.bf16.gmra.mrb[40].mxu1 %v1463_v31  ;;  %v1324_v35 = vor.u32 %v1323_v44, %v1319_v36  ;;  %v1657_v0 = vor.u32 %v1656_v48, %v1652_v56  ;;  %v1668_v36 = vrot.slane %v1666_v24, 1  ;;  %v315_v44 = vmul.f32 %v5439_v32, %v276_v10  ;;  %v4947_v56 = vld [vmem:[%s6562_s4 + $0x210] sm:$0xff]  }
  0x91   : > { %3260 = vmatprep.mubr.bf16.mxu1 %v5682_v34  ;;  %v1673_v54 = vrot.slane %v1671_v39, 1  ;;  %v1471_v32 = vrot.slane %v5620_v52, 1  ;;  %v355_v48 = vadd.f32 %v5454_v38, %v316_v19  ;;  %v1470_v50 = vrot.slane %v4081_v63, 1  ;;  %v4958_v52 = vld [vmem:[%s6562_s4 + $0x218] sm:$0xff]   ;;  %v907_v19 = vld [vmem:[#allocation2 + $0x84] sm:$0xe] }
  0x92   : > { %v1329_v61 = vsel %vm1185_vm0, %v1324_v35, %v1328_v18  ;;  %v1662_v31 = vsel %vm1185_vm0, %v1657_v0, %v1661_v37  ;;  %v1469_v18 = vsel %vm1442_vm5, %v1467_v28, %v1468_v22  ;;  %v1669_v43 = vor.u32 %v1668_v36, %v1664_v11  ;;  %v963_v35 = vld [vmem:[#allocation2 + $0x30] sm:$0xe] }
  0x93   : > { %3131 = vmatprep.mubr.bf16.mxu0 %v1329_v61  ;;  %v354_v1 = vadd.f32 %v5454_v38, %v315_v44  ;;  %v5730_v61 = vld [vmem:[#allocation2 + $0x88] sm:$0xf]  ;;  %v1683_v24 = vshll.u32 %v4928_v40, 16  ;;  %v4123_v38 = vcombine.low %v963_v35, %v5533_v58  ;;  %v387_v0 = vmax.f32 %v355_v48, 0.0  ;;  %v5752_v44 = vld [vmem:[#allocation2 + $0x94] sm:$0xf] }
  0x94   : > { %v1674_v23 = vsel %vm1185_vm0, %v1669_v43, %v1673_v54  ;;  %v1472_v37 = vsel %vm1442_vm5, %v1470_v50, %v1471_v32  ;;  %v5740_v10 = vcombine.low %v932_v29, %v5730_v61  ;;  %v1690_v28 = vshll.u32 %v5567_v33, 16 }
  0x95   : > { %v420_v49 = vsel %vm388_vm1, %v387_v0, 0.0  ;;  %v1685_v22 = vrot.slane %v1683_v24, 1  ;;  %v1916_v53 = vrot.slane %v4123_v38, 1  ;;  %v1474_v11 = vrot.slane %v5654_v42, 1  ;;  %v936_v24 = vld [vmem:[#allocation2 + $0x9c] sm:$0xf] }
  0x96   : > { %3132 = vmatmul.mubr.bf16.gmra.mrb[44].mxu0 %v4051_v15  ;;  %v5705_v15 = vld [vmem:[#allocation2 + $0x7c] sm:$0xf]  ;;  %v1473_v36 = vrot.slane %v4082_v17, 1  ;;  %v1688_v39 = vshrl.u32 %v5567_v33, 16  ;;  %v1692_v63 = vrot.slane %v1690_v28, 1  ;;  %v4124_v54 = vcombine.low %v964_v4, %v5594_v6  ;;  %v4973_v33 = vld [vmem:[%s6562_s4 + $0x228] sm:$0xff]  }
  0x97   : > { %3365 = vmatprep.mubr.bf16.mxu0 %v1909_v3  ;;  %v5717_v46 = vcombine.low %v930_v27, %v5705_v15  ;;  %v4932_v3 = vld [vmem:[#allocation2 + $0x38] ss:$0 sps:$4 sm:$0x11]   ;;  %v4083_v32 = vcombine.low %v907_v19, %v5674_v16  ;;  %v4980_v16 = vld [vmem:[%s6562_s4 + $0x230] sm:$0xff]   ;;  %v5776_v38 = vld [vmem:[#allocation2 + $0xa0] sm:$0xf] }
  0x98   : > { %3261 = vmatmul.mubr.bf16.gmra.mrb[44].mxu1 %v1466_v47  ;;  %v1680_v47 = vrot.slane %v1678_v26, 1  ;;  %v1695_v42 = vshll.u32 %v4932_v3, 16  ;;  %v4939_v26 = vld [vmem:[#allocation2 + $0x44] ss:$0 sps:$4 sm:$0x11]   ;;  %v1475_v35 = vsel %vm1442_vm5, %v1473_v36, %v1474_v11  ;;  %v1693_v6 = vor.u32 %v1692_v63, %v1688_v39 }
  0x99   : > { %3268 = vmatprep.mubr.bf16.mxu1 %v5697_v7  ;;  %v1920_v29 = vrot.slane %v4939_v26, 1  ;;  %v1700_v0 = vshrl.u32 %v5615_v45, 16  ;;  %v1707_v17 = vshll.u32 %v4939_v26, 16  ;;  %v4943_v28 = vld [vmem:[#allocation2 + $0x50] ss:$0 sps:$4 sm:$0x11]  }
  0x9a   : > { %v1697_v48 = vrot.slane %v1695_v42, 1  ;;  %v1714_v4 = vshll.u32 %v5646_v20, 16  ;;  %v1923_v11 = vrot.slane %v4943_v28, 1  ;;  %v5025_v39 = vld [vmem:[#allocation2 + $0x98] ss:$0 sps:$4 sm:$0x11]  }
  0x9b   : > { %v909_v19 = vld [vmem:[#allocation2 + $0x9c] sm:$0xe]  ;;  %v1712_v63 = vshrl.u32 %v5646_v20, 16  ;;  %v1719_v26 = vshll.u32 %v4943_v28, 16 }
  0x9c   : > { %v1716_v42 = vrot.slane %v1714_v4, 1  ;;  %v968_v4 = vld [vmem:[#allocation2 + $0x6c] sm:$0xe] }
  0x9e   : > { %3366 = vmatmul.mubr.bf16.vlgmr.msra.gmra.mrb[48].mxu0 %v1662_v31  ;;  %v1917_v31 = vrot.slane %v4932_v3, 1  ;;  %v1717_v20 = vor.u32 %v1716_v42, %v1712_v63  ;;  %v4965_v63 = vld [vmem:[#allocation2 + $0x20] ss:$0 sps:$4 sm:$0x11]   ;;  %v979_v42 = vld [vmem:[#allocation2 + $0x24] sm:$0xf] }
  0x9f   : > { %3373 = vmatprep.mubr.bf16.mxu0 %v1912_v57  ;;  %4734 = vmatpush3.bf16.msra.mxu0 %v5561_v30  ;;  %v1676_v30 = vshrl.u32 %v5521_v60, 16  ;;  %v386_v60 = vmax.f32 %v354_v1, 0.0  ;;  %v934_v57 = vld [vmem:[#allocation2 + $0x90] sm:$0xf]  ;;  %v1702_v1 = vshll.u32 %v5615_v45, 16 }
  0xa0   : > { %3269 = vmatmul.mubr.bf16.gmra.mrb[48].mxu1 %v1469_v18  ;;  %4735 = vmatprep.subr.bf16.mxu0 %v4936_v62  ;;  %v1918_v55 = vsel %vm1442_vm5, %v1916_v53, %v1917_v31  ;;  %v5764_v51 = vcombine.low %v934_v57, %v5752_v44  ;;  %v1709_v53 = vrot.slane %v1707_v17, 1  ;;  %v1480_v57 = vrot.slane %v5025_v39, 1 }
  0xa1   : > { %3276 = vmatprep.mubr.bf16.mxu1 %v5717_v46  ;;  %v419_v25 = vsel %vm388_vm1, %v386_v60, 0.0  ;;  %v1681_v58 = vor.u32 %v1680_v47, %v1676_v30  ;;  %v1919_v30 = vrot.slane %v4124_v54, 1  ;;  %v1477_v47 = vrot.slane %v5669_v9, 1  ;;  %v4987_v9 = vld [vmem:[%s6562_s4 + $0x238] sm:$0xff]  }
  0xa2   : > { %v436_v27 = vpack.c.bf16 %v420_v49, %v419_v25  ;;  %v1698_v60 = vsel %vm1185_vm0, %v1693_v6, %v1697_v48  ;;  %v1726_v6 = vshll.u32 %v5665_v59, 16  ;;  %v967_v48 = vld [vmem:[#allocation2 + $0x60] sm:$0xe] }
  0xa3   : > { %4736 = vmatpush3.bf16.msra.mxu0 %v4936_v62  ;;  %v1686_v18 = vsel %vm1185_vm0, %v1681_v58, %v1685_v22  ;;  %v1921_v49 = vsel %vm1442_vm5, %v1919_v30, %v1920_v29  ;;  %v5787_v22 = vcombine.low %v936_v24, %v5776_v38  ;;  %v940_v29 = vld [vmem:[#allocation2 + $0xb4] sm:$0xf]  ;;  %v1724_v24 = vshrl.u32 %v5665_v59, 16 }
  0xa4   : > { %4737 = vmatprep.subr.bf16.mxu0 %v4947_v56  ;;  %v550_v40 = vshrl.u32 %v436_v27, 16  ;;  %v553_v62 = vshll.u32 %v436_v27, 16  ;;  %v5024_v27 = vld [vmem:[#allocation2 + $0x94] sm:$0xf]  ;;  %v1728_v17 = vrot.slane %v1726_v6, 1 }
  0xa6   : > { %3374 = vmatmul.mubr.bf16.gmra.mrb[52].mxu0 %v1674_v23  ;;  %v5755_v43 = vrot.slane %v550_v40, 7  ;;  %v1476_v23 = vrot.slane %v4083_v32, 1  ;;  %v938_v40 = vld [vmem:[#allocation2 + $0xa8] sm:$0xf] }
  0xa7   : > { %3381 = vmatprep.mubr.bf16.mxu0 %v1915_v2  ;;  %4738 = vmatpush3.bf16.msra.mxu0 %v4947_v56  ;;  %v908_v2 = vld [vmem:[#allocation2 + $0x90] sm:$0xe] }
  0xa8   : > { %3277 = vmatmul.mubr.bf16.gmra.mrb[52].mxu1 %v1472_v37  ;;  %4739 = vmatprep.subr.bf16.mxu0 %v4958_v52  ;;  %v555_v56 = vor.u32 %v553_v62, %v5755_v43  ;;  %v1704_v37 = vrot.slane %v1702_v1, 1  ;;  %v1478_v58 = vsel %vm1442_vm5, %v1476_v23, %v1477_v47  ;;  %v4084_v45 = vcombine.low %v908_v2, %v5024_v27  ;;  %v5791_v62 = vld [vmem:[#allocation2 + $0xac] sm:$0xf]  ;;  %v910_v23 = vld [vmem:[#allocation2 + $0xa8] sm:$0xe] }
  0xa9   : > { %3284 = vmatprep.mubr.bf16.mxu1 %v5740_v10  ;;  %v5799_v32 = vcombine.low %v938_v40, %v5791_v62  ;;  %v4127_v47 = vcombine.low %v967_v48, %v5672_v21  ;;  %v622_v59 = vsel %vm5195_vm4, %v5755_v43, 0  ;;  %v911_v40 = vld [vmem:[#allocation2 + $0xb4] sm:$0xe] }
  0xaa   : > { %v606_v50 = vsel %vm5195_vm4, 0, %v555_v56  ;;  %v1479_v36 = vrot.slane %v4084_v45, 1  ;;  %v5026_v56 = vld [vmem:[#allocation2 + $0xa0] sm:$0xf] }
  0xab   : > { %4740 = vmatpush3.bf16.msra.mxu0 %v4958_v52  ;;  %v4037_v3 = vcombine.low %v606_v50, %v606_v50  ;;  %v4038_v5 = vcombine.high %v606_v50, %v606_v50  ;;  %v965_v52 = vld [vmem:[#allocation2 + $0x48] sm:$0xe]  ;;  %v4085_v1 = vcombine.low %v909_v19, %v5026_v56  ;;  %v1721_v50 = vrot.slane %v1719_v26, 1 }
  0xac   : > { %4741 = vmatprep.subr.bf16.mxu0 %v4966_v14  ;;  %v4125_v25 = vcombine.low %v965_v52, %v5638_v12  ;;  %v1705_v12 = vor.u32 %v1704_v37, %v1700_v0  ;;  %v978_v0 = vld [vmem:[#allocation2 + $0x1c] sm:$0xf]  ;;  %v4039_v19 = vcombine.low %v622_v59, %v622_v59 }
  0xad   : > { %845 = vst [vmem:[#allocation2 + $0xc0] sm:$0xf] %v4037_v3  ;;  %846 = vst [vmem:[#allocation2 + $0xc4] sm:$0xf] %v4038_v5  ;;  %v5802_v3 = vld [vmem:[#allocation2 + $0xb8] sm:$0xf]  ;;  %v1722_v37 = vsel %vm1185_vm0, %v1717_v20, %v1721_v50 }
  0xae   : > { %3382 = vmatmul.mubr.bf16.gmra.mrb[56].mxu0 %v1686_v18  ;;  %v1922_v31 = vrot.slane %v4125_v25, 1  ;;  %v1710_v18 = vsel %vm1185_vm0, %v1705_v12, %v1709_v53  ;;  %v1482_v5 = vrot.slane %v4085_v1, 1  ;;  %v4954_v25 = vld [vmem:[#allocation2 + $0x68] ss:$0 sps:$4 sm:$0x11]   ;;  %v5812_v45 = vcombine.low %v940_v29, %v5802_v3 }
  0xaf   : > { %3389 = vmatprep.mubr.bf16.mxu0 %v1918_v55  ;;  %4742 = vmatpush3.bf16.msra.mxu0 %v4966_v14  ;;  %v966_v14 = vld [vmem:[#allocation2 + $0x54] sm:$0xe]  ;;  %v1750_v12 = vshll.u32 %v5697_v7, 16  ;;  %v1929_v39 = vrot.slane %v4954_v25, 1  ;;  %847 = vst [vmem:[#allocation2 + $0xc8] sm:$0x1] %v4039_v19 }
  0xb0   : > { %3285 = vmatmul.mubr.bf16.gmra.mrb[56].mxu1 %v1475_v35  ;;  %4743 = vmatprep.subr.bf16.mxu0 %v4973_v33  ;;  %v4126_v54 = vcombine.low %v966_v14, %v5651_v41  ;;  %v1924_v55 = vsel %vm1442_vm5, %v1922_v31, %v1923_v11  ;;  %v1481_v35 = vsel %vm1442_vm5, %v1479_v36, %v1480_v57  ;;  %v1928_v31 = vrot.slane %v4127_v47, 1  ;;  %v5029_v11 = vld [vmem:[#allocation2 + $0xb0] ss:$0 sps:$4 sm:$0x11]   ;;  %v5030_v20 = vld [vmem:[#allocation2 + $0xb8] sm:$0xf] }
  0xb1   : > { %3292 = vmatprep.mubr.bf16.mxu1 %v5764_v51  ;;  %v1486_v14 = vrot.slane %v5029_v11, 1  ;;  %v1729_v36 = vor.u32 %v1728_v17, %v1724_v24  ;;  %v1736_v57 = vshrl.u32 %v5682_v34, 16  ;;  %v1743_v56 = vshll.u32 %v4954_v25, 16  ;;  %v4969_v1 = vld [vmem:[#allocation2 + $0x2c] ss:$0 sps:$4 sm:$0x11]  }
  0xb2   : > { %v1925_v30 = vrot.slane %v4126_v54, 1  ;;  %v1930_v6 = vsel %vm1442_vm5, %v1928_v31, %v1929_v39  ;;  %v4087_v50 = vcombine.low %v911_v40, %v5030_v20  ;;  %v1026_v29 = vld [vmem:[#allocation2 + $0x24] sm:$0xe]  ;;  %v5845_v40 = vld [vmem:[#allocation2 + $0x34] sm:$0xf] }
  0xb3   : > { %4744 = vmatpush3.bf16.msra.mxu0 %v4973_v33  ;;  %v4950_v33 = vld [vmem:[#allocation2 + $0x5c] ss:$0 sps:$4 sm:$0x11]  }
  0xb4   : > { %4745 = vmatprep.subr.bf16.mxu0 %v4980_v16  ;;  %v1926_v41 = vrot.slane %v4950_v33, 1  ;;  %v1731_v2 = vshll.u32 %v4950_v33, 16  ;;  %v942_v26 = vld [vmem:[#allocation2 + $0xc0] sm:$0xf]  ;;  %v5823_v54 = vld [vmem:[#allocation2 + $0xc4] sm:$0xf] }
  0xb5   : > { %v980_v33 = vld [vmem:[#allocation2 + $0x28] sm:$0xf]  ;;  %v1488_v59 = vrot.slane %v4087_v50, 1 }
  0xb6   : > { %3390 = vmatmul.mubr.bf16.gmra.mrb[60].mxu0 %v1698_v60  ;;  %v977_v60 = vld [vmem:[#allocation2 + $0x18] sm:$0xf]  ;;  %v1927_v28 = vsel %vm1442_vm5, %v1925_v30, %v1926_v41  ;;  %v1733_v53 = vrot.slane %v1731_v2, 1  ;;  %v5833_v47 = vcombine.low %v979_v42, %v980_v33  ;;  %v4169_v24 = vcombine.low %v1026_v29, %v980_v33 }
  0xb7   : > { %3397 = vmatprep.mubr.bf16.mxu0 %v1921_v49  ;;  %4746 = vmatpush3.bf16.msra.mxu0 %v4980_v16  ;;  %v5027_v16 = vld [vmem:[#allocation2 + $0xa4] ss:$0 sps:$4 sm:$0x11]   ;;  %v1738_v49 = vshll.u32 %v5682_v34, 16  ;;  %v5814_v21 = vcombine.low %v977_v60, %v978_v0  ;;  %v1025_v41 = vld [vmem:[#allocation2 + $0x18] sm:$0xe] }
  0xb8   : > { %3293 = vmatmul.mubr.bf16.gmra.mrb[60].mxu1 %v1478_v58  ;;  %4747 = vmatprep.subr.bf16.mxu0 %v4987_v9  ;;  %v1483_v52 = vrot.slane %v5027_v16, 1  ;;  %v1734_v34 = vsel %vm1185_vm0, %v1729_v36, %v1733_v53  ;;  %v2123_v16 = vshll.u32 %v4965_v63, 16  ;;  %v2375_v2 = vrot.slane %v4969_v1, 1 }
  0xb9   : > { %3300 = vmatprep.mubr.bf16.mxu1 %v5787_v22  ;;  %v1740_v8 = vrot.slane %v1738_v49, 1  ;;  %v2118_v43 = vshll.u32 %v5814_v21, 16  ;;  %v2116_v30 = vshrl.u32 %v5814_v21, 16  ;;  %v2130_v36 = vshll.u32 %v5833_v47, 16 }
  0xba   : > { %v1484_v27 = vsel %vm1442_vm5, %v1482_v5, %v1483_v52  ;;  %v5831_v5 = vcombine.low %v942_v26, %v5823_v54  ;;  %v4168_v52 = vcombine.low %v1025_v41, %v978_v0  ;;  %v969_v0 = vld [vmem:[#allocation2 + $0x78] sm:$0xe]  ;;  %v2128_v42 = vshrl.u32 %v5833_v47, 16  ;;  %v5859_v41 = vld [vmem:[#allocation2 + $0x40] sm:$0xf] }
  0xbb   : > { %4748 = vmatpush3.bf16.msra.mxu0 %v4987_v9  ;;  %v5028_v9 = vld [vmem:[#allocation2 + $0xac] sm:$0xf]  ;;  %v1741_v60 = vor.u32 %v1740_v8, %v1736_v57  ;;  %v4129_v19 = vcombine.low %v969_v0, %v5705_v15  ;;  %v2135_v8 = vshll.u32 %v4969_v1, 16  ;;  %v2132_v26 = vrot.slane %v2130_v36, 1 }
  0xbc   : > { %v4086_v58 = vcombine.low %v910_v23, %v5028_v9  ;;  %v2120_v23 = vrot.slane %v2118_v43, 1  ;;  %v2371_v25 = vrot.slane %v4168_v52, 1  ;;  %v1762_v33 = vshll.u32 %v5717_v46, 16  ;;  %v5856_v1 = vld [vmem:[#allocation2 + $0x38] ss:$0 sps:$4 sm:$0x11]  }
  0xbd   : > { %v2137_v20 = vrot.slane %v2135_v8, 1  ;;  %v1772_v0 = vshrl.u32 %v5740_v10, 16 }
  0xbe   : > { %3398 = vmatmul.mubr.bf16.gmra.mrb[64].mxu0 %v1710_v18  ;;  %v1485_v18 = vrot.slane %v4086_v58, 1  ;;  %v1748_v58 = vshrl.u32 %v5697_v7, 16  ;;  %v2121_v11 = vor.u32 %v2120_v23, %v2116_v30  ;;  %v981_v7 = vld [vmem:[#allocation2 + $0x30] sm:$0xf]  ;;  %v983_v30 = vld [vmem:[#allocation2 + $0x3c] sm:$0xf] }
  0xbf   : > { %3405 = vmatprep.mubr.bf16.mxu0 %v1924_v55  ;;  %v4961_v55 = vld [vmem:[#allocation2 + $0x74] ss:$0 sps:$4 sm:$0x11]   ;;  %v1764_v52 = vrot.slane %v1762_v33, 1 }
  0xc0   : > { %3301 = vmatmul.mubr.bf16.gmra.mrb[64].mxu1 %v1481_v35  ;;  %v4128_v35 = vcombine.low %v968_v4, %v5688_v13  ;;  %v1487_v48 = vsel %vm1442_vm5, %v1485_v18, %v1486_v14  ;;  %v2372_v13 = vrot.slane %v4965_v63, 1  ;;  %v1932_v49 = vrot.slane %v4961_v55, 1  ;;  %v4963_v18 = vld [vmem:[#allocation2 + $0x80] ss:$0 sps:$4 sm:$0x11]  }
  0xc1   : > { %3308 = vmatprep.mubr.bf16.mxu1 %v5799_v32  ;;  %v1752_v4 = vrot.slane %v1750_v12, 1  ;;  %v1755_v53 = vshll.u32 %v4961_v55, 16  ;;  %v2125_v14 = vrot.slane %v2123_v16, 1  ;;  %v5853_v55 = vcombine.low %v981_v7, %v5845_v40  ;;  %v985_v7 = vld [vmem:[#allocation2 + $0x48] sm:$0xf] }
  0xc2   : > { %v1931_v17 = vrot.slane %v4128_v35, 1  ;;  %v5838_v31 = vsel %vm1442_vm5, %v2371_v25, %v2372_v13  ;;  %v1760_v16 = vshrl.u32 %v5717_v46, 16  ;;  %v1767_v13 = vshll.u32 %v4963_v18, 16 }
  0xc3   : > { %v2126_v43 = vsel %vm1185_vm0, %v2121_v11, %v2125_v14  ;;  %v1753_v35 = vor.u32 %v1752_v4, %v1748_v58  ;;  %v1757_v15 = vrot.slane %v1755_v53, 1  ;;  %v2142_v50 = vshll.u32 %v5853_v55, 16 }
  0xc4   : > { %v1933_v12 = vsel %vm1442_vm5, %v1931_v17, %v1932_v49  ;;  %v2140_v25 = vshrl.u32 %v5853_v55, 16  ;;  %v2147_v46 = vshll.u32 %v5856_v1, 16 }
  0xc5   : > { %v1758_v29 = vsel %vm1185_vm0, %v1753_v35, %v1757_v15  ;;  %v2144_v49 = vrot.slane %v2142_v50, 1 }
  0xc6   : > { %3406 = vmatmul.mubr.bf16.gmra.mrb[68].mxu0 %v1722_v37  ;;  %v1745_v37 = vrot.slane %v1743_v56, 1  ;;  %v1935_v56 = vrot.slane %v4963_v18, 1  ;;  %v2149_v36 = vrot.slane %v2147_v46, 1  ;;  %v4970_v18 = vld [vmem:[#allocation2 + $0x98] ss:$0 sps:$4 sm:$0x11]  }
  0xc7   : > { %3413 = vmatprep.mubr.bf16.mxu0 %v1927_v28  ;;  %v5031_v28 = vld [vmem:[#allocation2 + $0xbc] ss:$0 sps:$4 sm:$0x11]   ;;  %v2145_v14 = vor.u32 %v2144_v49, %v2140_v25  ;;  %v1941_v15 = vrot.slane %v4970_v18, 1  ;;  %v1798_v49 = vshll.u32 %v5787_v22, 16 }
  0xc8   : > { %3309 = vmatmul.mubr.bf16.gmra.mrb[68].mxu1 %v1484_v27  ;;  %v1489_v9 = vrot.slane %v5031_v28, 1  ;;  %v2374_v27 = vrot.slane %v4169_v24, 1  ;;  %v1746_v57 = vsel %vm1185_vm0, %v1741_v60, %v1745_v37  ;;  %v1774_v60 = vshll.u32 %v5740_v10, 16 }
  0xc9   : > { %3316 = vmatprep.mubr.bf16.mxu1 %v5812_v45  ;;  %v5867_v37 = vcombine.low %v983_v30, %v5859_v41  ;;  %v1765_v28 = vor.u32 %v1764_v52, %v1760_v16  ;;  %v1791_v16 = vshll.u32 %v4970_v18, 16  ;;  %v987_v52 = vld [vmem:[#allocation2 + $0x54] sm:$0xf]  ;;  %v989_v18 = vld [vmem:[#allocation2 + $0x60] sm:$0xf] }
  0xca   : > { %v5842_v39 = vsel %vm1442_vm5, %v2374_v27, %v2375_v2  ;;  %v1490_v63 = vsel %vm1442_vm5, %v1488_v59, %v1489_v9  ;;  %v4967_v2 = vld [vmem:[#allocation2 + $0x8c] ss:$0 sps:$4 sm:$0x11]   ;;  %v1769_v9 = vrot.slane %v1767_v13, 1  ;;  %v1776_v53 = vrot.slane %v1774_v60, 1 }
  0xcb   : > { %v1938_v27 = vrot.slane %v4967_v2, 1  ;;  %v5874_v59 = vld [vmem:[#allocation2 + $0x44] ss:$0 sps:$4 sm:$0x11]   ;;  %v2154_v4 = vshll.u32 %v5867_v37, 16  ;;  %v1779_v11 = vshll.u32 %v4967_v2, 16 }
  0xcc   : > { %v2152_v10 = vshrl.u32 %v5867_v37, 16  ;;  %v2159_v8 = vshll.u32 %v5874_v59, 16  ;;  %v1777_v33 = vor.u32 %v1776_v53, %v1772_v0  ;;  %v5895_v13 = vld [vmem:[#allocation2 + $0x58] sm:$0xf]  ;;  %v1796_v0 = vshrl.u32 %v5787_v22, 16 }
  0xcd   : > { %v1781_v35 = vrot.slane %v1779_v11, 1  ;;  %v5903_v25 = vcombine.low %v987_v52, %v5895_v13 }
  0xce   : > { %3414 = vmatmul.mubr.bf16.gmra.mrb[72].mxu0 %v1734_v34  ;;  %v1934_v34 = vrot.slane %v4129_v19, 1  ;;  %v5878_v19 = vld [vmem:[#allocation2 + $0x4c] sm:$0xf] }
  0xcf   : > { %3421 = vmatprep.mubr.bf16.mxu0 %v1930_v6  ;;  %v970_v6 = vld [vmem:[#allocation2 + $0x84] sm:$0xe]  ;;  %v1782_v30 = vsel %vm1185_vm0, %v1777_v33, %v1781_v35 }
  0xd0   : > { %3317 = vmatmul.mubr.bf16.gmra.mrb[72].mxu1 %v1487_v48  ;;  %v2133_v48 = vor.u32 %v2132_v26, %v2128_v42  ;;  %v4130_v23 = vcombine.low %v970_v6, %v5730_v61  ;;  %v1936_v24 = vsel %vm1442_vm5, %v1934_v34, %v1935_v56  ;;  %v971_v61 = vld [vmem:[#allocation2 + $0x90] sm:$0xe]  ;;  %v5886_v42 = vcombine.low %v985_v7, %v5878_v19  ;;  %v972_v34 = vld [vmem:[#allocation2 + $0x9c] sm:$0xe] }
  0xd1   : > { %3324 = vmatprep.mubr.bf16.mxu1 %v5831_v5  ;;  %v1786_v26 = vshll.u32 %v5764_v51, 16  ;;  %v1784_v56 = vshrl.u32 %v5764_v51, 16 }
  0xd2   : > { %v2138_v17 = vsel %vm1185_vm0, %v2133_v48, %v2137_v20  ;;  %v1937_v58 = vrot.slane %v4130_v23, 1  ;;  %v2161_v48 = vrot.slane %v2159_v8, 1  ;;  %v5891_v20 = vld [vmem:[#allocation2 + $0x50] ss:$0 sps:$4 sm:$0x11]   ;;  %v2166_v50 = vshll.u32 %v5886_v42, 16 }
  0xd3   : > { %v2164_v2 = vshrl.u32 %v5886_v42, 16 }
  0xd4   : > { %v2168_v60 = vrot.slane %v2166_v50, 1  ;;  %v974_v50 = vld [vmem:[#allocation2 + $0xb4] sm:$0xe] }
  0xd6   : > { %3422 = vmatmul.mubr.bf16.gmra.mrb[76].mxu0 %v1746_v57  ;;  %v1770_v57 = vsel %vm1185_vm0, %v1765_v28, %v1769_v9  ;;  %v1793_v28 = vrot.slane %v1791_v16, 1  ;;  %v2169_v11 = vor.u32 %v2168_v60, %v2164_v2  ;;  %v991_v2 = vld [vmem:[#allocation2 + $0x6c] sm:$0xf]  ;;  %v5933_v60 = vld [vmem:[#allocation2 + $0x70] sm:$0xf] }
  0xd7   : > { %3429 = vmatprep.mubr.bf16.mxu0 %v1933_v12  ;;  %v1939_v12 = vsel %vm1442_vm5, %v1937_v58, %v1938_v27  ;;  %v973_v27 = vld [vmem:[#allocation2 + $0xa8] sm:$0xe] }
  0xd8   : > { %3325 = vmatmul.mubr.bf16.gmra.mrb[76].mxu1 %v1490_v63  ;;  %v2156_v63 = vrot.slane %v2154_v4, 1  ;;  %v4133_v22 = vcombine.low %v973_v27, %v5791_v62 }
  0xd9   : > { %3526 = vmatprep.mubr.bf16.mxu1 %v2126_v43  ;;  %v2150_v43 = vsel %vm1185_vm0, %v2145_v14, %v2149_v36  ;;  %v5910_v36 = vld [vmem:[#allocation2 + $0x5c] ss:$0 sps:$4 sm:$0x11]  }
  0xda   : > { %v2157_v6 = vor.u32 %v2156_v63, %v2152_v10  ;;  %v5914_v10 = vld [vmem:[#allocation2 + $0x64] sm:$0xf]  ;;  %v1946_v62 = vrot.slane %v4133_v22, 1  ;;  %v993_v22 = vld [vmem:[#allocation2 + $0x78] sm:$0xf] }
  0xdc   : > { %v2162_v51 = vsel %vm1185_vm0, %v2157_v6, %v2161_v48 }
  0xde   : > { %3430 = vmatmul.mubr.bf16.gmra.mrb[80].mxu0 %v1758_v29  ;;  %v1788_v29 = vrot.slane %v1786_v26, 1  ;;  %v2176_v26 = vshrl.u32 %v5903_v25, 16 }
  0xdf   : > { %3437 = vmatprep.mubr.bf16.mxu0 %v1936_v24  ;;  %v4974_v24 = vld [vmem:[#allocation2 + $0xa4] ss:$0 sps:$4 sm:$0x11]  }
  0xe0   : > { %3527 = vmatmul.mubr.bf16.vlgmr.msra.gmra.mrb[80].mxu1 %v5814_v21  ;;  %v4131_v21 = vcombine.low %v971_v61, %v5752_v44  ;;  %v1789_v46 = vor.u32 %v1788_v29, %v1784_v56  ;;  %v1944_v61 = vrot.slane %v4974_v24, 1  ;;  %v1808_v29 = vshrl.u32 %v5799_v32, 16 }
  0xe1   : > { %3534 = vmatprep.mubr.bf16.mxu1 %v2138_v17  ;;  %v2171_v17 = vshll.u32 %v5891_v20, 16 }
  0xe2   : > { %v1940_v44 = vrot.slane %v4131_v21, 1  ;;  %v1794_v21 = vsel %vm1185_vm0, %v1789_v46, %v1793_v28 }
  0xe3   : > { %v2173_v14 = vrot.slane %v2171_v17, 1 }
  0xe4   : > { %v1942_v23 = vsel %vm1442_vm5, %v1940_v44, %v1941_v15  ;;  %v2183_v44 = vshll.u32 %v5910_v36, 16  ;;  %v5924_v15 = vcombine.low %v989_v18, %v5914_v10 }
  0xe5   : > { %v2174_v33 = vsel %vm1185_vm0, %v2169_v11, %v2173_v14  ;;  %v1820_v11 = vshrl.u32 %v5812_v45, 16 }
  0xe6   : > { %3438 = vmatmul.mubr.bf16.gmra.mrb[84].mxu0 %v1770_v57  ;;  %v2178_v57 = vshll.u32 %v5903_v25, 16  ;;  %v2185_v52 = vrot.slane %v2183_v44, 1  ;;  %v2188_v28 = vshrl.u32 %v5924_v15, 16 }
  0xe7   : > { %3445 = vmatprep.mubr.bf16.mxu0 %v1939_v12  ;;  %v1803_v12 = vshll.u32 %v4974_v24, 16 }
  0xe8   : > { %3535 = vmatmul.mubr.bf16.gmra.mrb[84].mxu1 %v5833_v47  ;;  %v4132_v47 = vcombine.low %v972_v34, %v5776_v38  ;;  %v2180_v35 = vrot.slane %v2178_v57, 1  ;;  %v1810_v34 = vshll.u32 %v5799_v32, 16 }
  0xe9   : > { %3542 = vmatprep.mubr.bf16.mxu1 %v2150_v43  ;;  %v4977_v43 = vld [vmem:[#allocation2 + $0xb0] ss:$0 sps:$4 sm:$0x11]   ;;  %v1805_v6 = vrot.slane %v1803_v12, 1 }
  0xea   : > { %v1943_v9 = vrot.slane %v4132_v47, 1  ;;  %v1947_v48 = vrot.slane %v4977_v43, 1  ;;  %v2181_v16 = vor.u32 %v2180_v35, %v2176_v26  ;;  %v2190_v47 = vshll.u32 %v5924_v15, 16  ;;  %v4984_v26 = vld [vmem:[#allocation2 + $0xc8] ss:$0 sps:$4 sm:$0x11]  }
  0xeb   : > { %v1812_v24 = vrot.slane %v1810_v34, 1 }
  0xec   : > { %v1945_v8 = vsel %vm1442_vm5, %v1943_v9, %v1944_v61  ;;  %v1948_v17 = vsel %vm1442_vm5, %v1946_v62, %v1947_v48  ;;  %v2186_v32 = vsel %vm1185_vm0, %v2181_v16, %v2185_v52  ;;  %v5941_v9 = vcombine.low %v991_v2, %v5933_v60 }
  0xed   : > { %v1822_v61 = vshll.u32 %v5812_v45, 16  ;;  %v1834_v48 = vshll.u32 %v5831_v5, 16 }
  0xee   : > { %3446 = vmatmul.mubr.bf16.gmra.mrb[88].mxu0 %v1782_v30  ;;  %v5928_v30 = vld [vmem:[#allocation2 + $0x68] ss:$0 sps:$4 sm:$0x11]   ;;  %v2200_v45 = vshrl.u32 %v5941_v9, 16 }
  0xef   : > { %3453 = vmatprep.mubr.bf16.mxu0 %v1942_v23  ;;  %v2195_v46 = vshll.u32 %v5928_v30, 16  ;;  %v1824_v12 = vrot.slane %v1822_v61, 1 }
  0xf0   : > { %3543 = vmatmul.mubr.bf16.gmra.mrb[88].mxu1 %v5853_v55  ;;  %v1800_v55 = vrot.slane %v1798_v49, 1  ;;  %v4981_v49 = vld [vmem:[#allocation2 + $0xbc] ss:$0 sps:$4 sm:$0x11]  }
  0xf1   : > { %3550 = vmatprep.mubr.bf16.mxu1 %v2162_v51  ;;  %v1815_v51 = vshll.u32 %v4977_v43, 16  ;;  %v2197_v57 = vrot.slane %v2195_v46, 1  ;;  %v1827_v18 = vshll.u32 %v4981_v49, 16  ;;  %v5969_v46 = vld [vmem:[#allocation2 + $0x80] ss:$0 sps:$4 sm:$0x11]  }
  0xf2   : > { %v1801_v56 = vor.u32 %v1800_v55, %v1796_v0  ;;  %v1950_v0 = vrot.slane %v4981_v49, 1 }
  0xf3   : > { %v1817_v27 = vrot.slane %v1815_v51, 1 }
  0xf4   : > { %v1806_v23 = vsel %vm1185_vm0, %v1801_v56, %v1805_v6 }
  0xf6   : > { %3454 = vmatmul.mubr.bf16.gmra.mrb[92].mxu0 %v1794_v21  ;;  %v2202_v21 = vshll.u32 %v5941_v9, 16 }
  0xf7   : > { %3461 = vmatprep.mubr.bf16.mxu0 %v1945_v8  ;;  %v5950_v8 = vld [vmem:[#allocation2 + $0x7c] sm:$0xf] }
  0xf8   : > { %3551 = vmatmul.mubr.bf16.gmra.mrb[92].mxu1 %v5867_v37  ;;  %v4134_v37 = vcombine.low %v974_v50, %v5802_v3  ;;  %v2204_v34 = vrot.slane %v2202_v21, 1  ;;  %v5958_v62 = vcombine.low %v993_v22, %v5950_v8  ;;  %v1829_v50 = vrot.slane %v1827_v18, 1 }
  0xf9   : > { %v4277_v38 = vpop.f32.mrb[0].mxu0  ;;  %3558 = vmatprep.mubr.bf16.mxu1 %v2174_v33 }
  0xfa   : > { %v4278_v58 = vpop.f32.mrb[1].mxu0  ;;  %v1949_v3 = vrot.slane %v4134_v37, 1  ;;  %v1832_v37 = vshrl.u32 %v5831_v5, 16 }
  0xfb   : > { %v5908_v4 = vadd.f32 %v4278_v58, %v4277_v38  ;;  %v4280_v53 = vpop.f32.mrb[2].mxu0  ;;  %v2192_v38 = vrot.slane %v2190_v47, 1  ;;  %v1813_v58 = vor.u32 %v1812_v24, %v1808_v29 }
  0xfc   : > { %v4281_v7 = vpop.f32.mrb[3].mxu0  ;;  %v1951_v43 = vsel %vm1442_vm5, %v1949_v3, %v1950_v0  ;;  %v995_v3 = vld [vmem:[#allocation2 + $0x84] sm:$0xf]  ;;  %v5975_v0 = vld [vmem:[#allocation2 + $0x88] sm:$0xf] }
  0xfd   : > { %v5916_v63 = vadd.f32 %v4281_v7, %v4280_v53  ;;  %v975_v53 = vld [vmem:[#allocation2 + $0xc0] sm:$0xe]  ;;  %v2193_v14 = vor.u32 %v2192_v38, %v2188_v28  ;;  %v5946_v7 = vld [vmem:[#allocation2 + $0x74] ss:$0 sps:$4 sm:$0x11]   ;;  %v1818_v55 = vsel %vm1185_vm0, %v1813_v58, %v1817_v27  ;;  %v2205_v28 = vor.u32 %v2204_v34, %v2200_v45 }
  0xfe   : > { %3462 = vmatmul.mubr.bf16.gmra.mrb[96].mxu0 %v1806_v23  ;;  %v2207_v56 = vshll.u32 %v5946_v7, 16  ;;  %v1953_v23 = vrot.slane %v4984_v26, 1  ;;  %v1836_v58 = vrot.slane %v1834_v48, 1  ;;  %v1839_v27 = vshll.u32 %v4984_v26, 16 }
  0xff   : > { %3469 = vmatprep.mubr.bf16.mxu0 %v1948_v17  ;;  %v2198_v35 = vsel %vm1185_vm0, %v2193_v14, %v2197_v57  ;;  %v2212_v14 = vshrl.u32 %v5958_v62, 16  ;;  %v5987_v34 = vld [vmem:[#allocation2 + $0x8c] ss:$0 sps:$4 sm:$0x11]  }
 0x100   : > { %3559 = vmatmul.mubr.bf16.gmra.mrb[96].mxu1 %v5886_v42  ;;  %v4135_v42 = vcombine.low %v975_v53, %v5823_v54  ;;  %v1825_v54 = vor.u32 %v1824_v12, %v1820_v11  ;;  %v2209_v38 = vrot.slane %v2207_v56, 1  ;;  %v2219_v53 = vshll.u32 %v5969_v46, 16 }
 0x101   : > { %3566 = vmatprep.mubr.bf16.mxu1 %v2186_v32  ;;  %v1837_v12 = vor.u32 %v1836_v58, %v1832_v37  ;;  %v1841_v18 = vrot.slane %v1839_v27, 1  ;;  %v1028_v58 = vld [vmem:[#allocation2 + $0x3c] sm:$0xe]  ;;  %v6009_v27 = vld [vmem:[#allocation2 + $0x98] ss:$0 sps:$4 sm:$0x11]  }
 0x102   : > { %v1952_v47 = vrot.slane %v4135_v42, 1  ;;  %v1830_v61 = vsel %vm1185_vm0, %v1825_v54, %v1829_v50  ;;  %v2210_v11 = vsel %vm1185_vm0, %v2205_v28, %v2209_v38 }
 0x104   : > { %v1954_v5 = vsel %vm1442_vm5, %v1952_v47, %v1953_v23  ;;  %v5995_v47 = vld [vmem:[#allocation2 + $0x94] sm:$0xf] }
 0x106   : > { %3470 = vmatmul.mubr.bf16.gmra.mrb[100].mxu0 %v1818_v55  ;;  %v5982_v55 = vcombine.low %v995_v3, %v5975_v0 }
 0x107   : > { %3477 = vmatprep.mubr.bf16.mxu0 %v1951_v43  ;;  %v1027_v43 = vld [vmem:[#allocation2 + $0x30] sm:$0xe] }
 0x108   : > { %v4283_v33 = vpop.f32.mrb[4].mxu0  ;;  %3567 = vmatmul.mubr.bf16.gmra.mrb[100].mxu1 %v5903_v25  ;;  %v2214_v25 = vshll.u32 %v5958_v62, 16  ;;  %v2226_v50 = vshll.u32 %v5982_v55, 16 }
 0x109   : > { %v4349_v44 = vpop.f32.mrb[0].mxu1  ;;  %v4284_v6 = vpop.f32.mrb[5].mxu0  ;;  %3574 = vmatprep.mubr.bf16.mxu1 %v2198_v35  ;;  %v2221_v35 = vrot.slane %v2219_v53, 1 }
 0x10a   : > { %v4350_v29 = vpop.f32.mrb[1].mxu1  ;;  %v5961_v16 = vadd.f32 %v4284_v6, %v4283_v33  ;;  %v4286_v52 = vpop.f32.mrb[6].mxu0  ;;  %v2216_v57 = vrot.slane %v2214_v25, 1  ;;  %v2228_v28 = vrot.slane %v2226_v50, 1 }
 0x10b   : > { %v5964_v24 = vadd.f32 %v4350_v29, %v4349_v44  ;;  %v4352_v51 = vpop.f32.mrb[2].mxu1  ;;  %v4287_v2 = vpop.f32.mrb[7].mxu0 }
 0x10c   : > { %v4353_v17 = vpop.f32.mrb[3].mxu1  ;;  %v5967_v49 = vadd.f32 %v4287_v2, %v4286_v52  ;;  %v2217_v48 = vor.u32 %v2216_v57, %v2212_v14  ;;  %v997_v52 = vld [vmem:[#allocation2 + $0x90] sm:$0xf]  ;;  %v2231_v2 = vshll.u32 %v5987_v34, 16  ;;  %v999_v14 = vld [vmem:[#allocation2 + $0x9c] sm:$0xf] }
 0x10d   : > { %v5971_v32 = vadd.f32 %v4353_v17, %v4352_v51  ;;  %v4170_v51 = vcombine.low %v1027_v43, %v5845_v40  ;;  %v2224_v17 = vshrl.u32 %v5982_v55, 16  ;;  %v6004_v38 = vcombine.low %v997_v52, %v5995_v47  ;;  %v1029_v40 = vld [vmem:[#allocation2 + $0x48] sm:$0xe]  ;;  %v6013_v57 = vld [vmem:[#allocation2 + $0xa0] sm:$0xf] }
 0x10e   : > { %3478 = vmatmul.mubr.bf16.gmra.mrb[104].mxu0 %v1830_v61  ;;  %v2222_v37 = vsel %vm1185_vm0, %v2217_v48, %v2221_v35  ;;  %v2378_v61 = vrot.slane %v5856_v1, 1  ;;  %v2243_v1 = vshll.u32 %v6009_v27, 16  ;;  %v6031_v52 = vld [vmem:[#allocation2 + $0xa4] ss:$0 sps:$4 sm:$0x11]  }
 0x10f   : > { %3485 = vmatprep.mubr.bf16.mxu0 %v1954_v5  ;;  %v2377_v25 = vrot.slane %v4170_v51, 1  ;;  %v2229_v3 = vor.u32 %v2228_v28, %v2224_v17  ;;  %v2233_v5 = vrot.slane %v2231_v2, 1  ;;  %v2238_v53 = vshll.u32 %v6004_v38, 16 }
 0x110   : > { %3575 = vmatmul.mubr.bf16.gmra.mrb[104].mxu1 %v5924_v15  ;;  %v1842_v15 = vsel %vm1185_vm0, %v1837_v12, %v1841_v18 }
 0x111   : > { %v4289_v21 = vpop.f32.mrb[8].mxu0  ;;  %3582 = vmatprep.mubr.bf16.mxu1 %v2210_v11  ;;  %v4171_v11 = vcombine.low %v1028_v58, %v5859_v41  ;;  %v2234_v12 = vsel %vm1185_vm0, %v2229_v3, %v2233_v5  ;;  %v6022_v41 = vcombine.low %v999_v14, %v6013_v57  ;;  %v2255_v5 = vshll.u32 %v6031_v52, 16 }
 0x112   : > { %v4290_v22 = vpop.f32.mrb[9].mxu0 }
 0x113   : > { %v4355_v42 = vpop.f32.mrb[4].mxu1  ;;  %v5985_v26 = vadd.f32 %v4290_v22, %v4289_v21  ;;  %v4292_v45 = vpop.f32.mrb[10].mxu0  ;;  %v2236_v22 = vshrl.u32 %v6004_v38, 16  ;;  %v2380_v43 = vrot.slane %v4171_v11, 1  ;;  %v2248_v11 = vshrl.u32 %v6022_v41, 16 }
 0x114   : > { %v4356_v33 = vpop.f32.mrb[5].mxu1  ;;  %v4293_v44 = vpop.f32.mrb[11].mxu0 }
 0x115   : > { %v5989_v56 = vadd.f32 %v4356_v33, %v4355_v42  ;;  %v4358_v6 = vpop.f32.mrb[6].mxu1  ;;  %v5991_v54 = vadd.f32 %v4293_v44, %v4292_v45  ;;  %v2240_v42 = vrot.slane %v2238_v53, 1  ;;  %v2381_v45 = vrot.slane %v5874_v59, 1 }
 0x116   : > { %v4359_v29 = vpop.f32.mrb[7].mxu1  ;;  %3486 = vmatmul.mubr.bf16.gmra.mrb[108].mxu0 %v1842_v15  ;;  %v2384_v44 = vrot.slane %v5891_v20, 1 }
 0x117   : > { %v5997_v23 = vadd.f32 %v4359_v29, %v4358_v6  ;;  %4749 = vmatprep.mubr.bf16.mxu0 %v5838_v31  ;;  %v2379_v31 = vsel %vm1442_vm5, %v2377_v25, %v2378_v61  ;;  %v1030_v6 = vld [vmem:[#allocation2 + $0x54] sm:$0xe]  ;;  %v1031_v29 = vld [vmem:[#allocation2 + $0x60] sm:$0xe]  ;;  %v2241_v2 = vor.u32 %v2240_v42, %v2236_v22  ;;  %v2382_v17 = vsel %vm1442_vm5, %v2380_v43, %v2381_v45  ;;  %v1001_v25 = vld [vmem:[#allocation2 + $0xa8] sm:$0xf] }
 0x118   : > { %3583 = vmatmul.mubr.bf16.gmra.mrb[108].mxu1 %v5941_v9  ;;  %v4172_v9 = vcombine.low %v1029_v40, %v5878_v19  ;;  %v4173_v20 = vcombine.low %v1030_v6, %v5895_v13  ;;  %v6038_v61 = vld [vmem:[#allocation2 + $0xac] sm:$0xf]  ;;  %v4174_v3 = vcombine.low %v1031_v29, %v5914_v10  ;;  %v2390_v10 = vrot.slane %v5928_v30, 1  ;;  %v1033_v22 = vld [vmem:[#allocation2 + $0x78] sm:$0xe] }
 0x119   : > { %3590 = vmatprep.mubr.bf16.mxu1 %v2222_v37  ;;  %v2245_v37 = vrot.slane %v2243_v1, 1  ;;  %v1032_v1 = vld [vmem:[#allocation2 + $0x6c] sm:$0xe]  ;;  %v6053_v42 = vld [vmem:[#allocation2 + $0xb0] ss:$0 sps:$4 sm:$0x11]  }
 0x11a   : > { %v2386_v13 = vrot.slane %v4173_v20, 1  ;;  %v1003_v6 = vld [vmem:[#allocation2 + $0xb4] sm:$0xf] }
 0x11b   : > { %v2246_v53 = vsel %vm1185_vm0, %v2241_v2, %v2245_v37  ;;  %v4176_v2 = vcombine.low %v1033_v22, %v5950_v8  ;;  %v2393_v8 = vrot.slane %v5946_v7, 1  ;;  %v1005_v7 = vld [vmem:[#allocation2 + $0xc0] sm:$0xf] }
 0x11e   : > { %v4295_v21 = vpop.f32.mrb[12].mxu0  ;;  %4750 = vmatmul.mubr.bf16.vlgmr.msra.gmra.mrb[112].mxu0 %v5842_v39  ;;  %v2383_v39 = vrot.slane %v4172_v9, 1  ;;  %v2387_v9 = vrot.slane %v5910_v36, 1 }
 0x11f   : > { %v4296_v18 = vpop.f32.mrb[13].mxu0  ;;  %4753 = vmatprep.mubr.bf16.mxu0 %v2379_v31  ;;  %v6048_v31 = vcombine.low %v1001_v25, %v6038_v61 }
 0x120   : > { %v6025_v33 = vadd.f32 %v4296_v18, %v4295_v21  ;;  %v4298_v19 = vpop.f32.mrb[14].mxu0  ;;  %3591 = vmatmul.mubr.bf16.gmra.mrb[112].mxu1 %v5958_v62  ;;  %v2250_v62 = vshll.u32 %v6022_v41, 16  ;;  %v2385_v40 = vsel %vm1442_vm5, %v2383_v39, %v2384_v44  ;;  %v2389_v21 = vrot.slane %v4174_v3, 1 }
 0x121   : > { %v4299_v48 = vpop.f32.mrb[15].mxu0  ;;  %3598 = vmatprep.mubr.bf16.mxu1 %v2234_v12  ;;  %v2262_v39 = vshll.u32 %v6048_v31, 16  ;;  %v2388_v36 = vsel %vm1442_vm5, %v2386_v13, %v2387_v9  ;;  %v4175_v44 = vcombine.low %v1032_v1, %v5933_v60  ;;  %v2260_v20 = vshrl.u32 %v6048_v31, 16  ;;  %v1035_v13 = vld [vmem:[#allocation2 + $0x90] sm:$0xe] }
 0x122   : > { %v6029_v15 = vadd.f32 %v4299_v48, %v4298_v19  ;;  %v2252_v14 = vrot.slane %v2250_v62, 1  ;;  %v6060_v48 = vld [vmem:[#allocation2 + $0xb8] sm:$0xf]  ;;  %v2391_v29 = vsel %vm1442_vm5, %v2389_v21, %v2390_v10  ;;  %v6079_v9 = vld [vmem:[#allocation2 + $0xbc] ss:$0 sps:$4 sm:$0x11]  }
 0x123   : > { %v4361_v35 = vpop.f32.mrb[8].mxu1  ;;  %v2264_v25 = vrot.slane %v2262_v39, 1 }
 0x124   : > { %v4362_v50 = vpop.f32.mrb[9].mxu1  ;;  %v2253_v19 = vor.u32 %v2252_v14, %v2248_v11  ;;  %v2396_v11 = vrot.slane %v5969_v46, 1  ;;  %v1034_v14 = vld [vmem:[#allocation2 + $0x84] sm:$0xe] }
 0x125   : > { %v6033_v51 = vadd.f32 %v4362_v50, %v4361_v35  ;;  %v4364_v59 = vpop.f32.mrb[10].mxu1  ;;  %v2257_v35 = vrot.slane %v2255_v5, 1  ;;  %v2392_v5 = vrot.slane %v4175_v44, 1  ;;  %v2265_v21 = vor.u32 %v2264_v25, %v2260_v20 }
 0x126   : > { %v4365_v28 = vpop.f32.mrb[11].mxu1  ;;  %4754 = vmatmul.mubr.bf16.gmra.mrb[116].mxu0 %v2382_v17  ;;  %v2267_v17 = vshll.u32 %v6053_v42, 16  ;;  %v4177_v22 = vcombine.low %v1034_v14, %v5975_v0 }
 0x127   : > { %v6040_v58 = vadd.f32 %v4365_v28, %v4364_v59  ;;  %4757 = vmatprep.mubr.bf16.mxu0 %v2385_v40  ;;  %v2258_v60 = vsel %vm1185_vm0, %v2253_v19, %v2257_v35  ;;  %v6072_v40 = vcombine.low %v1003_v6, %v6060_v48  ;;  %v4178_v19 = vcombine.low %v1035_v13, %v5995_v47 }
 0x128   : > { %3599 = vmatmul.mubr.bf16.gmra.mrb[116].mxu1 %v5982_v55  ;;  %v2269_v10 = vrot.slane %v2267_v17, 1  ;;  %v2398_v47 = vrot.slane %v4177_v22, 1 }
 0x129   : > { %v4301_v12 = vpop.f32.mrb[16].mxu0  ;;  %3606 = vmatprep.mubr.bf16.mxu1 %v2246_v53  ;;  %v2395_v53 = vrot.slane %v4176_v2, 1  ;;  %v2274_v1 = vshll.u32 %v6072_v40, 16  ;;  %v2399_v2 = vrot.slane %v5987_v34, 1  ;;  %v2401_v17 = vrot.slane %v4178_v19, 1 }
 0x12a   : > { %v4302_v18 = vpop.f32.mrb[17].mxu0  ;;  %v2270_v44 = vsel %vm1185_vm0, %v2265_v21, %v2269_v10  ;;  %v6110_v10 = vld [vmem:[#allocation2 + $0xd0] sm:$0xf] }
 0x12b   : > { %v6055_v43 = vadd.f32 %v4302_v18, %v4301_v12  ;;  %v4304_v45 = vpop.f32.mrb[18].mxu0  ;;  %v4367_v55 = vpop.f32.mrb[12].mxu1  ;;  %v2394_v12 = vsel %vm1442_vm5, %v2392_v5, %v2393_v8  ;;  %v2397_v46 = vsel %vm1442_vm5, %v2395_v53, %v2396_v11  ;;  %v2276_v6 = vrot.slane %v2274_v1, 1  ;;  %v1037_v5 = vld [vmem:[#allocation2 + $0xa8] sm:$0xe] }
 0x12c   : > { %v4305_v30 = vpop.f32.mrb[19].mxu0  ;;  %v4368_v50 = vpop.f32.mrb[13].mxu1  ;;  %v2400_v14 = vsel %vm1442_vm5, %v2398_v47, %v2399_v2  ;;  %v4180_v22 = vcombine.low %v1037_v5, %v6038_v61  ;;  %v2408_v47 = vrot.slane %v6053_v42, 1  ;;  %v1038_v2 = vld [vmem:[#allocation2 + $0xb4] sm:$0xe] }
 0x12d   : > { %v6063_v59 = vadd.f32 %v4305_v30, %v4304_v45  ;;  %v6066_v37 = vadd.f32 %v4368_v50, %v4367_v55  ;;  %v4370_v62 = vpop.f32.mrb[14].mxu1  ;;  %v6084_v45 = vld [vmem:[#allocation2 + $0xc4] sm:$0xf]  ;;  %v2272_v30 = vshrl.u32 %v6072_v40, 16  ;;  %v4181_v42 = vcombine.low %v1038_v2, %v6060_v48 }
 0x12e   : > { %4758 = vmatmul.mubr.bf16.gmra.mrb[120].mxu0 %v2388_v36  ;;  %v4371_v28 = vpop.f32.mrb[15].mxu1  ;;  %v2279_v36 = vshll.u32 %v6079_v9, 16  ;;  %v6092_v0 = vcombine.low %v1005_v7, %v6084_v45 }
 0x12f   : > { %v6074_v3 = vadd.f32 %v4371_v28, %v4370_v62  ;;  %4761 = vmatprep.mubr.bf16.mxu0 %v2391_v29  ;;  %v2402_v28 = vrot.slane %v6009_v27, 1  ;;  %v2277_v11 = vor.u32 %v2276_v6, %v2272_v30  ;;  %v2405_v30 = vrot.slane %v6031_v52, 1 }
 0x130   : > { %3607 = vmatmul.mubr.bf16.gmra.mrb[120].mxu1 %v6004_v38  ;;  %v2281_v34 = vrot.slane %v2279_v36, 1 }
 0x131   : > { %3614 = vmatprep.mubr.bf16.mxu1 %v2258_v60  ;;  %v1036_v60 = vld [vmem:[#allocation2 + $0x9c] sm:$0xe] }
 0x132   : > { %v4179_v21 = vcombine.low %v1036_v60, %v6013_v57  ;;  %v2284_v57 = vshrl.u32 %v6092_v0, 16 }
 0x133   : > { %v4389_v18 = vpop.f32.mrb[16].mxu1 }
 0x134   : > { %v4390_v38 = vpop.f32.mrb[17].mxu1  ;;  %v2404_v61 = vrot.slane %v4179_v21, 1 }
 0x135   : > { %v4391_v35 = vadd.f32 %v4390_v38, %v4389_v18  ;;  %v4392_v39 = vpop.f32.mrb[18].mxu1  ;;  %v2403_v18 = vsel %vm1442_vm5, %v2401_v17, %v2402_v28  ;;  %v1039_v28 = vld [vmem:[#allocation2 + $0xc0] sm:$0xe] }
 0x136   : > { %4762 = vmatmul.mubr.bf16.gmra.mrb[124].mxu0 %v2394_v12  ;;  %v4393_v55 = vpop.f32.mrb[19].mxu1 }
 0x137   : > { %v6095_v50 = vadd.f32 %v4391_v35, %v5908_v4  ;;  %v4394_v29 = vadd.f32 %v4393_v55, %v4392_v39  ;;  %4765 = vmatprep.mubr.bf16.mxu0 %v2397_v46  ;;  %v6103_v4 = vld [vmem:[#allocation2 + $0xc8] ss:$0 sps:$4 sm:$0x11]   ;;  %v2282_v35 = vsel %vm1185_vm0, %v2277_v11, %v2281_v34 }
 0x138   : > { %3615 = vmatmul.mubr.bf16.gmra.mrb[124].mxu1 %v6022_v41  ;;  %v2286_v41 = vshll.u32 %v6092_v0, 16  ;;  %v2291_v46 = vshll.u32 %v6103_v4, 16 }
 0x139   : > { %v4307_v62 = vpop.f32.mrb[20].mxu0  ;;  %v6101_v20 = vadd.f32 %v4394_v29, %v5916_v63  ;;  %3622 = vmatprep.mubr.bf16.mxu1 %v2270_v44  ;;  %v1007_v63 = vld [vmem:[#allocation2 + $0xcc] sm:$0xf]  ;;  %v2407_v29 = vrot.slane %v4180_v22, 1 }
 0x13a   : > { %v4308_v25 = vpop.f32.mrb[21].mxu0  ;;  %v2288_v39 = vrot.slane %v2286_v41, 1  ;;  %v6120_v36 = vcombine.low %v1007_v63, %v6110_v10  ;;  %v2293_v5 = vrot.slane %v2291_v46, 1  ;;  %v2410_v46 = vrot.slane %v4181_v42, 1 }
 0x13b   : > { %v6105_v8 = vadd.f32 %v4308_v25, %v4307_v62  ;;  %v4310_v53 = vpop.f32.mrb[22].mxu0  ;;  %v4395_v13 = vpop.f32.mrb[20].mxu1 }
 0x13c   : > { %v4311_v27 = vpop.f32.mrb[23].mxu0  ;;  %v4396_v1 = vpop.f32.mrb[21].mxu1  ;;  %v2289_v25 = vor.u32 %v2288_v39, %v2284_v57  ;;  %v2298_v52 = vshll.u32 %v6120_v36, 16  ;;  %v2414_v57 = vrot.slane %v6103_v4, 1  ;;  %v1040_v39 = vld [vmem:[#allocation2 + $0xcc] sm:$0xe] }
 0x13d   : > { %v6112_v12 = vadd.f32 %v4311_v27, %v4310_v53  ;;  %v4397_v7 = vadd.f32 %v4396_v1, %v4395_v13  ;;  %v4398_v38 = vpop.f32.mrb[22].mxu1  ;;  %v5020_v53 = vld [vmem:[#allocation2 + $0xd4] ss:$0 sps:$4 sm:$0x11]   ;;  %v4182_v13 = vcombine.low %v1039_v28, %v6084_v45 }
 0x13e   : > { %4766 = vmatmul.mubr.bf16.gmra.mrb[128].mxu0 %v2400_v14  ;;  %v4399_v19 = vpop.f32.mrb[23].mxu1  ;;  %v2409_v14 = vsel %vm1442_vm5, %v2407_v29, %v2408_v47  ;;  %v2294_v1 = vsel %vm1185_vm0, %v2289_v25, %v2293_v5  ;;  %v2300_v22 = vrot.slane %v2298_v52, 1 }
 0x13f   : > { %v6123_v55 = vadd.f32 %v4397_v7, %v5961_v16  ;;  %v4400_v44 = vadd.f32 %v4399_v19, %v4398_v38  ;;  %4769 = vmatprep.mubr.bf16.mxu0 %v2403_v18  ;;  %v2296_v18 = vshrl.u32 %v6120_v36, 16  ;;  %v2303_v7 = vshll.u32 %v5020_v53, 16 }
 0x140   : > { %3623 = vmatmul.mubr.bf16.gmra.mrb[128].mxu1 %v6048_v31  ;;  %v2406_v31 = vsel %vm1442_vm5, %v2404_v61, %v2405_v30  ;;  %v2411_v19 = vrot.slane %v6079_v9, 1 }
 0x141   : > { %v4313_v6 = vpop.f32.mrb[24].mxu0  ;;  %v6129_v62 = vadd.f32 %v4400_v44, %v5967_v49  ;;  %3630 = vmatprep.mubr.bf16.mxu1 %v2282_v35  ;;  %v2413_v35 = vrot.slane %v4182_v13, 1  ;;  %v2305_v29 = vrot.slane %v2303_v7, 1 }
 0x142   : > { %v4314_v17 = vpop.f32.mrb[25].mxu0  ;;  %v2412_v47 = vsel %vm1442_vm5, %v2410_v46, %v2411_v19 }
 0x143   : > { %v6131_v16 = vadd.f32 %v4314_v17, %v4313_v6  ;;  %v4316_v60 = vpop.f32.mrb[26].mxu0  ;;  %v4401_v11 = vpop.f32.mrb[24].mxu1  ;;  %v2301_v6 = vor.u32 %v2300_v22, %v2296_v18  ;;  %v2415_v4 = vsel %vm1442_vm5, %v2413_v35, %v2414_v57 }
 0x144   : > { %v4317_v34 = vpop.f32.mrb[27].mxu0  ;;  %v4402_v41 = vpop.f32.mrb[25].mxu1 }
 0x145   : > { %v6136_v49 = vadd.f32 %v4317_v34, %v4316_v60  ;;  %v4403_v27 = vadd.f32 %v4402_v41, %v4401_v11  ;;  %v4404_v21 = vpop.f32.mrb[26].mxu1  ;;  %v2306_v5 = vsel %vm1185_vm0, %v2301_v6, %v2305_v29  ;;  %v2417_v34 = vrot.slane %v5020_v53, 1 }
 0x146   : > { %4770 = vmatmul.mubr.bf16.gmra.mrb[132].mxu0 %v2406_v31  ;;  %v4405_v63 = vpop.f32.mrb[27].mxu1 }
 0x147   : > { %v6143_v38 = vadd.f32 %v4403_v27, %v5985_v26  ;;  %v4406_v48 = vadd.f32 %v4405_v63, %v4404_v21  ;;  %4773 = vmatprep.mubr.bf16.mxu0 %v2409_v14 }
 0x148   : > { %3631 = vmatmul.mubr.bf16.gmra.mrb[132].mxu1 %v6072_v40  ;;  %v4183_v40 = vcombine.low %v1040_v39, %v6110_v10 }
 0x149   : > { %v4319_v45 = vpop.f32.mrb[28].mxu0  ;;  %v6149_v44 = vadd.f32 %v4406_v48, %v5991_v54  ;;  %3638 = vmatprep.mubr.bf16.mxu1 %v2294_v1 }
 0x14a   : > { %v4320_v61 = vpop.f32.mrb[29].mxu0  ;;  %v2416_v11 = vrot.slane %v4183_v40, 1 }
 0x14b   : > { %v6151_v30 = vadd.f32 %v4320_v61, %v4319_v45  ;;  %v4322_v26 = vpop.f32.mrb[30].mxu0  ;;  %v4407_v9 = vpop.f32.mrb[28].mxu1 }
 0x14c   : > { %v4323_v2 = vpop.f32.mrb[31].mxu0  ;;  %v4408_v17 = vpop.f32.mrb[29].mxu1  ;;  %v2418_v21 = vsel %vm1442_vm5, %v2416_v11, %v2417_v34 }
 0x14d   : > { %v6155_v28 = vadd.f32 %v4323_v2, %v4322_v26  ;;  %v4409_v54 = vadd.f32 %v4408_v17, %v4407_v9  ;;  %v4410_v60 = vpop.f32.mrb[30].mxu1 }
 0x14e   : > { %4774 = vmatmul.mubr.bf16.gmra.mrb[136].mxu0 %v2412_v47  ;;  %v4411_v25 = vpop.f32.mrb[31].mxu1 }
 0x14f   : > { %v6160_v52 = vadd.f32 %v4409_v54, %v6025_v33  ;;  %v4412_v31 = vadd.f32 %v4411_v25, %v4410_v60  ;;  %4777 = vmatprep.mubr.bf16.mxu0 %v2415_v4 }
 0x150   : > { %3639 = vmatmul.mubr.bf16.gmra.mrb[136].mxu1 %v6092_v0 }
 0x151   : > { %v4325_v10 = vpop.f32.mrb[32].mxu0  ;;  %v6164_v42 = vadd.f32 %v4412_v31, %v6029_v15  ;;  %3646 = vmatprep.mubr.bf16.mxu1 %v2306_v5 }
 0x152   : > { %v4326_v41 = vpop.f32.mrb[33].mxu0 }
 0x153   : > { %v6166_v14 = vadd.f32 %v4326_v41, %v4325_v10  ;;  %v4328_v13 = vpop.f32.mrb[34].mxu0  ;;  %v4413_v27 = vpop.f32.mrb[32].mxu1 }
 0x154   : > { %v4329_v33 = vpop.f32.mrb[35].mxu0  ;;  %v4414_v63 = vpop.f32.mrb[33].mxu1 }
 0x155   : > { %v6169_v1 = vadd.f32 %v4329_v33, %v4328_v13  ;;  %v4415_v18 = vadd.f32 %v4414_v63, %v4413_v27  ;;  %v4416_v53 = vpop.f32.mrb[34].mxu1 }
 0x156   : > { %4778 = vmatmul.mubr.bf16.gmra.mrb[140].mxu0 %v2418_v21  ;;  %v4417_v0 = vpop.f32.mrb[35].mxu1 }
 0x157   : > { %v6172_v22 = vadd.f32 %v4415_v18, %v6055_v43  ;;  %v4418_v15 = vadd.f32 %v4417_v0, %v4416_v53 }
 0x158   : > { %3647 = vmatmul.mubr.bf16.gmra.mrb[140].mxu1 %v6120_v36 }
 0x159   : > { %v4331_v7 = vpop.f32.mrb[36].mxu0  ;;  %v6176_v48 = vadd.f32 %v4418_v15, %v6063_v59 }
 0x15a   : > { %v4332_v46 = vpop.f32.mrb[37].mxu0 }
 0x15b   : > { %v6178_v19 = vadd.f32 %v4332_v46, %v4331_v7  ;;  %v4334_v45 = vpop.f32.mrb[38].mxu0  ;;  %v4419_v35 = vpop.f32.mrb[36].mxu1 }
 0x15c   : > { %v4335_v57 = vpop.f32.mrb[39].mxu0  ;;  %v4420_v39 = vpop.f32.mrb[37].mxu1 }
 0x15d   : > { %v6180_v61 = vadd.f32 %v4335_v57, %v4334_v45  ;;  %v4421_v26 = vadd.f32 %v4420_v39, %v4419_v35  ;;  %v4422_v6 = vpop.f32.mrb[38].mxu1 }
 0x15e   : > { %v4423_v43 = vpop.f32.mrb[39].mxu1 }
 0x15f   : > { %v6183_v29 = vadd.f32 %v4421_v26, %v6105_v8  ;;  %v4424_v36 = vadd.f32 %v4423_v43, %v4422_v6 }
 0x161   : > { %v6186_v47 = vadd.f32 %v4424_v36, %v6112_v12  ;;  %v4337_v59 = vpop.f32.mrb[40].mxu0 }
 0x162   : > { %v4338_v9 = vpop.f32.mrb[41].mxu0 }
 0x163   : > { %v4425_v2 = vpop.f32.mrb[40].mxu1  ;;  %v6188_v40 = vadd.f32 %v4338_v9, %v4337_v59  ;;  %v4340_v17 = vpop.f32.mrb[42].mxu0 }
 0x164   : > { %v4426_v4 = vpop.f32.mrb[41].mxu1  ;;  %v4341_v54 = vpop.f32.mrb[43].mxu0 }
 0x165   : > { %v4427_v60 = vadd.f32 %v4426_v4, %v4425_v2  ;;  %v4428_v25 = vpop.f32.mrb[42].mxu1  ;;  %v6190_v5 = vadd.f32 %v4341_v54, %v4340_v17 }
 0x166   : > { %v4429_v31 = vpop.f32.mrb[43].mxu1 }
 0x167   : > { %v6193_v8 = vadd.f32 %v4427_v60, %v6131_v16  ;;  %v4430_v11 = vadd.f32 %v4429_v31, %v4428_v25 }
 0x169   : > { %v6196_v12 = vadd.f32 %v4430_v11, %v6136_v49  ;;  %v4343_v34 = vpop.f32.mrb[44].mxu0 }
 0x16a   : > { %v4344_v10 = vpop.f32.mrb[45].mxu0 }
 0x16b   : > { %v6198_v41 = vadd.f32 %v4344_v10, %v4343_v34  ;;  %v4346_v13 = vpop.f32.mrb[46].mxu0  ;;  %v4431_v27 = vpop.f32.mrb[44].mxu1 }
 0x16c   : > { %v4347_v21 = vpop.f32.mrb[47].mxu0  ;;  %v4432_v33 = vpop.f32.mrb[45].mxu1 }
 0x16d   : > { %v6200_v63 = vadd.f32 %v4347_v21, %v4346_v13  ;;  %v4433_v18 = vadd.f32 %v4432_v33, %v4431_v27  ;;  %v4434_v53 = vpop.f32.mrb[46].mxu1 }
 0x16e   : > { %v4435_v0 = vpop.f32.mrb[47].mxu1 }
 0x16f   : > { %v6203_v16 = vadd.f32 %v4433_v18, %v6151_v30  ;;  %v4436_v15 = vadd.f32 %v4435_v0, %v4434_v53 }
 0x171   : > { %v4501_v7 = vpop.f32.mrb[48].mxu0  ;;  %v6206_v49 = vadd.f32 %v4436_v15, %v6155_v28 }
 0x172   : > { %v4502_v46 = vpop.f32.mrb[49].mxu0 }
 0x173   : > { %v4503_v45 = vadd.f32 %v4502_v46, %v4501_v7  ;;  %v4504_v35 = vpop.f32.mrb[50].mxu0  ;;  %v4437_v57 = vpop.f32.mrb[48].mxu1 }
 0x174   : > { %v4505_v39 = vpop.f32.mrb[51].mxu0  ;;  %v4438_v26 = vpop.f32.mrb[49].mxu1 }
 0x175   : > { %v6209_v6 = vadd.f32 %v4503_v45, %v6095_v50  ;;  %v4506_v43 = vadd.f32 %v4505_v39, %v4504_v35  ;;  %v4439_v36 = vadd.f32 %v4438_v26, %v4437_v57  ;;  %v4440_v59 = vpop.f32.mrb[50].mxu1 }
 0x176   : > { %v4441_v9 = vpop.f32.mrb[51].mxu1 }
 0x177   : > { %v6212_v30 = vadd.f32 %v4506_v43, %v6101_v20  ;;  %v6215_v2 = vadd.f32 %v4439_v36, %v6166_v14  ;;  %v4442_v28 = vadd.f32 %v4441_v9, %v4440_v59 }
 0x179   : > { %v4507_v17 = vpop.f32.mrb[52].mxu0  ;;  %v6218_v4 = vadd.f32 %v4442_v28, %v6169_v1 }
 0x17a   : > { %v4508_v54 = vpop.f32.mrb[53].mxu0 }
 0x17b   : > { %v4509_v60 = vadd.f32 %v4508_v54, %v4507_v17  ;;  %v4510_v25 = vpop.f32.mrb[54].mxu0  ;;  %v4443_v50 = vpop.f32.mrb[52].mxu1 }
 0x17c   : > { %v4511_v31 = vpop.f32.mrb[55].mxu0  ;;  %v4444_v11 = vpop.f32.mrb[53].mxu1 }
 0x17d   : > { %v6221_v34 = vadd.f32 %v4509_v60, %v6123_v55  ;;  %v4512_v10 = vadd.f32 %v4511_v31, %v4510_v25  ;;  %v4445_v20 = vadd.f32 %v4444_v11, %v4443_v50  ;;  %v4446_v13 = vpop.f32.mrb[54].mxu1 }
 0x17e   : > { %v4447_v27 = vpop.f32.mrb[55].mxu1 }
 0x17f   : > { %v6224_v14 = vadd.f32 %v4512_v10, %v6129_v62  ;;  %v6227_v21 = vadd.f32 %v4445_v20, %v6178_v19  ;;  %v4448_v1 = vadd.f32 %v4447_v27, %v4446_v13 }
 0x181   : > { %v4513_v33 = vpop.f32.mrb[56].mxu0  ;;  %v6230_v18 = vadd.f32 %v4448_v1, %v6180_v61 }
 0x182   : > { %v4514_v53 = vpop.f32.mrb[57].mxu0 }
 0x183   : > { %v4515_v0 = vadd.f32 %v4514_v53, %v4513_v33  ;;  %v4516_v15 = vpop.f32.mrb[58].mxu0  ;;  %v4449_v55 = vpop.f32.mrb[56].mxu1 }
 0x184   : > { %v4517_v7 = vpop.f32.mrb[59].mxu0  ;;  %v4450_v46 = vpop.f32.mrb[57].mxu1 }
 0x185   : > { %v6233_v45 = vadd.f32 %v4515_v0, %v6143_v38  ;;  %v4518_v35 = vadd.f32 %v4517_v7, %v4516_v15  ;;  %v4451_v62 = vadd.f32 %v4450_v46, %v4449_v55  ;;  %v4452_v57 = vpop.f32.mrb[58].mxu1 }
 0x186   : > { %v4453_v39 = vpop.f32.mrb[59].mxu1 }
 0x187   : > { %v6236_v19 = vadd.f32 %v4518_v35, %v6149_v44  ;;  %v6239_v26 = vadd.f32 %v4451_v62, %v6188_v40  ;;  %v4454_v61 = vadd.f32 %v4453_v39, %v4452_v57 }
 0x189   : > { %v4519_v43 = vpop.f32.mrb[60].mxu0  ;;  %v6242_v36 = vadd.f32 %v4454_v61, %v6190_v5 }
 0x18a   : > { %v4520_v59 = vpop.f32.mrb[61].mxu0 }
 0x18b   : > { %v4521_v9 = vadd.f32 %v4520_v59, %v4519_v43  ;;  %v4522_v28 = vpop.f32.mrb[62].mxu0  ;;  %v4455_v38 = vpop.f32.mrb[60].mxu1 }
 0x18c   : > { %v4523_v17 = vpop.f32.mrb[63].mxu0  ;;  %v4456_v54 = vpop.f32.mrb[61].mxu1 }
 0x18d   : > { %v6245_v60 = vadd.f32 %v4521_v9, %v6160_v52  ;;  %v4524_v25 = vadd.f32 %v4523_v17, %v4522_v28  ;;  %v4457_v44 = vadd.f32 %v4456_v54, %v4455_v38  ;;  %v4458_v50 = vpop.f32.mrb[62].mxu1 }
 0x18e   : > { %v4459_v31 = vpop.f32.mrb[63].mxu1 }
 0x18f   : > { %v6248_v40 = vadd.f32 %v4524_v25, %v6164_v42  ;;  %v6251_v11 = vadd.f32 %v4457_v44, %v6198_v41  ;;  %v4460_v5 = vadd.f32 %v4459_v31, %v4458_v50 }
 0x191   : > { %v4525_v10 = vpop.f32.mrb[64].mxu0  ;;  %v6254_v20 = vadd.f32 %v4460_v5, %v6200_v63 }
 0x192   : > { %v4526_v13 = vpop.f32.mrb[65].mxu0 }
 0x193   : > { %v4527_v27 = vadd.f32 %v4526_v13, %v4525_v10  ;;  %v4528_v1 = vpop.f32.mrb[66].mxu0  ;;  %v4461_v52 = vpop.f32.mrb[64].mxu1 }
 0x194   : > { %v4529_v33 = vpop.f32.mrb[67].mxu0  ;;  %v4462_v53 = vpop.f32.mrb[65].mxu1 }
 0x195   : > { %v6257_v0 = vadd.f32 %v4527_v27, %v6172_v22  ;;  %v4530_v15 = vadd.f32 %v4529_v33, %v4528_v1  ;;  %v4463_v42 = vadd.f32 %v4462_v53, %v4461_v52  ;;  %v4464_v55 = vpop.f32.mrb[66].mxu1 }
 0x196   : > { %v4465_v7 = vpop.f32.mrb[67].mxu1 }
 0x197   : > { %v6260_v41 = vadd.f32 %v4530_v15, %v6176_v48  ;;  %v6263_v46 = vadd.f32 %v4463_v42, %v5964_v24  ;;  %v4466_v63 = vadd.f32 %v4465_v7, %v4464_v55 }
 0x199   : > { %v4531_v35 = vpop.f32.mrb[68].mxu0  ;;  %v6266_v62 = vadd.f32 %v4466_v63, %v5971_v32 }
 0x19a   : > { %v4532_v57 = vpop.f32.mrb[69].mxu0 }
 0x19b   : > { %v4533_v39 = vadd.f32 %v4532_v57, %v4531_v35  ;;  %v4534_v61 = vpop.f32.mrb[70].mxu0  ;;  %v4467_v22 = vpop.f32.mrb[68].mxu1 }
 0x19c   : > { %v4535_v43 = vpop.f32.mrb[71].mxu0  ;;  %v4468_v59 = vpop.f32.mrb[69].mxu1 }
 0x19d   : > { %v6269_v9 = vadd.f32 %v4533_v39, %v6183_v29  ;;  %v4536_v28 = vadd.f32 %v4535_v43, %v4534_v61  ;;  %v4469_v48 = vadd.f32 %v4468_v59, %v4467_v22  ;;  %v4470_v38 = vpop.f32.mrb[70].mxu1 }
 0x19e   : > { %v4471_v17 = vpop.f32.mrb[71].mxu1 }
 0x19f   : > { %v6272_v24 = vadd.f32 %v4536_v28, %v6186_v47  ;;  %v6275_v54 = vadd.f32 %v4469_v48, %v5989_v56  ;;  %v4472_v32 = vadd.f32 %v4471_v17, %v4470_v38 }
 0x1a1   : > { %v4537_v25 = vpop.f32.mrb[72].mxu0  ;;  %v6278_v44 = vadd.f32 %v4472_v32, %v5997_v23 }
 0x1a2   : > { %v4538_v50 = vpop.f32.mrb[73].mxu0 }
 0x1a3   : > { %v4539_v31 = vadd.f32 %v4538_v50, %v4537_v25  ;;  %v4540_v5 = vpop.f32.mrb[74].mxu0  ;;  %v4473_v29 = vpop.f32.mrb[72].mxu1 }
 0x1a4   : > { %v4541_v10 = vpop.f32.mrb[75].mxu0  ;;  %v4474_v13 = vpop.f32.mrb[73].mxu1 }
 0x1a5   : > { %v6281_v27 = vadd.f32 %v4539_v31, %v6193_v8  ;;  %v4542_v1 = vadd.f32 %v4541_v10, %v4540_v5  ;;  %v4475_v47 = vadd.f32 %v4474_v13, %v4473_v29  ;;  %v4476_v52 = vpop.f32.mrb[74].mxu1 }
 0x1a6   : > { %v4477_v33 = vpop.f32.mrb[75].mxu1 }
 0x1a7   : > { %v6284_v56 = vadd.f32 %v4542_v1, %v6196_v12  ;;  %v6287_v53 = vadd.f32 %v4475_v47, %v6033_v51  ;;  %v4478_v23 = vadd.f32 %v4477_v33, %v4476_v52 }
 0x1a9   : > { %v4543_v15 = vpop.f32.mrb[76].mxu0  ;;  %v6290_v42 = vadd.f32 %v4478_v23, %v6040_v58 }
 0x1aa   : > { %v4544_v55 = vpop.f32.mrb[77].mxu0 }
 0x1ab   : > { %v4545_v7 = vadd.f32 %v4544_v55, %v4543_v15  ;;  %v4546_v63 = vpop.f32.mrb[78].mxu0  ;;  %v4479_v8 = vpop.f32.mrb[76].mxu1 }
 0x1ac   : > { %v4547_v35 = vpop.f32.mrb[79].mxu0  ;;  %v4480_v57 = vpop.f32.mrb[77].mxu1 }
 0x1ad   : > { %v6293_v39 = vadd.f32 %v4545_v7, %v6203_v16  ;;  %v4548_v61 = vadd.f32 %v4547_v35, %v4546_v63  ;;  %v4481_v12 = vadd.f32 %v4480_v57, %v4479_v8  ;;  %v4482_v22 = vpop.f32.mrb[78].mxu1 }
 0x1ae   : > { %v4483_v43 = vpop.f32.mrb[79].mxu1 }
 0x1af   : > { %v6296_v51 = vadd.f32 %v4548_v61, %v6206_v49  ;;  %v6299_v59 = vadd.f32 %v4481_v12, %v6066_v37  ;;  %v4484_v58 = vadd.f32 %v4483_v43, %v4482_v22 }
 0x1b1   : > { %v4549_v28 = vpop.f32.mrb[80].mxu0  ;;  %v6302_v48 = vadd.f32 %v4484_v58, %v6074_v3 }
 0x1b2   : > { %v4550_v38 = vpop.f32.mrb[81].mxu0 }
 0x1b3   : > { %v4551_v17 = vadd.f32 %v4550_v38, %v4549_v28  ;;  %v4552_v32 = vpop.f32.mrb[82].mxu0  ;;  %v4613_v16 = vpop.f32.mrb[80].mxu1 }
 0x1b4   : > { %v4553_v25 = vpop.f32.mrb[83].mxu0  ;;  %v4614_v50 = vpop.f32.mrb[81].mxu1 }
 0x1b5   : > { %v6305_v31 = vadd.f32 %v4551_v17, %v6215_v2  ;;  %v4554_v5 = vadd.f32 %v4553_v25, %v4552_v32  ;;  %v4615_v49 = vadd.f32 %v4614_v50, %v4613_v16  ;;  %v4616_v29 = vpop.f32.mrb[82].mxu1 }
 0x1b6   : > { %v4617_v10 = vpop.f32.mrb[83].mxu1 }
 0x1b7   : > { %v6308_v37 = vadd.f32 %v4554_v5, %v6218_v4  ;;  %v4618_v13 = vadd.f32 %v4617_v10, %v4616_v29  ;;  %v6311_v3 = vadd.f32 %v4615_v49, %v6209_v6 }
 0x1b9   : > { %v4555_v1 = vpop.f32.mrb[84].mxu0  ;;  %v6314_v47 = vadd.f32 %v4618_v13, %v6212_v30 }
 0x1ba   : > { %v4556_v52 = vpop.f32.mrb[85].mxu0 }
 0x1bb   : > { %v4557_v33 = vadd.f32 %v4556_v52, %v4555_v1  ;;  %v4558_v23 = vpop.f32.mrb[86].mxu0  ;;  %v4619_v2 = vpop.f32.mrb[84].mxu1 }
 0x1bc   : > { %v4559_v15 = vpop.f32.mrb[87].mxu0  ;;  %v4620_v55 = vpop.f32.mrb[85].mxu1 }
 0x1bd   : > { %v6317_v7 = vadd.f32 %v4557_v33, %v6227_v21  ;;  %v4560_v63 = vadd.f32 %v4559_v15, %v4558_v23  ;;  %v4621_v4 = vadd.f32 %v4620_v55, %v4619_v2  ;;  %v4622_v8 = vpop.f32.mrb[86].mxu1 }
 0x1be   : > { %v4623_v35 = vpop.f32.mrb[87].mxu1 }
 0x1bf   : > { %v6320_v6 = vadd.f32 %v4560_v63, %v6230_v18  ;;  %v4624_v57 = vadd.f32 %v4623_v35, %v4622_v8  ;;  %v6323_v30 = vadd.f32 %v4621_v4, %v6221_v34 }
 0x1c1   : > { %v4561_v61 = vpop.f32.mrb[88].mxu0  ;;  %v6326_v12 = vadd.f32 %v4624_v57, %v6224_v14 }
 0x1c2   : > { %v4562_v22 = vpop.f32.mrb[89].mxu0 }
 0x1c3   : > { %v4563_v43 = vadd.f32 %v4562_v22, %v4561_v61  ;;  %v4564_v58 = vpop.f32.mrb[90].mxu0  ;;  %v4625_v21 = vpop.f32.mrb[88].mxu1 }
 0x1c4   : > { %v4565_v28 = vpop.f32.mrb[91].mxu0  ;;  %v4626_v38 = vpop.f32.mrb[89].mxu1 }
 0x1c5   : > { %v6329_v17 = vadd.f32 %v4563_v43, %v6239_v26  ;;  %v4566_v32 = vadd.f32 %v4565_v28, %v4564_v58  ;;  %v4627_v18 = vadd.f32 %v4626_v38, %v4625_v21  ;;  %v4628_v16 = vpop.f32.mrb[90].mxu1 }
 0x1c6   : > { %v4629_v25 = vpop.f32.mrb[91].mxu1 }
 0x1c7   : > { %v6332_v34 = vadd.f32 %v4566_v32, %v6242_v36  ;;  %v4630_v50 = vadd.f32 %v4629_v25, %v4628_v16  ;;  %v6335_v14 = vadd.f32 %v4627_v18, %v6233_v45 }
 0x1c9   : > { %v4567_v5 = vpop.f32.mrb[92].mxu0  ;;  %v6338_v49 = vadd.f32 %v4630_v50, %v6236_v19 }
 0x1ca   : > { %v4568_v29 = vpop.f32.mrb[93].mxu0 }
 0x1cb   : > { %v4569_v10 = vadd.f32 %v4568_v29, %v4567_v5  ;;  %v4570_v13 = vpop.f32.mrb[94].mxu0  ;;  %v4631_v26 = vpop.f32.mrb[92].mxu1 }
 0x1cc   : > { %v4571_v1 = vpop.f32.mrb[95].mxu0  ;;  %v4632_v52 = vpop.f32.mrb[93].mxu1 }
 0x1cd   : > { %v6341_v33 = vadd.f32 %v4569_v10, %v6251_v11  ;;  %v4572_v23 = vadd.f32 %v4571_v1, %v4570_v13  ;;  %v4633_v36 = vadd.f32 %v4632_v52, %v4631_v26  ;;  %v4634_v2 = vpop.f32.mrb[94].mxu1 }
 0x1ce   : > { %v4635_v15 = vpop.f32.mrb[95].mxu1 }
 0x1cf   : > { %v6344_v45 = vadd.f32 %v4572_v23, %v6254_v20  ;;  %v4636_v55 = vadd.f32 %v4635_v15, %v4634_v2  ;;  %v6347_v19 = vadd.f32 %v4633_v36, %v6245_v60 }
 0x1d1   : > { %v4573_v63 = vpop.f32.mrb[96].mxu0  ;;  %v6350_v4 = vadd.f32 %v4636_v55, %v6248_v40 }
 0x1d2   : > { %v4574_v8 = vpop.f32.mrb[97].mxu0 }
 0x1d3   : > { %v4575_v35 = vadd.f32 %v4574_v8, %v4573_v63  ;;  %v4576_v57 = vpop.f32.mrb[98].mxu0  ;;  %v4637_v11 = vpop.f32.mrb[96].mxu1 }
 0x1d4   : > { %v4577_v61 = vpop.f32.mrb[99].mxu0  ;;  %v4638_v22 = vpop.f32.mrb[97].mxu1 }
 0x1d5   : > { %v6353_v43 = vadd.f32 %v4575_v35, %v6263_v46  ;;  %v4578_v58 = vadd.f32 %v4577_v61, %v4576_v57  ;;  %v4639_v20 = vadd.f32 %v4638_v22, %v4637_v11  ;;  %v4640_v21 = vpop.f32.mrb[98].mxu1 }
 0x1d6   : > { %v4641_v28 = vpop.f32.mrb[99].mxu1 }
 0x1d7   : > { %v6356_v60 = vadd.f32 %v4578_v58, %v6266_v62  ;;  %v4642_v38 = vadd.f32 %v4641_v28, %v4640_v21  ;;  %v6359_v40 = vadd.f32 %v4639_v20, %v6257_v0 }
 0x1d9   : > { %v4579_v32 = vpop.f32.mrb[100].mxu0  ;;  %v6362_v18 = vadd.f32 %v4642_v38, %v6260_v41 }
 0x1da   : > { %v4580_v16 = vpop.f32.mrb[101].mxu0 }
 0x1db   : > { %v4581_v25 = vadd.f32 %v4580_v16, %v4579_v32  ;;  %v4582_v50 = vpop.f32.mrb[102].mxu0  ;;  %v4643_v46 = vpop.f32.mrb[100].mxu1 }
 0x1dc   : > { %v4583_v5 = vpop.f32.mrb[103].mxu0  ;;  %v4644_v29 = vpop.f32.mrb[101].mxu1 }
 0x1dd   : > { %v6365_v10 = vadd.f32 %v4581_v25, %v6275_v54  ;;  %v4584_v13 = vadd.f32 %v4583_v5, %v4582_v50  ;;  %v4645_v62 = vadd.f32 %v4644_v29, %v4643_v46  ;;  %v4646_v26 = vpop.f32.mrb[102].mxu1 }
 0x1de   : > { %v4647_v1 = vpop.f32.mrb[103].mxu1 }
 0x1df   : > { %v6368_v0 = vadd.f32 %v4584_v13, %v6278_v44  ;;  %v4648_v52 = vadd.f32 %v4647_v1, %v4646_v26  ;;  %v6371_v41 = vadd.f32 %v4645_v62, %v6269_v9  ;;  %v3818_v13 = vld [vmem:[%s6395_s21 + $0x10] sm:$0xff] }
 0x1e1   : > { %v4585_v23 = vpop.f32.mrb[104].mxu0  ;;  %v6374_v36 = vadd.f32 %v4648_v52, %v6272_v24  ;;  %v3816_v52 = vld [vmem:[%s6395_s21] sm:$0xff] }
 0x1e2   : > { %v4586_v2 = vpop.f32.mrb[105].mxu0 }
 0x1e3   : > { %v4587_v15 = vadd.f32 %v4586_v2, %v4585_v23  ;;  %v4588_v55 = vpop.f32.mrb[106].mxu0  ;;  %v4649_v54 = vpop.f32.mrb[104].mxu1  ;;  %v3819_v23 = vld [vmem:[%s6395_s21 + $0x18] sm:$0xff] }
 0x1e4   : > { %v4589_v63 = vpop.f32.mrb[107].mxu0  ;;  %v4650_v8 = vpop.f32.mrb[105].mxu1 }
 0x1e5   : > { %v6377_v35 = vadd.f32 %v4587_v15, %v6287_v53  ;;  %v4590_v57 = vadd.f32 %v4589_v63, %v4588_v55  ;;  %v4651_v44 = vadd.f32 %v4650_v8, %v4649_v54  ;;  %v4652_v11 = vpop.f32.mrb[106].mxu1  ;;  %v3817_v55 = vld [vmem:[%s6395_s21 + $0x8] sm:$0xff] }
 0x1e6   : > { %v4653_v61 = vpop.f32.mrb[107].mxu1 }
 0x1e7   : > { %v6380_v9 = vadd.f32 %v4590_v57, %v6290_v42  ;;  %v4654_v22 = vadd.f32 %v4653_v61, %v4652_v11  ;;  %v6383_v24 = vadd.f32 %v4651_v44, %v6281_v27 }
 0x1e9   : > { %v4591_v58 = vpop.f32.mrb[108].mxu0  ;;  %v6386_v20 = vadd.f32 %v4654_v22, %v6284_v56 }
 0x1ea   : > { %v4592_v21 = vpop.f32.mrb[109].mxu0 }
 0x1eb   : > { %v4593_v28 = vadd.f32 %v4592_v21, %v4591_v58  ;;  %v4594_v53 = vpop.f32.mrb[110].mxu0  ;;  %v4655_v38 = vpop.f32.mrb[108].mxu1  ;;  %v3822_v58 = vld [vmem:[%s6395_s21 + $0x30] sm:$0xff] }
 0x1ec   : > { %v4595_v32 = vpop.f32.mrb[111].mxu0  ;;  %v4656_v16 = vpop.f32.mrb[109].mxu1 }
 0x1ed   : > { %v6389_v25 = vadd.f32 %v4593_v28, %v6299_v59  ;;  %v4596_v42 = vadd.f32 %v4595_v32, %v4594_v53  ;;  %v4657_v50 = vadd.f32 %v4656_v16, %v4655_v38  ;;  %v4658_v46 = vpop.f32.mrb[110].mxu1  ;;  %v3820_v38 = vld [vmem:[%s6395_s21 + $0x20] sm:$0xff]  ;;  %v3823_v16 = vld [vmem:[%s6395_s21 + $0x38] sm:$0xff] }
 0x1ee   : > { %v4659_v27 = vpop.f32.mrb[111].mxu1 }
 0x1ef   : > { %v6398_v56 = vadd.f32 %v4596_v42, %v6302_v48  ;;  %v4660_v5 = vadd.f32 %v4659_v27, %v4658_v46  ;;  %v6401_v59 = vadd.f32 %v4657_v50, %v6293_v39 }
 0x1f1   : > { %v4751_v29 = vpop.f32.mrb[112].mxu0  ;;  %v6405_v62 = vadd.f32 %v4660_v5, %v6296_v51  ;;  %v3821_v5 = vld [vmem:[%s6395_s21 + $0x28] sm:$0xff] }
 0x1f2   : > { %v3698_v26 = vadd.f32 %v4751_v29, %v6323_v30  ;;  %v3689_v1 = vpop.f32.mrb[113].mxu0 }
 0x1f3   : > { %v3690_v48 = vadd.f32 %v3689_v1, %v6311_v3  ;;  %v4752_v39 = vpop.f32.mrb[114].mxu0  ;;  %v4661_v2 = vpop.f32.mrb[112].mxu1 }
 0x1f4   : > { %v3850_v15 = vadd.f32 %v3818_v13, %v3698_v26  ;;  %v3701_v51 = vadd.f32 %v4752_v39, %v6326_v12  ;;  %v3692_v30 = vpop.f32.mrb[115].mxu0  ;;  %v4662_v54 = vpop.f32.mrb[113].mxu1  ;;  %v3826_v39 = vld [vmem:[%s6395_s21 + $0x50] sm:$0xff] }
 0x1f5   : > { %v3848_v63 = vadd.f32 %v3816_v52, %v3690_v48  ;;  %v3693_v8 = vadd.f32 %v3692_v30, %v6314_v47  ;;  %v4663_v57 = vadd.f32 %v4662_v54, %v4661_v2  ;;  %v4664_v44 = vpop.f32.mrb[114].mxu1 }
 0x1f6   : > { %3882 = vst.msk [vmem:[%s6413_s24 + $0x10] sm:$0xff] %vm388_vm1, %v3850_v15  ;;  %v3851_v3 = vadd.f32 %v3819_v23, %v3701_v51  ;;  %v4665_v11 = vpop.f32.mrb[115].mxu1  ;;  %v3824_v51 = vld [vmem:[%s6395_s21 + $0x40] sm:$0xff] }
 0x1f7   : > { %3880 = vst.msk [vmem:[%s6413_s24] sm:$0xff] %vm388_vm1, %v3848_v63  ;;  %v3849_v61 = vadd.f32 %v3817_v55, %v3693_v8  ;;  %v4666_v12 = vadd.f32 %v4665_v11, %v4664_v44  ;;  %v6425_v22 = vadd.f32 %v4663_v57, %v6305_v31  ;;  %v3825_v44 = vld [vmem:[%s6395_s21 + $0x48] sm:$0xff] }
 0x1f8   : > { %3883 = vst.msk [vmem:[%s6413_s24 + $0x18] sm:$0xff] %vm388_vm1, %v3851_v3 }
 0x1f9   : > { %3881 = vst.msk [vmem:[%s6413_s24 + $0x8] sm:$0xff] %vm388_vm1, %v3849_v61  ;;  %v4755_v47 = vpop.f32.mrb[116].mxu0  ;;  %v6433_v21 = vadd.f32 %v4666_v12, %v6308_v37 }
 0x1fa   : > { %v3714_v28 = vadd.f32 %v4755_v47, %v6347_v19  ;;  %v3705_v53 = vpop.f32.mrb[117].mxu0 }
 0x1fb   : > { %v3706_v32 = vadd.f32 %v3705_v53, %v6335_v14  ;;  %v4756_v31 = vpop.f32.mrb[118].mxu0  ;;  %v4667_v42 = vpop.f32.mrb[116].mxu1 }
 0x1fc   : > { %v3854_v50 = vadd.f32 %v3822_v58, %v3714_v28  ;;  %v3717_v46 = vadd.f32 %v4756_v31, %v6350_v4  ;;  %v3708_v27 = vpop.f32.mrb[119].mxu0  ;;  %v4668_v37 = vpop.f32.mrb[117].mxu1  ;;  %v3830_v28 = vld [vmem:[%s6395_s21 + $0x70] sm:$0xff]  ;;  %v3828_v31 = vld [vmem:[%s6395_s21 + $0x60] sm:$0xff] }
 0x1fd   : > { %v3852_v29 = vadd.f32 %v3820_v38, %v3706_v32  ;;  %v3709_v19 = vadd.f32 %v3708_v27, %v6338_v49  ;;  %v4669_v13 = vadd.f32 %v4668_v37, %v4667_v42  ;;  %v4670_v26 = vpop.f32.mrb[118].mxu1  ;;  %v3831_v42 = vld [vmem:[%s6395_s21 + $0x78] sm:$0xff]  ;;  %v3829_v37 = vld [vmem:[%s6395_s21 + $0x68] sm:$0xff] }
 0x1fe   : > { %3886 = vst.msk [vmem:[%s6413_s24 + $0x30] sm:$0xff] %vm388_vm1, %v3854_v50  ;;  %v3855_v14 = vadd.f32 %v3823_v16, %v3717_v46  ;;  %v4671_v1 = vpop.f32.mrb[119].mxu1 }
 0x1ff   : > { %3884 = vst.msk [vmem:[%s6413_s24 + $0x20] sm:$0xff] %vm388_vm1, %v3852_v29  ;;  %v3853_v52 = vadd.f32 %v3821_v5, %v3709_v19  ;;  %v4672_v4 = vadd.f32 %v4671_v1, %v4670_v26  ;;  %v3601_v48 = vadd.f32 %v4669_v13, %v6317_v7  ;;  %v3827_v7 = vld [vmem:[%s6395_s21 + $0x58] sm:$0xff] }
 0x200   : > { %3887 = vst.msk [vmem:[%s6413_s24 + $0x38] sm:$0xff] %vm388_vm1, %v3855_v14 }
 0x201   : > { %3885 = vst.msk [vmem:[%s6413_s24 + $0x28] sm:$0xff] %vm388_vm1, %v3853_v52  ;;  %v4759_v49 = vpop.f32.mrb[120].mxu0  ;;  %v6453_v23 = vadd.f32 %v4672_v4, %v6320_v6  ;;  %v3834_v52 = vld [vmem:[%s6395_s21 + $0x90] sm:$0xff] }
 0x202   : > { %v3730_v2 = vadd.f32 %v4759_v49, %v6371_v41  ;;  %v3721_v15 = vpop.f32.mrb[121].mxu0 }
 0x203   : > { %v3722_v30 = vadd.f32 %v3721_v15, %v6359_v40  ;;  %v4760_v55 = vpop.f32.mrb[122].mxu0  ;;  %v4673_v54 = vpop.f32.mrb[120].mxu1 }
 0x204   : > { %v3858_v63 = vadd.f32 %v3826_v39, %v3730_v2  ;;  %v3733_v8 = vadd.f32 %v4760_v55, %v6374_v36  ;;  %v3724_v57 = vpop.f32.mrb[123].mxu0  ;;  %v4674_v6 = vpop.f32.mrb[121].mxu1  ;;  %v3832_v2 = vld [vmem:[%s6395_s21 + $0x80] sm:$0xff] }
 0x205   : > { %v3856_v3 = vadd.f32 %v3824_v51, %v3722_v30  ;;  %v3725_v41 = vadd.f32 %v3724_v57, %v6362_v18  ;;  %v4675_v11 = vadd.f32 %v4674_v6, %v4673_v54  ;;  %v4676_v61 = vpop.f32.mrb[122].mxu1  ;;  %v3835_v30 = vld [vmem:[%s6395_s21 + $0x98] sm:$0xff] }
 0x206   : > { %3890 = vst.msk [vmem:[%s6413_s24 + $0x50] sm:$0xff] %vm388_vm1, %v3858_v63  ;;  %v3859_v40 = vadd.f32 %v3827_v7, %v3733_v8  ;;  %v4677_v12 = vpop.f32.mrb[123].mxu1  ;;  %v3833_v63 = vld [vmem:[%s6395_s21 + $0x88] sm:$0xff] }
 0x207   : > { %3888 = vst.msk [vmem:[%s6413_s24 + $0x40] sm:$0xff] %vm388_vm1, %v3856_v3  ;;  %v3857_v47 = vadd.f32 %v3825_v44, %v3725_v41  ;;  %v4678_v36 = vadd.f32 %v4677_v12, %v4676_v61  ;;  %v6467_v58 = vadd.f32 %v4675_v11, %v6329_v17  ;;  %v3838_v11 = vld [vmem:[%s6395_s21 + $0xb0] sm:$0xff] }
 0x208   : > { %3891 = vst.msk [vmem:[%s6413_s24 + $0x58] sm:$0xff] %vm388_vm1, %v3859_v40 }
 0x209   : > { %3889 = vst.msk [vmem:[%s6413_s24 + $0x48] sm:$0xff] %vm388_vm1, %v3857_v47  ;;  %v4763_v18 = vpop.f32.mrb[124].mxu0  ;;  %v6475_v53 = vadd.f32 %v4678_v36, %v6332_v34  ;;  %v3836_v47 = vld [vmem:[%s6395_s21 + $0xa0] sm:$0xff] }
 0x20a   : > { %v3746_v38 = vadd.f32 %v4763_v18, %v6401_v59  ;;  %v3737_v32 = vpop.f32.mrb[125].mxu0 }
 0x20b   : > { %v3738_v16 = vadd.f32 %v3737_v32, %v6383_v24  ;;  %v4764_v17 = vpop.f32.mrb[126].mxu0  ;;  %v4679_v50 = vpop.f32.mrb[124].mxu1 }
 0x20c   : > { %v3862_v46 = vadd.f32 %v3830_v28, %v3746_v38  ;;  %v3749_v27 = vadd.f32 %v4764_v17, %v6405_v62  ;;  %v3740_v5 = vpop.f32.mrb[127].mxu0  ;;  %v4680_v34 = vpop.f32.mrb[125].mxu1  ;;  %v3839_v28 = vld [vmem:[%s6395_s21 + $0xb8] sm:$0xff] }
 0x20d   : > { %v3860_v29 = vadd.f32 %v3828_v31, %v3738_v16  ;;  %v3741_v59 = vadd.f32 %v3740_v5, %v6386_v20  ;;  %v4681_v19 = vadd.f32 %v4680_v34, %v4679_v50  ;;  %v4682_v13 = vpop.f32.mrb[126].mxu1  ;;  %v3837_v16 = vld [vmem:[%s6395_s21 + $0xa8] sm:$0xff] }
 0x20e   : > { %3894 = vst.msk [vmem:[%s6413_s24 + $0x70] sm:$0xff] %vm388_vm1, %v3862_v46  ;;  %v3863_v24 = vadd.f32 %v3831_v42, %v3749_v27  ;;  %v4683_v26 = vpop.f32.mrb[127].mxu1 }
 0x20f   : > { %3892 = vst.msk [vmem:[%s6413_s24 + $0x60] sm:$0xff] %vm388_vm1, %v3860_v29  ;;  %v3861_v14 = vadd.f32 %v3829_v37, %v3741_v59  ;;  %v4684_v62 = vadd.f32 %v4683_v26, %v4682_v13  ;;  %v3617_v1 = vadd.f32 %v4681_v19, %v6341_v33  ;;  %v3842_v29 = vld [vmem:[%s6395_s21 + $0xd0] sm:$0xff] }
 0x210   : > { %3895 = vst.msk [vmem:[%s6413_s24 + $0x78] sm:$0xff] %vm388_vm1, %v3863_v24  ;;  %v3840_v24 = vld [vmem:[%s6395_s21 + $0xc0] sm:$0xff] }
 0x211   : > { %3893 = vst.msk [vmem:[%s6413_s24 + $0x68] sm:$0xff] %vm388_vm1, %v3861_v14  ;;  %v4767_v20 = vpop.f32.mrb[128].mxu0  ;;  %v3620_v4 = vadd.f32 %v4684_v62, %v6344_v45  ;;  %v3843_v62 = vld [vmem:[%s6395_s21 + $0xd8] sm:$0xff] }
 0x212   : > { %v3762_v49 = vadd.f32 %v4767_v20, %v3601_v48  ;;  %v3753_v39 = vpop.f32.mrb[129].mxu0 }
 0x213   : > { %v3754_v15 = vadd.f32 %v3753_v39, %v6425_v22  ;;  %v4768_v51 = vpop.f32.mrb[130].mxu0  ;;  %v4685_v55 = vpop.f32.mrb[128].mxu1 }
 0x214   : > { %v3866_v33 = vadd.f32 %v3834_v52, %v3762_v49  ;;  %v3765_v7 = vadd.f32 %v4768_v51, %v6453_v23  ;;  %v3756_v54 = vpop.f32.mrb[131].mxu0  ;;  %v4686_v8 = vpop.f32.mrb[129].mxu1 }
 0x215   : > { %v3864_v45 = vadd.f32 %v3832_v2, %v3754_v15  ;;  %v3757_v48 = vadd.f32 %v3756_v54, %v6433_v21  ;;  %v4687_v57 = vadd.f32 %v4686_v8, %v4685_v55  ;;  %v4688_v44 = vpop.f32.mrb[130].mxu1 }
 0x216   : > { %3898 = vst.msk [vmem:[%s6413_s24 + $0x90] sm:$0xff] %vm388_vm1, %v3866_v33  ;;  %v3867_v22 = vadd.f32 %v3835_v30, %v3765_v7  ;;  %v4689_v6 = vpop.f32.mrb[131].mxu1 }
 0x217   : > { %3896 = vst.msk [vmem:[%s6413_s24 + $0x80] sm:$0xff] %vm388_vm1, %v3864_v45  ;;  %v3865_v3 = vadd.f32 %v3833_v63, %v3757_v48  ;;  %v4690_v23 = vadd.f32 %v4689_v6, %v4688_v44  ;;  %v3625_v41 = vadd.f32 %v4687_v57, %v6353_v43  ;;  %v3844_v45 = vld [vmem:[%s6395_s21 + $0xe0] sm:$0xff]  ;;  %v3845_v6 = vld [vmem:[%s6395_s21 + $0xe8] sm:$0xff] }
 0x218   : > { %3899 = vst.msk [vmem:[%s6413_s24 + $0x98] sm:$0xff] %vm388_vm1, %v3867_v22 }
 0x219   : > { %3897 = vst.msk [vmem:[%s6413_s24 + $0x88] sm:$0xff] %vm388_vm1, %v3865_v3  ;;  %v4771_v21 = vpop.f32.mrb[132].mxu0  ;;  %v3628_v61 = vadd.f32 %v4690_v23, %v6356_v60 }
 0x21a   : > { %v3778_v40 = vadd.f32 %v4771_v21, %v3617_v1  ;;  %v3769_v12 = vpop.f32.mrb[133].mxu0 }
 0x21b   : > { %v3770_v36 = vadd.f32 %v3769_v12, %v6467_v58  ;;  %v4772_v18 = vpop.f32.mrb[134].mxu0  ;;  %v4691_v38 = vpop.f32.mrb[132].mxu1  ;;  %v3846_v12 = vld [vmem:[%s6395_s21 + $0xf0] sm:$0xff] }
 0x21c   : > { %v3870_v43 = vadd.f32 %v3838_v11, %v3778_v40  ;;  %v3781_v32 = vadd.f32 %v4772_v18, %v3620_v4  ;;  %v3772_v31 = vpop.f32.mrb[135].mxu0  ;;  %v4692_v17 = vpop.f32.mrb[133].mxu1  ;;  %v3841_v4 = vld [vmem:[%s6395_s21 + $0xc8] sm:$0xff]  ;;  %v3847_v18 = vld [vmem:[%s6395_s21 + $0xf8] sm:$0xff] }
 0x21d   : > { %v3868_v42 = vadd.f32 %v3836_v47, %v3770_v36  ;;  %v3773_v60 = vadd.f32 %v3772_v31, %v6475_v53  ;;  %v4693_v50 = vadd.f32 %v4692_v17, %v4691_v38  ;;  %v4694_v46 = vpop.f32.mrb[134].mxu1 }
 0x21e   : > { %3902 = vst.msk [vmem:[%s6413_s24 + $0xb0] sm:$0xff] %vm388_vm1, %v3870_v43  ;;  %v3871_v58 = vadd.f32 %v3839_v28, %v3781_v32  ;;  %v4695_v27 = vpop.f32.mrb[135].mxu1 }
 0x21f   : > { %3900 = vst.msk [vmem:[%s6413_s24 + $0xa0] sm:$0xff] %vm388_vm1, %v3868_v42  ;;  %v3869_v5 = vadd.f32 %v3837_v16, %v3773_v60  ;;  %v3633_v37 = vadd.f32 %v4693_v50, %v6365_v10  ;;  %v4696_v34 = vadd.f32 %v4695_v27, %v4694_v46 }
 0x220   : > { %3903 = vst.msk [vmem:[%s6413_s24 + $0xb8] sm:$0xff] %vm388_vm1, %v3871_v58 }
 0x221   : > { %3901 = vst.msk [vmem:[%s6413_s24 + $0xa8] sm:$0xff] %vm388_vm1, %v3869_v5  ;;  %v4775_v53 = vpop.f32.mrb[136].mxu0  ;;  %v3636_v59 = vadd.f32 %v4696_v34, %v6368_v0 }
 0x222   : > { %v3794_v19 = vadd.f32 %v4775_v53, %v3633_v37  ;;  %v3785_v13 = vpop.f32.mrb[137].mxu0 }
 0x223   : > { %v3786_v26 = vadd.f32 %v3785_v13, %v3625_v41  ;;  %v4776_v14 = vpop.f32.mrb[138].mxu0  ;;  %v4697_v1 = vpop.f32.mrb[136].mxu1 }
 0x224   : > { %v3874_v10 = vadd.f32 %v3842_v29, %v3794_v19  ;;  %v3797_v20 = vadd.f32 %v4776_v14, %v3636_v59  ;;  %v3788_v52 = vpop.f32.mrb[139].mxu0  ;;  %v4698_v49 = vpop.f32.mrb[137].mxu1 }
 0x225   : > { %v3872_v39 = vadd.f32 %v3840_v24, %v3786_v26  ;;  %v3789_v2 = vadd.f32 %v3788_v52, %v3628_v61  ;;  %v4699_v0 = vadd.f32 %v4698_v49, %v4697_v1  ;;  %v4700_v15 = vpop.f32.mrb[138].mxu1 }
 0x226   : > { %3906 = vst.msk [vmem:[%s6413_s24 + $0xd0] sm:$0xff] %vm388_vm1, %v3874_v10  ;;  %v3875_v51 = vadd.f32 %v3843_v62, %v3797_v20  ;;  %v4701_v30 = vpop.f32.mrb[139].mxu1 }
 0x227   : > { %3904 = vst.msk [vmem:[%s6413_s24 + $0xc0] sm:$0xff] %vm388_vm1, %v3872_v39  ;;  %v3873_v55 = vadd.f32 %v3841_v4, %v3789_v2  ;;  %v4702_v33 = vadd.f32 %v4701_v30, %v4700_v15  ;;  %v3641_v7 = vadd.f32 %v4699_v0, %v6377_v35 }
 0x228   : > { %3907 = vst.msk [vmem:[%s6413_s24 + $0xd8] sm:$0xff] %vm388_vm1, %v3875_v51 }
 0x229   : > { %3905 = vst.msk [vmem:[%s6413_s24 + $0xc8] sm:$0xff] %vm388_vm1, %v3873_v55  ;;  %v4779_v54 = vpop.f32.mrb[140].mxu0  ;;  %v3644_v63 = vadd.f32 %v4702_v33, %v6380_v9 }
 0x22a   : > { %v3801_v8 = vpop.f32.mrb[141].mxu0 }
 0x22b   : > { %v3802_v48 = vadd.f32 %v3801_v8, %v3641_v7  ;;  %v4780_v57 = vpop.f32.mrb[142].mxu0  ;;  %v4703_v44 = vpop.f32.mrb[140].mxu1 }
 0x22c   : > { %v3804_v22 = vpop.f32.mrb[143].mxu0  ;;  %v4704_v3 = vpop.f32.mrb[141].mxu1 }
 0x22d   : > { %v3876_v35 = vadd.f32 %v3844_v45, %v3802_v48  ;;  %v3805_v23 = vadd.f32 %v3804_v22, %v3644_v63  ;;  %v4705_v41 = vadd.f32 %v4704_v3, %v4703_v44  ;;  %v4706_v21 = vpop.f32.mrb[142].mxu1 }
 0x22e   : > { %v4707_v11 = vpop.f32.mrb[143].mxu1 }
 0x22f   : > { %3908 = vst.msk [vmem:[%s6413_s24 + $0xe0] sm:$0xff] %vm388_vm1, %v3876_v35  ;;  %v3877_v9 = vadd.f32 %v3845_v6, %v3805_v23  ;;  %v3649_v61 = vadd.f32 %v4705_v41, %v6389_v25  ;;  %v4708_v40 = vadd.f32 %v4707_v11, %v4706_v21 }
 0x231   : > { %3909 = vst.msk [vmem:[%s6413_s24 + $0xe8] sm:$0xff] %vm388_vm1, %v3877_v9  ;;  %v3810_v47 = vadd.f32 %v4779_v54, %v3649_v61  ;;  %v3652_v36 = vadd.f32 %v4708_v40, %v6398_v56 }
 0x233   : > { %v3878_v28 = vadd.f32 %v3846_v12, %v3810_v47  ;;  %v3813_v38 = vadd.f32 %v4780_v57, %v3652_v36 }
 0x235   : > { %3910 = vst.msk [vmem:[%s6413_s24 + $0xf0] sm:$0xff] %vm388_vm1, %v3878_v28  ;;  %v3879_v43 = vadd.f32 %v3847_v18, %v3813_v38 }
 0x237   : > { %3911 = vst.msk [vmem:[%s6413_s24 + $0xf8] sm:$0xff] %vm388_vm1, %v3879_v43 }
 0x238 PF: > { %s15_s18 = sadd.s32 1, %s5038_s18  }
 0x239   : > { %p12_p4 = scmp.ge.s32.totalorder %s15_s18, 4  }
 0x23b   :  { %14 = sbr.rel (!%p12_p4) target bundleno = 1 (0x1), region = 76 }

</bundles_post_ra>
